<compile_context>
chip_gen: v7x
topology: tpu7x:2x2x1
jax: 0.10.0
libtpu: 0.0.40
codegen_flags: <defaults>
</compile_context>

<pallas_src>
import functools

import numpy as np

import jax
import jax.numpy as jnp
from jax.experimental import pallas as pl
from jax.experimental.pallas import tpu as pltpu

LEAKY_SLOPE = 0.01
BN_EPS = 1e-5
CONV3_FLAT = 32 * 4 * 4  # 512


# ----------------------------------------------------------------------------
# In-kernel building blocks (operate on VMEM refs / values only).
# ----------------------------------------------------------------------------
def _conv_bn_lrelu(xs, r_ref, m_ref, bb_ref, t_ref, tt_ref, g_ref, be_ref):
    """One conv(3x3, s=2, p=1) + BatchNorm2d (batch stats) + LeakyReLU layer.

    xs: list (length N) of per-sample activations laid out as (H_in, W_in*C_in).
    Returns list of per-sample outputs laid out as (H_out, W_out*C_out).
    """
    n_b = len(xs)
    h_out = r_ref.shape[1]
    c_out = t_ref.shape[1]
    w_out = m_ref.shape[2] // c_out
    inv_count = 1.0 / float(n_b * h_out * w_out)

    # Conv as three (row-select @ X @ banded-weight) sandwiches, plus bias.
    ys = []
    for xn in xs:
        acc = jnp.zeros((h_out, m_ref.shape[2]), jnp.float32)
        for kh in range(3):
            rows = jnp.dot(r_ref[kh], xn, preferred_element_type=jnp.float32)
            acc = acc + jnp.dot(rows, m_ref[kh], preferred_element_type=jnp.float32)
        ys.append(acc + bb_ref[...])

    # BatchNorm2d, training-mode (biased variance over (n, h, w) per channel).
    col_sum = ys[0].sum(axis=0, keepdims=True)
    for yn in ys[1:]:
        col_sum = col_sum + yn.sum(axis=0, keepdims=True)
    mean_c = jnp.dot(col_sum, t_ref[...], preferred_element_type=jnp.float32) * inv_count
    mean_bc = jnp.dot(mean_c, tt_ref[...], preferred_element_type=jnp.float32)

    sq_sum = jnp.square(ys[0] - mean_bc).sum(axis=0, keepdims=True)
    for yn in ys[1:]:
        sq_sum = sq_sum + jnp.square(yn - mean_bc).sum(axis=0, keepdims=True)
    var_c = jnp.dot(sq_sum, t_ref[...], preferred_element_type=jnp.float32) * inv_count

    scale_c = g_ref[...] * jax.lax.rsqrt(var_c + BN_EPS)
    shift_c = be_ref[...] - mean_c * scale_c
    scale_bc = jnp.dot(scale_c, tt_ref[...], preferred_element_type=jnp.float32)
    shift_bc = jnp.dot(shift_c, tt_ref[...], preferred_element_type=jnp.float32)

    outs = []
    for yn in ys:
        v = yn * scale_bc + shift_bc
        outs.append(jnp.where(v >= 0.0, v, LEAKY_SLOPE * v))
    return outs


def _fc_bn_lrelu(x, w_ref, b_ref, g_ref, be_ref):
    """Linear + BatchNorm1d (batch stats) + LeakyReLU on a (N, F) matrix."""
    y = jnp.dot(x, w_ref[...], preferred_element_type=jnp.float32) + b_ref[...]
    mean = jnp.mean(y, axis=0, keepdims=True)
    var = jnp.mean(jnp.square(y - mean), axis=0, keepdims=True)
    y = (y - mean) * jax.lax.rsqrt(var + BN_EPS) * g_ref[...] + be_ref[...]
    return jnp.where(y >= 0.0, y, LEAKY_SLOPE * y)


# ----------------------------------------------------------------------------
# The single fused kernel: conv1..3 + flatten + fc1 + fc2 + z_out.
# ----------------------------------------------------------------------------
def _encoder_kernel(*refs):
    (x_ref,
     r1, m1, bb1, t1, tt1, g1, be1,
     r2, m2, bb2, t2, tt2, g2, be2,
     r3, m3, bb3, t3, tt3, g3, be3,
     p_ref,
     fc1w, fc1b, fc1g, fc1be,
     fc2w, fc2b, fc2g, fc2be,
     zw, zb,
     flat_ref, z_ref) = refs

    n_b = x_ref.shape[0]

    # Conv stack; per-sample activations stay in VMEM as (H, W*C) values.
    acts = [x_ref[n] for n in range(n_b)]                    # (32, 32) each (C_in = 1)
    acts = _conv_bn_lrelu(acts, r1, m1, bb1, t1, tt1, g1, be1)   # -> (16, 512)
    acts = _conv_bn_lrelu(acts, r2, m2, bb2, t2, tt2, g2, be2)   # -> (8, 256)
    acts = _conv_bn_lrelu(acts, r3, m3, bb3, t3, tt3, g3, be3)   # -> (4, 128)

    # NCHW-order flatten of conv3 output via constant permutation matmuls.
    n_rows = p_ref.shape[0]                                  # = 4
    for n in range(n_b):
        y3 = acts[n]                                         # (4, 128) = (h, w*C)
        f = jnp.dot(y3[0:1, :], p_ref[0], preferred_element_type=jnp.float32)
        for i in range(1, n_rows):
            f = f + jnp.dot(y3[i:i + 1, :], p_ref[i], preferred_element_type=jnp.float32)
        flat_ref[pl.ds(n, 1), :] = f                         # (1, 512) lane-dense row
    flat = flat_ref[...]                                     # (N, 512)

    # FC head.
    h = _fc_bn_lrelu(flat, fc1w, fc1b, fc1g, fc1be)          # (N, 256)
    h = _fc_bn_lrelu(h, fc2w, fc2b, fc2g, fc2be)             # (N, 128)
    z_ref[...] = jnp.dot(h, zw[...], preferred_element_type=jnp.float32) + zb[...]


# ----------------------------------------------------------------------------
# Host-side (one-time) parameter preprocessing: build the constant selector /
# banded-weight / channel-reduction / permutation matrices the kernel consumes.
# ----------------------------------------------------------------------------
def _row_selectors(h_in, h_out, ksize=3, stride=2, pad=1):
    r = np.zeros((ksize, h_out, h_in), np.float32)
    for kh in range(ksize):
        for i in range(h_out):
            src = stride * i + kh - pad
            if 0 <= src < h_in:
                r[kh, i, src] = 1.0
    return r


def _banded_weights(w_hwio, w_in, w_out, stride=2, pad=1):
    ksize, _, cin, cout = w_hwio.shape
    m = np.zeros((ksize, w_in * cin, w_out * cout), np.float32)
    for kh in range(ksize):
        for kw in range(ksize):
            for j in range(w_out):
                src = stride * j + kw - pad
                if 0 <= src < w_in:
                    m[kh, src * cin:(src + 1) * cin, j * cout:(j + 1) * cout] = w_hwio[kh, kw]
    return m


def _channel_reduce(w_out, c):
    # T[(w*c + cc), c'] = delta(cc, c')
    return np.tile(np.eye(c, dtype=np.float32), (w_out, 1))


def _nchw_flatten_perm(h, w, c):
    # Maps conv3 layout (h, w*c) -> NCHW flatten index c*h*w + ...
    p = np.zeros((h, w * c, c * h * w), np.float32)
    for i in range(h):
        for j in range(w):
            for d in range(c):
                p[i, j * c + d, d * h * w + i * w + j] = 1.0
    return p


def prepare_operands(params, latent_dim):
    ops = []
    spatial = [(32, 16), (16, 8), (8, 4)]       # (H_in, H_out) per conv layer
    cins = [1, 32, 32]
    for l, ((s_in, s_out), _cin) in enumerate(zip(spatial, cins), start=1):
        w = np.asarray(params[f"conv{l}_w"], np.float32)      # (3, 3, Cin, Cout) HWIO
        b = np.asarray(params[f"conv{l}_b"], np.float32)
        cout = w.shape[-1]
        r = _row_selectors(s_in, s_out)
        m = _banded_weights(w, s_in, s_out)
        bias_bc = np.tile(b, s_out).reshape(1, s_out * cout)
        t = _channel_reduce(s_out, cout)
        tt = np.ascontiguousarray(t.T)
        g = np.asarray(params[f"bn{l}_g"], np.float32).reshape(1, cout)
        be = np.asarray(params[f"bn{l}_b"], np.float32).reshape(1, cout)
        ops += [r, m, bias_bc, t, tt, g, be]

    ops.append(_nchw_flatten_perm(4, 4, 32))                  # (4, 128, 512)

    for name, bn in (("fc1", "bnf1"), ("fc2", "bnf2")):
        ops += [np.asarray(params[f"{name}_w"], np.float32),
                np.asarray(params[f"{name}_b"], np.float32).reshape(1, -1),
                np.asarray(params[f"{bn}_g"], np.float32).reshape(1, -1),
                np.asarray(params[f"{bn}_b"], np.float32).reshape(1, -1)]

    # z head, zero-padded to a lane-dense 128-wide output.
    zp = max(128, ((latent_dim + 127) // 128) * 128)
    zw = np.zeros((128, zp), np.float32)
    zw[:, :latent_dim] = np.asarray(params["z_w"], np.float32)
    zb = np.zeros((1, zp), np.float32)
    zb[0, :latent_dim] = np.asarray(params["z_b"], np.float32)
    ops += [zw, zb]

    return tuple(jnp.asarray(o) for o in ops)


# ----------------------------------------------------------------------------
# Wrapper: single fused pallas_call.
# ----------------------------------------------------------------------------
@functools.partial(jax.jit, static_argnames=("latent_dim",))
def encoder_forward(x_nchw, ops, latent_dim):
    n = x_nchw.shape[0]
    x2d = x_nchw.reshape(n, x_nchw.shape[2], x_nchw.shape[3])   # C_in = 1 -> (N, 32, 32)
    zpad = ops[-1].shape[-1]

    vmem = pl.BlockSpec(memory_space=pltpu.MemorySpace.VMEM)
    flat, z_pad = pl.pallas_call(
        _encoder_kernel,
        out_shape=(jax.ShapeDtypeStruct((n, CONV3_FLAT), jnp.float32),
                   jax.ShapeDtypeStruct((n, zpad), jnp.float32)),
        in_specs=[vmem] * (1 + len(ops)),
        out_specs=(vmem, vmem),
    )(x2d, *ops)

    return z_pad[:, :latent_dim], flat


# ----------------------------------------------------------------------------
# Deterministic synthetic parameters (PyTorch-like shapes, HWIO conv weights).
# ----------------------------------------------------------------------------
def init_params(key, latent_dim):
    specs = {
        "conv1_w": (3, 3, 1, 32),  "conv1_b": (32,),
        "conv2_w": (3, 3, 32, 32), "conv2_b": (32,),
        "conv3_w": (3, 3, 32, 32), "conv3_b": (32,),
        "bn1_g": (32,), "bn1_b": (32,),
        "bn2_g": (32,), "bn2_b": (32,),
        "bn3_g": (32,), "bn3_b": (32,),
        "fc1_w": (512, 256), "fc1_b": (256,),
        "bnf1_g": (256,), "bnf1_b": (256,),
        "fc2_w": (256, 128), "fc2_b": (128,),
        "bnf2_g": (128,), "bnf2_b": (128,),
        "z_w": (128, latent_dim), "z_b": (latent_dim,),
    }
    names = sorted(specs)
    keys = jax.random.split(key, len(names))
    params = {}
    for k, name in zip(keys, names):
        v = 0.1 * jax.random.normal(k, specs[name], dtype=jnp.float32)
        if name.endswith("_g"):
            v = v + 1.0
        params[name] = v
    return params


# ----------------------------------------------------------------------------
# Independent pure-JAX reference (lax.conv + explicit BN), for a sanity check.
# ----------------------------------------------------------------------------
def encoder_reference(x_nchw, params):
    h = x_nchw
    for i in (1, 2, 3):
        h = jax.lax.conv_general_dilated(
            h, params[f"conv{i}_w"], window_strides=(2, 2),
            padding=((1, 1), (1, 1)),
            dimension_numbers=("NCHW", "HWIO", "NCHW"),
            precision=jax.lax.Precision.HIGHEST)
        h = h + params[f"conv{i}_b"].reshape(1, -1, 1, 1)
        mean = jnp.mean(h, axis=(0, 2, 3), keepdims=True)
        var = jnp.mean(jnp.square(h - mean), axis=(0, 2, 3), keepdims=True)
        h = (h - mean) * jax.lax.rsqrt(var + BN_EPS)
        h = h * params[f"bn{i}_g"].reshape(1, -1, 1, 1) + params[f"bn{i}_b"].reshape(1, -1, 1, 1)
        h = jnp.where(h >= 0, h, LEAKY_SLOPE * h)
    flat = h.reshape(h.shape[0], -1)                          # NCHW flatten -> (N, 512)

    def fc(x, w, b, g, be):
        y = jnp.dot(x, w, precision=jax.lax.Precision.HIGHEST) + b
        mean = jnp.mean(y, axis=0, keepdims=True)
        var = jnp.mean(jnp.square(y - mean), axis=0, keepdims=True)
        y = (y - mean) * jax.lax.rsqrt(var + BN_EPS) * g + be
        return jnp.where(y >= 0, y, LEAKY_SLOPE * y)

    f1 = fc(flat, params["fc1_w"], params["fc1_b"], params["bnf1_g"], params["bnf1_b"])
    f2 = fc(f1, params["fc2_w"], params["fc2_b"], params["bnf2_g"], params["bnf2_b"])
    z = jnp.dot(f2, params["z_w"], precision=jax.lax.Precision.HIGHEST) + params["z_b"]
    return z, flat


if __name__ == "__main__":
    LATENT_DIM = 16
    key = jax.random.PRNGKey(0)
    k_x, k_p = jax.random.split(key)

    # Input implied by the module: (N, 1, 32, 32) NCHW (32 -> 16 -> 8 -> 4; 32*4*4 = 512).
    x = jax.random.normal(k_x, (2, 1, 32, 32), dtype=jnp.float32)
    params = init_params(k_p, LATENT_DIM)
    ops = prepare_operands(params, LATENT_DIM)        # one-time host preprocessing

    z, conv3_flat = encoder_forward(x, ops, latent_dim=LATENT_DIM)
    z = jax.block_until_ready(z)
    conv3_flat = jax.block_until_ready(conv3_flat)

    assert z.shape == (2, LATENT_DIM) and conv3_flat.shape == (2, 512)

    z_exp, flat_exp = encoder_reference(x, params)
    assert jnp.allclose(conv3_flat, flat_exp, atol=2e-2, rtol=2e-2), "conv3_flat mismatch vs reference"
    assert jnp.allclose(z, z_exp, atol=2e-2, rtol=2e-2), "z mismatch vs reference"

    print("KERNEL_OK")
</pallas_src>

<mosaic_0001>
module attributes {stable_mosaic.version = 11 : i64} {
  func.func @_encoder_kernel(%arg0: memref<2x32x32xf32, #tpu.memory_space<vmem>>, %arg1: memref<3x16x32xf32, #tpu.memory_space<vmem>>, %arg2: memref<3x32x512xf32, #tpu.memory_space<vmem>>, %arg3: memref<1x512xf32, #tpu.memory_space<vmem>>, %arg4: memref<512x32xf32, #tpu.memory_space<vmem>>, %arg5: memref<32x512xf32, #tpu.memory_space<vmem>>, %arg6: memref<1x32xf32, #tpu.memory_space<vmem>>, %arg7: memref<1x32xf32, #tpu.memory_space<vmem>>, %arg8: memref<3x8x16xf32, #tpu.memory_space<vmem>>, %arg9: memref<3x512x256xf32, #tpu.memory_space<vmem>>, %arg10: memref<1x256xf32, #tpu.memory_space<vmem>>, %arg11: memref<256x32xf32, #tpu.memory_space<vmem>>, %arg12: memref<32x256xf32, #tpu.memory_space<vmem>>, %arg13: memref<1x32xf32, #tpu.memory_space<vmem>>, %arg14: memref<1x32xf32, #tpu.memory_space<vmem>>, %arg15: memref<3x4x8xf32, #tpu.memory_space<vmem>>, %arg16: memref<3x256x128xf32, #tpu.memory_space<vmem>>, %arg17: memref<1x128xf32, #tpu.memory_space<vmem>>, %arg18: memref<128x32xf32, #tpu.memory_space<vmem>>, %arg19: memref<32x128xf32, #tpu.memory_space<vmem>>, %arg20: memref<1x32xf32, #tpu.memory_space<vmem>>, %arg21: memref<1x32xf32, #tpu.memory_space<vmem>>, %arg22: memref<4x128x512xf32, #tpu.memory_space<vmem>>, %arg23: memref<512x256xf32, #tpu.memory_space<vmem>>, %arg24: memref<1x256xf32, #tpu.memory_space<vmem>>, %arg25: memref<1x256xf32, #tpu.memory_space<vmem>>, %arg26: memref<1x256xf32, #tpu.memory_space<vmem>>, %arg27: memref<256x128xf32, #tpu.memory_space<vmem>>, %arg28: memref<1x128xf32, #tpu.memory_space<vmem>>, %arg29: memref<1x128xf32, #tpu.memory_space<vmem>>, %arg30: memref<1x128xf32, #tpu.memory_space<vmem>>, %arg31: memref<128x128xf32, #tpu.memory_space<vmem>>, %arg32: memref<1x128xf32, #tpu.memory_space<vmem>>, %arg33: memref<2x512xf32, #tpu.memory_space<vmem>>, %arg34: memref<2x128xf32, #tpu.memory_space<vmem>>) attributes {dimension_semantics = [], scalar_prefetch = 0 : i64, scratch_operands = 0 : i64, tpu.core_type = #tpu.core_type<tc>} {
    %c0 = arith.constant 0 : index
    %c0_0 = arith.constant 0 : index
    %c0_1 = arith.constant 0 : index
    %0 = vector.load %arg0[%c0, %c0_0, %c0_1] : memref<2x32x32xf32, #tpu.memory_space<vmem>>, vector<1x32x32xf32>
    %1 = vector.shape_cast %0 : vector<1x32x32xf32> to vector<32x32xf32>
    %c1 = arith.constant 1 : index
    %c0_2 = arith.constant 0 : index
    %c0_3 = arith.constant 0 : index
    %2 = vector.load %arg0[%c1, %c0_2, %c0_3] : memref<2x32x32xf32, #tpu.memory_space<vmem>>, vector<1x32x32xf32>
    %3 = vector.shape_cast %2 : vector<1x32x32xf32> to vector<32x32xf32>
    %cst = arith.constant 0.000000e+00 : f32
    %4 = vector.broadcast %cst : f32 to vector<16x512xf32>
    %c0_4 = arith.constant 0 : index
    %c0_5 = arith.constant 0 : index
    %c0_6 = arith.constant 0 : index
    %5 = vector.load %arg1[%c0_4, %c0_5, %c0_6] : memref<3x16x32xf32, #tpu.memory_space<vmem>>, vector<1x16x32xf32>
    %6 = vector.shape_cast %5 : vector<1x16x32xf32> to vector<16x32xf32>
    %cst_7 = arith.constant dense<0.000000e+00> : vector<16x32xf32>
    %7 = tpu.matmul %6, %1, %cst_7 {dimension_numbers = #tpu.dot_dimension_numbers<[1], [0], [0], [1], [0, 0, 1, 1], [], []>} : vector<16x32xf32>, vector<32x32xf32>, vector<16x32xf32> -> vector<16x32xf32>
    %c0_8 = arith.constant 0 : index
    %c0_9 = arith.constant 0 : index
    %c0_10 = arith.constant 0 : index
    %8 = vector.load %arg2[%c0_8, %c0_9, %c0_10] : memref<3x32x512xf32, #tpu.memory_space<vmem>>, vector<1x32x512xf32>
    %9 = vector.shape_cast %8 : vector<1x32x512xf32> to vector<32x512xf32>
    %cst_11 = arith.constant dense<0.000000e+00> : vector<16x512xf32>
    %10 = tpu.matmul %7, %9, %cst_11 {dimension_numbers = #tpu.dot_dimension_numbers<[1], [0], [0], [1], [0, 0, 1, 1], [], []>} : vector<16x32xf32>, vector<32x512xf32>, vector<16x512xf32> -> vector<16x512xf32>
    %11 = arith.addf %4, %10 : vector<16x512xf32>
    %c1_12 = arith.constant 1 : index
    %c0_13 = arith.constant 0 : index
    %c0_14 = arith.constant 0 : index
    %12 = vector.load %arg1[%c1_12, %c0_13, %c0_14] : memref<3x16x32xf32, #tpu.memory_space<vmem>>, vector<1x16x32xf32>
    %13 = vector.shape_cast %12 : vector<1x16x32xf32> to vector<16x32xf32>
    %cst_15 = arith.constant dense<0.000000e+00> : vector<16x32xf32>
    %14 = tpu.matmul %13, %1, %cst_15 {dimension_numbers = #tpu.dot_dimension_numbers<[1], [0], [0], [1], [0, 0, 1, 1], [], []>} : vector<16x32xf32>, vector<32x32xf32>, vector<16x32xf32> -> vector<16x32xf32>
    %c1_16 = arith.constant 1 : index
    %c0_17 = arith.constant 0 : index
    %c0_18 = arith.constant 0 : index
    %15 = vector.load %arg2[%c1_16, %c0_17, %c0_18] : memref<3x32x512xf32, #tpu.memory_space<vmem>>, vector<1x32x512xf32>
    %16 = vector.shape_cast %15 : vector<1x32x512xf32> to vector<32x512xf32>
    %cst_19 = arith.constant dense<0.000000e+00> : vector<16x512xf32>
    %17 = tpu.matmul %14, %16, %cst_19 {dimension_numbers = #tpu.dot_dimension_numbers<[1], [0], [0], [1], [0, 0, 1, 1], [], []>} : vector<16x32xf32>, vector<32x512xf32>, vector<16x512xf32> -> vector<16x512xf32>
    %18 = arith.addf %11, %17 : vector<16x512xf32>
    %c2 = arith.constant 2 : index
    %c0_20 = arith.constant 0 : index
    %c0_21 = arith.constant 0 : index
    %19 = vector.load %arg1[%c2, %c0_20, %c0_21] : memref<3x16x32xf32, #tpu.memory_space<vmem>>, vector<1x16x32xf32>
    %20 = vector.shape_cast %19 : vector<1x16x32xf32> to vector<16x32xf32>
    %cst_22 = arith.constant dense<0.000000e+00> : vector<16x32xf32>
    %21 = tpu.matmul %20, %1, %cst_22 {dimension_numbers = #tpu.dot_dimension_numbers<[1], [0], [0], [1], [0, 0, 1, 1], [], []>} : vector<16x32xf32>, vector<32x32xf32>, vector<16x32xf32> -> vector<16x32xf32>
    %c2_23 = arith.constant 2 : index
    %c0_24 = arith.constant 0 : index
    %c0_25 = arith.constant 0 : index
    %22 = vector.load %arg2[%c2_23, %c0_24, %c0_25] : memref<3x32x512xf32, #tpu.memory_space<vmem>>, vector<1x32x512xf32>
    %23 = vector.shape_cast %22 : vector<1x32x512xf32> to vector<32x512xf32>
    %cst_26 = arith.constant dense<0.000000e+00> : vector<16x512xf32>
    %24 = tpu.matmul %21, %23, %cst_26 {dimension_numbers = #tpu.dot_dimension_numbers<[1], [0], [0], [1], [0, 0, 1, 1], [], []>} : vector<16x32xf32>, vector<32x512xf32>, vector<16x512xf32> -> vector<16x512xf32>
    %25 = arith.addf %18, %24 : vector<16x512xf32>
    %c0_27 = arith.constant 0 : index
    %c0_28 = arith.constant 0 : index
    %26 = vector.load %arg3[%c0_27, %c0_28] : memref<1x512xf32, #tpu.memory_space<vmem>>, vector<1x512xf32>
    %27 = vector.broadcast %26 : vector<1x512xf32> to vector<16x512xf32>
    %28 = arith.addf %25, %27 : vector<16x512xf32>
    %cst_29 = arith.constant 0.000000e+00 : f32
    %29 = vector.broadcast %cst_29 : f32 to vector<16x512xf32>
    %c0_30 = arith.constant 0 : index
    %c0_31 = arith.constant 0 : index
    %c0_32 = arith.constant 0 : index
    %30 = vector.load %arg1[%c0_30, %c0_31, %c0_32] : memref<3x16x32xf32, #tpu.memory_space<vmem>>, vector<1x16x32xf32>
    %31 = vector.shape_cast %30 : vector<1x16x32xf32> to vector<16x32xf32>
    %cst_33 = arith.constant dense<0.000000e+00> : vector<16x32xf32>
    %32 = tpu.matmul %31, %3, %cst_33 {dimension_numbers = #tpu.dot_dimension_numbers<[1], [0], [0], [1], [0, 0, 1, 1], [], []>} : vector<16x32xf32>, vector<32x32xf32>, vector<16x32xf32> -> vector<16x32xf32>
    %c0_34 = arith.constant 0 : index
    %c0_35 = arith.constant 0 : index
    %c0_36 = arith.constant 0 : index
    %33 = vector.load %arg2[%c0_34, %c0_35, %c0_36] : memref<3x32x512xf32, #tpu.memory_space<vmem>>, vector<1x32x512xf32>
    %34 = vector.shape_cast %33 : vector<1x32x512xf32> to vector<32x512xf32>
    %cst_37 = arith.constant dense<0.000000e+00> : vector<16x512xf32>
    %35 = tpu.matmul %32, %34, %cst_37 {dimension_numbers = #tpu.dot_dimension_numbers<[1], [0], [0], [1], [0, 0, 1, 1], [], []>} : vector<16x32xf32>, vector<32x512xf32>, vector<16x512xf32> -> vector<16x512xf32>
    %36 = arith.addf %29, %35 : vector<16x512xf32>
    %c1_38 = arith.constant 1 : index
    %c0_39 = arith.constant 0 : index
    %c0_40 = arith.constant 0 : index
    %37 = vector.load %arg1[%c1_38, %c0_39, %c0_40] : memref<3x16x32xf32, #tpu.memory_space<vmem>>, vector<1x16x32xf32>
    %38 = vector.shape_cast %37 : vector<1x16x32xf32> to vector<16x32xf32>
    %cst_41 = arith.constant dense<0.000000e+00> : vector<16x32xf32>
    %39 = tpu.matmul %38, %3, %cst_41 {dimension_numbers = #tpu.dot_dimension_numbers<[1], [0], [0], [1], [0, 0, 1, 1], [], []>} : vector<16x32xf32>, vector<32x32xf32>, vector<16x32xf32> -> vector<16x32xf32>
    %c1_42 = arith.constant 1 : index
    %c0_43 = arith.constant 0 : index
    %c0_44 = arith.constant 0 : index
    %40 = vector.load %arg2[%c1_42, %c0_43, %c0_44] : memref<3x32x512xf32, #tpu.memory_space<vmem>>, vector<1x32x512xf32>
    %41 = vector.shape_cast %40 : vector<1x32x512xf32> to vector<32x512xf32>
    %cst_45 = arith.constant dense<0.000000e+00> : vector<16x512xf32>
    %42 = tpu.matmul %39, %41, %cst_45 {dimension_numbers = #tpu.dot_dimension_numbers<[1], [0], [0], [1], [0, 0, 1, 1], [], []>} : vector<16x32xf32>, vector<32x512xf32>, vector<16x512xf32> -> vector<16x512xf32>
    %43 = arith.addf %36, %42 : vector<16x512xf32>
    %c2_46 = arith.constant 2 : index
    %c0_47 = arith.constant 0 : index
    %c0_48 = arith.constant 0 : index
    %44 = vector.load %arg1[%c2_46, %c0_47, %c0_48] : memref<3x16x32xf32, #tpu.memory_space<vmem>>, vector<1x16x32xf32>
    %45 = vector.shape_cast %44 : vector<1x16x32xf32> to vector<16x32xf32>
    %cst_49 = arith.constant dense<0.000000e+00> : vector<16x32xf32>
    %46 = tpu.matmul %45, %3, %cst_49 {dimension_numbers = #tpu.dot_dimension_numbers<[1], [0], [0], [1], [0, 0, 1, 1], [], []>} : vector<16x32xf32>, vector<32x32xf32>, vector<16x32xf32> -> vector<16x32xf32>
    %c2_50 = arith.constant 2 : index
    %c0_51 = arith.constant 0 : index
    %c0_52 = arith.constant 0 : index
    %47 = vector.load %arg2[%c2_50, %c0_51, %c0_52] : memref<3x32x512xf32, #tpu.memory_space<vmem>>, vector<1x32x512xf32>
    %48 = vector.shape_cast %47 : vector<1x32x512xf32> to vector<32x512xf32>
    %cst_53 = arith.constant dense<0.000000e+00> : vector<16x512xf32>
    %49 = tpu.matmul %46, %48, %cst_53 {dimension_numbers = #tpu.dot_dimension_numbers<[1], [0], [0], [1], [0, 0, 1, 1], [], []>} : vector<16x32xf32>, vector<32x512xf32>, vector<16x512xf32> -> vector<16x512xf32>
    %50 = arith.addf %43, %49 : vector<16x512xf32>
    %c0_54 = arith.constant 0 : index
    %c0_55 = arith.constant 0 : index
    %51 = vector.load %arg3[%c0_54, %c0_55] : memref<1x512xf32, #tpu.memory_space<vmem>>, vector<1x512xf32>
    %52 = vector.broadcast %51 : vector<1x512xf32> to vector<16x512xf32>
    %53 = arith.addf %50, %52 : vector<16x512xf32>
    %cst_56 = arith.constant dense<0.000000e+00> : vector<512xf32>
    %54 = vector.multi_reduction <add>, %28, %cst_56 [0] : vector<16x512xf32> to vector<512xf32>
    %55 = vector.shape_cast %54 : vector<512xf32> to vector<1x512xf32>
    %cst_57 = arith.constant dense<0.000000e+00> : vector<512xf32>
    %56 = vector.multi_reduction <add>, %53, %cst_57 [0] : vector<16x512xf32> to vector<512xf32>
    %57 = vector.shape_cast %56 : vector<512xf32> to vector<1x512xf32>
    %58 = arith.addf %55, %57 : vector<1x512xf32>
    %c0_58 = arith.constant 0 : index
    %c0_59 = arith.constant 0 : index
    %59 = vector.load %arg4[%c0_58, %c0_59] : memref<512x32xf32, #tpu.memory_space<vmem>>, vector<512x32xf32>
    %cst_60 = arith.constant dense<0.000000e+00> : vector<1x32xf32>
    %60 = tpu.matmul %58, %59, %cst_60 {dimension_numbers = #tpu.dot_dimension_numbers<[1], [0], [0], [1], [0, 0, 1, 1], [], []>} : vector<1x512xf32>, vector<512x32xf32>, vector<1x32xf32> -> vector<1x32xf32>
    %cst_61 = arith.constant 0.001953125 : f32
    %61 = vector.broadcast %cst_61 : f32 to vector<1x32xf32>
    %62 = arith.mulf %60, %61 : vector<1x32xf32>
    %c0_62 = arith.constant 0 : index
    %c0_63 = arith.constant 0 : index
    %63 = vector.load %arg5[%c0_62, %c0_63] : memref<32x512xf32, #tpu.memory_space<vmem>>, vector<32x512xf32>
    %cst_64 = arith.constant dense<0.000000e+00> : vector<1x512xf32>
    %64 = tpu.matmul %62, %63, %cst_64 {dimension_numbers = #tpu.dot_dimension_numbers<[1], [0], [0], [1], [0, 0, 1, 1], [], []>} : vector<1x32xf32>, vector<32x512xf32>, vector<1x512xf32> -> vector<1x512xf32>
    %65 = vector.broadcast %64 : vector<1x512xf32> to vector<16x512xf32>
    %66 = arith.subf %28, %65 : vector<16x512xf32>
    %67 = arith.mulf %66, %66 : vector<16x512xf32>
    %cst_65 = arith.constant dense<0.000000e+00> : vector<512xf32>
    %68 = vector.multi_reduction <add>, %67, %cst_65 [0] : vector<16x512xf32> to vector<512xf32>
    %69 = vector.shape_cast %68 : vector<512xf32> to vector<1x512xf32>
    %70 = vector.broadcast %64 : vector<1x512xf32> to vector<16x512xf32>
    %71 = arith.subf %53, %70 : vector<16x512xf32>
    %72 = arith.mulf %71, %71 : vector<16x512xf32>
    %cst_66 = arith.constant dense<0.000000e+00> : vector<512xf32>
    %73 = vector.multi_reduction <add>, %72, %cst_66 [0] : vector<16x512xf32> to vector<512xf32>
    %74 = vector.shape_cast %73 : vector<512xf32> to vector<1x512xf32>
    %75 = arith.addf %69, %74 : vector<1x512xf32>
    %c0_67 = arith.constant 0 : index
    %c0_68 = arith.constant 0 : index
    %76 = vector.load %arg4[%c0_67, %c0_68] : memref<512x32xf32, #tpu.memory_space<vmem>>, vector<512x32xf32>
    %cst_69 = arith.constant dense<0.000000e+00> : vector<1x32xf32>
    %77 = tpu.matmul %75, %76, %cst_69 {dimension_numbers = #tpu.dot_dimension_numbers<[1], [0], [0], [1], [0, 0, 1, 1], [], []>} : vector<1x512xf32>, vector<512x32xf32>, vector<1x32xf32> -> vector<1x32xf32>
    %cst_70 = arith.constant 0.001953125 : f32
    %78 = vector.broadcast %cst_70 : f32 to vector<1x32xf32>
    %79 = arith.mulf %77, %78 : vector<1x32xf32>
    %c0_71 = arith.constant 0 : index
    %c0_72 = arith.constant 0 : index
    %80 = vector.load %arg6[%c0_71, %c0_72] : memref<1x32xf32, #tpu.memory_space<vmem>>, vector<1x32xf32>
    %cst_73 = arith.constant 9.99999974E-6 : f32
    %81 = vector.broadcast %cst_73 : f32 to vector<1x32xf32>
    %82 = arith.addf %79, %81 : vector<1x32xf32>
    %83 = math.rsqrt %82 : vector<1x32xf32>
    %84 = arith.mulf %80, %83 : vector<1x32xf32>
    %c0_74 = arith.constant 0 : index
    %c0_75 = arith.constant 0 : index
    %85 = vector.load %arg7[%c0_74, %c0_75] : memref<1x32xf32, #tpu.memory_space<vmem>>, vector<1x32xf32>
    %86 = arith.mulf %62, %84 : vector<1x32xf32>
    %87 = arith.subf %85, %86 : vector<1x32xf32>
    %c0_76 = arith.constant 0 : index
    %c0_77 = arith.constant 0 : index
    %88 = vector.load %arg5[%c0_76, %c0_77] : memref<32x512xf32, #tpu.memory_space<vmem>>, vector<32x512xf32>
    %cst_78 = arith.constant dense<0.000000e+00> : vector<1x512xf32>
    %89 = tpu.matmul %84, %88, %cst_78 {dimension_numbers = #tpu.dot_dimension_numbers<[1], [0], [0], [1], [0, 0, 1, 1], [], []>} : vector<1x32xf32>, vector<32x512xf32>, vector<1x512xf32> -> vector<1x512xf32>
    %c0_79 = arith.constant 0 : index
    %c0_80 = arith.constant 0 : index
    %90 = vector.load %arg5[%c0_79, %c0_80] : memref<32x512xf32, #tpu.memory_space<vmem>>, vector<32x512xf32>
    %cst_81 = arith.constant dense<0.000000e+00> : vector<1x512xf32>
    %91 = tpu.matmul %87, %90, %cst_81 {dimension_numbers = #tpu.dot_dimension_numbers<[1], [0], [0], [1], [0, 0, 1, 1], [], []>} : vector<1x32xf32>, vector<32x512xf32>, vector<1x512xf32> -> vector<1x512xf32>
    %92 = vector.broadcast %89 : vector<1x512xf32> to vector<16x512xf32>
    %93 = arith.mulf %28, %92 : vector<16x512xf32>
    %94 = vector.broadcast %91 : vector<1x512xf32> to vector<16x512xf32>
    %95 = arith.addf %93, %94 : vector<16x512xf32>
    %cst_82 = arith.constant 0.000000e+00 : f32
    %96 = vector.broadcast %cst_82 : f32 to vector<16x512xf32>
    %97 = arith.cmpf oge, %95, %96 : vector<16x512xf32>
    %cst_83 = arith.constant 0.00999999977 : f32
    %98 = vector.broadcast %cst_83 : f32 to vector<16x512xf32>
    %99 = arith.mulf %98, %95 : vector<16x512xf32>
    %100 = arith.select %97, %95, %99 : vector<16x512xi1>, vector<16x512xf32>
    %101 = vector.broadcast %89 : vector<1x512xf32> to vector<16x512xf32>
    %102 = arith.mulf %53, %101 : vector<16x512xf32>
    %103 = vector.broadcast %91 : vector<1x512xf32> to vector<16x512xf32>
    %104 = arith.addf %102, %103 : vector<16x512xf32>
    %cst_84 = arith.constant 0.000000e+00 : f32
    %105 = vector.broadcast %cst_84 : f32 to vector<16x512xf32>
    %106 = arith.cmpf oge, %104, %105 : vector<16x512xf32>
    %cst_85 = arith.constant 0.00999999977 : f32
    %107 = vector.broadcast %cst_85 : f32 to vector<16x512xf32>
    %108 = arith.mulf %107, %104 : vector<16x512xf32>
    %109 = arith.select %106, %104, %108 : vector<16x512xi1>, vector<16x512xf32>
    %cst_86 = arith.constant 0.000000e+00 : f32
    %110 = vector.broadcast %cst_86 : f32 to vector<8x256xf32>
    %c0_87 = arith.constant 0 : index
    %c0_88 = arith.constant 0 : index
    %c0_89 = arith.constant 0 : index
    %111 = vector.load %arg8[%c0_87, %c0_88, %c0_89] : memref<3x8x16xf32, #tpu.memory_space<vmem>>, vector<1x8x16xf32>
    %112 = vector.shape_cast %111 : vector<1x8x16xf32> to vector<8x16xf32>
    %cst_90 = arith.constant dense<0.000000e+00> : vector<8x512xf32>
    %113 = tpu.matmul %112, %100, %cst_90 {dimension_numbers = #tpu.dot_dimension_numbers<[1], [0], [0], [1], [0, 0, 1, 1], [], []>} : vector<8x16xf32>, vector<16x512xf32>, vector<8x512xf32> -> vector<8x512xf32>
    %c0_91 = arith.constant 0 : index
    %c0_92 = arith.constant 0 : index
    %c0_93 = arith.constant 0 : index
    %114 = vector.load %arg9[%c0_91, %c0_92, %c0_93] : memref<3x512x256xf32, #tpu.memory_space<vmem>>, vector<1x512x256xf32>
    %115 = vector.shape_cast %114 : vector<1x512x256xf32> to vector<512x256xf32>
    %cst_94 = arith.constant dense<0.000000e+00> : vector<8x256xf32>
    %116 = tpu.matmul %113, %115, %cst_94 {dimension_numbers = #tpu.dot_dimension_numbers<[1], [0], [0], [1], [0, 0, 1, 1], [], []>} : vector<8x512xf32>, vector<512x256xf32>, vector<8x256xf32> -> vector<8x256xf32>
    %117 = arith.addf %110, %116 : vector<8x256xf32>
    %c1_95 = arith.constant 1 : index
    %c0_96 = arith.constant 0 : index
    %c0_97 = arith.constant 0 : index
    %118 = vector.load %arg8[%c1_95, %c0_96, %c0_97] : memref<3x8x16xf32, #tpu.memory_space<vmem>>, vector<1x8x16xf32>
    %119 = vector.shape_cast %118 : vector<1x8x16xf32> to vector<8x16xf32>
    %cst_98 = arith.constant dense<0.000000e+00> : vector<8x512xf32>
    %120 = tpu.matmul %119, %100, %cst_98 {dimension_numbers = #tpu.dot_dimension_numbers<[1], [0], [0], [1], [0, 0, 1, 1], [], []>} : vector<8x16xf32>, vector<16x512xf32>, vector<8x512xf32> -> vector<8x512xf32>
    %c1_99 = arith.constant 1 : index
    %c0_100 = arith.constant 0 : index
    %c0_101 = arith.constant 0 : index
    %121 = vector.load %arg9[%c1_99, %c0_100, %c0_101] : memref<3x512x256xf32, #tpu.memory_space<vmem>>, vector<1x512x256xf32>
    %122 = vector.shape_cast %121 : vector<1x512x256xf32> to vector<512x256xf32>
    %cst_102 = arith.constant dense<0.000000e+00> : vector<8x256xf32>
    %123 = tpu.matmul %120, %122, %cst_102 {dimension_numbers = #tpu.dot_dimension_numbers<[1], [0], [0], [1], [0, 0, 1, 1], [], []>} : vector<8x512xf32>, vector<512x256xf32>, vector<8x256xf32> -> vector<8x256xf32>
    %124 = arith.addf %117, %123 : vector<8x256xf32>
    %c2_103 = arith.constant 2 : index
    %c0_104 = arith.constant 0 : index
    %c0_105 = arith.constant 0 : index
    %125 = vector.load %arg8[%c2_103, %c0_104, %c0_105] : memref<3x8x16xf32, #tpu.memory_space<vmem>>, vector<1x8x16xf32>
    %126 = vector.shape_cast %125 : vector<1x8x16xf32> to vector<8x16xf32>
    %cst_106 = arith.constant dense<0.000000e+00> : vector<8x512xf32>
    %127 = tpu.matmul %126, %100, %cst_106 {dimension_numbers = #tpu.dot_dimension_numbers<[1], [0], [0], [1], [0, 0, 1, 1], [], []>} : vector<8x16xf32>, vector<16x512xf32>, vector<8x512xf32> -> vector<8x512xf32>
    %c2_107 = arith.constant 2 : index
    %c0_108 = arith.constant 0 : index
    %c0_109 = arith.constant 0 : index
    %128 = vector.load %arg9[%c2_107, %c0_108, %c0_109] : memref<3x512x256xf32, #tpu.memory_space<vmem>>, vector<1x512x256xf32>
    %129 = vector.shape_cast %128 : vector<1x512x256xf32> to vector<512x256xf32>
    %cst_110 = arith.constant dense<0.000000e+00> : vector<8x256xf32>
    %130 = tpu.matmul %127, %129, %cst_110 {dimension_numbers = #tpu.dot_dimension_numbers<[1], [0], [0], [1], [0, 0, 1, 1], [], []>} : vector<8x512xf32>, vector<512x256xf32>, vector<8x256xf32> -> vector<8x256xf32>
    %131 = arith.addf %124, %130 : vector<8x256xf32>
    %c0_111 = arith.constant 0 : index
    %c0_112 = arith.constant 0 : index
    %132 = vector.load %arg10[%c0_111, %c0_112] : memref<1x256xf32, #tpu.memory_space<vmem>>, vector<1x256xf32>
    %133 = vector.broadcast %132 : vector<1x256xf32> to vector<8x256xf32>
    %134 = arith.addf %131, %133 : vector<8x256xf32>
    %cst_113 = arith.constant 0.000000e+00 : f32
    %135 = vector.broadcast %cst_113 : f32 to vector<8x256xf32>
    %c0_114 = arith.constant 0 : index
    %c0_115 = arith.constant 0 : index
    %c0_116 = arith.constant 0 : index
    %136 = vector.load %arg8[%c0_114, %c0_115, %c0_116] : memref<3x8x16xf32, #tpu.memory_space<vmem>>, vector<1x8x16xf32>
    %137 = vector.shape_cast %136 : vector<1x8x16xf32> to vector<8x16xf32>
    %cst_117 = arith.constant dense<0.000000e+00> : vector<8x512xf32>
    %138 = tpu.matmul %137, %109, %cst_117 {dimension_numbers = #tpu.dot_dimension_numbers<[1], [0], [0], [1], [0, 0, 1, 1], [], []>} : vector<8x16xf32>, vector<16x512xf32>, vector<8x512xf32> -> vector<8x512xf32>
    %c0_118 = arith.constant 0 : index
    %c0_119 = arith.constant 0 : index
    %c0_120 = arith.constant 0 : index
    %139 = vector.load %arg9[%c0_118, %c0_119, %c0_120] : memref<3x512x256xf32, #tpu.memory_space<vmem>>, vector<1x512x256xf32>
    %140 = vector.shape_cast %139 : vector<1x512x256xf32> to vector<512x256xf32>
    %cst_121 = arith.constant dense<0.000000e+00> : vector<8x256xf32>
    %141 = tpu.matmul %138, %140, %cst_121 {dimension_numbers = #tpu.dot_dimension_numbers<[1], [0], [0], [1], [0, 0, 1, 1], [], []>} : vector<8x512xf32>, vector<512x256xf32>, vector<8x256xf32> -> vector<8x256xf32>
    %142 = arith.addf %135, %141 : vector<8x256xf32>
    %c1_122 = arith.constant 1 : index
    %c0_123 = arith.constant 0 : index
    %c0_124 = arith.constant 0 : index
    %143 = vector.load %arg8[%c1_122, %c0_123, %c0_124] : memref<3x8x16xf32, #tpu.memory_space<vmem>>, vector<1x8x16xf32>
    %144 = vector.shape_cast %143 : vector<1x8x16xf32> to vector<8x16xf32>
    %cst_125 = arith.constant dense<0.000000e+00> : vector<8x512xf32>
    %145 = tpu.matmul %144, %109, %cst_125 {dimension_numbers = #tpu.dot_dimension_numbers<[1], [0], [0], [1], [0, 0, 1, 1], [], []>} : vector<8x16xf32>, vector<16x512xf32>, vector<8x512xf32> -> vector<8x512xf32>
    %c1_126 = arith.constant 1 : index
    %c0_127 = arith.constant 0 : index
    %c0_128 = arith.constant 0 : index
    %146 = vector.load %arg9[%c1_126, %c0_127, %c0_128] : memref<3x512x256xf32, #tpu.memory_space<vmem>>, vector<1x512x256xf32>
    %147 = vector.shape_cast %146 : vector<1x512x256xf32> to vector<512x256xf32>
    %cst_129 = arith.constant dense<0.000000e+00> : vector<8x256xf32>
    %148 = tpu.matmul %145, %147, %cst_129 {dimension_numbers = #tpu.dot_dimension_numbers<[1], [0], [0], [1], [0, 0, 1, 1], [], []>} : vector<8x512xf32>, vector<512x256xf32>, vector<8x256xf32> -> vector<8x256xf32>
    %149 = arith.addf %142, %148 : vector<8x256xf32>
    %c2_130 = arith.constant 2 : index
    %c0_131 = arith.constant 0 : index
    %c0_132 = arith.constant 0 : index
    %150 = vector.load %arg8[%c2_130, %c0_131, %c0_132] : memref<3x8x16xf32, #tpu.memory_space<vmem>>, vector<1x8x16xf32>
    %151 = vector.shape_cast %150 : vector<1x8x16xf32> to vector<8x16xf32>
    %cst_133 = arith.constant dense<0.000000e+00> : vector<8x512xf32>
    %152 = tpu.matmul %151, %109, %cst_133 {dimension_numbers = #tpu.dot_dimension_numbers<[1], [0], [0], [1], [0, 0, 1, 1], [], []>} : vector<8x16xf32>, vector<16x512xf32>, vector<8x512xf32> -> vector<8x512xf32>
    %c2_134 = arith.constant 2 : index
    %c0_135 = arith.constant 0 : index
    %c0_136 = arith.constant 0 : index
    %153 = vector.load %arg9[%c2_134, %c0_135, %c0_136] : memref<3x512x256xf32, #tpu.memory_space<vmem>>, vector<1x512x256xf32>
    %154 = vector.shape_cast %153 : vector<1x512x256xf32> to vector<512x256xf32>
    %cst_137 = arith.constant dense<0.000000e+00> : vector<8x256xf32>
    %155 = tpu.matmul %152, %154, %cst_137 {dimension_numbers = #tpu.dot_dimension_numbers<[1], [0], [0], [1], [0, 0, 1, 1], [], []>} : vector<8x512xf32>, vector<512x256xf32>, vector<8x256xf32> -> vector<8x256xf32>
    %156 = arith.addf %149, %155 : vector<8x256xf32>
    %c0_138 = arith.constant 0 : index
    %c0_139 = arith.constant 0 : index
    %157 = vector.load %arg10[%c0_138, %c0_139] : memref<1x256xf32, #tpu.memory_space<vmem>>, vector<1x256xf32>
    %158 = vector.broadcast %157 : vector<1x256xf32> to vector<8x256xf32>
    %159 = arith.addf %156, %158 : vector<8x256xf32>
    %cst_140 = arith.constant dense<0.000000e+00> : vector<256xf32>
    %160 = vector.multi_reduction <add>, %134, %cst_140 [0] : vector<8x256xf32> to vector<256xf32>
    %161 = vector.shape_cast %160 : vector<256xf32> to vector<1x256xf32>
    %cst_141 = arith.constant dense<0.000000e+00> : vector<256xf32>
    %162 = vector.multi_reduction <add>, %159, %cst_141 [0] : vector<8x256xf32> to vector<256xf32>
    %163 = vector.shape_cast %162 : vector<256xf32> to vector<1x256xf32>
    %164 = arith.addf %161, %163 : vector<1x256xf32>
    %c0_142 = arith.constant 0 : index
    %c0_143 = arith.constant 0 : index
    %165 = vector.load %arg11[%c0_142, %c0_143] : memref<256x32xf32, #tpu.memory_space<vmem>>, vector<256x32xf32>
    %cst_144 = arith.constant dense<0.000000e+00> : vector<1x32xf32>
    %166 = tpu.matmul %164, %165, %cst_144 {dimension_numbers = #tpu.dot_dimension_numbers<[1], [0], [0], [1], [0, 0, 1, 1], [], []>} : vector<1x256xf32>, vector<256x32xf32>, vector<1x32xf32> -> vector<1x32xf32>
    %cst_145 = arith.constant 7.812500e-03 : f32
    %167 = vector.broadcast %cst_145 : f32 to vector<1x32xf32>
    %168 = arith.mulf %166, %167 : vector<1x32xf32>
    %c0_146 = arith.constant 0 : index
    %c0_147 = arith.constant 0 : index
    %169 = vector.load %arg12[%c0_146, %c0_147] : memref<32x256xf32, #tpu.memory_space<vmem>>, vector<32x256xf32>
    %cst_148 = arith.constant dense<0.000000e+00> : vector<1x256xf32>
    %170 = tpu.matmul %168, %169, %cst_148 {dimension_numbers = #tpu.dot_dimension_numbers<[1], [0], [0], [1], [0, 0, 1, 1], [], []>} : vector<1x32xf32>, vector<32x256xf32>, vector<1x256xf32> -> vector<1x256xf32>
    %171 = vector.broadcast %170 : vector<1x256xf32> to vector<8x256xf32>
    %172 = arith.subf %134, %171 : vector<8x256xf32>
    %173 = arith.mulf %172, %172 : vector<8x256xf32>
    %cst_149 = arith.constant dense<0.000000e+00> : vector<256xf32>
    %174 = vector.multi_reduction <add>, %173, %cst_149 [0] : vector<8x256xf32> to vector<256xf32>
    %175 = vector.shape_cast %174 : vector<256xf32> to vector<1x256xf32>
    %176 = vector.broadcast %170 : vector<1x256xf32> to vector<8x256xf32>
    %177 = arith.subf %159, %176 : vector<8x256xf32>
    %178 = arith.mulf %177, %177 : vector<8x256xf32>
    %cst_150 = arith.constant dense<0.000000e+00> : vector<256xf32>
    %179 = vector.multi_reduction <add>, %178, %cst_150 [0] : vector<8x256xf32> to vector<256xf32>
    %180 = vector.shape_cast %179 : vector<256xf32> to vector<1x256xf32>
    %181 = arith.addf %175, %180 : vector<1x256xf32>
    %c0_151 = arith.constant 0 : index
    %c0_152 = arith.constant 0 : index
    %182 = vector.load %arg11[%c0_151, %c0_152] : memref<256x32xf32, #tpu.memory_space<vmem>>, vector<256x32xf32>
    %cst_153 = arith.constant dense<0.000000e+00> : vector<1x32xf32>
    %183 = tpu.matmul %181, %182, %cst_153 {dimension_numbers = #tpu.dot_dimension_numbers<[1], [0], [0], [1], [0, 0, 1, 1], [], []>} : vector<1x256xf32>, vector<256x32xf32>, vector<1x32xf32> -> vector<1x32xf32>
    %cst_154 = arith.constant 7.812500e-03 : f32
    %184 = vector.broadcast %cst_154 : f32 to vector<1x32xf32>
    %185 = arith.mulf %183, %184 : vector<1x32xf32>
    %c0_155 = arith.constant 0 : index
    %c0_156 = arith.constant 0 : index
    %186 = vector.load %arg13[%c0_155, %c0_156] : memref<1x32xf32, #tpu.memory_space<vmem>>, vector<1x32xf32>
    %cst_157 = arith.constant 9.99999974E-6 : f32
    %187 = vector.broadcast %cst_157 : f32 to vector<1x32xf32>
    %188 = arith.addf %185, %187 : vector<1x32xf32>
    %189 = math.rsqrt %188 : vector<1x32xf32>
    %190 = arith.mulf %186, %189 : vector<1x32xf32>
    %c0_158 = arith.constant 0 : index
    %c0_159 = arith.constant 0 : index
    %191 = vector.load %arg14[%c0_158, %c0_159] : memref<1x32xf32, #tpu.memory_space<vmem>>, vector<1x32xf32>
    %192 = arith.mulf %168, %190 : vector<1x32xf32>
    %193 = arith.subf %191, %192 : vector<1x32xf32>
    %c0_160 = arith.constant 0 : index
    %c0_161 = arith.constant 0 : index
    %194 = vector.load %arg12[%c0_160, %c0_161] : memref<32x256xf32, #tpu.memory_space<vmem>>, vector<32x256xf32>
    %cst_162 = arith.constant dense<0.000000e+00> : vector<1x256xf32>
    %195 = tpu.matmul %190, %194, %cst_162 {dimension_numbers = #tpu.dot_dimension_numbers<[1], [0], [0], [1], [0, 0, 1, 1], [], []>} : vector<1x32xf32>, vector<32x256xf32>, vector<1x256xf32> -> vector<1x256xf32>
    %c0_163 = arith.constant 0 : index
    %c0_164 = arith.constant 0 : index
    %196 = vector.load %arg12[%c0_163, %c0_164] : memref<32x256xf32, #tpu.memory_space<vmem>>, vector<32x256xf32>
    %cst_165 = arith.constant dense<0.000000e+00> : vector<1x256xf32>
    %197 = tpu.matmul %193, %196, %cst_165 {dimension_numbers = #tpu.dot_dimension_numbers<[1], [0], [0], [1], [0, 0, 1, 1], [], []>} : vector<1x32xf32>, vector<32x256xf32>, vector<1x256xf32> -> vector<1x256xf32>
    %198 = vector.broadcast %195 : vector<1x256xf32> to vector<8x256xf32>
    %199 = arith.mulf %134, %198 : vector<8x256xf32>
    %200 = vector.broadcast %197 : vector<1x256xf32> to vector<8x256xf32>
    %201 = arith.addf %199, %200 : vector<8x256xf32>
    %cst_166 = arith.constant 0.000000e+00 : f32
    %202 = vector.broadcast %cst_166 : f32 to vector<8x256xf32>
    %203 = arith.cmpf oge, %201, %202 : vector<8x256xf32>
    %cst_167 = arith.constant 0.00999999977 : f32
    %204 = vector.broadcast %cst_167 : f32 to vector<8x256xf32>
    %205 = arith.mulf %204, %201 : vector<8x256xf32>
    %206 = arith.select %203, %201, %205 : vector<8x256xi1>, vector<8x256xf32>
    %207 = vector.broadcast %195 : vector<1x256xf32> to vector<8x256xf32>
    %208 = arith.mulf %159, %207 : vector<8x256xf32>
    %209 = vector.broadcast %197 : vector<1x256xf32> to vector<8x256xf32>
    %210 = arith.addf %208, %209 : vector<8x256xf32>
    %cst_168 = arith.constant 0.000000e+00 : f32
    %211 = vector.broadcast %cst_168 : f32 to vector<8x256xf32>
    %212 = arith.cmpf oge, %210, %211 : vector<8x256xf32>
    %cst_169 = arith.constant 0.00999999977 : f32
    %213 = vector.broadcast %cst_169 : f32 to vector<8x256xf32>
    %214 = arith.mulf %213, %210 : vector<8x256xf32>
    %215 = arith.select %212, %210, %214 : vector<8x256xi1>, vector<8x256xf32>
    %cst_170 = arith.constant 0.000000e+00 : f32
    %216 = vector.broadcast %cst_170 : f32 to vector<4x128xf32>
    %c0_171 = arith.constant 0 : index
    %c0_172 = arith.constant 0 : index
    %c0_173 = arith.constant 0 : index
    %217 = vector.load %arg15[%c0_171, %c0_172, %c0_173] : memref<3x4x8xf32, #tpu.memory_space<vmem>>, vector<1x4x8xf32>
    %218 = vector.shape_cast %217 : vector<1x4x8xf32> to vector<4x8xf32>
    %cst_174 = arith.constant dense<0.000000e+00> : vector<4x256xf32>
    %219 = tpu.matmul %218, %206, %cst_174 {dimension_numbers = #tpu.dot_dimension_numbers<[1], [0], [0], [1], [0, 0, 1, 1], [], []>} : vector<4x8xf32>, vector<8x256xf32>, vector<4x256xf32> -> vector<4x256xf32>
    %c0_175 = arith.constant 0 : index
    %c0_176 = arith.constant 0 : index
    %c0_177 = arith.constant 0 : index
    %220 = vector.load %arg16[%c0_175, %c0_176, %c0_177] : memref<3x256x128xf32, #tpu.memory_space<vmem>>, vector<1x256x128xf32>
    %221 = vector.shape_cast %220 : vector<1x256x128xf32> to vector<256x128xf32>
    %cst_178 = arith.constant dense<0.000000e+00> : vector<4x128xf32>
    %222 = tpu.matmul %219, %221, %cst_178 {dimension_numbers = #tpu.dot_dimension_numbers<[1], [0], [0], [1], [0, 0, 1, 1], [], []>} : vector<4x256xf32>, vector<256x128xf32>, vector<4x128xf32> -> vector<4x128xf32>
    %223 = arith.addf %216, %222 : vector<4x128xf32>
    %c1_179 = arith.constant 1 : index
    %c0_180 = arith.constant 0 : index
    %c0_181 = arith.constant 0 : index
    %224 = vector.load %arg15[%c1_179, %c0_180, %c0_181] : memref<3x4x8xf32, #tpu.memory_space<vmem>>, vector<1x4x8xf32>
    %225 = vector.shape_cast %224 : vector<1x4x8xf32> to vector<4x8xf32>
    %cst_182 = arith.constant dense<0.000000e+00> : vector<4x256xf32>
    %226 = tpu.matmul %225, %206, %cst_182 {dimension_numbers = #tpu.dot_dimension_numbers<[1], [0], [0], [1], [0, 0, 1, 1], [], []>} : vector<4x8xf32>, vector<8x256xf32>, vector<4x256xf32> -> vector<4x256xf32>
    %c1_183 = arith.constant 1 : index
    %c0_184 = arith.constant 0 : index
    %c0_185 = arith.constant 0 : index
    %227 = vector.load %arg16[%c1_183, %c0_184, %c0_185] : memref<3x256x128xf32, #tpu.memory_space<vmem>>, vector<1x256x128xf32>
    %228 = vector.shape_cast %227 : vector<1x256x128xf32> to vector<256x128xf32>
    %cst_186 = arith.constant dense<0.000000e+00> : vector<4x128xf32>
    %229 = tpu.matmul %226, %228, %cst_186 {dimension_numbers = #tpu.dot_dimension_numbers<[1], [0], [0], [1], [0, 0, 1, 1], [], []>} : vector<4x256xf32>, vector<256x128xf32>, vector<4x128xf32> -> vector<4x128xf32>
    %230 = arith.addf %223, %229 : vector<4x128xf32>
    %c2_187 = arith.constant 2 : index
    %c0_188 = arith.constant 0 : index
    %c0_189 = arith.constant 0 : index
    %231 = vector.load %arg15[%c2_187, %c0_188, %c0_189] : memref<3x4x8xf32, #tpu.memory_space<vmem>>, vector<1x4x8xf32>
    %232 = vector.shape_cast %231 : vector<1x4x8xf32> to vector<4x8xf32>
    %cst_190 = arith.constant dense<0.000000e+00> : vector<4x256xf32>
    %233 = tpu.matmul %232, %206, %cst_190 {dimension_numbers = #tpu.dot_dimension_numbers<[1], [0], [0], [1], [0, 0, 1, 1], [], []>} : vector<4x8xf32>, vector<8x256xf32>, vector<4x256xf32> -> vector<4x256xf32>
    %c2_191 = arith.constant 2 : index
    %c0_192 = arith.constant 0 : index
    %c0_193 = arith.constant 0 : index
    %234 = vector.load %arg16[%c2_191, %c0_192, %c0_193] : memref<3x256x128xf32, #tpu.memory_space<vmem>>, vector<1x256x128xf32>
    %235 = vector.shape_cast %234 : vector<1x256x128xf32> to vector<256x128xf32>
    %cst_194 = arith.constant dense<0.000000e+00> : vector<4x128xf32>
    %236 = tpu.matmul %233, %235, %cst_194 {dimension_numbers = #tpu.dot_dimension_numbers<[1], [0], [0], [1], [0, 0, 1, 1], [], []>} : vector<4x256xf32>, vector<256x128xf32>, vector<4x128xf32> -> vector<4x128xf32>
    %237 = arith.addf %230, %236 : vector<4x128xf32>
    %c0_195 = arith.constant 0 : index
    %c0_196 = arith.constant 0 : index
    %238 = vector.load %arg17[%c0_195, %c0_196] : memref<1x128xf32, #tpu.memory_space<vmem>>, vector<1x128xf32>
    %239 = vector.broadcast %238 : vector<1x128xf32> to vector<4x128xf32>
    %240 = arith.addf %237, %239 : vector<4x128xf32>
    %cst_197 = arith.constant 0.000000e+00 : f32
    %241 = vector.broadcast %cst_197 : f32 to vector<4x128xf32>
    %c0_198 = arith.constant 0 : index
    %c0_199 = arith.constant 0 : index
    %c0_200 = arith.constant 0 : index
    %242 = vector.load %arg15[%c0_198, %c0_199, %c0_200] : memref<3x4x8xf32, #tpu.memory_space<vmem>>, vector<1x4x8xf32>
    %243 = vector.shape_cast %242 : vector<1x4x8xf32> to vector<4x8xf32>
    %cst_201 = arith.constant dense<0.000000e+00> : vector<4x256xf32>
    %244 = tpu.matmul %243, %215, %cst_201 {dimension_numbers = #tpu.dot_dimension_numbers<[1], [0], [0], [1], [0, 0, 1, 1], [], []>} : vector<4x8xf32>, vector<8x256xf32>, vector<4x256xf32> -> vector<4x256xf32>
    %c0_202 = arith.constant 0 : index
    %c0_203 = arith.constant 0 : index
    %c0_204 = arith.constant 0 : index
    %245 = vector.load %arg16[%c0_202, %c0_203, %c0_204] : memref<3x256x128xf32, #tpu.memory_space<vmem>>, vector<1x256x128xf32>
    %246 = vector.shape_cast %245 : vector<1x256x128xf32> to vector<256x128xf32>
    %cst_205 = arith.constant dense<0.000000e+00> : vector<4x128xf32>
    %247 = tpu.matmul %244, %246, %cst_205 {dimension_numbers = #tpu.dot_dimension_numbers<[1], [0], [0], [1], [0, 0, 1, 1], [], []>} : vector<4x256xf32>, vector<256x128xf32>, vector<4x128xf32> -> vector<4x128xf32>
    %248 = arith.addf %241, %247 : vector<4x128xf32>
    %c1_206 = arith.constant 1 : index
    %c0_207 = arith.constant 0 : index
    %c0_208 = arith.constant 0 : index
    %249 = vector.load %arg15[%c1_206, %c0_207, %c0_208] : memref<3x4x8xf32, #tpu.memory_space<vmem>>, vector<1x4x8xf32>
    %250 = vector.shape_cast %249 : vector<1x4x8xf32> to vector<4x8xf32>
    %cst_209 = arith.constant dense<0.000000e+00> : vector<4x256xf32>
    %251 = tpu.matmul %250, %215, %cst_209 {dimension_numbers = #tpu.dot_dimension_numbers<[1], [0], [0], [1], [0, 0, 1, 1], [], []>} : vector<4x8xf32>, vector<8x256xf32>, vector<4x256xf32> -> vector<4x256xf32>
    %c1_210 = arith.constant 1 : index
    %c0_211 = arith.constant 0 : index
    %c0_212 = arith.constant 0 : index
    %252 = vector.load %arg16[%c1_210, %c0_211, %c0_212] : memref<3x256x128xf32, #tpu.memory_space<vmem>>, vector<1x256x128xf32>
    %253 = vector.shape_cast %252 : vector<1x256x128xf32> to vector<256x128xf32>
    %cst_213 = arith.constant dense<0.000000e+00> : vector<4x128xf32>
    %254 = tpu.matmul %251, %253, %cst_213 {dimension_numbers = #tpu.dot_dimension_numbers<[1], [0], [0], [1], [0, 0, 1, 1], [], []>} : vector<4x256xf32>, vector<256x128xf32>, vector<4x128xf32> -> vector<4x128xf32>
    %255 = arith.addf %248, %254 : vector<4x128xf32>
    %c2_214 = arith.constant 2 : index
    %c0_215 = arith.constant 0 : index
    %c0_216 = arith.constant 0 : index
    %256 = vector.load %arg15[%c2_214, %c0_215, %c0_216] : memref<3x4x8xf32, #tpu.memory_space<vmem>>, vector<1x4x8xf32>
    %257 = vector.shape_cast %256 : vector<1x4x8xf32> to vector<4x8xf32>
    %cst_217 = arith.constant dense<0.000000e+00> : vector<4x256xf32>
    %258 = tpu.matmul %257, %215, %cst_217 {dimension_numbers = #tpu.dot_dimension_numbers<[1], [0], [0], [1], [0, 0, 1, 1], [], []>} : vector<4x8xf32>, vector<8x256xf32>, vector<4x256xf32> -> vector<4x256xf32>
    %c2_218 = arith.constant 2 : index
    %c0_219 = arith.constant 0 : index
    %c0_220 = arith.constant 0 : index
    %259 = vector.load %arg16[%c2_218, %c0_219, %c0_220] : memref<3x256x128xf32, #tpu.memory_space<vmem>>, vector<1x256x128xf32>
    %260 = vector.shape_cast %259 : vector<1x256x128xf32> to vector<256x128xf32>
    %cst_221 = arith.constant dense<0.000000e+00> : vector<4x128xf32>
    %261 = tpu.matmul %258, %260, %cst_221 {dimension_numbers = #tpu.dot_dimension_numbers<[1], [0], [0], [1], [0, 0, 1, 1], [], []>} : vector<4x256xf32>, vector<256x128xf32>, vector<4x128xf32> -> vector<4x128xf32>
    %262 = arith.addf %255, %261 : vector<4x128xf32>
    %c0_222 = arith.constant 0 : index
    %c0_223 = arith.constant 0 : index
    %263 = vector.load %arg17[%c0_222, %c0_223] : memref<1x128xf32, #tpu.memory_space<vmem>>, vector<1x128xf32>
    %264 = vector.broadcast %263 : vector<1x128xf32> to vector<4x128xf32>
    %265 = arith.addf %262, %264 : vector<4x128xf32>
    %cst_224 = arith.constant dense<0.000000e+00> : vector<128xf32>
    %266 = vector.multi_reduction <add>, %240, %cst_224 [0] : vector<4x128xf32> to vector<128xf32>
    %267 = vector.shape_cast %266 : vector<128xf32> to vector<1x128xf32>
    %cst_225 = arith.constant dense<0.000000e+00> : vector<128xf32>
    %268 = vector.multi_reduction <add>, %265, %cst_225 [0] : vector<4x128xf32> to vector<128xf32>
    %269 = vector.shape_cast %268 : vector<128xf32> to vector<1x128xf32>
    %270 = arith.addf %267, %269 : vector<1x128xf32>
    %c0_226 = arith.constant 0 : index
    %c0_227 = arith.constant 0 : index
    %271 = vector.load %arg18[%c0_226, %c0_227] : memref<128x32xf32, #tpu.memory_space<vmem>>, vector<128x32xf32>
    %cst_228 = arith.constant dense<0.000000e+00> : vector<1x32xf32>
    %272 = tpu.matmul %270, %271, %cst_228 {dimension_numbers = #tpu.dot_dimension_numbers<[1], [0], [0], [1], [0, 0, 1, 1], [], []>} : vector<1x128xf32>, vector<128x32xf32>, vector<1x32xf32> -> vector<1x32xf32>
    %cst_229 = arith.constant 3.125000e-02 : f32
    %273 = vector.broadcast %cst_229 : f32 to vector<1x32xf32>
    %274 = arith.mulf %272, %273 : vector<1x32xf32>
    %c0_230 = arith.constant 0 : index
    %c0_231 = arith.constant 0 : index
    %275 = vector.load %arg19[%c0_230, %c0_231] : memref<32x128xf32, #tpu.memory_space<vmem>>, vector<32x128xf32>
    %cst_232 = arith.constant dense<0.000000e+00> : vector<1x128xf32>
    %276 = tpu.matmul %274, %275, %cst_232 {dimension_numbers = #tpu.dot_dimension_numbers<[1], [0], [0], [1], [0, 0, 1, 1], [], []>} : vector<1x32xf32>, vector<32x128xf32>, vector<1x128xf32> -> vector<1x128xf32>
    %277 = vector.broadcast %276 : vector<1x128xf32> to vector<4x128xf32>
    %278 = arith.subf %240, %277 : vector<4x128xf32>
    %279 = arith.mulf %278, %278 : vector<4x128xf32>
    %cst_233 = arith.constant dense<0.000000e+00> : vector<128xf32>
    %280 = vector.multi_reduction <add>, %279, %cst_233 [0] : vector<4x128xf32> to vector<128xf32>
    %281 = vector.shape_cast %280 : vector<128xf32> to vector<1x128xf32>
    %282 = vector.broadcast %276 : vector<1x128xf32> to vector<4x128xf32>
    %283 = arith.subf %265, %282 : vector<4x128xf32>
    %284 = arith.mulf %283, %283 : vector<4x128xf32>
    %cst_234 = arith.constant dense<0.000000e+00> : vector<128xf32>
    %285 = vector.multi_reduction <add>, %284, %cst_234 [0] : vector<4x128xf32> to vector<128xf32>
    %286 = vector.shape_cast %285 : vector<128xf32> to vector<1x128xf32>
    %287 = arith.addf %281, %286 : vector<1x128xf32>
    %c0_235 = arith.constant 0 : index
    %c0_236 = arith.constant 0 : index
    %288 = vector.load %arg18[%c0_235, %c0_236] : memref<128x32xf32, #tpu.memory_space<vmem>>, vector<128x32xf32>
    %cst_237 = arith.constant dense<0.000000e+00> : vector<1x32xf32>
    %289 = tpu.matmul %287, %288, %cst_237 {dimension_numbers = #tpu.dot_dimension_numbers<[1], [0], [0], [1], [0, 0, 1, 1], [], []>} : vector<1x128xf32>, vector<128x32xf32>, vector<1x32xf32> -> vector<1x32xf32>
    %cst_238 = arith.constant 3.125000e-02 : f32
    %290 = vector.broadcast %cst_238 : f32 to vector<1x32xf32>
    %291 = arith.mulf %289, %290 : vector<1x32xf32>
    %c0_239 = arith.constant 0 : index
    %c0_240 = arith.constant 0 : index
    %292 = vector.load %arg20[%c0_239, %c0_240] : memref<1x32xf32, #tpu.memory_space<vmem>>, vector<1x32xf32>
    %cst_241 = arith.constant 9.99999974E-6 : f32
    %293 = vector.broadcast %cst_241 : f32 to vector<1x32xf32>
    %294 = arith.addf %291, %293 : vector<1x32xf32>
    %295 = math.rsqrt %294 : vector<1x32xf32>
    %296 = arith.mulf %292, %295 : vector<1x32xf32>
    %c0_242 = arith.constant 0 : index
    %c0_243 = arith.constant 0 : index
    %297 = vector.load %arg21[%c0_242, %c0_243] : memref<1x32xf32, #tpu.memory_space<vmem>>, vector<1x32xf32>
    %298 = arith.mulf %274, %296 : vector<1x32xf32>
    %299 = arith.subf %297, %298 : vector<1x32xf32>
    %c0_244 = arith.constant 0 : index
    %c0_245 = arith.constant 0 : index
    %300 = vector.load %arg19[%c0_244, %c0_245] : memref<32x128xf32, #tpu.memory_space<vmem>>, vector<32x128xf32>
    %cst_246 = arith.constant dense<0.000000e+00> : vector<1x128xf32>
    %301 = tpu.matmul %296, %300, %cst_246 {dimension_numbers = #tpu.dot_dimension_numbers<[1], [0], [0], [1], [0, 0, 1, 1], [], []>} : vector<1x32xf32>, vector<32x128xf32>, vector<1x128xf32> -> vector<1x128xf32>
    %c0_247 = arith.constant 0 : index
    %c0_248 = arith.constant 0 : index
    %302 = vector.load %arg19[%c0_247, %c0_248] : memref<32x128xf32, #tpu.memory_space<vmem>>, vector<32x128xf32>
    %cst_249 = arith.constant dense<0.000000e+00> : vector<1x128xf32>
    %303 = tpu.matmul %299, %302, %cst_249 {dimension_numbers = #tpu.dot_dimension_numbers<[1], [0], [0], [1], [0, 0, 1, 1], [], []>} : vector<1x32xf32>, vector<32x128xf32>, vector<1x128xf32> -> vector<1x128xf32>
    %304 = vector.broadcast %301 : vector<1x128xf32> to vector<4x128xf32>
    %305 = arith.mulf %240, %304 : vector<4x128xf32>
    %306 = vector.broadcast %303 : vector<1x128xf32> to vector<4x128xf32>
    %307 = arith.addf %305, %306 : vector<4x128xf32>
    %cst_250 = arith.constant 0.000000e+00 : f32
    %308 = vector.broadcast %cst_250 : f32 to vector<4x128xf32>
    %309 = arith.cmpf oge, %307, %308 : vector<4x128xf32>
    %cst_251 = arith.constant 0.00999999977 : f32
    %310 = vector.broadcast %cst_251 : f32 to vector<4x128xf32>
    %311 = arith.mulf %310, %307 : vector<4x128xf32>
    %312 = arith.select %309, %307, %311 : vector<4x128xi1>, vector<4x128xf32>
    %313 = vector.broadcast %301 : vector<1x128xf32> to vector<4x128xf32>
    %314 = arith.mulf %265, %313 : vector<4x128xf32>
    %315 = vector.broadcast %303 : vector<1x128xf32> to vector<4x128xf32>
    %316 = arith.addf %314, %315 : vector<4x128xf32>
    %cst_252 = arith.constant 0.000000e+00 : f32
    %317 = vector.broadcast %cst_252 : f32 to vector<4x128xf32>
    %318 = arith.cmpf oge, %316, %317 : vector<4x128xf32>
    %cst_253 = arith.constant 0.00999999977 : f32
    %319 = vector.broadcast %cst_253 : f32 to vector<4x128xf32>
    %320 = arith.mulf %319, %316 : vector<4x128xf32>
    %321 = arith.select %318, %316, %320 : vector<4x128xi1>, vector<4x128xf32>
    %322 = vector.extract_strided_slice %312 {offsets = [0, 0], sizes = [1, 128], strides = [1, 1]} : vector<4x128xf32> to vector<1x128xf32>
    %c0_254 = arith.constant 0 : index
    %c0_255 = arith.constant 0 : index
    %c0_256 = arith.constant 0 : index
    %323 = vector.load %arg22[%c0_254, %c0_255, %c0_256] : memref<4x128x512xf32, #tpu.memory_space<vmem>>, vector<1x128x512xf32>
    %324 = vector.shape_cast %323 : vector<1x128x512xf32> to vector<128x512xf32>
    %cst_257 = arith.constant dense<0.000000e+00> : vector<1x512xf32>
    %325 = tpu.matmul %322, %324, %cst_257 {dimension_numbers = #tpu.dot_dimension_numbers<[1], [0], [0], [1], [0, 0, 1, 1], [], []>} : vector<1x128xf32>, vector<128x512xf32>, vector<1x512xf32> -> vector<1x512xf32>
    %326 = vector.extract_strided_slice %312 {offsets = [1, 0], sizes = [1, 128], strides = [1, 1]} : vector<4x128xf32> to vector<1x128xf32>
    %c1_258 = arith.constant 1 : index
    %c0_259 = arith.constant 0 : index
    %c0_260 = arith.constant 0 : index
    %327 = vector.load %arg22[%c1_258, %c0_259, %c0_260] : memref<4x128x512xf32, #tpu.memory_space<vmem>>, vector<1x128x512xf32>
    %328 = vector.shape_cast %327 : vector<1x128x512xf32> to vector<128x512xf32>
    %cst_261 = arith.constant dense<0.000000e+00> : vector<1x512xf32>
    %329 = tpu.matmul %326, %328, %cst_261 {dimension_numbers = #tpu.dot_dimension_numbers<[1], [0], [0], [1], [0, 0, 1, 1], [], []>} : vector<1x128xf32>, vector<128x512xf32>, vector<1x512xf32> -> vector<1x512xf32>
    %330 = arith.addf %325, %329 : vector<1x512xf32>
    %331 = vector.extract_strided_slice %312 {offsets = [2, 0], sizes = [1, 128], strides = [1, 1]} : vector<4x128xf32> to vector<1x128xf32>
    %c2_262 = arith.constant 2 : index
    %c0_263 = arith.constant 0 : index
    %c0_264 = arith.constant 0 : index
    %332 = vector.load %arg22[%c2_262, %c0_263, %c0_264] : memref<4x128x512xf32, #tpu.memory_space<vmem>>, vector<1x128x512xf32>
    %333 = vector.shape_cast %332 : vector<1x128x512xf32> to vector<128x512xf32>
    %cst_265 = arith.constant dense<0.000000e+00> : vector<1x512xf32>
    %334 = tpu.matmul %331, %333, %cst_265 {dimension_numbers = #tpu.dot_dimension_numbers<[1], [0], [0], [1], [0, 0, 1, 1], [], []>} : vector<1x128xf32>, vector<128x512xf32>, vector<1x512xf32> -> vector<1x512xf32>
    %335 = arith.addf %330, %334 : vector<1x512xf32>
    %336 = vector.extract_strided_slice %312 {offsets = [3, 0], sizes = [1, 128], strides = [1, 1]} : vector<4x128xf32> to vector<1x128xf32>
    %c3 = arith.constant 3 : index
    %c0_266 = arith.constant 0 : index
    %c0_267 = arith.constant 0 : index
    %337 = vector.load %arg22[%c3, %c0_266, %c0_267] : memref<4x128x512xf32, #tpu.memory_space<vmem>>, vector<1x128x512xf32>
    %338 = vector.shape_cast %337 : vector<1x128x512xf32> to vector<128x512xf32>
    %cst_268 = arith.constant dense<0.000000e+00> : vector<1x512xf32>
    %339 = tpu.matmul %336, %338, %cst_268 {dimension_numbers = #tpu.dot_dimension_numbers<[1], [0], [0], [1], [0, 0, 1, 1], [], []>} : vector<1x128xf32>, vector<128x512xf32>, vector<1x512xf32> -> vector<1x512xf32>
    %340 = arith.addf %335, %339 : vector<1x512xf32>
    %c0_269 = arith.constant 0 : index
    %c0_270 = arith.constant 0 : index
    %341 = vector.load %arg33[%c0_269, %c0_270] : memref<2x512xf32, #tpu.memory_space<vmem>>, vector<1x512xf32>
    tpu.vector_store %arg33[%c0_269, %c0_270], %340 {strides = array<i32>} : memref<2x512xf32, #tpu.memory_space<vmem>>, vector<1x512xf32>,
    %342 = vector.extract_strided_slice %321 {offsets = [0, 0], sizes = [1, 128], strides = [1, 1]} : vector<4x128xf32> to vector<1x128xf32>
    %c0_271 = arith.constant 0 : index
    %c0_272 = arith.constant 0 : index
    %c0_273 = arith.constant 0 : index
    %343 = vector.load %arg22[%c0_271, %c0_272, %c0_273] : memref<4x128x512xf32, #tpu.memory_space<vmem>>, vector<1x128x512xf32>
    %344 = vector.shape_cast %343 : vector<1x128x512xf32> to vector<128x512xf32>
    %cst_274 = arith.constant dense<0.000000e+00> : vector<1x512xf32>
    %345 = tpu.matmul %342, %344, %cst_274 {dimension_numbers = #tpu.dot_dimension_numbers<[1], [0], [0], [1], [0, 0, 1, 1], [], []>} : vector<1x128xf32>, vector<128x512xf32>, vector<1x512xf32> -> vector<1x512xf32>
    %346 = vector.extract_strided_slice %321 {offsets = [1, 0], sizes = [1, 128], strides = [1, 1]} : vector<4x128xf32> to vector<1x128xf32>
    %c1_275 = arith.constant 1 : index
    %c0_276 = arith.constant 0 : index
    %c0_277 = arith.constant 0 : index
    %347 = vector.load %arg22[%c1_275, %c0_276, %c0_277] : memref<4x128x512xf32, #tpu.memory_space<vmem>>, vector<1x128x512xf32>
    %348 = vector.shape_cast %347 : vector<1x128x512xf32> to vector<128x512xf32>
    %cst_278 = arith.constant dense<0.000000e+00> : vector<1x512xf32>
    %349 = tpu.matmul %346, %348, %cst_278 {dimension_numbers = #tpu.dot_dimension_numbers<[1], [0], [0], [1], [0, 0, 1, 1], [], []>} : vector<1x128xf32>, vector<128x512xf32>, vector<1x512xf32> -> vector<1x512xf32>
    %350 = arith.addf %345, %349 : vector<1x512xf32>
    %351 = vector.extract_strided_slice %321 {offsets = [2, 0], sizes = [1, 128], strides = [1, 1]} : vector<4x128xf32> to vector<1x128xf32>
    %c2_279 = arith.constant 2 : index
    %c0_280 = arith.constant 0 : index
    %c0_281 = arith.constant 0 : index
    %352 = vector.load %arg22[%c2_279, %c0_280, %c0_281] : memref<4x128x512xf32, #tpu.memory_space<vmem>>, vector<1x128x512xf32>
    %353 = vector.shape_cast %352 : vector<1x128x512xf32> to vector<128x512xf32>
    %cst_282 = arith.constant dense<0.000000e+00> : vector<1x512xf32>
    %354 = tpu.matmul %351, %353, %cst_282 {dimension_numbers = #tpu.dot_dimension_numbers<[1], [0], [0], [1], [0, 0, 1, 1], [], []>} : vector<1x128xf32>, vector<128x512xf32>, vector<1x512xf32> -> vector<1x512xf32>
    %355 = arith.addf %350, %354 : vector<1x512xf32>
    %356 = vector.extract_strided_slice %321 {offsets = [3, 0], sizes = [1, 128], strides = [1, 1]} : vector<4x128xf32> to vector<1x128xf32>
    %c3_283 = arith.constant 3 : index
    %c0_284 = arith.constant 0 : index
    %c0_285 = arith.constant 0 : index
    %357 = vector.load %arg22[%c3_283, %c0_284, %c0_285] : memref<4x128x512xf32, #tpu.memory_space<vmem>>, vector<1x128x512xf32>
    %358 = vector.shape_cast %357 : vector<1x128x512xf32> to vector<128x512xf32>
    %cst_286 = arith.constant dense<0.000000e+00> : vector<1x512xf32>
    %359 = tpu.matmul %356, %358, %cst_286 {dimension_numbers = #tpu.dot_dimension_numbers<[1], [0], [0], [1], [0, 0, 1, 1], [], []>} : vector<1x128xf32>, vector<128x512xf32>, vector<1x512xf32> -> vector<1x512xf32>
    %360 = arith.addf %355, %359 : vector<1x512xf32>
    %c1_287 = arith.constant 1 : index
    %c0_288 = arith.constant 0 : index
    %361 = vector.load %arg33[%c1_287, %c0_288] : memref<2x512xf32, #tpu.memory_space<vmem>>, vector<1x512xf32>
    tpu.vector_store %arg33[%c1_287, %c0_288], %360 {strides = array<i32>} : memref<2x512xf32, #tpu.memory_space<vmem>>, vector<1x512xf32>,
    %c0_289 = arith.constant 0 : index
    %c0_290 = arith.constant 0 : index
    %362 = vector.load %arg33[%c0_289, %c0_290] : memref<2x512xf32, #tpu.memory_space<vmem>>, vector<2x512xf32>
    %c0_291 = arith.constant 0 : index
    %c0_292 = arith.constant 0 : index
    %363 = vector.load %arg23[%c0_291, %c0_292] : memref<512x256xf32, #tpu.memory_space<vmem>>, vector<512x256xf32>
    %cst_293 = arith.constant dense<0.000000e+00> : vector<2x256xf32>
    %364 = tpu.matmul %362, %363, %cst_293 {dimension_numbers = #tpu.dot_dimension_numbers<[1], [0], [0], [1], [0, 0, 1, 1], [], []>} : vector<2x512xf32>, vector<512x256xf32>, vector<2x256xf32> -> vector<2x256xf32>
    %c0_294 = arith.constant 0 : index
    %c0_295 = arith.constant 0 : index
    %365 = vector.load %arg24[%c0_294, %c0_295] : memref<1x256xf32, #tpu.memory_space<vmem>>, vector<1x256xf32>
    %366 = vector.broadcast %365 : vector<1x256xf32> to vector<2x256xf32>
    %367 = arith.addf %364, %366 : vector<2x256xf32>
    %cst_296 = arith.constant dense<0.000000e+00> : vector<256xf32>
    %368 = vector.multi_reduction <add>, %367, %cst_296 [0] : vector<2x256xf32> to vector<256xf32>
    %369 = vector.shape_cast %368 : vector<256xf32> to vector<1x256xf32>
    %cst_297 = arith.constant 2.000000e+00 : f32
    %370 = vector.broadcast %cst_297 : f32 to vector<1x256xf32>
    %371 = arith.divf %369, %370 : vector<1x256xf32>
    %372 = vector.broadcast %371 : vector<1x256xf32> to vector<2x256xf32>
    %373 = arith.subf %367, %372 : vector<2x256xf32>
    %374 = arith.mulf %373, %373 : vector<2x256xf32>
    %cst_298 = arith.constant dense<0.000000e+00> : vector<256xf32>
    %375 = vector.multi_reduction <add>, %374, %cst_298 [0] : vector<2x256xf32> to vector<256xf32>
    %376 = vector.shape_cast %375 : vector<256xf32> to vector<1x256xf32>
    %cst_299 = arith.constant 2.000000e+00 : f32
    %377 = vector.broadcast %cst_299 : f32 to vector<1x256xf32>
    %378 = arith.divf %376, %377 : vector<1x256xf32>
    %379 = vector.broadcast %371 : vector<1x256xf32> to vector<2x256xf32>
    %380 = arith.subf %367, %379 : vector<2x256xf32>
    %cst_300 = arith.constant 9.99999974E-6 : f32
    %381 = vector.broadcast %cst_300 : f32 to vector<1x256xf32>
    %382 = arith.addf %378, %381 : vector<1x256xf32>
    %383 = math.rsqrt %382 : vector<1x256xf32>
    %384 = vector.broadcast %383 : vector<1x256xf32> to vector<2x256xf32>
    %385 = arith.mulf %380, %384 : vector<2x256xf32>
    %c0_301 = arith.constant 0 : index
    %c0_302 = arith.constant 0 : index
    %386 = vector.load %arg25[%c0_301, %c0_302] : memref<1x256xf32, #tpu.memory_space<vmem>>, vector<1x256xf32>
    %387 = vector.broadcast %386 : vector<1x256xf32> to vector<2x256xf32>
    %388 = arith.mulf %385, %387 : vector<2x256xf32>
    %c0_303 = arith.constant 0 : index
    %c0_304 = arith.constant 0 : index
    %389 = vector.load %arg26[%c0_303, %c0_304] : memref<1x256xf32, #tpu.memory_space<vmem>>, vector<1x256xf32>
    %390 = vector.broadcast %389 : vector<1x256xf32> to vector<2x256xf32>
    %391 = arith.addf %388, %390 : vector<2x256xf32>
    %cst_305 = arith.constant 0.000000e+00 : f32
    %392 = vector.broadcast %cst_305 : f32 to vector<2x256xf32>
    %393 = arith.cmpf oge, %391, %392 : vector<2x256xf32>
    %cst_306 = arith.constant 0.00999999977 : f32
    %394 = vector.broadcast %cst_306 : f32 to vector<2x256xf32>
    %395 = arith.mulf %394, %391 : vector<2x256xf32>
    %396 = arith.select %393, %391, %395 : vector<2x256xi1>, vector<2x256xf32>
    %c0_307 = arith.constant 0 : index
    %c0_308 = arith.constant 0 : index
    %397 = vector.load %arg27[%c0_307, %c0_308] : memref<256x128xf32, #tpu.memory_space<vmem>>, vector<256x128xf32>
    %cst_309 = arith.constant dense<0.000000e+00> : vector<2x128xf32>
    %398 = tpu.matmul %396, %397, %cst_309 {dimension_numbers = #tpu.dot_dimension_numbers<[1], [0], [0], [1], [0, 0, 1, 1], [], []>} : vector<2x256xf32>, vector<256x128xf32>, vector<2x128xf32> -> vector<2x128xf32>
    %c0_310 = arith.constant 0 : index
    %c0_311 = arith.constant 0 : index
    %399 = vector.load %arg28[%c0_310, %c0_311] : memref<1x128xf32, #tpu.memory_space<vmem>>, vector<1x128xf32>
    %400 = vector.broadcast %399 : vector<1x128xf32> to vector<2x128xf32>
    %401 = arith.addf %398, %400 : vector<2x128xf32>
    %cst_312 = arith.constant dense<0.000000e+00> : vector<128xf32>
    %402 = vector.multi_reduction <add>, %401, %cst_312 [0] : vector<2x128xf32> to vector<128xf32>
    %403 = vector.shape_cast %402 : vector<128xf32> to vector<1x128xf32>
    %cst_313 = arith.constant 2.000000e+00 : f32
    %404 = vector.broadcast %cst_313 : f32 to vector<1x128xf32>
    %405 = arith.divf %403, %404 : vector<1x128xf32>
    %406 = vector.broadcast %405 : vector<1x128xf32> to vector<2x128xf32>
    %407 = arith.subf %401, %406 : vector<2x128xf32>
    %408 = arith.mulf %407, %407 : vector<2x128xf32>
    %cst_314 = arith.constant dense<0.000000e+00> : vector<128xf32>
    %409 = vector.multi_reduction <add>, %408, %cst_314 [0] : vector<2x128xf32> to vector<128xf32>
    %410 = vector.shape_cast %409 : vector<128xf32> to vector<1x128xf32>
    %cst_315 = arith.constant 2.000000e+00 : f32
    %411 = vector.broadcast %cst_315 : f32 to vector<1x128xf32>
    %412 = arith.divf %410, %411 : vector<1x128xf32>
    %413 = vector.broadcast %405 : vector<1x128xf32> to vector<2x128xf32>
    %414 = arith.subf %401, %413 : vector<2x128xf32>
    %cst_316 = arith.constant 9.99999974E-6 : f32
    %415 = vector.broadcast %cst_316 : f32 to vector<1x128xf32>
    %416 = arith.addf %412, %415 : vector<1x128xf32>
    %417 = math.rsqrt %416 : vector<1x128xf32>
    %418 = vector.broadcast %417 : vector<1x128xf32> to vector<2x128xf32>
    %419 = arith.mulf %414, %418 : vector<2x128xf32>
    %c0_317 = arith.constant 0 : index
    %c0_318 = arith.constant 0 : index
    %420 = vector.load %arg29[%c0_317, %c0_318] : memref<1x128xf32, #tpu.memory_space<vmem>>, vector<1x128xf32>
    %421 = vector.broadcast %420 : vector<1x128xf32> to vector<2x128xf32>
    %422 = arith.mulf %419, %421 : vector<2x128xf32>
    %c0_319 = arith.constant 0 : index
    %c0_320 = arith.constant 0 : index
    %423 = vector.load %arg30[%c0_319, %c0_320] : memref<1x128xf32, #tpu.memory_space<vmem>>, vector<1x128xf32>
    %424 = vector.broadcast %423 : vector<1x128xf32> to vector<2x128xf32>
    %425 = arith.addf %422, %424 : vector<2x128xf32>
    %cst_321 = arith.constant 0.000000e+00 : f32
    %426 = vector.broadcast %cst_321 : f32 to vector<2x128xf32>
    %427 = arith.cmpf oge, %425, %426 : vector<2x128xf32>
    %cst_322 = arith.constant 0.00999999977 : f32
    %428 = vector.broadcast %cst_322 : f32 to vector<2x128xf32>
    %429 = arith.mulf %428, %425 : vector<2x128xf32>
    %430 = arith.select %427, %425, %429 : vector<2x128xi1>, vector<2x128xf32>
    %c0_323 = arith.constant 0 : index
    %c0_324 = arith.constant 0 : index
    %431 = vector.load %arg31[%c0_323, %c0_324] : memref<128x128xf32, #tpu.memory_space<vmem>>, vector<128x128xf32>
    %cst_325 = arith.constant dense<0.000000e+00> : vector<2x128xf32>
    %432 = tpu.matmul %430, %431, %cst_325 {dimension_numbers = #tpu.dot_dimension_numbers<[1], [0], [0], [1], [0, 0, 1, 1], [], []>} : vector<2x128xf32>, vector<128x128xf32>, vector<2x128xf32> -> vector<2x128xf32>
    %c0_326 = arith.constant 0 : index
    %c0_327 = arith.constant 0 : index
    %433 = vector.load %arg32[%c0_326, %c0_327] : memref<1x128xf32, #tpu.memory_space<vmem>>, vector<1x128xf32>
    %434 = vector.broadcast %433 : vector<1x128xf32> to vector<2x128xf32>
    %435 = arith.addf %432, %434 : vector<2x128xf32>
    %c0_328 = arith.constant 0 : index
    %c0_329 = arith.constant 0 : index
    %436 = vector.load %arg34[%c0_328, %c0_329] : memref<2x128xf32, #tpu.memory_space<vmem>>, vector<2x128xf32>
    tpu.vector_store %arg34[%c0_328, %c0_329], %435 {strides = array<i32>} : memref<2x128xf32, #tpu.memory_space<vmem>>, vector<2x128xf32>,
    return
  }
}

</mosaic_0001>

<bundles_post_ra>
// kernel: encoder_forward.1
= control target key start
LH: loop header
LB: loop body
LE: loop exit
PB: predicated region body
PF: predicated region fallthrough
CT: control target
= control target key end

     0   :  { %s13579_s6 = smov 1   ;;  %s13580_s10 = smov 2   ;;  %s15987_s0 = inlined_call_operand.smem [shape: u32[35], index: -1, kind: input, shape index: {}] }
   0x1   :  { %s13666_s5 = sld [smem:[%s15987_s0]]   ;;  %s13581_s14 = smov 3  }
   0x2   :  { %s13671_s9 = sld [smem:[%s15987_s0 + %s13579_s6]]   ;;  %s13582_s18 = smov 4  }
   0x3   :  { %s13676_s13 = sld [smem:[%s15987_s0 + %s13580_s10]]   ;;  %s13583_s22 = smov 5  }
   0x4   :  { %s13681_s17 = sld [smem:[%s15987_s0 + %s13581_s14]]   ;;  %s13584_s26 = smov 6  }
   0x5   :  { %s13686_s21 = sld [smem:[%s15987_s0 + %s13582_s18]]   ;;  %s13585_s30 = smov 7  }
   0x6   :  { %s13691_s25 = sld [smem:[%s15987_s0 + %s13583_s22]]   ;;  %s13586_s4 = smov 8  }
   0x7   :  { %16020 = sst [smem:[#allocation70_spill]] %s13666_s5  ;;  %s13587_s10 = smov 9  }
   0x8   :  { %s13696_s29 = sld [smem:[%s15987_s0 + %s13584_s26]]   ;;  %s13588_s15 = smov 10  }
   0x9   :  { %16021 = sst [smem:[#allocation71_spill]] %s13676_s13  ;;  %s13589_s20 = smov 11  }
   0xa   :  { %s13701_s3 = sld [smem:[%s15987_s0 + %s13585_s30]]   ;;  %s13590_s26 = smov 12  }
   0xb   :  { %16022 = sst [smem:[#allocation72_spill]] %s13686_s21  ;;  %s13591_s1 = smov 13  }
   0xc   :  { %16023 = sst [smem:[#allocation73_spill]] %s13691_s25  ;;  %s13592_s7 = smov 14  }
   0xd   :  { %s13706_s8 = sld [smem:[%s15987_s0 + %s13586_s4]]   ;;  %s13594_s22 = smov 16  }
   0xe   :  { %s13711_s14 = sld [smem:[%s15987_s0 + %s13587_s10]]   ;;  %s13595_s28 = smov 17  }
   0xf   :  { %s13716_s19 = sld [smem:[%s15987_s0 + %s13588_s15]]   ;;  %s13593_s15 = smov 15  }
  0x10   :  { %16024 = sst [smem:[#allocation74_spill]] %s13701_s3 }
  0x11   :  { %s13721_s24 = sld [smem:[%s15987_s0 + %s13589_s20]]  }
  0x12   :  { %s13726_s30 = sld [smem:[%s15987_s0 + %s13590_s26]]  }
  0x13   :  { %s13731_s6 = sld [smem:[%s15987_s0 + %s13591_s1]]  }
  0x14   :  { %16025 = sst [smem:[#allocation75_spill]] %s13711_s14 }
  0x15   :  { %s13736_s12 = sld [smem:[%s15987_s0 + %s13592_s7]]   ;;  %s13596_s7 = smov 18  }
  0x16   :  { %s13741_s20 = sld [smem:[%s15987_s0 + %s13593_s15]]   ;;  %s13597_s15 = smov 19  }
  0x17   :  { %16026 = sst [smem:[#allocation76_spill]] %s13721_s24 }
  0x18   :  { %16027 = sst [smem:[#allocation77_spill]] %s13726_s30 }
  0x19   :  { %s13746_s27 = sld [smem:[%s15987_s0 + %s13594_s22]]   ;;  %s13598_s22 = smov 20  }
  0x1a   :  { %s13751_s4 = sld [smem:[%s15987_s0 + %s13595_s28]]   ;;  %s13599_s28 = smov 21  }
  0x1b   :  { %16028 = sst [smem:[#allocation78_spill]] %s13736_s12 }
  0x1c   :  { %s13756_s24 = sld [smem:[%s15987_s0 + %s13596_s7]]   ;;  %s13600_s7 = smov 22  }
  0x1d   :  { %s13761_s21 = sld [smem:[%s15987_s0 + %s13597_s15]]   ;;  %s13601_s15 = smov 23  }
  0x1e   :  { %s13771_s12 = sld [smem:[%s15987_s0 + %s13599_s28]]   ;;  %s13603_s28 = smov 25  }
  0x1f   :  { %16029 = sst [smem:[#allocation79_spill]] %s13746_s27 }
  0x20   :  { %s13766_s27 = sld [smem:[%s15987_s0 + %s13598_s22]]   ;;  %s13602_s22 = smov 24  }
  0x21   :  { %s13786_s30 = sld [smem:[%s15987_s0 + %s13602_s22]]   ;;  %s13606_s22 = smov 28  }
  0x22   :  { %16030 = sst [smem:[#allocation80_spill]] %s13756_s24 }
  0x23   :  { %16031 = sst [smem:[#allocation81_spill]] %s13761_s21 }
  0x24   :  { %16032 = sst [smem:[#allocation82_spill]] %s13771_s12 }
  0x25   :  { %s13776_s24 = sld [smem:[%s15987_s0 + %s13600_s7]]   ;;  %s13604_s7 = smov 26  }
  0x26   :  { %s13781_s21 = sld [smem:[%s15987_s0 + %s13601_s15]]   ;;  %s13605_s15 = smov 27  }
  0x27   :  { %s13791_s12 = sld [smem:[%s15987_s0 + %s13603_s28]]   ;;  %s13607_s28 = smov 29  }
  0x28   :  { %s13796_s14 = sld [smem:[%s15987_s0 + %s13604_s7]]   ;;  %s13608_s7 = smov 30  }
  0x29   :  { %s13806_s3 = sld [smem:[%s15987_s0 + %s13606_s22]]   ;;  %s13610_s22 = smov 32  }
  0x2a   :  { %s13816_s25 = sld [smem:[%s15987_s0 + %s13608_s7]]   ;;  %s13612_s7 = smov 34  }
  0x2b   :  { %s13826_s13 = sld [smem:[%s15987_s0 + %s13610_s22]]  }
  0x2c   :  { %16033 = sst [smem:[#allocation83_spill]] %s13781_s21 }
  0x2d   :  { %16034 = sst [smem:[#allocation84_spill]] %s13791_s12 }
  0x2e   :  { %s13801_s21 = sld [smem:[%s15987_s0 + %s13605_s15]]   ;;  %s13609_s15 = smov 31  }
  0x2f   :  { %s13811_s12 = sld [smem:[%s15987_s0 + %s13607_s28]]   ;;  %s13611_s28 = smov 33  }
  0x30   :  { %s13836_s5 = sld [smem:[%s15987_s0 + %s13612_s7]]  }
  0x34   :  { %16035 = sst [smem:[#allocation85_spill]] %s13801_s21 }
  0x35   :  { %16036 = sst [smem:[#allocation86_spill]] %s13811_s12 }
  0x36   :  { %s13821_s21 = sld [smem:[%s15987_s0 + %s13609_s15]]  }
  0x37   :  { %s13831_s12 = sld [smem:[%s15987_s0 + %s13611_s28]]  }
  0x38   :  { %75 = vsyncpa [#allocation3], 0 }
  0x39   :  { %76 = vsyncpa [#allocation6], 0 }
  0x3a   :  { %77 = vsyncpa [#allocation9], 0 }
  0x3b   :  { %78 = vsyncpa [#allocation12], 0 }
  0x3c   :  { %79 = vsyncpa [#allocation15], 0 }
  0x3d   :  { %80 = vsyncpa [#allocation18], 0 }
  0x3e   :  { %81 = vsyncpa [#allocation21], 0 }
  0x3f   :  { %82 = vsyncpa [#allocation24], 0 }
  0x40   :  { %83 = vsyncpa [#allocation27], 0 }
  0x41   :  { %84 = vsyncpa [#allocation30], 0 }
  0x42   :  { %85 = vsyncpa [#allocation33], 0 }
  0x43   :  { %86 = vsyncpa [#allocation36], 0 }
  0x44   :  { %87 = vsyncpa [#allocation39], 0 }
  0x45   :  { %88 = vsyncpa [#allocation42], 0 }
  0x46   :  { %89 = vsyncpa [#allocation45], 0 }
  0x47   :  { %90 = vsyncpa [#allocation48], 0 }
  0x48   :  { %91 = vsyncpa [#allocation4], 0 }
  0x49   :  { %92 = vsyncpa [#allocation51], 0  ;;  %s13613_s0 = smov [#allocation5]   ;;  %s13614_s16 = smov [#allocation8]  }
  0x4a   :  { %s110_s15 = sshll.u32 %s13613_s0, 4  ;;  %s135_s18 = sshll.u32 %s13614_s16, 4  ;;  %s111_s15 = int_to_ptr.vmem [resolvable:$true] %s110_s15  ;;  %s136_s18 = int_to_ptr.vmem [resolvable:$true] %s135_s18 }
  0x4b   :  { %s12839_s22 = scalar_lea.hbm %s13671_s9, 768 }
  0x4c   :  { %p12840_p0 = scmp.ne.s32.totalorder %s13671_s9, %s12839_s22  ;;  %p12843_p1 = scmp.lt.u32.totalorder %s12839_s22, %s13671_s9 }
  0x4e   :  { %p12845_p2 = pnand %p12843_p1, %p12840_p0 }
  0x50   :  { %12848 = shalt.err (!%p12845_p2)
}
  0x51   :  { %s12849_s23 = scalar_lea.vmem %s111_s15, 768  ;;  %p12854_p4 = scmp.lt.s32.totalorder %s111_s15, %s111_s15 }
  0x52   :  { %p12850_p3 = scmp.ne.s32.totalorder %s111_s15, %s12849_s23  ;;  %p12855_p5 = scmp.lt.s32.totalorder %s12849_s23, %s12849_s23 }
  0x54   :  { %p12856_p6 = por %p12855_p5, %p12854_p4 }
  0x56   :  { %p12857_p7 = pnand %p12856_p6, %p12850_p3 }
  0x58   :  { %12860 = shalt.err (!%p12857_p7)
}
  0x59   :  { %s13615_s26 = smov 128   ;;  %s13616_s28 = smov 8  }
  0x5a   :  { %116 = dma.hbm_to_vmem [thread:$0]  %s13671_s9, 768, %s111_s15, [#allocation6], %s13615_s26, %s13615_s26, %s13616_s28  }
  0x5b   :  { %s12861_s1 = scalar_lea.hbm %s13681_s17, 64 }
  0x5c   :  { %p12862_p8 = scmp.ne.s32.totalorder %s13681_s17, %s12861_s1  ;;  %p12865_p9 = scmp.lt.u32.totalorder %s12861_s1, %s13681_s17 }
  0x5e   :  { %p12867_p10 = pnand %p12865_p9, %p12862_p8 }
  0x60   :  { %12870 = shalt.err (!%p12867_p10)
}
  0x61   :  { %s12871_s2 = scalar_lea.vmem %s136_s18, 64  ;;  %p12876_p12 = scmp.lt.s32.totalorder %s136_s18, %s136_s18 }
  0x62   :  { %p12872_p11 = scmp.ne.s32.totalorder %s136_s18, %s12871_s2  ;;  %p12877_p13 = scmp.lt.s32.totalorder %s12871_s2, %s12871_s2 }
  0x64   :  { %p12878_p0 = por %p12877_p13, %p12876_p12 }
  0x66   :  { %p12879_p1 = pnand %p12878_p0, %p12872_p11 }
  0x68   :  { %12882 = shalt.err (!%p12879_p1)
}
  0x69   :  { %138 = dma.hbm_to_vmem [thread:$0]  %s13681_s17, 64, %s136_s18, [#allocation9]  }
  0x6a   :  { %s13617_s7 = smov [#allocation11]   ;;  %s13618_s9 = smov [#allocation14]  }
  0x6b   :  { %s159_s10 = sshll.u32 %s13617_s7, 4  ;;  %s178_s11 = sshll.u32 %s13618_s9, 4  ;;  %s160_s10 = int_to_ptr.vmem [resolvable:$true] %s159_s10  ;;  %s13849_s11 = int_to_ptr.vmem [resolvable:$true] %s178_s11 }
  0x6c   :  { %s12883_s0 = scalar_lea.hbm %s13696_s29, 16 }
  0x6d   :  { %p12884_p2 = scmp.ne.s32.totalorder %s13696_s29, %s12883_s0  ;;  %p12887_p3 = scmp.lt.u32.totalorder %s12883_s0, %s13696_s29 }
  0x6f   :  { %p12889_p4 = pnand %p12887_p3, %p12884_p2 }
  0x71   :  { %12892 = shalt.err (!%p12889_p4)
}
  0x72   :  { %s12893_s15 = scalar_lea.vmem %s160_s10, 16  ;;  %s12897_s16 = scalar_lea.vmem %s160_s10, 32 }
  0x73   :  { %p12894_p5 = scmp.ne.s32.totalorder %s160_s10, %s12893_s15  ;;  %p12898_p6 = scmp.lt.s32.totalorder %s160_s10, %s160_s10 }
  0x74   :  { %p12899_p7 = scmp.lt.s32.totalorder %s12897_s16, %s12893_s15 }
  0x76   :  { %p12900_p8 = por %p12899_p7, %p12898_p6 }
  0x78   :  { %p12901_p9 = pnand %p12900_p8, %p12894_p5 }
  0x7a   :  { %12904 = shalt.err (!%p12901_p9)
}
  0x7b   :  { %162 = dma.hbm_to_vmem [thread:$0]  %s13696_s29, 16, %s160_s10, [#allocation12]  }
  0x7c   :  { %s12905_s17 = scalar_lea.hbm %s13706_s8, 384 }
  0x7d   :  { %p12906_p10 = scmp.ne.s32.totalorder %s13706_s8, %s12905_s17  ;;  %p12909_p11 = scmp.lt.u32.totalorder %s12905_s17, %s13706_s8 }
  0x7f   :  { %p12911_p12 = pnand %p12909_p11, %p12906_p10 }
  0x81   :  { %12914 = shalt.err (!%p12911_p12)
}
  0x82   :  { %s12915_s18 = scalar_lea.vmem %s13849_s11, 384  ;;  %p12920_p0 = scmp.lt.s32.totalorder %s13849_s11, %s13849_s11 }
  0x83   :  { %p12916_p13 = scmp.ne.s32.totalorder %s13849_s11, %s12915_s18  ;;  %p12921_p1 = scmp.lt.s32.totalorder %s12915_s18, %s12915_s18 }
  0x85   :  { %p12922_p2 = por %p12921_p1, %p12920_p0 }
  0x87   :  { %p12923_p3 = pnand %p12922_p2, %p12916_p13 }
  0x89   :  { %12926 = shalt.err (!%p12923_p3)
}
  0x8a   :  { %184 = dma.hbm_to_vmem [thread:$0]  %s13706_s8, 384, %s13849_s11, [#allocation15], %s13615_s26, %s13615_s26, %s13616_s28  }
  0x8b   :  { %s13619_s29 = smov [#allocation17]   ;;  %s13620_s23 = smov [#allocation20]  }
  0x8c   :  { %s203_s22 = sshll.u32 %s13619_s29, 4  ;;  %s227_s1 = sshll.u32 %s13620_s23, 4  ;;  %s204_s22 = int_to_ptr.vmem [resolvable:$true] %s203_s22  ;;  %s228_s1 = int_to_ptr.vmem [resolvable:$true] %s227_s1 }
  0x8d   :  { %s12927_s2 = scalar_lea.hbm %s13716_s19, 32 }
  0x8e   :  { %p12928_p4 = scmp.ne.s32.totalorder %s13716_s19, %s12927_s2  ;;  %p12931_p5 = scmp.lt.u32.totalorder %s12927_s2, %s13716_s19 }
  0x90   :  { %p12933_p6 = pnand %p12931_p5, %p12928_p4 }
  0x92   :  { %12936 = shalt.err (!%p12933_p6)
}
  0x93   :  { %s12937_s7 = scalar_lea.vmem %s204_s22, 32  ;;  %p12942_p8 = scmp.lt.s32.totalorder %s204_s22, %s204_s22 }
  0x94   :  { %p12938_p7 = scmp.ne.s32.totalorder %s204_s22, %s12937_s7  ;;  %p12943_p9 = scmp.lt.s32.totalorder %s12937_s7, %s12937_s7 }
  0x96   :  { %p12944_p10 = por %p12943_p9, %p12942_p8 }
  0x98   :  { %p12945_p11 = pnand %p12944_p10, %p12938_p7 }
  0x9a   :  { %12948 = shalt.err (!%p12945_p11)
}
  0x9b   :  { %206 = dma.hbm_to_vmem [thread:$0]  %s13716_s19, 32, %s204_s22, [#allocation18]  }
  0x9c   :  { %s12949_s8 = scalar_lea.hbm %s13731_s6, 16 }
  0x9d   :  { %p12950_p12 = scmp.ne.s32.totalorder %s13731_s6, %s12949_s8  ;;  %p12953_p13 = scmp.lt.u32.totalorder %s12949_s8, %s13731_s6 }
  0x9f   :  { %p12955_p0 = pnand %p12953_p13, %p12950_p12 }
  0xa1   :  { %12958 = shalt.err (!%p12955_p0)
}
  0xa2   :  { %s12959_s10 = scalar_lea.vmem %s228_s1, 16  ;;  %s12963_s9 = scalar_lea.vmem %s228_s1, 32 }
  0xa3   :  { %p12960_p1 = scmp.ne.s32.totalorder %s228_s1, %s12959_s10  ;;  %p12964_p2 = scmp.lt.s32.totalorder %s228_s1, %s228_s1 }
  0xa4   :  { %p12965_p3 = scmp.lt.s32.totalorder %s12963_s9, %s12959_s10 }
  0xa6   :  { %p12966_p4 = por %p12965_p3, %p12964_p2 }
  0xa8   :  { %p12967_p5 = pnand %p12966_p4, %p12960_p1 }
  0xaa   :  { %12970 = shalt.err (!%p12967_p5)
}
  0xab   :  { %230 = dma.hbm_to_vmem [thread:$0]  %s13731_s6, 16, %s228_s1, [#allocation21]  }
  0xac   :  { %s13621_s11 = smov [#allocation23]   ;;  %s12971_s0 = scalar_lea.hbm %s13741_s20, 192 }
  0xad   :  { %s246_s19 = sshll.u32 %s13621_s11, 4  ;;  %p12972_p6 = scmp.ne.s32.totalorder %s13741_s20, %s12971_s0  ;;  %s247_s19 = int_to_ptr.vmem [resolvable:$true] %s246_s19 }
  0xae   :  { %p12975_p7 = scmp.lt.u32.totalorder %s12971_s0, %s13741_s20 }
  0xb0   :  { %p12977_p8 = pnand %p12975_p7, %p12972_p6 }
  0xb2   :  { %12980 = shalt.err (!%p12977_p8)
}
  0xb3   :  { %s12981_s15 = scalar_lea.vmem %s247_s19, 192  ;;  %p12986_p10 = scmp.lt.s32.totalorder %s247_s19, %s247_s19 }
  0xb4   :  { %p12982_p9 = scmp.ne.s32.totalorder %s247_s19, %s12981_s15  ;;  %p12987_p11 = scmp.lt.s32.totalorder %s12981_s15, %s12981_s15 }
  0xb6   :  { %p12988_p12 = por %p12987_p11, %p12986_p10 }
  0xb8   :  { %p12989_p13 = pnand %p12988_p12, %p12982_p9 }
  0xba   :  { %12992 = shalt.err (!%p12989_p13)
}
  0xbb   :  { %s13622_s16 = smov 64   ;;  %s13623_s6 = smov 4  }
  0xbc   :  { %252 = dma.hbm_to_vmem [thread:$0]  %s13741_s20, 192, %s247_s19, [#allocation24], %s13622_s16, %s13622_s16, %s13623_s6  }
  0xbd   :  { %s13624_s17 = smov [#allocation26]   ;;  %s13625_s29 = smov [#allocation29]  }
  0xbe   :  { %s271_s18 = sshll.u32 %s13624_s17, 4  ;;  %s295_s22 = sshll.u32 %s13625_s29, 4  ;;  %s272_s18 = int_to_ptr.vmem [resolvable:$true] %s271_s18  ;;  %s296_s22 = int_to_ptr.vmem [resolvable:$true] %s295_s22 }
  0xbf   :  { %s12993_s23 = scalar_lea.hbm %s13751_s4, 16 }
  0xc0   :  { %p12994_p0 = scmp.ne.s32.totalorder %s13751_s4, %s12993_s23  ;;  %p12997_p1 = scmp.lt.u32.totalorder %s12993_s23, %s13751_s4 }
  0xc2   :  { %p12999_p2 = pnand %p12997_p1, %p12994_p0 }
  0xc4   :  { %13002 = shalt.err (!%p12999_p2)
}
  0xc5   :  { %s13003_s1 = scalar_lea.vmem %s272_s18, 16  ;;  %s13007_s2 = scalar_lea.vmem %s272_s18, 32 }
  0xc6   :  { %p13004_p3 = scmp.ne.s32.totalorder %s272_s18, %s13003_s1  ;;  %p13008_p4 = scmp.lt.s32.totalorder %s272_s18, %s272_s18 }
  0xc7   :  { %p13009_p5 = scmp.lt.s32.totalorder %s13007_s2, %s13003_s1 }
  0xc9   :  { %p13010_p6 = por %p13009_p5, %p13008_p4 }
  0xcb   :  { %p13011_p7 = pnand %p13010_p6, %p13004_p3 }
  0xcd   :  { %13014 = shalt.err (!%p13011_p7)
}
  0xce   :  { %274 = dma.hbm_to_vmem [thread:$0]  %s13751_s4, 16, %s272_s18, [#allocation27]  }
  0xcf   :  { %s13015_s20 = scalar_lea.hbm %s13766_s27, 16 }
  0xd0   :  { %p13016_p8 = scmp.ne.s32.totalorder %s13766_s27, %s13015_s20  ;;  %p13019_p9 = scmp.lt.u32.totalorder %s13015_s20, %s13766_s27 }
  0xd2   :  { %p13021_p10 = pnand %p13019_p9, %p13016_p8 }
  0xd4   :  { %13024 = shalt.err (!%p13021_p10)
}
  0xd5   :  { %s13025_s7 = scalar_lea.vmem %s296_s22, 16  ;;  %s13029_s8 = scalar_lea.vmem %s296_s22, 32 }
  0xd6   :  { %p13026_p11 = scmp.ne.s32.totalorder %s296_s22, %s13025_s7  ;;  %p13030_p12 = scmp.lt.s32.totalorder %s296_s22, %s296_s22 }
  0xd7   :  { %p13031_p13 = scmp.lt.s32.totalorder %s13029_s8, %s13025_s7 }
  0xd9   :  { %p13032_p0 = por %p13031_p13, %p13030_p12 }
  0xdb   :  { %p13033_p1 = pnand %p13032_p0, %p13026_p11 }
  0xdd   :  { %13036 = shalt.err (!%p13033_p1)
}
  0xde   :  { %298 = dma.hbm_to_vmem [thread:$0]  %s13766_s27, 16, %s296_s22, [#allocation30]  }
  0xdf   :  { %s13626_s4 = smov [#allocation32]   ;;  %s13627_s9 = smov [#allocation35]  }
  0xe0   :  { %s314_s10 = sshll.u32 %s13626_s4, 4  ;;  %s339_s11 = sshll.u32 %s13627_s9, 4  ;;  %s315_s10 = int_to_ptr.vmem [resolvable:$true] %s314_s10  ;;  %s340_s11 = int_to_ptr.vmem [resolvable:$true] %s339_s11 }
  0xe1   :  { %s13037_s19 = scalar_lea.hbm %s13776_s24, 32768 }
  0xe2   :  { %p13038_p2 = scmp.ne.s32.totalorder %s13776_s24, %s13037_s19  ;;  %p13041_p3 = scmp.lt.u32.totalorder %s13037_s19, %s13776_s24 }
  0xe4   :  { %p13043_p4 = pnand %p13041_p3, %p13038_p2 }
  0xe6   :  { %13046 = shalt.err (!%p13043_p4)
}
  0xe7   :  { %s13047_s0 = scalar_lea.vmem %s315_s10, 32768  ;;  %p13052_p6 = scmp.lt.s32.totalorder %s315_s10, %s315_s10 }
  0xe8   :  { %p13048_p5 = scmp.ne.s32.totalorder %s315_s10, %s13047_s0  ;;  %p13053_p7 = scmp.lt.s32.totalorder %s13047_s0, %s13047_s0 }
  0xea   :  { %p13054_p8 = por %p13053_p7, %p13052_p6 }
  0xec   :  { %p13055_p9 = pnand %p13054_p8, %p13048_p5 }
  0xee   :  { %13058 = shalt.err (!%p13055_p9)
}
  0xef   :  { %s13628_s15 = smov 512   ;;  %s13629_s27 = smov 32  }
  0xf0   :  { %320 = dma.hbm_to_vmem [thread:$0]  %s13776_s24, 32768, %s315_s10, [#allocation33], %s13628_s15, %s13628_s15, %s13629_s27  }
  0xf1   :  { %s13059_s16 = scalar_lea.hbm %s13786_s30, 32 }
  0xf2   :  { %p13060_p10 = scmp.ne.s32.totalorder %s13786_s30, %s13059_s16  ;;  %p13063_p11 = scmp.lt.u32.totalorder %s13059_s16, %s13786_s30 }
  0xf4   :  { %p13065_p12 = pnand %p13063_p11, %p13060_p10 }
  0xf6   :  { %13068 = shalt.err (!%p13065_p12)
}
  0xf7   :  { %s13069_s6 = scalar_lea.vmem %s340_s11, 32  ;;  %p13074_p0 = scmp.lt.s32.totalorder %s340_s11, %s340_s11 }
  0xf8   :  { %p13070_p13 = scmp.ne.s32.totalorder %s340_s11, %s13069_s6  ;;  %p13075_p1 = scmp.lt.s32.totalorder %s13069_s6, %s13069_s6 }
  0xfa   :  { %p13076_p2 = por %p13075_p1, %p13074_p0 }
  0xfc   :  { %p13077_p3 = pnand %p13076_p2, %p13070_p13 }
  0xfe   :  { %13080 = shalt.err (!%p13077_p3)
}
  0xff   :  { %342 = dma.hbm_to_vmem [thread:$0]  %s13786_s30, 32, %s340_s11, [#allocation36]  }
 0x100   :  { %s13630_s17 = smov [#allocation38]   ;;  %s13631_s18 = smov [#allocation41]  }
 0x101   :  { %s359_s24 = sshll.u32 %s13630_s17, 4  ;;  %s381_s29 = sshll.u32 %s13631_s18, 4  ;;  %s360_s24 = int_to_ptr.vmem [resolvable:$true] %s359_s24  ;;  %s382_s29 = int_to_ptr.vmem [resolvable:$true] %s381_s29 }
 0x102   :  { %s13081_s22 = scalar_lea.hbm %s13796_s14, 32 }
 0x103   :  { %p13082_p4 = scmp.ne.s32.totalorder %s13796_s14, %s13081_s22  ;;  %p13085_p5 = scmp.lt.u32.totalorder %s13081_s22, %s13796_s14 }
 0x105   :  { %p13087_p6 = pnand %p13085_p5, %p13082_p4 }
 0x107   :  { %13090 = shalt.err (!%p13087_p6)
}
 0x108   :  { %s13091_s23 = scalar_lea.vmem %s360_s24, 32  ;;  %p13096_p8 = scmp.lt.s32.totalorder %s360_s24, %s360_s24 }
 0x109   :  { %p13092_p7 = scmp.ne.s32.totalorder %s360_s24, %s13091_s23  ;;  %p13097_p9 = scmp.lt.s32.totalorder %s13091_s23, %s13091_s23 }
 0x10b   :  { %p13098_p10 = por %p13097_p9, %p13096_p8 }
 0x10d   :  { %p13099_p11 = pnand %p13098_p10, %p13092_p7 }
 0x10f   :  { %13102 = shalt.err (!%p13099_p11)
}
 0x110   :  { %362 = dma.hbm_to_vmem [thread:$0]  %s13796_s14, 32, %s360_s24, [#allocation39]  }
 0x111   :  { %s13103_s30 = scalar_lea.hbm %s13806_s3, 16 }
 0x112   :  { %p13104_p12 = scmp.ne.s32.totalorder %s13806_s3, %s13103_s30  ;;  %p13107_p13 = scmp.lt.u32.totalorder %s13103_s30, %s13806_s3 }
 0x114   :  { %p13109_p0 = pnand %p13107_p13, %p13104_p12 }
 0x116   :  { %13112 = shalt.err (!%p13109_p0)
}
 0x117   :  { %s13113_s1 = scalar_lea.vmem %s382_s29, 16  ;;  %s13117_s2 = scalar_lea.vmem %s382_s29, 32 }
 0x118   :  { %p13114_p1 = scmp.ne.s32.totalorder %s382_s29, %s13113_s1  ;;  %p13118_p2 = scmp.lt.s32.totalorder %s382_s29, %s382_s29 }
 0x119   :  { %p13119_p3 = scmp.lt.s32.totalorder %s13117_s2, %s13113_s1 }
 0x11b   :  { %p13120_p4 = por %p13119_p3, %p13118_p2 }
 0x11d   :  { %p13121_p5 = pnand %p13120_p4, %p13114_p1 }
 0x11f   :  { %13124 = shalt.err (!%p13121_p5)
}
 0x120   :  { %384 = dma.hbm_to_vmem [thread:$0]  %s13806_s3, 16, %s382_s29, [#allocation42]  }
 0x121   :  { %s13632_s14 = smov [#allocation44]   ;;  %s13633_s7 = smov [#allocation2]  }
 0x122   :  { %s401_s20 = sshll.u32 %s13632_s14, 4  ;;  %s98_s8 = sshll.u32 %s13633_s7, 4  ;;  %s402_s20 = int_to_ptr.vmem [resolvable:$true] %s401_s20  ;;  %s99_s8 = int_to_ptr.vmem [resolvable:$true] %s98_s8 }
 0x123   :  { %s13125_s4 = scalar_lea.hbm %s13816_s25, 16 }
 0x124   :  { %p13126_p6 = scmp.ne.s32.totalorder %s13816_s25, %s13125_s4  ;;  %p13129_p7 = scmp.lt.u32.totalorder %s13125_s4, %s13816_s25 }
 0x126   :  { %p13131_p8 = pnand %p13129_p7, %p13126_p6 }
 0x128   :  { %13134 = shalt.err (!%p13131_p8)
}
 0x129   :  { %s13135_s10 = scalar_lea.vmem %s402_s20, 16  ;;  %s13139_s9 = scalar_lea.vmem %s402_s20, 32 }
 0x12a   :  { %p13136_p9 = scmp.ne.s32.totalorder %s402_s20, %s13135_s10  ;;  %p13140_p10 = scmp.lt.s32.totalorder %s402_s20, %s402_s20 }
 0x12b   :  { %p13141_p11 = scmp.lt.s32.totalorder %s13139_s9, %s13135_s10 }
 0x12d   :  { %p13142_p12 = por %p13141_p11, %p13140_p10 }
 0x12f   :  { %p13143_p13 = pnand %p13142_p12, %p13136_p9 }
 0x131   :  { %13146 = shalt.err (!%p13143_p13)
}
 0x132   :  { %s16037_s3 = sld [smem:[#allocation70_spill]] }
 0x133   :  { %404 = dma.hbm_to_vmem [thread:$0]  %s13816_s25, 16, %s402_s20, [#allocation45]  }
 0x138   :  { %s13147_s11 = scalar_lea.hbm %s16037_s3, 1024 }
 0x139   :  { %p13148_p0 = scmp.ne.s32.totalorder %s16037_s3, %s13147_s11  ;;  %p13151_p1 = scmp.lt.u32.totalorder %s13147_s11, %s16037_s3 }
 0x13b   :  { %p13153_p2 = pnand %p13151_p1, %p13148_p0 }
 0x13d   :  { %13156 = shalt.err (!%p13153_p2)
}
 0x13e   :  { %s13157_s19 = scalar_lea.vmem %s99_s8, 1024  ;;  %p13162_p4 = scmp.lt.s32.totalorder %s99_s8, %s99_s8 }
 0x13f   :  { %p13158_p3 = scmp.ne.s32.totalorder %s99_s8, %s13157_s19  ;;  %p13163_p5 = scmp.lt.s32.totalorder %s13157_s19, %s13157_s19 }
 0x141   :  { %p13164_p6 = por %p13163_p5, %p13162_p4 }
 0x143   :  { %p13165_p7 = pnand %p13164_p6, %p13158_p3 }
 0x145   :  { %13168 = shalt.err (!%p13165_p7)
}
 0x146   :  { %s16038_s0 = sld [smem:[#allocation71_spill]]  ;;  %s13634_s25 = smov [#allocation7]  }
 0x147   :  { %104 = dma.hbm_to_vmem [thread:$0]  %s16037_s3, 1024, %s99_s8, [#allocation3], %s13615_s26, %s13615_s26, %s13616_s28  }
 0x148   :  { %s122_s16 = sshll.u32 %s13634_s25, 4  ;;  %s13635_s6 = smov [#allocation10]   ;;  %s123_s16 = int_to_ptr.vmem [resolvable:$true] %s122_s16 }
 0x149   :  { %s146_s17 = sshll.u32 %s13635_s6, 4  ;;  %s147_s17 = int_to_ptr.vmem [resolvable:$true] %s146_s17 }
 0x14c   :  { %s13169_s24 = scalar_lea.hbm %s16038_s0, 6144 }
 0x14d   :  { %p13170_p8 = scmp.ne.s32.totalorder %s16038_s0, %s13169_s24  ;;  %p13173_p9 = scmp.lt.u32.totalorder %s13169_s24, %s16038_s0 }
 0x14f   :  { %p13175_p10 = pnand %p13173_p9, %p13170_p8 }
 0x151   :  { %13178 = shalt.err (!%p13175_p10)
}
 0x152   :  { %s13179_s18 = scalar_lea.vmem %s123_s16, 6144  ;;  %p13184_p12 = scmp.lt.s32.totalorder %s123_s16, %s123_s16 }
 0x153   :  { %p13180_p11 = scmp.ne.s32.totalorder %s123_s16, %s13179_s18  ;;  %p13185_p13 = scmp.lt.s32.totalorder %s13179_s18, %s13179_s18 }
 0x155   :  { %p13186_p0 = por %p13185_p13, %p13184_p12 }
 0x157   :  { %p13187_p1 = pnand %p13186_p0, %p13180_p11 }
 0x159   :  { %13190 = shalt.err (!%p13187_p1)
}
 0x15a   :  { %s16039_s29 = sld [smem:[#allocation73_spill]] }
 0x15b   :  { %128 = dma.hbm_to_vmem [thread:$0]  %s16038_s0, 6144, %s123_s16, [#allocation6], %s13628_s15, %s13628_s15, %s13629_s27  }
 0x160   :  { %s13191_s22 = scalar_lea.hbm %s16039_s29, 2048 }
 0x161   :  { %p13192_p2 = scmp.ne.s32.totalorder %s16039_s29, %s13191_s22  ;;  %p13195_p3 = scmp.lt.u32.totalorder %s13191_s22, %s16039_s29 }
 0x163   :  { %p13197_p4 = pnand %p13195_p3, %p13192_p2 }
 0x165   :  { %13200 = shalt.err (!%p13197_p4)
}
 0x166   :  { %s13201_s23 = scalar_lea.vmem %s147_s17, 2048  ;;  %p13206_p6 = scmp.lt.s32.totalorder %s147_s17, %s147_s17 }
 0x167   :  { %p13202_p5 = scmp.ne.s32.totalorder %s147_s17, %s13201_s23  ;;  %p13207_p7 = scmp.lt.s32.totalorder %s13201_s23, %s13201_s23 }
 0x169   :  { %p13208_p8 = por %p13207_p7, %p13206_p6 }
 0x16b   :  { %p13209_p9 = pnand %p13208_p8, %p13202_p5 }
 0x16d   :  { %13212 = shalt.err (!%p13209_p9)
}
 0x16e   :  { %s16040_s30 = sld [smem:[#allocation74_spill]]  ;;  %s13636_s1 = smov [#allocation13]  }
 0x16f   :  { %152 = dma.hbm_to_vmem [thread:$0]  %s16039_s29, 2048, %s147_s17, [#allocation9], %s13628_s15, %s13628_s15, %s13629_s27  }
 0x170   :  { %s169_s2 = sshll.u32 %s13636_s1, 4  ;;  %s13637_s14 = smov [#allocation16]   ;;  %s170_s2 = int_to_ptr.vmem [resolvable:$true] %s169_s2 }
 0x171   :  { %s190_s20 = sshll.u32 %s13637_s14, 4  ;;  %s191_s20 = int_to_ptr.vmem [resolvable:$true] %s190_s20 }
 0x174   :  { %s13213_s7 = scalar_lea.hbm %s16040_s30, 16 }
 0x175   :  { %p13214_p10 = scmp.ne.s32.totalorder %s16040_s30, %s13213_s7  ;;  %p13217_p11 = scmp.lt.u32.totalorder %s13213_s7, %s16040_s30 }
 0x177   :  { %p13219_p12 = pnand %p13217_p11, %p13214_p10 }
 0x179   :  { %13222 = shalt.err (!%p13219_p12)
}
 0x17a   :  { %s13223_s8 = scalar_lea.vmem %s170_s2, 16  ;;  %s13227_s4 = scalar_lea.vmem %s170_s2, 32 }
 0x17b   :  { %p13224_p13 = scmp.ne.s32.totalorder %s170_s2, %s13223_s8  ;;  %p13228_p0 = scmp.lt.s32.totalorder %s170_s2, %s170_s2 }
 0x17c   :  { %p13229_p1 = scmp.lt.s32.totalorder %s13227_s4, %s13223_s8 }
 0x17e   :  { %p13230_p2 = por %p13229_p1, %p13228_p0 }
 0x180   :  { %p13231_p3 = pnand %p13230_p2, %p13224_p13 }
 0x182   :  { %13234 = shalt.err (!%p13231_p3)
}
 0x183   :  { %s16041_s15 = sld [smem:[#allocation75_spill]] }
 0x184   :  { %172 = dma.hbm_to_vmem [thread:$0]  %s16040_s30, 16, %s170_s2, [#allocation12]  }
 0x189   :  { %s13235_s27 = scalar_lea.hbm %s16041_s15, 49152 }
 0x18a   :  { %p13236_p4 = scmp.ne.s32.totalorder %s16041_s15, %s13235_s27  ;;  %p13239_p5 = scmp.lt.u32.totalorder %s13235_s27, %s16041_s15 }
 0x18c   :  { %p13241_p6 = pnand %p13239_p5, %p13236_p4 }
 0x18e   :  { %13244 = shalt.err (!%p13241_p6)
}
 0x18f   :  { %s13245_s10 = scalar_lea.vmem %s191_s20, 49152  ;;  %p13250_p8 = scmp.lt.s32.totalorder %s191_s20, %s191_s20 }
 0x190   :  { %p13246_p7 = scmp.ne.s32.totalorder %s191_s20, %s13245_s10  ;;  %p13251_p9 = scmp.lt.s32.totalorder %s13245_s10, %s13245_s10 }
 0x192   :  { %p13252_p10 = por %p13251_p9, %p13250_p8 }
 0x194   :  { %p13253_p11 = pnand %p13252_p10, %p13246_p7 }
 0x196   :  { %13256 = shalt.err (!%p13253_p11)
}
 0x197   :  { %s13638_s9 = smov 256   ;;  %s16042_s3 = sld [smem:[#allocation77_spill]] }
 0x198   :  { %s13639_s11 = smov 16   ;;  %s13640_s19 = smov [#allocation19]  }
 0x199   :  { %196 = dma.hbm_to_vmem [thread:$0]  %s16041_s15, 49152, %s191_s20, [#allocation15], %s13638_s9, %s13638_s9, %s13639_s11  }
 0x19a   :  { %s214_s0 = sshll.u32 %s13640_s19, 4  ;;  %s13641_s25 = smov [#allocation22]   ;;  %s215_s0 = int_to_ptr.vmem [resolvable:$true] %s214_s0 }
 0x19b   :  { %s237_s16 = sshll.u32 %s13641_s25, 4  ;;  %s238_s16 = int_to_ptr.vmem [resolvable:$true] %s237_s16 }
 0x19d   :  { %s13257_s6 = scalar_lea.hbm %s16042_s3, 1024 }
 0x19e   :  { %p13258_p12 = scmp.ne.s32.totalorder %s16042_s3, %s13257_s6  ;;  %p13261_p13 = scmp.lt.u32.totalorder %s13257_s6, %s16042_s3 }
 0x1a0   :  { %p13263_p0 = pnand %p13261_p13, %p13258_p12 }
 0x1a2   :  { %13266 = shalt.err (!%p13263_p0)
}
 0x1a3   :  { %s13267_s17 = scalar_lea.vmem %s215_s0, 1024  ;;  %p13272_p2 = scmp.lt.s32.totalorder %s215_s0, %s215_s0 }
 0x1a4   :  { %p13268_p1 = scmp.ne.s32.totalorder %s215_s0, %s13267_s17  ;;  %p13273_p3 = scmp.lt.s32.totalorder %s13267_s17, %s13267_s17 }
 0x1a6   :  { %p13274_p4 = por %p13273_p3, %p13272_p2 }
 0x1a8   :  { %p13275_p5 = pnand %p13274_p4, %p13268_p1 }
 0x1aa   :  { %13278 = shalt.err (!%p13275_p5)
}
 0x1ab   :  { %s16043_s24 = sld [smem:[#allocation78_spill]] }
 0x1ac   :  { %220 = dma.hbm_to_vmem [thread:$0]  %s16042_s3, 1024, %s215_s0, [#allocation18], %s13638_s9, %s13638_s9, %s13639_s11  }
 0x1b1   :  { %s13279_s18 = scalar_lea.hbm %s16043_s24, 16 }
 0x1b2   :  { %p13280_p6 = scmp.ne.s32.totalorder %s16043_s24, %s13279_s18  ;;  %p13283_p7 = scmp.lt.u32.totalorder %s13279_s18, %s16043_s24 }
 0x1b4   :  { %p13285_p8 = pnand %p13283_p7, %p13280_p6 }
 0x1b6   :  { %13288 = shalt.err (!%p13285_p8)
}
 0x1b7   :  { %s13289_s29 = scalar_lea.vmem %s238_s16, 16  ;;  %s13293_s22 = scalar_lea.vmem %s238_s16, 32 }
 0x1b8   :  { %p13290_p9 = scmp.ne.s32.totalorder %s238_s16, %s13289_s29  ;;  %p13294_p10 = scmp.lt.s32.totalorder %s238_s16, %s238_s16 }
 0x1b9   :  { %p13295_p11 = scmp.lt.s32.totalorder %s13293_s22, %s13289_s29 }
 0x1bb   :  { %p13296_p12 = por %p13295_p11, %p13294_p10 }
 0x1bd   :  { %p13297_p13 = pnand %p13296_p12, %p13290_p9 }
 0x1bf   :  { %13300 = shalt.err (!%p13297_p13)
}
 0x1c0   :  { %s16044_s23 = sld [smem:[#allocation79_spill]]  ;;  %s13642_s30 = smov [#allocation25]  }
 0x1c1   :  { %240 = dma.hbm_to_vmem [thread:$0]  %s16043_s24, 16, %s238_s16, [#allocation21]  }
 0x1c2   :  { %s258_s1 = sshll.u32 %s13642_s30, 4  ;;  %s13643_s2 = smov [#allocation28]   ;;  %s259_s1 = int_to_ptr.vmem [resolvable:$true] %s258_s1 }
 0x1c3   :  { %s282_s14 = sshll.u32 %s13643_s2, 4  ;;  %s283_s14 = int_to_ptr.vmem [resolvable:$true] %s282_s14 }
 0x1c6   :  { %s13301_s20 = scalar_lea.hbm %s16044_s23, 12288 }
 0x1c7   :  { %p13302_p0 = scmp.ne.s32.totalorder %s16044_s23, %s13301_s20  ;;  %p13305_p1 = scmp.lt.u32.totalorder %s13301_s20, %s16044_s23 }
 0x1c9   :  { %p13307_p2 = pnand %p13305_p1, %p13302_p0 }
 0x1cb   :  { %13310 = shalt.err (!%p13307_p2)
}
 0x1cc   :  { %s13311_s7 = scalar_lea.vmem %s259_s1, 12288  ;;  %p13316_p4 = scmp.lt.s32.totalorder %s259_s1, %s259_s1 }
 0x1cd   :  { %p13312_p3 = scmp.ne.s32.totalorder %s259_s1, %s13311_s7  ;;  %p13317_p5 = scmp.lt.s32.totalorder %s13311_s7, %s13311_s7 }
 0x1cf   :  { %p13318_p6 = por %p13317_p5, %p13316_p4 }
 0x1d1   :  { %p13319_p7 = pnand %p13318_p6, %p13312_p3 }
 0x1d3   :  { %13322 = shalt.err (!%p13319_p7)
}
 0x1d4   :  { %s16045_s8 = sld [smem:[#allocation81_spill]] }
 0x1d5   :  { %264 = dma.hbm_to_vmem [thread:$0]  %s16044_s23, 12288, %s259_s1, [#allocation24], %s13615_s26, %s13615_s26, %s13616_s28  }
 0x1da   :  { %s13323_s4 = scalar_lea.hbm %s16045_s8, 512 }
 0x1db   :  { %p13324_p8 = scmp.ne.s32.totalorder %s16045_s8, %s13323_s4  ;;  %p13327_p9 = scmp.lt.u32.totalorder %s13323_s4, %s16045_s8 }
 0x1dd   :  { %p13329_p10 = pnand %p13327_p9, %p13324_p8 }
 0x1df   :  { %13332 = shalt.err (!%p13329_p10)
}
 0x1e0   :  { %s13333_s15 = scalar_lea.vmem %s283_s14, 512  ;;  %p13338_p12 = scmp.lt.s32.totalorder %s283_s14, %s283_s14 }
 0x1e1   :  { %p13334_p11 = scmp.ne.s32.totalorder %s283_s14, %s13333_s15  ;;  %p13339_p13 = scmp.lt.s32.totalorder %s13333_s15, %s13333_s15 }
 0x1e3   :  { %p13340_p0 = por %p13339_p13, %p13338_p12 }
 0x1e5   :  { %p13341_p1 = pnand %p13340_p0, %p13334_p11 }
 0x1e7   :  { %13344 = shalt.err (!%p13341_p1)
}
 0x1e8   :  { %s16046_s27 = sld [smem:[#allocation82_spill]]  ;;  %s13644_s10 = smov [#allocation31]  }
 0x1e9   :  { %288 = dma.hbm_to_vmem [thread:$0]  %s16045_s8, 512, %s283_s14, [#allocation27], %s13615_s26, %s13615_s26, %s13616_s28  }
 0x1ea   :  { %s305_s3 = sshll.u32 %s13644_s10, 4  ;;  %s13645_s19 = smov [#allocation34]   ;;  %s306_s3 = int_to_ptr.vmem [resolvable:$true] %s305_s3 }
 0x1eb   :  { %s326_s0 = sshll.u32 %s13645_s19, 4  ;;  %s327_s0 = int_to_ptr.vmem [resolvable:$true] %s326_s0 }
 0x1ee   :  { %s13345_s25 = scalar_lea.hbm %s16046_s27, 16 }
 0x1ef   :  { %p13346_p2 = scmp.ne.s32.totalorder %s16046_s27, %s13345_s25  ;;  %p13349_p3 = scmp.lt.u32.totalorder %s13345_s25, %s16046_s27 }
 0x1f1   :  { %p13351_p4 = pnand %p13349_p3, %p13346_p2 }
 0x1f3   :  { %13354 = shalt.err (!%p13351_p4)
}
 0x1f4   :  { %s13355_s16 = scalar_lea.vmem %s306_s3, 16  ;;  %s13359_s6 = scalar_lea.vmem %s306_s3, 32 }
 0x1f5   :  { %p13356_p5 = scmp.ne.s32.totalorder %s306_s3, %s13355_s16  ;;  %p13360_p6 = scmp.lt.s32.totalorder %s306_s3, %s306_s3 }
 0x1f6   :  { %p13361_p7 = scmp.lt.s32.totalorder %s13359_s6, %s13355_s16 }
 0x1f8   :  { %p13362_p8 = por %p13361_p7, %p13360_p6 }
 0x1fa   :  { %p13363_p9 = pnand %p13362_p8, %p13356_p5 }
 0x1fc   :  { %13366 = shalt.err (!%p13363_p9)
}
 0x1fd   :  { %s16047_s17 = sld [smem:[#allocation83_spill]] }
 0x1fe   :  { %308 = dma.hbm_to_vmem [thread:$0]  %s16046_s27, 16, %s306_s3, [#allocation30]  }
 0x203   :  { %s13367_s24 = scalar_lea.hbm %s16047_s17, 16384 }
 0x204   :  { %p13368_p10 = scmp.ne.s32.totalorder %s16047_s17, %s13367_s24  ;;  %p13371_p11 = scmp.lt.u32.totalorder %s13367_s24, %s16047_s17 }
 0x206   :  { %p13373_p12 = pnand %p13371_p11, %p13368_p10 }
 0x208   :  { %13376 = shalt.err (!%p13373_p12)
}
 0x209   :  { %s13377_s18 = scalar_lea.vmem %s327_s0, 16384  ;;  %p13382_p0 = scmp.lt.s32.totalorder %s327_s0, %s327_s0 }
 0x20a   :  { %p13378_p13 = scmp.ne.s32.totalorder %s327_s0, %s13377_s18  ;;  %p13383_p1 = scmp.lt.s32.totalorder %s13377_s18, %s13377_s18 }
 0x20c   :  { %p13384_p2 = por %p13383_p1, %p13382_p0 }
 0x20e   :  { %p13385_p3 = pnand %p13384_p2, %p13378_p13 }
 0x210   :  { %13388 = shalt.err (!%p13385_p3)
}
 0x211   :  { %s16048_s29 = sld [smem:[#allocation84_spill]]  ;;  %s13646_s22 = smov [#allocation37]  }
 0x212   :  { %332 = dma.hbm_to_vmem [thread:$0]  %s16047_s17, 16384, %s327_s0, [#allocation33], %s13638_s9, %s13638_s9, %s13639_s11  }
 0x213   :  { %s349_s23 = sshll.u32 %s13646_s22, 4  ;;  %s13647_s30 = smov [#allocation40]   ;;  %s350_s23 = int_to_ptr.vmem [resolvable:$true] %s349_s23 }
 0x214   :  { %s368_s1 = sshll.u32 %s13647_s30, 4  ;;  %s369_s1 = int_to_ptr.vmem [resolvable:$true] %s368_s1 }
 0x217   :  { %s13389_s2 = scalar_lea.hbm %s16048_s29, 32 }
 0x218   :  { %p13390_p4 = scmp.ne.s32.totalorder %s16048_s29, %s13389_s2  ;;  %p13393_p5 = scmp.lt.u32.totalorder %s13389_s2, %s16048_s29 }
 0x21a   :  { %p13395_p6 = pnand %p13393_p5, %p13390_p4 }
 0x21c   :  { %13398 = shalt.err (!%p13395_p6)
}
 0x21d   :  { %s13399_s14 = scalar_lea.vmem %s350_s23, 32  ;;  %p13404_p8 = scmp.lt.s32.totalorder %s350_s23, %s350_s23 }
 0x21e   :  { %p13400_p7 = scmp.ne.s32.totalorder %s350_s23, %s13399_s14  ;;  %p13405_p9 = scmp.lt.s32.totalorder %s13399_s14, %s13399_s14 }
 0x220   :  { %p13406_p10 = por %p13405_p9, %p13404_p8 }
 0x222   :  { %p13407_p11 = pnand %p13406_p10, %p13400_p7 }
 0x224   :  { %13410 = shalt.err (!%p13407_p11)
}
 0x225   :  { %s16049_s20 = sld [smem:[#allocation85_spill]] }
 0x226   :  { %352 = dma.hbm_to_vmem [thread:$0]  %s16048_s29, 32, %s350_s23, [#allocation36]  }
 0x22b   :  { %s13411_s9 = scalar_lea.hbm %s16049_s20, 4096 }
 0x22c   :  { %p13412_p12 = scmp.ne.s32.totalorder %s16049_s20, %s13411_s9  ;;  %p13415_p13 = scmp.lt.u32.totalorder %s13411_s9, %s16049_s20 }
 0x22e   :  { %p13417_p0 = pnand %p13415_p13, %p13412_p12 }
 0x230   :  { %13420 = shalt.err (!%p13417_p0)
}
 0x231   :  { %s13421_s11 = scalar_lea.vmem %s369_s1, 4096  ;;  %p13426_p2 = scmp.lt.s32.totalorder %s369_s1, %s369_s1 }
 0x232   :  { %p13422_p1 = scmp.ne.s32.totalorder %s369_s1, %s13421_s11  ;;  %p13427_p3 = scmp.lt.s32.totalorder %s13421_s11, %s13421_s11 }
 0x234   :  { %p13428_p4 = por %p13427_p3, %p13426_p2 }
 0x236   :  { %p13429_p5 = pnand %p13428_p4, %p13422_p1 }
 0x238   :  { %13432 = shalt.err (!%p13429_p5)
}
 0x239   :  { %s16050_s7 = sld [smem:[#allocation86_spill]]  ;;  %s13648_s8 = smov [#allocation43]  }
 0x23a   :  { %374 = dma.hbm_to_vmem [thread:$0]  %s16049_s20, 4096, %s369_s1, [#allocation39], %s13615_s26, %s13615_s26, %s13616_s28  }
 0x23b   :  { %s391_s4 = sshll.u32 %s13648_s8, 4  ;;  %s13649_s15 = smov [#allocation46]   ;;  %s392_s4 = int_to_ptr.vmem [resolvable:$true] %s391_s4 }
 0x23c   :  { %s410_s27 = sshll.u32 %s13649_s15, 4  ;;  %s411_s27 = int_to_ptr.vmem [resolvable:$true] %s410_s27 }
 0x23f   :  { %s13433_s10 = scalar_lea.hbm %s16050_s7, 16 }
 0x240   :  { %p13434_p6 = scmp.ne.s32.totalorder %s16050_s7, %s13433_s10  ;;  %p13437_p7 = scmp.lt.u32.totalorder %s13433_s10, %s16050_s7 }
 0x242   :  { %p13439_p8 = pnand %p13437_p7, %p13434_p6 }
 0x244   :  { %13442 = shalt.err (!%p13439_p8)
}
 0x245   :  { %s13443_s3 = scalar_lea.vmem %s392_s4, 16  ;;  %s13447_s19 = scalar_lea.vmem %s392_s4, 32 }
 0x246   :  { %p13444_p9 = scmp.ne.s32.totalorder %s392_s4, %s13443_s3  ;;  %p13448_p10 = scmp.lt.s32.totalorder %s392_s4, %s392_s4 }
 0x247   :  { %p13449_p11 = scmp.lt.s32.totalorder %s13447_s19, %s13443_s3 }
 0x249   :  { %p13450_p12 = por %p13449_p11, %p13448_p10 }
 0x24b   :  { %p13451_p13 = pnand %p13450_p12, %p13444_p9 }
 0x24d   :  { %13454 = shalt.err (!%p13451_p13)
}
 0x24e   :  { %394 = dma.hbm_to_vmem [thread:$0]  %s16050_s7, 16, %s392_s4, [#allocation42]  }
 0x24f   :  { %s13455_s0 = scalar_lea.hbm %s13821_s21, 2048 }
 0x250   :  { %p13456_p0 = scmp.ne.s32.totalorder %s13821_s21, %s13455_s0  ;;  %p13459_p1 = scmp.lt.u32.totalorder %s13455_s0, %s13821_s21 }
 0x252   :  { %p13461_p2 = pnand %p13459_p1, %p13456_p0 }
 0x254   :  { %13464 = shalt.err (!%p13461_p2)
}
 0x255   :  { %s13465_s25 = scalar_lea.vmem %s411_s27, 2048  ;;  %p13470_p4 = scmp.lt.s32.totalorder %s411_s27, %s411_s27 }
 0x256   :  { %p13466_p3 = scmp.ne.s32.totalorder %s411_s27, %s13465_s25  ;;  %p13471_p5 = scmp.lt.s32.totalorder %s13465_s25, %s13465_s25 }
 0x258   :  { %p13472_p6 = por %p13471_p5, %p13470_p4 }
 0x25a   :  { %p13473_p7 = pnand %p13472_p6, %p13466_p3 }
 0x25c   :  { %13476 = shalt.err (!%p13473_p7)
}
 0x25d   :  { %416 = dma.hbm_to_vmem [thread:$0]  %s13821_s21, 2048, %s411_s27, [#allocation45], %s13615_s26, %s13615_s26, %s13616_s28  }
 0x25e   :  { %s13650_s16 = smov [#allocation47]   ;;  %s13477_s17 = scalar_lea.hbm %s13826_s13, 16 }
 0x25f   :  { %s423_s6 = sshll.u32 %s13650_s16, 4  ;;  %p13478_p8 = scmp.ne.s32.totalorder %s13826_s13, %s13477_s17  ;;  %s424_s6 = int_to_ptr.vmem [resolvable:$true] %s423_s6 }
 0x260   :  { %p13481_p9 = scmp.lt.u32.totalorder %s13477_s17, %s13826_s13 }
 0x262   :  { %p13483_p10 = pnand %p13481_p9, %p13478_p8 }
 0x264   :  { %13486 = shalt.err (!%p13483_p10)
}
 0x265   :  { %s13487_s24 = scalar_lea.vmem %s424_s6, 16  ;;  %s13491_s18 = scalar_lea.vmem %s424_s6, 32 }
 0x266   :  { %p13488_p11 = scmp.ne.s32.totalorder %s424_s6, %s13487_s24  ;;  %p13492_p12 = scmp.lt.s32.totalorder %s424_s6, %s424_s6 }
 0x267   :  { %p13493_p13 = scmp.lt.s32.totalorder %s13491_s18, %s13487_s24 }
 0x269   :  { %p13494_p0 = por %p13493_p13, %p13492_p12 }
 0x26b   :  { %p13495_p1 = pnand %p13494_p0, %p13488_p11 }
 0x26d   :  { %13498 = shalt.err (!%p13495_p1)
}
 0x26e   :  { %426 = dma.hbm_to_vmem [thread:$0]  %s13826_s13, 16, %s424_s6, [#allocation48]  }
 0x26f   :  { %13543 = dma.done.wait [#allocation3], 1024  }
 0x270   :  { %13544 = vsyncadd [#allocation3], 4294966272 }
 0x271   :  { %13545 = dma.done.wait [#allocation6], 6912  }
 0x272   :  { %13546 = vsyncadd [#allocation6], 4294960384 }
 0x273   :  { %13547 = dma.done.wait [#allocation9], 2112  }
 0x274   :  { %13548 = vsyncadd [#allocation9], 4294965184 }
 0x275   :  { %13549 = dma.done.wait [#allocation12], 32  }
 0x276   :  { %13550 = vsyncadd [#allocation12], 4294967264 }
 0x277   :  { %13551 = dma.done.wait [#allocation15], 49536  }
 0x278   :  { %13552 = vsyncadd [#allocation15], 4294917760 }
 0x279   :  { %13553 = dma.done.wait [#allocation18], 1056  }
 0x27a   :  { %13554 = vsyncadd [#allocation18], 4294966240 }
 0x27b   :  { %13555 = dma.done.wait [#allocation21], 32  }
 0x27c   :  { %13556 = vsyncadd [#allocation21], 4294967264 }
 0x27d   :  { %13557 = dma.done.wait [#allocation24], 12480  }
 0x27e   :  { %13558 = vsyncadd [#allocation24], 4294954816 }
 0x27f   :  { %13559 = dma.done.wait [#allocation27], 528  }
 0x280   :  { %13560 = vsyncadd [#allocation27], 4294966768 }
 0x281   :  { %13561 = dma.done.wait [#allocation30], 32  }
 0x282   :  { %13562 = vsyncadd [#allocation30], 4294967264 }
 0x283   :  { %13563 = dma.done.wait [#allocation33], 49152  }
 0x284   :  { %13564 = vsyncadd [#allocation33], 4294918144 }
 0x285   :  { %13565 = dma.done.wait [#allocation36], 64  }
 0x286   :  { %13566 = vsyncadd [#allocation36], 4294967232 }
 0x287   :  { %13567 = dma.done.wait [#allocation39], 4128  }
 0x288   :  { %13568 = vsyncadd [#allocation39], 4294963168 }
 0x289   :  { %13569 = dma.done.wait [#allocation42], 32  }
 0x28a   :  { %13570 = vsyncadd [#allocation42], 4294967264 }
 0x28b   :  { %13571 = dma.done.wait [#allocation45], 2064  }
 0x28c   :  { %13572 = vsyncadd [#allocation45], 4294965232 }
 0x28d   :  { %13573 = dma.done.wait [#allocation48], 16  }
 0x28e   :  { %13574 = vsyncadd [#allocation48], 4294967280  ;;  %vm528_vm0 = vcmask 261120   ;;  %v517_v0 = vld [vmem:[#allocation2] sm:$0xff]  ;;  %v518_v1 = vld [vmem:[#allocation2 + $0x8] sm:$0xff]  ;;  %v16006_v39 = vmov 0.0  }
 0x28f   :  { %v519_v2 = vld [vmem:[#allocation2 + $0x10] sm:$0xff]  ;;  %v14004_v3 = vpack.c.bf16 %v518_v1, %v517_v0  ;;  %v520_v4 = vld [vmem:[#allocation2 + $0x18] sm:$0xff]  ;;  %v14012_v7 = vld [vmem:[#allocation5] sm:$0xff]  ;;  %s16051_s13 = sld [smem:[#allocation72_spill]]  ;;  %vm3152_vm1 = vcmask 130048   ;;  %s16063_s21 = sld [smem:[#allocation76_spill]] }
 0x290   :  { %v14006_v5 = vld [vmem:[#allocation5 + $0x10] sm:$0xff]  ;;  %v14008_v6 = vpack.c.bf16 %v520_v4, %v519_v2  ;;  %v712_v8 = vld [vmem:[#allocation7 + $0x88] sm:$0xff]  ;;  %v714_v10 = vld [vmem:[#allocation7 + $0x98] sm:$0xff]  ;;  %10292 = vmatprep.mubr.msk.f32.mxu0 %vm528_vm0, %v14012_v7  ;;  %s16065_s26 = sld [smem:[#allocation80_spill]]  ;;  %s13656_s28 = smov [#allocation49]  }
 0x291   :  { %10303 = vmatprep.mubr.msk.f32.mxu1 %vm528_vm0, %v14006_v5  ;;  %10497 = vmatprep.subr.bf16.mxu1 %v14004_v3  ;;  %v716_v9 = vld [vmem:[#allocation7 + $0xa8] sm:$0xff]  ;;  %v718_v11 = vld [vmem:[#allocation7 + $0xb8] sm:$0xff]  ;;  %v711_v12 = vld [vmem:[#allocation7 + $0x80] sm:$0xff]  ;;  %s9584_s29 = sshll.u32 %s13656_s28, 4  ;;  %s9585_s29 = int_to_ptr.vmem [resolvable:$true] %s9584_s29 }
 0x292   :  { %10489 = vmatprep.subr.bf16.mxu0 %v14004_v3  ;;  %10499 = vmatpush3.bf16.msra.mxu1 %v14004_v3  ;;  %v715_v13 = vld [vmem:[#allocation7 + $0xa0] sm:$0xff]  ;;  %v14020_v14 = vpack.c.bf16 %v716_v9, %v712_v8  ;;  %v14022_v15 = vpack.c.bf16 %v718_v11, %v714_v10  ;;  %v713_v16 = vld [vmem:[#allocation7 + $0x90] sm:$0xff]  ;;  %v720_v18 = vld [vmem:[#allocation7 + $0xc8] sm:$0xff]  ;;  %s13499_s22 = scalar_lea.vmem %s9585_s29, 128  ;;  %p13504_p3 = scmp.lt.s32.totalorder %s9585_s29, %s9585_s29 }
 0x293   :  { %10491 = vmatpush3.bf16.msra.mxu0 %v14004_v3  ;;  %10501 = vmatprep.subr.bf16.mxu1 %v14008_v6  ;;  %v717_v17 = vld [vmem:[#allocation7 + $0xb0] sm:$0xff]  ;;  %v724_v19 = vld [vmem:[#allocation7 + $0xe8] sm:$0xff]  ;;  %v722_v20 = vld [vmem:[#allocation7 + $0xd8] sm:$0xff]  ;;  %v14032_v24 = vpack.c.bf16 %v715_v13, %v711_v12  ;;  %p13500_p2 = scmp.ne.s32.totalorder %s9585_s29, %s13499_s22  ;;  %p13505_p4 = scmp.lt.s32.totalorder %s13499_s22, %s13499_s22 }
 0x294   :  { %10493 = vmatprep.subr.bf16.mxu0 %v14008_v6  ;;  %v726_v21 = vld [vmem:[#allocation7 + $0xf8] sm:$0xff]  ;;  %v14027_v22 = vld [vmem:[#allocation5 + $0x18] sm:$0xff]  ;;  %v14034_v25 = vpack.c.bf16 %v717_v17, %v713_v16  ;;  %v719_v26 = vld [vmem:[#allocation7 + $0xc0] sm:$0xff]  ;;  %v14038_v27 = vpack.c.bf16 %v724_v19, %v720_v18 }
 0x295   :  { %v14030_v23 = vld [vmem:[#allocation5 + $0x8] sm:$0xff]  ;;  %v14040_v28 = vpack.c.bf16 %v726_v21, %v722_v20  ;;  %v723_v29 = vld [vmem:[#allocation7 + $0xe0] sm:$0xff]  ;;  %v721_v30 = vld [vmem:[#allocation7 + $0xd0] sm:$0xff]  ;;  %p13506_p5 = por %p13505_p4, %p13504_p3 }
 0x296   :  { %10503 = vmatpush3.bf16.msra.mxu1 %v14008_v6  ;;  %v725_v31 = vld [vmem:[#allocation7 + $0xf0] sm:$0xff]  ;;  %v14048_v32 = vpack.c.bf16 %v723_v29, %v719_v26  ;;  %v611_v34 = vld [vmem:[#allocation7 + $0x8] sm:$0xff]  ;;  %v613_v36 = vld [vmem:[#allocation7 + $0x18] sm:$0xff] }
 0x297   :  { %10495 = vmatpush3.bf16.msra.mxu0 %v14008_v6  ;;  %10513 = vmatprep.subr.bf16.mxu1 %v14022_v15  ;;  %v14050_v33 = vpack.c.bf16 %v725_v31, %v721_v30  ;;  %v615_v35 = vld [vmem:[#allocation7 + $0x28] sm:$0xff]  ;;  %v617_v38 = vld [vmem:[#allocation7 + $0x38] sm:$0xff]  ;;  %v610_v41 = vld [vmem:[#allocation7] sm:$0xff]  ;;  %p13507_p6 = pnand %p13506_p5, %p13500_p2 }
 0x298   :  { %10505 = vmatprep.subr.bf16.mxu0 %v14020_v14  ;;  %v14056_v37 = vpack.c.bf16 %v615_v35, %v611_v34  ;;  %v14060_v40 = vpack.c.bf16 %v617_v38, %v613_v36  ;;  %v614_v42 = vld [vmem:[#allocation7 + $0x20] sm:$0xff]  ;;  %v612_v43 = vld [vmem:[#allocation7 + $0x10] sm:$0xff]  ;;  %v619_v45 = vld [vmem:[#allocation7 + $0x48] sm:$0xff] }
 0x299   :  { %10304 = vmatmul.mubr.msk.f32.vlgmr.msra.gmra.mrb[0].mxu1 %vm528_vm0, %v14027_v22  ;;  %v616_v44 = vld [vmem:[#allocation7 + $0x30] sm:$0xff]  ;;  %v623_v46 = vld [vmem:[#allocation7 + $0x68] sm:$0xff]  ;;  %v621_v47 = vld [vmem:[#allocation7 + $0x58] sm:$0xff]  ;;  %v14064_v49 = vpack.c.bf16 %v614_v42, %v610_v41 }
 0x29a   :  { %10293 = vmatmul.mubr.msk.f32.vlgmr.msra.gmra.mrb[0].mxu0 %vm528_vm0, %v14030_v23  ;;  %10515 = vmatpush1.bf16.msra.mxu1 %v14034_v25  ;;  %v625_v48 = vld [vmem:[#allocation7 + $0x78] sm:$0xff]  ;;  %v14066_v50 = vpack.c.bf16 %v616_v44, %v612_v43  ;;  %v618_v51 = vld [vmem:[#allocation7 + $0x40] sm:$0xff]  ;;  %v620_v55 = vld [vmem:[#allocation7 + $0x50] sm:$0xff]  ;;  %v14068_v58 = vpack.c.bf16 %v623_v46, %v619_v45 }
 0x29b   :  { %10507 = vmatpush1.bf16.msra.mxu0 %v14032_v24  ;;  %10517 = vmatprep.subr.bf16.mxu1 %v14040_v28  ;;  %v622_v54 = vld [vmem:[#allocation7 + $0x60] sm:$0xff]  ;;  %v624_v56 = vld [vmem:[#allocation7 + $0x70] sm:$0xff]  ;;  %v14070_v59 = vpack.c.bf16 %v625_v48, %v621_v47  ;;  %v1135_v61 = vld [vmem:[#allocation7 + $0x118] sm:$0xff] }
 0x29c   :  { %10509 = vmatprep.subr.bf16.mxu0 %v14038_v27  ;;  %797 = vmatprep.mubr.f32.mxu0 %v16006_v39  ;;  %v1139_v62 = vld [vmem:[#allocation7 + $0x138] sm:$0xff]  ;;  %v14076_v63 = vpack.c.bf16 %v622_v54, %v618_v51  ;;  %v14078_v0 = vpack.c.bf16 %v624_v56, %v620_v55  ;;  %v1134_v2 = vld [vmem:[#allocation7 + $0x110] sm:$0xff]  ;;  %v1133_v8 = vld [vmem:[#allocation7 + $0x108] sm:$0xff] }
 0x29d   :  { %874 = vmatprep.mubr.f32.mxu1 %v16006_v39  ;;  %v14084_v1 = vpack.c.bf16 %v1139_v62, %v1135_v61  ;;  %v1138_v4 = vld [vmem:[#allocation7 + $0x130] sm:$0xff]  ;;  %v1137_v9 = vld [vmem:[#allocation7 + $0x128] sm:$0xff]  ;;  %v1143_v11 = vld [vmem:[#allocation7 + $0x158] sm:$0xff] }
 0x29e   :  { %10519 = vmatpush1.bf16.msra.mxu1 %v14050_v33  ;;  %v14094_v10 = vpack.c.bf16 %v1138_v4, %v1134_v2  ;;  %v1147_v12 = vld [vmem:[#allocation7 + $0x178] sm:$0xff]  ;;  %v1142_v13 = vld [vmem:[#allocation7 + $0x150] sm:$0xff]  ;;  %v14104_v18 = vpack.c.bf16 %v1137_v9, %v1133_v8  ;;  %v1132_v19 = vld [vmem:[#allocation7 + $0x100] sm:$0xff] }
 0x29f   :  { %10511 = vmatpush1.bf16.msra.mxu0 %v14048_v32  ;;  %10529 = vmatprep.subr.bf16.mxu1 %v14060_v40  ;;  %v1146_v16 = vld [vmem:[#allocation7 + $0x170] sm:$0xff]  ;;  %v1136_v20 = vld [vmem:[#allocation7 + $0x120] sm:$0xff]  ;;  %v14106_v21 = vpack.c.bf16 %v1147_v12, %v1143_v11  ;;  %v1141_v26 = vld [vmem:[#allocation7 + $0x148] sm:$0xff] }
 0x2a0   :  { %10521 = vmatprep.subr.bf16.mxu0 %v14056_v37  ;;  %v14102_v17 = vld [vmem:[#allocation5 + $0x20] sm:$0xff]  ;;  %v1145_v29 = vld [vmem:[#allocation7 + $0x168] sm:$0xff]  ;;  %v14109_v30 = vpack.c.bf16 %v1146_v16, %v1142_v13  ;;  %v14118_v31 = vpack.c.bf16 %v1136_v20, %v1132_v19  ;;  %v1140_v35 = vld [vmem:[#allocation7 + $0x140] sm:$0xff] }
 0x2a1   :  { %v14121_v34 = vpack.c.bf16 %v1145_v29, %v1141_v26  ;;  %v1144_v36 = vld [vmem:[#allocation7 + $0x160] sm:$0xff]  ;;  %v522_v38 = vld [vmem:[#allocation2 + $0x20] sm:$0xff]  ;;  %v523_v41 = vld [vmem:[#allocation2 + $0x28] sm:$0xff] }
 0x2a2   :  { %v14134_v42 = vpack.c.bf16 %v523_v41, %v522_v38  ;;  %v524_v43 = vld [vmem:[#allocation2 + $0x30] sm:$0xff]  ;;  %v525_v44 = vld [vmem:[#allocation2 + $0x38] sm:$0xff]  ;;  %v2148_v61 = vld [vmem:[%s16051_s13 + $0xa8] sm:$0xff] }
 0x2a3   :  { %v14138_v46 = vpack.c.bf16 %v525_v44, %v524_v43  ;;  %v2145_v51 = vld [vmem:[%s16051_s13 + $0x90] sm:$0xff]  ;;  %v2150_v4 = vld [vmem:[%s16051_s13 + $0xb8] sm:$0xff]  ;;  %v2151_v12 = vld [vmem:[%s16051_s13 + $0xc0] sm:$0xff] }
 0x2a4   :  { %v2149_v2 = vld [vmem:[%s16051_s13 + $0xb0] sm:$0xff]  ;;  %v2152_v13 = vld [vmem:[%s16051_s13 + $0xc8] sm:$0xff] }
 0x2a5   :  { %v14265_v8 = vpack.c.bf16 %v2150_v4, %v2149_v2  ;;  %v2133_v9 = vld [vmem:[%s16051_s13 + $0x30] sm:$0xff]  ;;  %v14275_v16 = vpack.c.bf16 %v2152_v13, %v2151_v12 }
 0x2a6   :  { %v2153_v20 = vld [vmem:[%s16051_s13 + $0xd0] sm:$0xff] }
 0x2a7   :  { %v2137_v29 = vld [vmem:[%s16051_s13 + $0x50] sm:$0xff] }
 0x2a8   :  { %v2157_v41 = vld [vmem:[%s16051_s13 + $0xf0] sm:$0xff] }
 0x2a9   :  { %v2141_v44 = vld [vmem:[%s16051_s13 + $0x70] sm:$0xff] }
 0x36c   :  { %v10305_v52 = vpop.f32.mrb[0].mxu1 }
 0x36d   :  { %v10294_v53 = vpop.f32.mrb[0].mxu0  ;;  %v701_v57 = vpop.f32.mrb[1].mxu1 }
 0x36e   :  { %v601_v60 = vpop.f32.mrb[1].mxu0  ;;  %9660 = vmatmul.mubr.msk.f32.vlgmr.msra.gmra.mrb[2].mxu0 %vm528_vm0, %v701_v57  ;;  %9662 = vmatmul.mubr.msk.f32.vlgmr.msra.gmra.mrb[2].mxu1 %vm528_vm0, %v701_v57  ;;  %v2129_v57 = vld [vmem:[%s16051_s13 + $0x10] sm:$0xff] }
 0x36f   :  { %10523 = vmatpush1.bf16.msra.mxu0 %v14064_v49  ;;  %10531 = vmatpush1.bf16.msra.mxu1 %v14066_v50 }
 0x370   :  { %803 = vmatprep.mubr.f32.mxu0 %v16006_v39  ;;  %880 = vmatprep.mubr.f32.mxu1 %v16006_v39 }
 0x371   :  { %10525 = vmatprep.subr.bf16.mxu0 %v14068_v58  ;;  %10533 = vmatprep.subr.bf16.mxu1 %v14070_v59 }
 0x372   :  { %9661 = vmatmul.mubr.msk.f32.gmra.mrb[4].mxu0 %vm528_vm0, %v10305_v52  ;;  %9663 = vmatmul.mubr.msk.f32.gmra.mrb[4].mxu1 %vm528_vm0, %v10305_v52  ;;  %v2146_v52 = vld [vmem:[%s16051_s13 + $0x98] sm:$0xff] }
 0x373   :  { %10527 = vmatpush1.bf16.msra.mxu0 %v14076_v63  ;;  %10535 = vmatpush1.bf16.msra.mxu1 %v14078_v0  ;;  %v14237_v56 = vpack.c.bf16 %v2146_v52, %v2145_v51 }
 0x374   :  { %957 = vmatprep.mubr.f32.mxu0 %v16006_v39  ;;  %1034 = vmatprep.mubr.f32.mxu1 %v16006_v39 }
 0x375   :  { %10537 = vmatprep.subr.bf16.mxu0 %v14004_v3  ;;  %10553 = vmatprep.subr.bf16.mxu1 %v14084_v1 }
 0x376   :  { %9664 = vmatmul.mubr.msk.f32.vlgmr.msra.gmra.mrb[2].mxu0 %vm528_vm0, %v601_v60  ;;  %9666 = vmatmul.mubr.msk.f32.vlgmr.msra.gmra.mrb[2].mxu1 %vm528_vm0, %v601_v60  ;;  %v2147_v60 = vld [vmem:[%s16051_s13 + $0xa0] sm:$0xff] }
 0x377   :  { %10539 = vmatpush3.bf16.msra.mxu0 %v14004_v3  ;;  %963 = vmatprep.mubr.f32.mxu0 %v16006_v39  ;;  %v14116_v3 = vld [vmem:[#allocation5 + $0x28] sm:$0xff]  ;;  %v14255_v62 = vpack.c.bf16 %v2148_v61, %v2147_v60 }
 0x378   :  { %1040 = vmatprep.mubr.f32.mxu1 %v16006_v39  ;;  %10541 = vmatprep.subr.bf16.mxu0 %v14008_v6 }
 0x379   :  { %10555 = vmatpush1.bf16.msra.mxu1 %v14094_v10 }
 0x37a   :  { %9665 = vmatmul.mubr.msk.f32.gmra.mrb[4].mxu0 %vm528_vm0, %v10294_v53  ;;  %9667 = vmatmul.mubr.msk.f32.gmra.mrb[4].mxu1 %vm528_vm0, %v10294_v53 }
 0x37b   :  { %10543 = vmatpush3.bf16.msra.mxu0 %v14008_v6  ;;  %10314 = vmatprep.mubr.msk.f32.mxu0 %vm528_vm0, %v14102_v17  ;;  %v14129_v6 = vpack.c.bf16 %v1144_v36, %v1140_v35  ;;  %v2139_v36 = vld [vmem:[%s16051_s13 + $0x60] sm:$0xff] }
 0x37c   :  { %10545 = vmatprep.subr.bf16.mxu0 %v14104_v18  ;;  %10557 = vmatprep.subr.bf16.mxu1 %v14106_v21 }
 0x37d   :  { %10559 = vmatpush1.bf16.msra.mxu1 %v14109_v30  ;;  %1295 = vmatprep.mubr.f32.mxu1 %v16006_v39 }
 0x37e   :  { %10315 = vmatmul.mubr.msk.f32.vlgmr.msra.gmra.mrb[6].mxu0 %vm528_vm0, %v14116_v3  ;;  %10561 = vmatprep.subr.bf16.mxu1 %v14134_v42 }
 0x37f   :  { %10547 = vmatpush1.bf16.msra.mxu0 %v14118_v31  ;;  %1218 = vmatprep.mubr.f32.mxu0 %v16006_v39 }
 0x380   :  { %10549 = vmatprep.subr.bf16.mxu0 %v14121_v34 }
 0x383   :  { %10551 = vmatpush1.bf16.msra.mxu0 %v14129_v6 }
 0x384   :  { %10569 = vmatprep.subr.bf16.mxu0 %v14134_v42 }
 0x451   :  { %v10316_v45 = vpop.f32.mrb[6].mxu0 }
 0x452   :  { %v1122_v47 = vpop.f32.mrb[7].mxu0 }
 0x453   :  { %9670 = vmatmul.mubr.msk.f32.vlgmr.msra.gmra.mrb[2].mxu0 %vm528_vm0, %v1122_v47  ;;  %9672 = vmatmul.mubr.msk.f32.vlgmr.msra.gmra.mrb[2].mxu1 %vm528_vm0, %v1122_v47  ;;  %v2175_v47 = vld [vmem:[%s16051_s13 + $0x180] sm:$0xff] }
 0x454   :  { %10571 = vmatpush3.bf16.msra.mxu0 %v14134_v42  ;;  %1224 = vmatprep.mubr.f32.mxu0 %v16006_v39 }
 0x455   :  { %1301 = vmatprep.mubr.f32.mxu1 %v16006_v39  ;;  %10573 = vmatprep.subr.bf16.mxu0 %v14138_v46 }
 0x456   :  { %10563 = vmatpush3.bf16.msra.mxu1 %v14134_v42 }
 0x457   :  { %9671 = vmatmul.mubr.msk.f32.gmra.mrb[4].mxu0 %vm528_vm0, %v10316_v45  ;;  %9673 = vmatmul.mubr.msk.f32.gmra.mrb[4].mxu1 %vm528_vm0, %v10316_v45  ;;  %v2142_v45 = vld [vmem:[%s16051_s13 + $0x78] sm:$0xff] }
 0x458   :  { %10575 = vmatpush3.bf16.msra.mxu0 %v14138_v46  ;;  %10336 = vmatprep.mubr.msk.f32.mxu0 %vm528_vm0, %v14006_v5 }
 0x459   :  { %10565 = vmatprep.subr.bf16.mxu1 %v14138_v46  ;;  %10325 = vmatprep.mubr.msk.f32.mxu1 %vm528_vm0, %v14012_v7 }
 0x45a   :  { %10567 = vmatpush3.bf16.msra.mxu1 %v14138_v46  ;;  %10585 = vmatprep.subr.bf16.mxu0 %v14022_v15 }
 0x45b   :  { %10337 = vmatmul.mubr.msk.f32.vlgmr.msra.gmra.mrb[8].mxu0 %vm528_vm0, %v14027_v22  ;;  %10577 = vmatprep.subr.bf16.mxu1 %v14020_v14 }
 0x45c   :  { %10587 = vmatpush1.bf16.msra.mxu0 %v14034_v25  ;;  %1643 = vmatprep.mubr.f32.mxu0 %v16006_v39 }
 0x45d   :  { %10326 = vmatmul.mubr.msk.f32.vlgmr.msra.gmra.mrb[6].mxu1 %vm528_vm0, %v14030_v23  ;;  %10589 = vmatprep.subr.bf16.mxu0 %v14040_v28 }
 0x45e   :  { %10579 = vmatpush1.bf16.msra.mxu1 %v14032_v24  ;;  %1566 = vmatprep.mubr.f32.mxu1 %v16006_v39 }
 0x45f   :  { %10581 = vmatprep.subr.bf16.mxu1 %v14038_v27 }
 0x460   :  { %10591 = vmatpush1.bf16.msra.mxu0 %v14050_v33 }
 0x461   :  { %10601 = vmatprep.subr.bf16.mxu0 %v14060_v40  ;;  %v2144_v40 = vld [vmem:[%s16051_s13 + $0x88] sm:$0xff] }
 0x462   :  { %10583 = vmatpush1.bf16.msra.mxu1 %v14048_v32 }
 0x463   :  { %10593 = vmatprep.subr.bf16.mxu1 %v14056_v37  ;;  %v2143_v37 = vld [vmem:[%s16051_s13 + $0x80] sm:$0xff] }
 0x464   :  { %v14228_v48 = vpack.c.bf16 %v2144_v40, %v2143_v37  ;;  %v14324_v40 = vld [vmem:[#allocation8] sm:$0xf] }
 0x526   :  { %v14172_v5 = vpop.f32.mrb[2].mxu0  ;;  %v14174_v7 = vpop.f32.mrb[2].mxu1 }
 0x527   :  { %v14176_v14 = vpop.f32.mrb[3].mxu0  ;;  %v14178_v15 = vpop.f32.mrb[3].mxu1 }
 0x52a   :  { %v14180_v22 = vpop.f32.mrb[4].mxu0  ;;  %v14182_v23 = vpop.f32.mrb[4].mxu1 }
 0x52b   :  { %v14184_v24 = vpop.f32.mrb[5].mxu0  ;;  %v14186_v25 = vpop.f32.mrb[5].mxu1 }
 0x52e   :  { %v10338_v27 = vpop.f32.mrb[8].mxu0 }
 0x52f   :  { %v1487_v28 = vpop.f32.mrb[9].mxu0 }
 0x530   :  { %9678 = vmatmul.mubr.msk.f32.vlgmr.msra.gmra.mrb[8].mxu1 %vm528_vm0, %v1487_v28  ;;  %9680 = vmatmul.mubr.msk.f32.vlgmr.msra.gmra.mrb[10].mxu0 %vm528_vm0, %v1487_v28  ;;  %v10327_v32 = vpop.f32.mrb[6].mxu1 }
 0x531   :  { %10595 = vmatpush1.bf16.msra.mxu1 %v14064_v49  ;;  %10603 = vmatpush1.bf16.msra.mxu0 %v14066_v50  ;;  %v1412_v33 = vpop.f32.mrb[7].mxu1  ;;  %v2127_v49 = vld [vmem:[%s16051_s13] sm:$0xff]  ;;  %v2128_v50 = vld [vmem:[%s16051_s13 + $0x8] sm:$0xff] }
 0x532   :  { %1572 = vmatprep.mubr.f32.mxu1 %v16006_v39  ;;  %1649 = vmatprep.mubr.f32.mxu0 %v16006_v39  ;;  %v14235_v54 = vpack.c.bf16 %v2128_v50, %v2127_v49 }
 0x533   :  { %10597 = vmatprep.subr.bf16.mxu1 %v14068_v58  ;;  %10605 = vmatprep.subr.bf16.mxu0 %v14070_v59  ;;  %v2130_v58 = vld [vmem:[%s16051_s13 + $0x18] sm:$0xff] }
 0x534   :  { %9679 = vmatmul.mubr.msk.f32.gmra.mrb[10].mxu1 %vm528_vm0, %v10338_v27  ;;  %9681 = vmatmul.mubr.msk.f32.gmra.mrb[12].mxu0 %vm528_vm0, %v10338_v27  ;;  %v14246_v59 = vpack.c.bf16 %v2130_v58, %v2129_v57  ;;  %v2176_v27 = vld [vmem:[%s16051_s13 + $0x188] sm:$0xff] }
 0x535   :  { %10599 = vmatpush1.bf16.msra.mxu1 %v14076_v63  ;;  %10607 = vmatpush1.bf16.msra.mxu0 %v14078_v0  ;;  %v2131_v63 = vld [vmem:[%s16051_s13 + $0x20] sm:$0xff]  ;;  %v2132_v0 = vld [vmem:[%s16051_s13 + $0x28] sm:$0xff]  ;;  %v14315_v28 = vpack.c.bf16 %v2176_v27, %v2175_v47 }
 0x536   :  { %1726 = vmatprep.mubr.f32.mxu1 %v16006_v39  ;;  %1803 = vmatprep.mubr.f32.mxu0 %v16006_v39 }
 0x537   :  { %10609 = vmatprep.subr.bf16.mxu1 %v14134_v42  ;;  %10625 = vmatprep.subr.bf16.mxu0 %v14084_v1  ;;  %v14259_v1 = vpack.c.bf16 %v2132_v0, %v2131_v63 }
 0x538   :  { %9682 = vmatmul.mubr.msk.f32.vlgmr.msra.gmra.mrb[8].mxu1 %vm528_vm0, %v1412_v33  ;;  %9684 = vmatmul.mubr.msk.f32.vlgmr.msra.gmra.mrb[10].mxu0 %vm528_vm0, %v1412_v33 }
 0x539   :  { %10611 = vmatpush3.bf16.msra.mxu1 %v14134_v42  ;;  %1732 = vmatprep.mubr.f32.mxu1 %v16006_v39  ;;  %v2158_v42 = vld [vmem:[%s16051_s13 + $0xf8] sm:$0xff] }
 0x53a   :  { %1809 = vmatprep.mubr.f32.mxu0 %v16006_v39  ;;  %10613 = vmatprep.subr.bf16.mxu1 %v14138_v46  ;;  %v14305_v43 = vpack.c.bf16 %v2158_v42, %v2157_v41 }
 0x53b   :  { %10627 = vmatpush1.bf16.msra.mxu0 %v14094_v10  ;;  %v2134_v10 = vld [vmem:[%s16051_s13 + $0x38] sm:$0xff] }
 0x53c   :  { %9683 = vmatmul.mubr.msk.f32.gmra.mrb[10].mxu1 %vm528_vm0, %v10327_v32  ;;  %9685 = vmatmul.mubr.msk.f32.gmra.mrb[12].mxu0 %vm528_vm0, %v10327_v32  ;;  %v14269_v11 = vpack.c.bf16 %v2134_v10, %v2133_v9  ;;  %v16005_v32 = vlaneseq }
 0x53d   :  { %10615 = vmatpush3.bf16.msra.mxu1 %v14138_v46  ;;  %10347 = vmatprep.mubr.msk.f32.mxu1 %vm528_vm0, %v14102_v17  ;;  %v2135_v17 = vld [vmem:[%s16051_s13 + $0x40] sm:$0xff]  ;;  %v14309_v46 = vpack.c.bf16 %v2142_v45, %v2141_v44 }
 0x53e   :  { %10617 = vmatprep.subr.bf16.mxu1 %v14104_v18  ;;  %10629 = vmatprep.subr.bf16.mxu0 %v14106_v21  ;;  %v2136_v18 = vld [vmem:[%s16051_s13 + $0x48] sm:$0xff]  ;;  %v2154_v21 = vld [vmem:[%s16051_s13 + $0xd8] sm:$0xff]  ;;  %v14319_v33 = vshrl.u32 %v16005_v32, 7 }
 0x53f   :  { %10631 = vmatpush1.bf16.msra.mxu0 %v14109_v30  ;;  %2038 = vmatprep.mubr.f32.mxu0 %v16006_v39  ;;  %v14279_v19 = vpack.c.bf16 %v2136_v18, %v2135_v17  ;;  %v14285_v26 = vpack.c.bf16 %v2154_v21, %v2153_v20  ;;  %v2138_v30 = vld [vmem:[%s16051_s13 + $0x58] sm:$0xff] }
 0x540   :  { %10348 = vmatmul.mubr.msk.f32.vlgmr.msra.gmra.mrb[12].mxu1 %vm528_vm0, %v14116_v3  ;;  %10633 = vmatprep.subr.bf16.mxu0 %v14228_v48  ;;  %v14289_v3 = vpack.c.bf16 %v2138_v30, %v2137_v29  ;;  %16052 = vst [vmem:[#allocation87_spill] sm:$0xff] %v14319_v33  ;;  %v14322_v37 = vsub.s32 1, %v14319_v33  ;;  %v14327_v49 = vsub.s32 0, %v14319_v33  ;;  %v1332_v50 = vsub.s32 3, %v14319_v33 }
 0x541   :  { %10619 = vmatpush1.bf16.msra.mxu1 %v14118_v31  ;;  %1961 = vmatprep.mubr.f32.mxu1 %v16006_v39  ;;  %v2155_v31 = vld [vmem:[%s16051_s13 + $0xe0] sm:$0xff]  ;;  %v1328_v32 = vsub.s32 2, %v14319_v33  ;;  %v2161_v33 = vld [vmem:[%s16051_s13 + $0x110] sm:$0xff] }
 0x542   :  { %10621 = vmatprep.subr.bf16.mxu1 %v14121_v34  ;;  %v2156_v34 = vld [vmem:[%s16051_s13 + $0xe8] sm:$0xff]  ;;  %16053 = vst [vmem:[#allocation88_spill] sm:$0xff] %v14322_v37  ;;  %v1325_v51 = vrot.slane %v14324_v40, %v14322_v37  ;;  %v1321_v52 = vrot.slane %v14324_v40, %v14327_v49 }
 0x543   :  { %v14295_v35 = vpack.c.bf16 %v2156_v34, %v2155_v31  ;;  %v2339_v37 = vld [vmem:[#allocation10 + $0x38] sm:$0xff] }
 0x544   :  { %v14339_v57 = vadd.f32 %v1321_v52, %v14180_v22  ;;  %v14345_v60 = vadd.f32 %v1325_v51, %v14176_v14  ;;  %v14348_v61 = vadd.f32 %v1321_v52, %v14172_v5 }
 0x545   :  { %10623 = vmatpush1.bf16.msra.mxu1 %v14129_v6  ;;  %v2140_v6 = vld [vmem:[%s16051_s13 + $0x68] sm:$0xff] }
 0x546   :  { %v14299_v38 = vpack.c.bf16 %v2140_v6, %v2139_v36 }
 0x613   :  { %v10349_v53 = vpop.f32.mrb[12].mxu1 }
 0x614   :  { %v1882_v55 = vpop.f32.mrb[13].mxu1 }
 0x615   :  { %9688 = vmatmul.mubr.msk.f32.vlgmr.msra.gmra.mrb[8].mxu1 %vm528_vm0, %v1882_v55  ;;  %9690 = vmatmul.mubr.msk.f32.vlgmr.msra.gmra.mrb[10].mxu0 %vm528_vm0, %v1882_v55  ;;  %v14336_v55 = vadd.f32 %v1325_v51, %v14184_v24  ;;  %v2067_v24 = vadd.f32 %v14339_v57, %v14348_v61 }
 0x616   :  { %1967 = vmatprep.mubr.f32.mxu1 %v16006_v39  ;;  %2044 = vmatprep.mubr.f32.mxu0 %v16006_v39 }
 0x617   :  { %10635 = vmatpush3.bf16.msra.mxu0 %v14235_v54  ;;  %v2074_v0 = vadd.f32 %v14336_v55, %v14345_v60  ;;  %v2068_v14 = vrot.slane %v2067_v24, 4 }
 0x618   :  { %10637 = vmatprep.subr.bf16.mxu0 %v14237_v56 }
 0x619   :  { %9689 = vmatmul.mubr.msk.f32.gmra.mrb[10].mxu1 %vm528_vm0, %v10349_v53  ;;  %9691 = vmatmul.mubr.msk.f32.gmra.mrb[12].mxu0 %vm528_vm0, %v10349_v53  ;;  %v1333_v53 = vrot.slane %v14324_v40, %v1332_v50  ;;  %v2069_v17 = vadd.f32 %v2068_v14, %v2067_v24 }
 0x61a   :  { %2486 = vmatprep.mubr.f32.mxu1 %v16006_v39 }
 0x61b   :  { %10639 = vmatpush3.bf16.msra.mxu0 %v14246_v59  ;;  %v14342_v58 = vadd.f32 %v1333_v53, %v14186_v25  ;;  %v14351_v63 = vadd.f32 %v1333_v53, %v14178_v15  ;;  %v2075_v25 = vrot.slane %v2074_v0, 4  ;;  %v2070_v47 = vrot.slane %v2069_v17, 2 }
 0x61c   :  { %10641 = vmatprep.subr.bf16.mxu0 %v14255_v62 }
 0x61d   :  { %v2088_v22 = vadd.f32 %v14342_v58, %v14351_v63  ;;  %v2076_v12 = vadd.f32 %v2075_v25, %v2074_v0  ;;  %v2071_v25 = vadd.f32 %v2070_v47, %v2069_v17  ;;  %v2160_v47 = vld [vmem:[%s16051_s13 + $0x108] sm:$0xff] }
 0x61f   :  { %10643 = vmatpush3.bf16.msra.mxu0 %v14259_v1  ;;  %v2089_v9 = vrot.slane %v2088_v22, 4  ;;  %v2077_v42 = vrot.slane %v2076_v12, 2  ;;  %v2072_v39 = vrot.slane %v2071_v25, 1 }
 0x620   :  { %10645 = vmatprep.subr.bf16.mxu0 %v14265_v8 }
 0x621   :  { %v2090_v18 = vadd.f32 %v2089_v9, %v2088_v22 }
 0x623   :  { %10647 = vmatpush3.bf16.msra.mxu0 %v14269_v11  ;;  %v2091_v50 = vrot.slane %v2090_v18, 2 }
 0x624   :  { %10649 = vmatprep.subr.bf16.mxu0 %v14275_v16 }
 0x627   :  { %10651 = vmatpush3.bf16.msra.mxu0 %v14279_v19 }
 0x628   :  { %10653 = vmatprep.subr.bf16.mxu0 %v14285_v26 }
 0x62b   :  { %10655 = vmatpush3.bf16.msra.mxu0 %v14289_v3 }
 0x62c   :  { %10657 = vmatprep.subr.bf16.mxu0 %v14295_v35 }
 0x62f   :  { %10659 = vmatpush3.bf16.msra.mxu0 %v14299_v38 }
 0x630   :  { %10661 = vmatprep.subr.bf16.mxu0 %v14305_v43 }
 0x633   :  { %10663 = vmatpush3.bf16.msra.mxu0 %v14309_v46 }
 0x634   :  { %10665 = vmatprep.subr.bf16.mxu0 %v14315_v28 }
 0x6e8   :  { %v1963_v2 = vpop.f32.mrb[8].mxu1  ;;  %v14359_v4 = vpop.f32.mrb[10].mxu0 }
 0x6e9   :  { %v1965_v5 = vpop.f32.mrb[9].mxu1  ;;  %v2042_v10 = vpop.f32.mrb[11].mxu0  ;;  %v14361_v20 = vadd.f32 %v1963_v2, %v1321_v52 }
 0x6ea   :  { %v14365_v31 = vadd.f32 %v1965_v5, %v1325_v51  ;;  %v14367_v34 = vadd.f32 %v2042_v10, %v1333_v53  ;;  %v2092_v5 = vadd.f32 %v2091_v50, %v2090_v18 }
 0x6ec   :  { %v1969_v15 = vpop.f32.mrb[10].mxu1  ;;  %v2046_v13 = vpop.f32.mrb[12].mxu0  ;;  %16054 = vst [vmem:[#allocation89_spill] sm:$0xff] %v14367_v34 }
 0x6ed   :  { %v14363_v21 = vadd.f32 %v1969_v15, %v1321_v52  ;;  %v1971_v29 = vpop.f32.mrb[11].mxu1  ;;  %v2048_v30 = vpop.f32.mrb[13].mxu0 }
 0x6ee   :  { %v14369_v36 = vadd.f32 %v1971_v29, %v1325_v51  ;;  %v14371_v6 = vadd.f32 %v2048_v30, %v1333_v53  ;;  %v2078_v53 = vadd.f32 %v2077_v42, %v2076_v12  ;;  %v2159_v42 = vld [vmem:[%s16051_s13 + $0x100] sm:$0xff] }
 0x6ef   :  { %v2095_v41 = vadd.f32 %v14363_v21, %v14361_v20 }
 0x6f0   :  { %16055 = vst [vmem:[#allocation90_spill] sm:$0xff] %v14371_v6  ;;  %v2102_v44 = vadd.f32 %v14369_v36, %v14365_v31  ;;  %v2116_v45 = vadd.f32 %v14371_v6, %v14367_v34  ;;  %v2079_v15 = vrot.slane %v2078_v53, 1  ;;  %v2332_v6 = vld [vmem:[#allocation10] sm:$0xff] }
 0x6f1   :  { %v2096_v27 = vrot.slane %v2095_v41, 4  ;;  %v2336_v34 = vld [vmem:[#allocation10 + $0x20] sm:$0xff] }
 0x6f2   :  { %v2103_v52 = vrot.slane %v2102_v44, 4  ;;  %v2117_v0 = vrot.slane %v2116_v45, 4 }
 0x6f3   :  { %v2097_v24 = vadd.f32 %v2096_v27, %v2095_v41  ;;  %v2080_v27 = vadd.f32 %v2079_v15, %v2078_v53  ;;  %v2162_v53 = vld [vmem:[%s16051_s13 + $0x118] sm:$0xff] }
 0x6f4   :  { %v2104_v51 = vadd.f32 %v2103_v52, %v2102_v44  ;;  %v2118_v22 = vadd.f32 %v2117_v0, %v2116_v45  ;;  %v2093_v45 = vrot.slane %v2092_v5, 1  ;;  %v2177_v52 = vld [vmem:[%s16051_s13 + $0x190] sm:$0xff]  ;;  %v2178_v0 = vld [vmem:[%s16051_s13 + $0x198] sm:$0xff] }
 0x6f5   :  { %v2098_v2 = vrot.slane %v2097_v24, 2 }
 0x6f6   :  { %v2105_v14 = vrot.slane %v2104_v51, 2  ;;  %v2119_v9 = vrot.slane %v2118_v22, 2 }
 0x6f7   :  { %v2099_v10 = vadd.f32 %v2098_v2, %v2097_v24  ;;  %v1329_v24 = vrot.slane %v14324_v40, %v1328_v32  ;;  %v14385_v2 = vpack.c.bf16 %v2160_v47, %v2159_v42  ;;  %v2180_v32 = vld [vmem:[%s16051_s13 + $0x1a8] sm:$0xff]  ;;  %v2165_v42 = vld [vmem:[%s16051_s13 + $0x130] sm:$0xff]  ;;  %v2166_v47 = vld [vmem:[%s16051_s13 + $0x138] sm:$0xff] }
 0x6f8   :  { %v2106_v29 = vadd.f32 %v2105_v14, %v2104_v51  ;;  %v2120_v30 = vadd.f32 %v2119_v9, %v2118_v22  ;;  %v2073_v51 = vadd.f32 %v2072_v39, %v2071_v25  ;;  %v2094_v14 = vadd.f32 %v2093_v45, %v2092_v5  ;;  %v2182_v45 = vld [vmem:[%s16051_s13 + $0x1b8] sm:$0xff] }
 0x6f9   :  { %v2100_v41 = vrot.slane %v2099_v10, 1  ;;  %v14387_v9 = vadd.f32 %v2046_v13, %v1329_v24  ;;  %v14396_v39 = vadd.f32 %v1329_v24, %v14182_v23  ;;  %v14399_v40 = vadd.f32 %v14359_v4, %v1329_v24  ;;  %v2163_v4 = vld [vmem:[%s16051_s13 + $0x120] sm:$0xff] }
 0x6fa   :  { %v2107_v44 = vrot.slane %v2106_v29, 1  ;;  %v2121_v12 = vrot.slane %v2120_v30, 1  ;;  %v14402_v13 = vpack.c.bf16 %v2162_v53, %v2161_v33  ;;  %v14405_v25 = vadd.f32 %v1329_v24, %v14174_v7 }
 0x6fb   :  { %v2101_v17 = vadd.f32 %v2100_v41, %v2099_v10  ;;  %v14389_v41 = vpack.c.bf16 %v2178_v0, %v2177_v52  ;;  %v2109_v5 = vadd.f32 %v14387_v9, %v14399_v40  ;;  %v14429_v52 = vpack.c.bf16 %v2166_v47, %v2165_v42  ;;  %v2171_v47 = vld [vmem:[%s16051_s13 + $0x160] sm:$0xff] }
 0x6fc   :  { %v2108_v18 = vadd.f32 %v2107_v44, %v2106_v29  ;;  %v2122_v50 = vadd.f32 %v2121_v12, %v2120_v30  ;;  %v2179_v29 = vld [vmem:[%s16051_s13 + $0x1a0] sm:$0xff]  ;;  %v2164_v30 = vld [vmem:[%s16051_s13 + $0x128] sm:$0xff]  ;;  %v2181_v44 = vld [vmem:[%s16051_s13 + $0x1b0] sm:$0xff]  ;;  %v2081_v33 = vadd.f32 %v14396_v39, %v14405_v25 }
 0x6fd   :  { %v2123_v10 = vadd.f32 %v2101_v17, %v2073_v51  ;;  %v14410_v23 = vpack.c.bf16 %v2180_v32, %v2179_v29  ;;  %v14419_v7 = vpack.c.bf16 %v2164_v30, %v2163_v4  ;;  %v2110_v12 = vrot.slane %v2109_v5, 4  ;;  %v2167_v51 = vld [vmem:[%s16051_s13 + $0x140] sm:$0xff]  ;;  %v2170_v4 = vld [vmem:[%s16051_s13 + $0x158] sm:$0xff] }
 0x6fe   :  { %v2124_v22 = vadd.f32 %v2108_v18, %v2080_v27  ;;  %v2126_v15 = vadd.f32 %v2122_v50, %v2094_v14  ;;  %v14422_v17 = vpack.c.bf16 %v2182_v45, %v2181_v44  ;;  %v2183_v27 = vld [vmem:[%s16051_s13 + $0x1c0] sm:$0xff]  ;;  %v2184_v18 = vld [vmem:[%s16051_s13 + $0x1c8] sm:$0xff]  ;;  %v2082_v50 = vrot.slane %v2081_v33, 4  ;;  %v2185_v14 = vld [vmem:[%s16051_s13 + $0x1d0] sm:$0xff] }
 0x6ff   :  { %v2111_v0 = vadd.f32 %v2110_v12, %v2109_v5  ;;  %v14432_v24 = vpack.c.bf16 %v2184_v18, %v2183_v27  ;;  %v2169_v5 = vld [vmem:[%s16051_s13 + $0x150] sm:$0xff]  ;;  %v2187_v30 = vld [vmem:[%s16051_s13 + $0x1e0] sm:$0xff]  ;;  %v2188_v44 = vld [vmem:[%s16051_s13 + $0x1e8] sm:$0xff] }
 0x700   :  { %2255 = vmatprep.mubr.f32.mxu0 %v2124_v22  ;;  %v2168_v22 = vld [vmem:[%s16051_s13 + $0x148] sm:$0xff]  ;;  %v2083_v53 = vadd.f32 %v2082_v50, %v2081_v33  ;;  %v14449_v33 = vpack.c.bf16 %v2170_v4, %v2169_v5  ;;  %v14452_v42 = vpack.c.bf16 %v2188_v44, %v2187_v30  ;;  %v2189_v18 = vld [vmem:[%s16051_s13 + $0x1f0] sm:$0xff]  ;;  %v2190_v50 = vld [vmem:[%s16051_s13 + $0x1f8] sm:$0xff] }
 0x701   :  { %2256 = vmatmul.mubr.f32.vlgmr.msra.gmra.mrb[14].mxu0 %v2123_v10  ;;  %v2186_v10 = vld [vmem:[%s16051_s13 + $0x1d8] sm:$0xff]  ;;  %v2112_v29 = vrot.slane %v2111_v0, 2  ;;  %v2172_v27 = vld [vmem:[%s16051_s13 + $0x168] sm:$0xff]  ;;  %v2173_v5 = vld [vmem:[%s16051_s13 + $0x170] sm:$0xff] }
 0x702   :  { %10667 = vmatpush3.bf16.msra.mxu0 %v14385_v2  ;;  %2325 = vmatprep.mubr.f32.mxu0 %v2126_v15  ;;  %v14439_v15 = vpack.c.bf16 %v2168_v22, %v2167_v51  ;;  %v14442_v32 = vpack.c.bf16 %v2186_v10, %v2185_v14  ;;  %v2084_v45 = vrot.slane %v2083_v53, 2  ;;  %v14459_v22 = vpack.c.bf16 %v2172_v27, %v2171_v47  ;;  %v2333_v47 = vld [vmem:[#allocation10 + $0x8] sm:$0xff] }
 0x703   :  { %10669 = vmatprep.subr.bf16.mxu0 %v14389_v41  ;;  %v2113_v12 = vadd.f32 %v2112_v29, %v2111_v0  ;;  %v14462_v10 = vpack.c.bf16 %v2190_v50, %v2189_v18  ;;  %v2174_v0 = vld [vmem:[%s16051_s13 + $0x178] sm:$0xff]  ;;  %v2335_v18 = vld [vmem:[#allocation10 + $0x18] sm:$0xff] }
 0x704   :  { %v2085_v51 = vadd.f32 %v2084_v45, %v2083_v53  ;;  %v14467_v4 = vpack.c.bf16 %v2174_v0, %v2173_v5  ;;  %v16056_v45 = vmov 0.0   ;;  %v2337_v27 = vld [vmem:[#allocation10 + $0x28] sm:$0xff]  ;;  %v14474_v5 = vpack.c.bf16 %v2339_v37, %v2335_v18  ;;  %v2347_v37 = vld [vmem:[#allocation10 + $0x78] sm:$0xff]  ;;  %v2342_v18 = vld [vmem:[#allocation10 + $0x50] sm:$0xff] }
 0x705   :  { %v2114_v14 = vrot.slane %v2113_v12, 1  ;;  %v14472_v50 = vpack.c.bf16 %v2337_v27, %v2333_v47  ;;  %v14476_v0 = vpack.c.bf16 %v2336_v34, %v2332_v6  ;;  %v2340_v34 = vld [vmem:[#allocation10 + $0x40] sm:$0xff] }
 0x706   :  { %10671 = vmatpush3.bf16.msra.mxu0 %v14402_v13  ;;  %v2086_v29 = vrot.slane %v2085_v51, 1  ;;  %10705 = vmatprep.subr.bf16.mxu1 %v14474_v5  ;;  %v2344_v6 = vld [vmem:[#allocation10 + $0x60] sm:$0xff] }
 0x707   :  { %10673 = vmatprep.subr.bf16.mxu0 %v14410_v23  ;;  %v2115_v30 = vadd.f32 %v2114_v14, %v2113_v12  ;;  %v2334_v12 = vld [vmem:[#allocation10 + $0x10] sm:$0xff]  ;;  %v14488_v27 = vpack.c.bf16 %v2344_v6, %v2340_v34 }
 0x708   :  { %v2087_v53 = vadd.f32 %v2086_v29, %v2085_v51  ;;  %v2338_v51 = vld [vmem:[#allocation10 + $0x30] sm:$0xff]  ;;  %v2341_v29 = vld [vmem:[#allocation10 + $0x48] sm:$0xff] }
 0x709   :  { %v14479_v14 = vpack.c.bf16 %v2338_v51, %v2334_v12  ;;  %v2346_v12 = vld [vmem:[#allocation10 + $0x70] sm:$0xff] }
 0x70a   :  { %10675 = vmatpush3.bf16.msra.mxu0 %v14419_v7  ;;  %v2125_v44 = vadd.f32 %v2115_v30, %v2087_v53  ;;  %v2345_v30 = vld [vmem:[#allocation10 + $0x68] sm:$0xff]  ;;  %v2343_v53 = vld [vmem:[#allocation10 + $0x58] sm:$0xff]  ;;  %v14491_v51 = vpack.c.bf16 %v2346_v12, %v2342_v18 }
 0x70b   :  { %10677 = vmatprep.subr.bf16.mxu0 %v14422_v17  ;;  %16057 = vst [vmem:[#allocation91_spill] sm:$0xff] %v14479_v14  ;;  %10707 = vmatpush1.bf16.msra.mxu1 %v14479_v14  ;;  %v14486_v47 = vpack.c.bf16 %v2347_v37, %v2343_v53 }
 0x70d   :  { %10709 = vmatprep.subr.bf16.mxu1 %v14486_v47 }
 0x70e   :  { %10679 = vmatpush3.bf16.msra.mxu0 %v14429_v52 }
 0x70f   :  { %10681 = vmatprep.subr.bf16.mxu0 %v14432_v24  ;;  %10711 = vmatpush1.bf16.msra.mxu1 %v14491_v51 }
 0x710   :  { %10745 = vmatprep.subr.bf16.mxu1 %v14315_v28 }
 0x712   :  { %10683 = vmatpush3.bf16.msra.mxu0 %v14439_v15 }
 0x713   :  { %10685 = vmatprep.subr.bf16.mxu0 %v14442_v32 }
 0x716   :  { %10687 = vmatpush3.bf16.msra.mxu0 %v14449_v33 }
 0x717   :  { %10689 = vmatprep.subr.bf16.mxu0 %v14452_v42 }
 0x71a   :  { %10691 = vmatpush3.bf16.msra.mxu0 %v14459_v22 }
 0x71b   :  { %10693 = vmatprep.subr.bf16.mxu0 %v14462_v10 }
 0x71e   :  { %10695 = vmatpush3.bf16.msra.mxu0 %v14467_v4 }
 0x71f   :  { %10697 = vmatprep.subr.bf16.mxu0 %v14472_v50 }
 0x721   :  { %2326 = vmatmul.mubr.f32.vlgmr.msra.gmra.mrb[16].mxu0 %v2125_v44  ;;  %v14484_v44 = vpack.c.bf16 %v2345_v30, %v2341_v29 }
 0x722   :  { %2415 = vmatprep.mubr.f32.mxu0 %v16056_v45  ;;  %10699 = vmatpush1.bf16.msra.mxu0 %v14476_v0 }
 0x723   :  { %16058 = vst [vmem:[#allocation92_spill] sm:$0xff] %v14484_v44  ;;  %10701 = vmatprep.subr.bf16.mxu0 %v14484_v44 }
 0x726   :  { %10703 = vmatpush1.bf16.msra.mxu0 %v14488_v27 }
 0x727   :  { %10713 = vmatprep.subr.bf16.mxu0 %v14228_v48 }
 0x7d4   :  { %v9795_v29 = vpop.f32.mrb[14].mxu0 }
 0x7d5   :  { %v9796_v30 = vpop.f32.mrb[15].mxu0 }
 0x7d6   :  { %v9797_v53 = vadd.f32 %v9796_v30, %v9795_v29 }
 0x7f4   :  { %v9830_v37 = vpop.f32.mrb[16].mxu0 }
 0x7f5   :  { %v9831_v34 = vpop.f32.mrb[17].mxu0 }
 0x7f6   :  { %v9832_v6 = vadd.f32 %v9831_v34, %v9830_v37 }
 0x7f8   :  { %v2328_v14 = vadd.f32 %v9832_v6, %v9797_v53 }
 0x7fa   :  { %v14498_v44 = vmul.f32 0.001953125, %v2328_v14 }
 0x7fc   :  { %9692 = vmatmul.mubr.msk.f32.vlgmr.msra.gmra.mrb[18].mxu0 %vm528_vm0, %v14498_v44  ;;  %9693 = vmatmul.mubr.msk.f32.vlgmr.msra.gmra.mrb[14].mxu1 %vm528_vm0, %v14498_v44 }
 0x7fd   :  { %10715 = vmatpush3.bf16.msra.mxu0 %v14235_v54  ;;  %10747 = vmatpush3.bf16.msra.mxu1 %v14385_v2 }
 0x7fe   :  { %10717 = vmatprep.subr.bf16.mxu0 %v14237_v56  ;;  %10749 = vmatprep.subr.bf16.mxu1 %v14389_v41 }
 0x801   :  { %10719 = vmatpush3.bf16.msra.mxu0 %v14246_v59  ;;  %10751 = vmatpush3.bf16.msra.mxu1 %v14402_v13 }
 0x802   :  { %10721 = vmatprep.subr.bf16.mxu0 %v14255_v62  ;;  %10753 = vmatprep.subr.bf16.mxu1 %v14410_v23 }
 0x805   :  { %10723 = vmatpush3.bf16.msra.mxu0 %v14259_v1  ;;  %10755 = vmatpush3.bf16.msra.mxu1 %v14419_v7 }
 0x806   :  { %10725 = vmatprep.subr.bf16.mxu0 %v14265_v8  ;;  %10757 = vmatprep.subr.bf16.mxu1 %v14422_v17 }
 0x809   :  { %10727 = vmatpush3.bf16.msra.mxu0 %v14269_v11  ;;  %10759 = vmatpush3.bf16.msra.mxu1 %v14429_v52 }
 0x80a   :  { %10729 = vmatprep.subr.bf16.mxu0 %v14275_v16  ;;  %10761 = vmatprep.subr.bf16.mxu1 %v14432_v24 }
 0x80d   :  { %10731 = vmatpush3.bf16.msra.mxu0 %v14279_v19  ;;  %10763 = vmatpush3.bf16.msra.mxu1 %v14439_v15 }
 0x80e   :  { %10733 = vmatprep.subr.bf16.mxu0 %v14285_v26  ;;  %10765 = vmatprep.subr.bf16.mxu1 %v14442_v32 }
 0x811   :  { %10735 = vmatpush3.bf16.msra.mxu0 %v14289_v3  ;;  %10767 = vmatpush3.bf16.msra.mxu1 %v14449_v33 }
 0x812   :  { %10737 = vmatprep.subr.bf16.mxu0 %v14295_v35  ;;  %10769 = vmatprep.subr.bf16.mxu1 %v14452_v42 }
 0x815   :  { %10739 = vmatpush3.bf16.msra.mxu0 %v14299_v38  ;;  %10771 = vmatpush3.bf16.msra.mxu1 %v14459_v22 }
 0x816   :  { %10741 = vmatprep.subr.bf16.mxu0 %v14305_v43  ;;  %10773 = vmatprep.subr.bf16.mxu1 %v14462_v10 }
 0x819   :  { %10743 = vmatpush3.bf16.msra.mxu0 %v14309_v46  ;;  %10775 = vmatpush3.bf16.msra.mxu1 %v14467_v4 }
 0x81a   :  { %10777 = vmatprep.subr.bf16.mxu0 %v14472_v50  ;;  %10785 = vmatprep.subr.bf16.mxu1 %v14474_v5 }
 0x8cf   :  { %v2417_v48 = vpop.f32.mrb[18].mxu0  ;;  %v2488_v54 = vpop.f32.mrb[14].mxu1 }
 0x8d0   :  { %v2496_v56 = vrot.slane %v2417_v48, %v14327_v49  ;;  %v2504_v59 = vrot.slane %v2488_v54, %v14327_v49  ;;  %v2419_v62 = vpop.f32.mrb[19].mxu0  ;;  %v2490_v1 = vpop.f32.mrb[15].mxu1 }
 0x8d1   :  { %v2500_v8 = vrot.slane %v2419_v62, %v14327_v49  ;;  %v2508_v11 = vrot.slane %v2490_v1, %v14327_v49 }
 0x8d2   :  { %v2509_v16 = vsub.f32 %v14348_v61, %v2496_v56  ;;  %v2513_v19 = vsub.f32 %v14339_v57, %v2496_v56  ;;  %v2553_v26 = vsub.f32 %v14361_v20, %v2496_v56  ;;  %v2557_v3 = vsub.f32 %v14363_v21, %v2496_v56 }
 0x8d3   :  { %v2511_v35 = vsub.f32 %v14405_v25, %v2504_v59  ;;  %v2515_v38 = vsub.f32 %v14396_v39, %v2504_v59  ;;  %v2555_v43 = vsub.f32 %v14399_v40, %v2504_v59  ;;  %v2559_v46 = vsub.f32 %v14387_v9, %v2504_v59 }
 0x8d4   :  { %v2517_v28 = vmul.f32 %v2509_v16, %v2509_v16  ;;  %v2521_v2 = vmul.f32 %v2513_v19, %v2513_v19  ;;  %v2561_v41 = vmul.f32 %v2553_v26, %v2553_v26  ;;  %v2565_v13 = vmul.f32 %v2557_v3, %v2557_v3  ;;  %v16060_v3 = vld [vmem:[#allocation90_spill] sm:$0xff] }
 0x8d5   :  { %v2519_v23 = vmul.f32 %v2511_v35, %v2511_v35  ;;  %v2523_v7 = vmul.f32 %v2515_v38, %v2515_v38  ;;  %v2563_v17 = vmul.f32 %v2555_v43, %v2555_v43  ;;  %v2567_v52 = vmul.f32 %v2559_v46, %v2559_v46 }
 0x8d6   :  { %v2525_v24 = vadd.f32 %v2521_v2, %v2517_v28  ;;  %v2569_v15 = vadd.f32 %v2565_v13, %v2561_v41  ;;  %v2510_v32 = vsub.f32 %v14345_v60, %v2500_v8  ;;  %v2514_v33 = vsub.f32 %v14336_v55, %v2500_v8 }
 0x8d7   :  { %v2539_v42 = vadd.f32 %v2523_v7, %v2519_v23  ;;  %v2583_v22 = vadd.f32 %v2567_v52, %v2563_v17  ;;  %v2554_v10 = vsub.f32 %v14365_v31, %v2500_v8  ;;  %v2558_v4 = vsub.f32 %v14369_v36, %v2500_v8  ;;  %v16059_v8 = vld [vmem:[#allocation89_spill] sm:$0xff] }
 0x8d8   :  { %v2526_v14 = vrot.slane %v2525_v24, 4  ;;  %v2570_v18 = vrot.slane %v2569_v15, 4  ;;  %v2518_v12 = vmul.f32 %v2510_v32, %v2510_v32  ;;  %v2522_v29 = vmul.f32 %v2514_v33, %v2514_v33 }
 0x8d9   :  { %v2540_v30 = vrot.slane %v2539_v42, 4  ;;  %v2584_v53 = vrot.slane %v2583_v22, 4  ;;  %v2562_v37 = vmul.f32 %v2554_v10, %v2554_v10  ;;  %v2566_v34 = vmul.f32 %v2558_v4, %v2558_v4 }
 0x8da   :  { %v2527_v6 = vadd.f32 %v2526_v14, %v2525_v24  ;;  %v2571_v48 = vadd.f32 %v2570_v18, %v2569_v15  ;;  %v2532_v54 = vadd.f32 %v2522_v29, %v2518_v12  ;;  %v2512_v56 = vsub.f32 %v14351_v63, %v2508_v11 }
 0x8db   :  { %v2541_v59 = vadd.f32 %v2540_v30, %v2539_v42  ;;  %v2585_v62 = vadd.f32 %v2584_v53, %v2583_v22  ;;  %v2576_v1 = vadd.f32 %v2566_v34, %v2562_v37  ;;  %v2516_v16 = vsub.f32 %v14342_v58, %v2508_v11 }
 0x8dc   :  { %v2520_v19 = vmul.f32 %v2512_v56, %v2512_v56  ;;  %v2556_v26 = vsub.f32 %v16059_v8, %v2508_v11  ;;  %v2560_v35 = vsub.f32 %v16060_v3, %v2508_v11  ;;  %v2533_v38 = vrot.slane %v2532_v54, 4 }
 0x8dd   :  { %v2524_v43 = vmul.f32 %v2516_v16, %v2516_v16  ;;  %v2577_v46 = vrot.slane %v2576_v1, 4  ;;  %v2528_v28 = vrot.slane %v2527_v6, 2  ;;  %v2572_v2 = vrot.slane %v2571_v48, 2 }
 0x8de   :  { %v2564_v41 = vmul.f32 %v2556_v26, %v2556_v26  ;;  %v2568_v13 = vmul.f32 %v2560_v35, %v2560_v35  ;;  %v2534_v23 = vadd.f32 %v2533_v38, %v2532_v54  ;;  %v2542_v7 = vrot.slane %v2541_v59, 2 }
 0x8df   :  { %v2546_v17 = vadd.f32 %v2524_v43, %v2520_v19  ;;  %v2578_v52 = vadd.f32 %v2577_v46, %v2576_v1  ;;  %v2529_v24 = vadd.f32 %v2528_v28, %v2527_v6  ;;  %v2573_v15 = vadd.f32 %v2572_v2, %v2571_v48 }
 0x8e0   :  { %v2590_v32 = vadd.f32 %v2568_v13, %v2564_v41  ;;  %v2535_v33 = vrot.slane %v2534_v23, 2  ;;  %v2586_v42 = vrot.slane %v2585_v62, 2  ;;  %v2543_v30 = vadd.f32 %v2542_v7, %v2541_v59 }
 0x8e1   :  { %v2579_v22 = vrot.slane %v2578_v52, 2  ;;  %v2547_v10 = vrot.slane %v2546_v17, 4  ;;  %v2530_v14 = vrot.slane %v2529_v24, 1  ;;  %v2574_v18 = vrot.slane %v2573_v15, 1 }
 0x8e2   :  { %v2536_v4 = vadd.f32 %v2535_v33, %v2534_v23  ;;  %v2591_v11 = vrot.slane %v2590_v32, 4  ;;  %v2587_v53 = vadd.f32 %v2586_v42, %v2585_v62  ;;  %v2544_v35 = vrot.slane %v2543_v30, 1 }
 0x8e3   :  { %v2580_v12 = vadd.f32 %v2579_v22, %v2578_v52  ;;  %v2548_v29 = vadd.f32 %v2547_v10, %v2546_v17  ;;  %v2531_v48 = vadd.f32 %v2530_v14, %v2529_v24  ;;  %v2575_v16 = vadd.f32 %v2574_v18, %v2573_v15  ;;  %v16061_v17 = vld [vmem:[#allocation92_spill] sm:$0xff]  ;;  %v16062_v24 = vld [vmem:[#allocation91_spill] sm:$0xff]  ;;  %v2742_v18 = vld [vmem:[#allocation11] sm:$0x1] }
 0x8e4   :  { %v2537_v37 = vrot.slane %v2536_v4, 1  ;;  %v2592_v34 = vadd.f32 %v2591_v11, %v2590_v32  ;;  %v2588_v38 = vrot.slane %v2587_v53, 1  ;;  %v2545_v62 = vadd.f32 %v2544_v35, %v2543_v30 }
 0x8e5   :  { %v2581_v54 = vrot.slane %v2580_v12, 1  ;;  %v2549_v56 = vrot.slane %v2548_v29, 2  ;;  %v2597_v41 = vadd.f32 %v2575_v16, %v2531_v48  ;;  %v3580_v48 = vld [vmem:[#allocation16 + $0x430] sm:$0xff] }
 0x8e6   :  { %v2538_v1 = vadd.f32 %v2537_v37, %v2536_v4  ;;  %v2593_v6 = vrot.slane %v2592_v34, 2  ;;  %v2589_v13 = vadd.f32 %v2588_v38, %v2587_v53  ;;  %v3577_v53 = vld [vmem:[#allocation16 + $0x418] sm:$0xff] }
 0x8e7   :  { %v2582_v19 = vadd.f32 %v2581_v54, %v2580_v12  ;;  %v2550_v26 = vadd.f32 %v2549_v56, %v2548_v29  ;;  %v3574_v54 = vld [vmem:[#allocation16 + $0x400] sm:$0xff]  ;;  %v3576_v56 = vld [vmem:[#allocation16 + $0x410] sm:$0xff] }
 0x8e8   :  { %v2594_v43 = vadd.f32 %v2593_v6, %v2592_v34  ;;  %v2599_v52 = vadd.f32 %v2589_v13, %v2545_v62  ;;  %v3578_v6 = vld [vmem:[#allocation16 + $0x420] sm:$0xff]  ;;  %v14587_v38 = vpack.c.bf16 %v3576_v56, %v3574_v54 }
 0x8e9   :  { %v2598_v46 = vadd.f32 %v2582_v19, %v2538_v1  ;;  %v2551_v28 = vrot.slane %v2550_v26, 1  ;;  %v3581_v1 = vld [vmem:[#allocation16 + $0x438] sm:$0xff] }
 0x8ea   :  { %v2595_v2 = vrot.slane %v2594_v43, 1 }
 0x8eb   :  { %2665 = vmatprep.mubr.f32.mxu0 %v2598_v46  ;;  %v2552_v59 = vadd.f32 %v2551_v28, %v2550_v26  ;;  %v14591_v46 = vpack.c.bf16 %v3580_v48, %v3578_v6 }
 0x8ec   :  { %v2596_v23 = vadd.f32 %v2595_v2, %v2594_v43  ;;  %2666 = vmatmul.mubr.f32.vlgmr.msra.gmra.mrb[20].mxu0 %v2597_v41 }
 0x8ed   :  { %10779 = vmatpush1.bf16.msra.mxu0 %v14476_v0  ;;  %2816 = vmatprep.mubr.f32.mxu0 %v16056_v45 }
 0x8ee   :  { %v2600_v7 = vadd.f32 %v2596_v23, %v2552_v59  ;;  %10781 = vmatprep.subr.bf16.mxu0 %v16061_v17 }
 0x8f0   :  { %2735 = vmatprep.mubr.f32.mxu1 %v2600_v7 }
 0x8f1   :  { %2736 = vmatmul.mubr.f32.vlgmr.msra.gmra.mrb[16].mxu1 %v2599_v52  ;;  %10783 = vmatpush1.bf16.msra.mxu0 %v14488_v27 }
 0x8f2   :  { %10787 = vmatpush1.bf16.msra.mxu1 %v16062_v24  ;;  %2887 = vmatprep.mubr.f32.mxu1 %v16056_v45 }
 0x8f3   :  { %10789 = vmatprep.subr.bf16.mxu1 %v14486_v47  ;;  %10793 = vmatprep.subr.bf16.mxu0 %v14472_v50 }
 0x8f6   :  { %10791 = vmatpush1.bf16.msra.mxu1 %v14491_v51 }
 0x8f7   :  { %10801 = vmatprep.subr.bf16.mxu1 %v14474_v5  ;;  %v2746_v5 = vld [vmem:[#allocation13] sm:$0x1] }
 0x9bf   :  { %v9865_v15 = vpop.f32.mrb[20].mxu0 }
 0x9c0   :  { %v9866_v32 = vpop.f32.mrb[21].mxu0 }
 0x9c1   :  { %v9867_v33 = vadd.f32 %v9866_v32, %v9865_v15 }
 0x9c4   :  { %v9900_v42 = vpop.f32.mrb[16].mxu1 }
 0x9c5   :  { %v9901_v22 = vpop.f32.mrb[17].mxu1 }
 0x9c6   :  { %v9902_v10 = vadd.f32 %v9901_v22, %v9900_v42 }
 0x9c8   :  { %v2738_v4 = vadd.f32 %v9902_v10, %v9867_v33 }
 0x9ca   :  { %v2741_v11 = vmul.f32 0.001953125, %v2738_v4 }
 0x9cc   :  { %v2743_v14 = vadd.f32 1e-05, %v2741_v11 }
 0x9ce   :  { %12826 = vrsqrt.f32 %v2743_v14 }
 0x9d8   :  { %v12827_v12 = vpop.eup %12826 }
 0x9d9   :  { %v2745_v29 = vmul.f32 %v12827_v12, %v2742_v18 }
 0x9db   :  { %9694 = vmatmul.mubr.msk.f32.vlgmr.msra.gmra.mrb[22].mxu0 %vm528_vm0, %v2745_v29  ;;  %9695 = vmatmul.mubr.msk.f32.vlgmr.msra.gmra.mrb[18].mxu1 %vm528_vm0, %v2745_v29  ;;  %v2747_v50 = vmul.f32 %v2745_v29, %v14498_v44 }
 0x9dc   :  { %10795 = vmatpush1.bf16.msra.mxu0 %v14476_v0  ;;  %10803 = vmatpush1.bf16.msra.mxu1 %v16062_v24 }
 0x9dd   :  { %10797 = vmatprep.subr.bf16.mxu0 %v16061_v17  ;;  %10805 = vmatprep.subr.bf16.mxu1 %v14486_v47  ;;  %v2748_v30 = vsub.f32 %v2746_v5, %v2747_v50  ;;  %v3575_v47 = vld [vmem:[#allocation16 + $0x408] sm:$0xff] }
 0x9de   :  { %2961 = vmatprep.mubr.f32.mxu0 %v16056_v45  ;;  %3032 = vmatprep.mubr.f32.mxu1 %v16056_v45  ;;  %v14584_v26 = vpack.c.bf16 %v3577_v53, %v3575_v47 }
 0x9e0   :  { %10799 = vmatpush1.bf16.msra.mxu0 %v14488_v27  ;;  %10807 = vmatpush1.bf16.msra.mxu1 %v14491_v51  ;;  %v3579_v27 = vld [vmem:[#allocation16 + $0x428] sm:$0xff] }
 0x9e1   :  { %v14589_v43 = vpack.c.bf16 %v3581_v1, %v3579_v27 }
 0x9e3   :  { %9696 = vmatmul.mubr.msk.f32.vlgmr.msra.gmra.mrb[24].mxu0 %vm528_vm0, %v2748_v30  ;;  %9697 = vmatmul.mubr.msk.f32.vlgmr.msra.gmra.mrb[20].mxu1 %vm528_vm0, %v2748_v30 }
 0x9e4   :  { %3220 = vmatprep.mubr.f32.mxu1 %v16056_v45  ;;  %3495 = vmatprep.mubr.f32.mxu0 %v16056_v45 }
 0xaae   :  { %v2818_v0 = vpop.f32.mrb[22].mxu0  ;;  %v2889_v44 = vpop.f32.mrb[18].mxu1 }
 0xaaf   :  { %v2820_v37 = vpop.f32.mrb[23].mxu0  ;;  %v2891_v34 = vpop.f32.mrb[19].mxu1  ;;  %v3042_v51 = vrot.slane %v2818_v0, %v14327_v49  ;;  %v3050_v16 = vrot.slane %v2889_v44, %v14327_v49 }
 0xab0   :  { %v3046_v19 = vrot.slane %v2820_v37, %v14327_v49  ;;  %v3054_v35 = vrot.slane %v2891_v34, %v14327_v49 }
 0xab1   :  { %v3055_v28 = vmul.f32 %v3042_v51, %v14348_v61  ;;  %v3059_v2 = vmul.f32 %v3042_v51, %v14339_v57  ;;  %v3111_v41 = vmul.f32 %v3042_v51, %v14361_v20  ;;  %v3115_v59 = vmul.f32 %v3042_v51, %v14363_v21 }
 0xab2   :  { %v3057_v62 = vmul.f32 %v3050_v16, %v14405_v25  ;;  %v3061_v13 = vmul.f32 %v3050_v16, %v14396_v39  ;;  %v3113_v23 = vmul.f32 %v3050_v16, %v14399_v40  ;;  %v3117_v7 = vmul.f32 %v3050_v16, %v14387_v9 }
 0xab3   :  { %v3056_v17 = vmul.f32 %v3046_v19, %v14345_v60  ;;  %v3060_v52 = vmul.f32 %v3046_v19, %v14336_v55  ;;  %v3112_v61 = vmul.f32 %v3046_v19, %v14365_v31  ;;  %v3116_v57 = vmul.f32 %v3046_v19, %v14369_v36  ;;  %v14634_v19 = vld [vmem:[#allocation14] sm:$0xff] }
 0xab4   :  { %v3058_v21 = vmul.f32 %v3054_v35, %v14351_v63  ;;  %v3062_v25 = vmul.f32 %v3054_v35, %v14342_v58  ;;  %v3114_v60 = vmul.f32 %v3054_v35, %v16059_v8  ;;  %v3118_v55 = vmul.f32 %v3054_v35, %v16060_v3 }
 0xab6   :  { %v2963_v24 = vpop.f32.mrb[24].mxu0  ;;  %v3034_v20 = vpop.f32.mrb[20].mxu1 }
 0xab7   :  { %v3066_v39 = vrot.slane %v2963_v24, %v14327_v49  ;;  %v3074_v40 = vrot.slane %v3034_v20, %v14327_v49  ;;  %v2965_v15 = vpop.f32.mrb[25].mxu0  ;;  %v3036_v9 = vpop.f32.mrb[21].mxu1  ;;  %v3585_v24 = vld [vmem:[#allocation16 + $0x458] sm:$0xff] }
 0xab8   :  { %v3070_v31 = vrot.slane %v2965_v15, %v14327_v49  ;;  %v3078_v36 = vrot.slane %v3036_v9, %v14327_v49 }
 0xab9   :  { %v3079_v32 = vadd.f32 %v3066_v39, %v3055_v28  ;;  %v3083_v33 = vadd.f32 %v3066_v39, %v3059_v2  ;;  %v14613_v42 = vadd.f32 %v3111_v41, %v3066_v39  ;;  %v14615_v63 = vadd.f32 %v3115_v59, %v3066_v39  ;;  %v14636_v41 = vld [vmem:[#allocation14 + $0x8] sm:$0xff] }
 0xaba   :  { %v3081_v58 = vadd.f32 %v3074_v40, %v3057_v62  ;;  %v3085_v22 = vadd.f32 %v3074_v40, %v3061_v13  ;;  %v14617_v10 = vadd.f32 %v3113_v23, %v3074_v40  ;;  %v14619_v4 = vadd.f32 %v3117_v7, %v3074_v40 }
 0xabb   :  { %v3080_v11 = vadd.f32 %v3070_v31, %v3056_v17  ;;  %v3084_v8 = vadd.f32 %v3070_v31, %v3060_v52  ;;  %v3120_v14 = vadd.f32 %v3112_v61, %v3070_v31  ;;  %v3124_v3 = vadd.f32 %v3116_v57, %v3070_v31  ;;  %v3583_v17 = vld [vmem:[#allocation16 + $0x448] sm:$0xff] }
 0xabc   :  { %v3082_v18 = vadd.f32 %v3078_v36, %v3058_v21  ;;  %v3086_v12 = vadd.f32 %v3078_v36, %v3062_v25  ;;  %v14621_v29 = vadd.f32 %v3114_v60, %v3078_v36  ;;  %v14623_v50 = vadd.f32 %v3118_v55, %v3078_v36 }
 0xabd   :  { %vm3088_vm2 = vcmp.ge.f32.partialorder %v3080_v11, 0.0  ;;  %vm3092_vm3 = vcmp.ge.f32.partialorder %v3084_v8, 0.0  ;;  %v3096_v5 = vmul.f32 0.01, %v3080_v11  ;;  %v3100_v30 = vmul.f32 0.01, %v3084_v8 }
 0xabe   :  { %vm3087_vm4 = vcmp.ge.f32.partialorder %v3079_v32, 0.0  ;;  %vm3091_vm5 = vcmp.ge.f32.partialorder %v3083_v33, 0.0  ;;  %v3095_v0 = vmul.f32 0.01, %v3079_v32  ;;  %v3099_v44 = vmul.f32 0.01, %v3083_v33 }
 0xabf   :  { %v3104_v47 = vsel %vm3088_vm2, %v3080_v11, %v3096_v5  ;;  %v3108_v53 = vsel %vm3092_vm3, %v3084_v8, %v3100_v30  ;;  %vm3090_vm6 = vcmp.ge.f32.partialorder %v3082_v18, 0.0  ;;  %vm3094_vm7 = vcmp.ge.f32.partialorder %v3086_v12, 0.0  ;;  %v3590_v5 = vld [vmem:[#allocation16 + $0x480] sm:$0xff]  ;;  %v3592_v30 = vld [vmem:[#allocation16 + $0x490] sm:$0xff] }
 0xac0   :  { %v14625_v37 = vpack.c.bf16 %v3108_v53, %v3104_v47  ;;  %v3103_v34 = vsel %vm3087_vm4, %v3079_v32, %v3095_v0  ;;  %v3107_v54 = vsel %vm3091_vm5, %v3083_v33, %v3099_v44  ;;  %v3098_v56 = vmul.f32 0.01, %v3082_v18  ;;  %v3582_v33 = vld [vmem:[#allocation16 + $0x440] sm:$0xff]  ;;  %v3595_v0 = vld [vmem:[#allocation16 + $0x4a8] sm:$0xff]  ;;  %v3597_v44 = vld [vmem:[#allocation16 + $0x4b8] sm:$0xff] }
 0xac1   :  { %v14627_v27 = vpack.c.bf16 %v3107_v54, %v3103_v34  ;;  %v3102_v51 = vmul.f32 0.01, %v3086_v12  ;;  %vm3089_vm8 = vcmp.ge.f32.partialorder %v3081_v58, 0.0  ;;  %vm3093_vm9 = vcmp.ge.f32.partialorder %v3085_v22, 0.0  ;;  %v3596_v34 = vld [vmem:[#allocation16 + $0x4b0] sm:$0xff]  ;;  %v3599_v54 = vld [vmem:[#allocation16 + $0x4c8] sm:$0xff] }
 0xac2   :  { %10809 = vmatprep.subr.bf16.mxu1 %v14625_v37  ;;  %10817 = vmatprep.subr.bf16.mxu0 %v14625_v37  ;;  %v3106_v1 = vsel %vm3090_vm6, %v3082_v18, %v3098_v56  ;;  %v3097_v6 = vmul.f32 0.01, %v3081_v58  ;;  %v3101_v48 = vmul.f32 0.01, %v3085_v22  ;;  %vm3128_vm10 = vcmp.ge.f32.partialorder %v3120_v14, 0.0  ;;  %v3591_v18 = vld [vmem:[#allocation16 + $0x488] sm:$0xff] }
 0xac3   :  { %10811 = vmatpush1.bf16.msra.mxu1 %v14627_v27  ;;  %10819 = vmatpush1.bf16.msra.mxu0 %v14627_v27  ;;  %v3110_v16 = vsel %vm3094_vm7, %v3086_v12, %v3102_v51  ;;  %vm3132_vm11 = vcmp.ge.f32.partialorder %v3124_v3, 0.0  ;;  %v3136_v35 = vmul.f32 0.01, %v3120_v14  ;;  %v3140_v28 = vmul.f32 0.01, %v3124_v3  ;;  %v3593_v12 = vld [vmem:[#allocation16 + $0x498] sm:$0xff] }
 0xac4   :  { %v10812_v2 = vpack.c.bf16 %v3110_v16, %v3106_v1  ;;  %v3105_v59 = vsel %vm3089_vm8, %v3081_v58, %v3097_v6  ;;  %v3109_v62 = vsel %vm3093_vm9, %v3085_v22, %v3101_v48  ;;  %vm3127_vm12 = vcmp.ge.f32.partialorder %v14613_v42, 0.0  ;;  %10825 = vmatprep.subr.bf16.mxu0 %v14584_v26  ;;  %v3587_v58 = vld [vmem:[#allocation16 + $0x468] sm:$0xff]  ;;  %v3589_v22 = vld [vmem:[#allocation16 + $0x478] sm:$0xff]  ;;  %v3598_v1 = vld [vmem:[#allocation16 + $0x4c0] sm:$0xff] }
 0xac5   :  { %v10814_v13 = vpack.c.bf16 %v3109_v62, %v3105_v59  ;;  %v3144_v23 = vsel %vm3128_vm10, %v3120_v14, %v3136_v35  ;;  %v3148_v7 = vsel %vm3132_vm11, %v3124_v3, %v3140_v28  ;;  %vm3131_vm13 = vcmp.ge.f32.partialorder %v14615_v63, 0.0  ;;  %v3586_v14 = vld [vmem:[#allocation16 + $0x460] sm:$0xff]  ;;  %v3588_v3 = vld [vmem:[#allocation16 + $0x470] sm:$0xff]  ;;  %v3601_v56 = vld [vmem:[#allocation16 + $0x4d8] sm:$0xff] }
 0xac6   :  { %10813 = vmatprep.subr.bf16.mxu1 %v10812_v2  ;;  %9698 = vmatmul.mubr.msk.f32.vlgmr.msra.gmra.mrb[22].mxu1 %vm3152_vm1, %v14634_v19  ;;  %v14645_v52 = vpack.c.bf16 %v3148_v7, %v3144_v23  ;;  %v3135_v61 = vmul.f32 0.01, %v14613_v42  ;;  %v3139_v57 = vmul.f32 0.01, %v14615_v63  ;;  %vm3130_vm14 = vcmp.ge.f32.partialorder %v14621_v29, 0.0  ;;  %v3600_v6 = vld [vmem:[#allocation16 + $0x4d0] sm:$0xff] }
 0xac7   :  { %9700 = vmatmul.mubr.msk.f32.vlgmr.msra.gmra.mrb[26].mxu0 %vm3152_vm1, %v14636_v41  ;;  %10815 = vmatpush1.bf16.msra.mxu1 %v10814_v13  ;;  %vm3134_vm15 = vcmp.ge.f32.partialorder %v14623_v50, 0.0  ;;  %v3138_v20 = vmul.f32 0.01, %v14621_v29  ;;  %v3142_v21 = vmul.f32 0.01, %v14623_v50  ;;  %vm3129_vm2 = vcmp.ge.f32.partialorder %v14617_v10, 0.0 }
 0xac8   :  { %10821 = vmatprep.subr.bf16.mxu1 %v10812_v2  ;;  %3291 = vmatprep.mubr.f32.mxu1 %v16056_v45  ;;  %v3143_v25 = vsel %vm3127_vm12, %v14613_v42, %v3135_v61  ;;  %v3147_v39 = vsel %vm3131_vm13, %v14615_v63, %v3139_v57  ;;  %vm3133_vm3 = vcmp.ge.f32.partialorder %v14619_v4, 0.0  ;;  %v3137_v40 = vmul.f32 0.01, %v14617_v10  ;;  %v3584_v42 = vld [vmem:[#allocation16 + $0x450] sm:$0xff]  ;;  %v3603_v48 = vld [vmem:[#allocation16 + $0x4e8] sm:$0xff]  ;;  %v3605_v16 = vld [vmem:[#allocation16 + $0x4f8] sm:$0xff] }
 0xac9   :  { %v14665_v15 = vpack.c.bf16 %v3147_v39, %v3143_v25  ;;  %v3146_v9 = vsel %vm3130_vm14, %v14621_v29, %v3138_v20  ;;  %v3150_v60 = vsel %vm3134_vm15, %v14623_v50, %v3142_v21  ;;  %v3141_v55 = vmul.f32 0.01, %v14619_v4  ;;  %10827 = vmatpush1.bf16.msra.mxu0 %v14587_v38  ;;  %v3604_v59 = vld [vmem:[#allocation16 + $0x4f0] sm:$0xff]  ;;  %v3607_v62 = vld [vmem:[#allocation16 + $0x508] sm:$0xff]  ;;  %v3606_v7 = vld [vmem:[#allocation16 + $0x500] sm:$0xff] }
 0xaca   :  { %9699 = vmatmul.mubr.msk.f32.vlgmr.msra.gmra.mrb[24].mxu1 %vm3152_vm1, %v14634_v19  ;;  %v14673_v31 = vpack.c.bf16 %v3150_v60, %v3146_v9  ;;  %v3145_v36 = vsel %vm3129_vm2, %v14617_v10, %v3137_v40  ;;  %10829 = vmatprep.subr.bf16.mxu0 %v14589_v43  ;;  %v14677_v32 = vpack.c.bf16 %v3585_v24, %v3583_v17  ;;  %v3608_v17 = vld [vmem:[#allocation16 + $0x510] sm:$0xff]  ;;  %v3611_v61 = vld [vmem:[#allocation16 + $0x528] sm:$0xff]  ;;  %v3613_v57 = vld [vmem:[#allocation16 + $0x538] sm:$0xff]  ;;  %vm5792_vm5 = vcmask 64512  }
 0xacb   :  { %10823 = vmatpush1.bf16.msra.mxu1 %v10814_v13  ;;  %3566 = vmatprep.mubr.f32.mxu1 %v16056_v45  ;;  %v3149_v63 = vsel %vm3133_vm3, %v14619_v4, %v3141_v55  ;;  %v14687_v10 = vpack.c.bf16 %v3584_v42, %v3582_v33  ;;  %v14692_v8 = vpack.c.bf16 %v3589_v22, %v3587_v58  ;;  %v3987_v4 = vld [vmem:[#allocation14 + $0x10] sm:$0xff]  ;;  %v3610_v21 = vld [vmem:[#allocation16 + $0x520] sm:$0xff]  ;;  %v3612_v25 = vld [vmem:[#allocation16 + $0x530] sm:$0xff]  ;;  %vm13653_vm8 = vmmov 0  }
 0xacc   :  { %11081 = vmatprep.subr.bf16.mxu1 %v14625_v37  ;;  %v14684_v11 = vpack.c.bf16 %v3149_v63, %v3145_v36  ;;  %v14697_v29 = vpack.c.bf16 %v3588_v3, %v3586_v14  ;;  %v14701_v50 = vpack.c.bf16 %v3593_v12, %v3591_v18  ;;  %v14706_v47 = vpack.c.bf16 %v3592_v30, %v3590_v5  ;;  %v3594_v37 = vld [vmem:[#allocation16 + $0x4a0] sm:$0xff]  ;;  %v3615_v39 = vld [vmem:[#allocation16 + $0x548] sm:$0xff]  ;;  %v3617_v40 = vld [vmem:[#allocation16 + $0x558] sm:$0xff] }
 0xacd   :  { %10831 = vmatpush1.bf16.msra.mxu0 %v14591_v46  ;;  %v14710_v53 = vpack.c.bf16 %v3597_v44, %v3595_v0  ;;  %v14721_v51 = vpack.c.bf16 %v3601_v56, %v3599_v54  ;;  %v14727_v35 = vpack.c.bf16 %v3600_v6, %v3598_v1  ;;  %v14732_v28 = vpack.c.bf16 %v3605_v16, %v3603_v48  ;;  %v3616_v60 = vld [vmem:[#allocation16 + $0x550] sm:$0xff]  ;;  %v3619_v55 = vld [vmem:[#allocation16 + $0x568] sm:$0xff]  ;;  %v3621_v36 = vld [vmem:[#allocation16 + $0x578] sm:$0xff] }
 0xace   :  { %9701 = vmatmul.mubr.msk.f32.vlgmr.msra.gmra.mrb[26].mxu1 %vm3152_vm1, %v14636_v41  ;;  %10833 = vmatprep.subr.bf16.mxu0 %v14677_v32  ;;  %v14749_v24 = vpack.c.bf16 %v3608_v17, %v3606_v7  ;;  %v14754_v20 = vpack.c.bf16 %v3613_v57, %v3611_v61  ;;  %v14762_v9 = vpack.c.bf16 %v3617_v40, %v3615_v39  ;;  %v3618_v33 = vld [vmem:[#allocation16 + $0x560] sm:$0xff]  ;;  %v3620_v42 = vld [vmem:[#allocation16 + $0x570] sm:$0xff]  ;;  %v3623_v63 = vld [vmem:[#allocation16 + $0x588] sm:$0xff]  ;;  %vm6761_vm9 = vcmask 1043456  }
 0xacf   :  { %11083 = vmatpush1.bf16.msra.mxu1 %v14627_v27  ;;  %4055 = vmatprep.mubr.f32.mxu1 %v16056_v45  ;;  %v14716_v27 = vpack.c.bf16 %v3596_v34, %v3594_v37  ;;  %v3625_v58 = vld [vmem:[#allocation16 + $0x598] sm:$0xff]  ;;  %v3622_v14 = vld [vmem:[#allocation16 + $0x580] sm:$0xff]  ;;  %v3627_v3 = vld [vmem:[#allocation16 + $0x5a8] sm:$0xff]  ;;  %vm9257_vm12 = vcmask 1041408  }
 0xad0   :  { %11085 = vmatprep.subr.bf16.mxu1 %v10812_v2  ;;  %v3602_v2 = vld [vmem:[#allocation16 + $0x4e0] sm:$0xff]  ;;  %v10872_v22 = vpack.c.bf16 %v3625_v58, %v3623_v63  ;;  %v3628_v5 = vld [vmem:[#allocation16 + $0x5b0] sm:$0xff]  ;;  %v3633_v30 = vld [vmem:[#allocation16 + $0x5d8] sm:$0xff] }
 0xad1   :  { %10835 = vmatpush1.bf16.msra.mxu0 %v14687_v10  ;;  %v14738_v23 = vpack.c.bf16 %v3604_v59, %v3602_v2  ;;  %v3626_v12 = vld [vmem:[#allocation16 + $0x5a0] sm:$0xff]  ;;  %v3632_v37 = vld [vmem:[#allocation16 + $0x5d0] sm:$0xff]  ;;  %v3637_v34 = vld [vmem:[#allocation16 + $0x5f8] sm:$0xff] }
 0xad2   :  { %9702 = vmatmul.mubr.msk.f32.vlgmr.msra.gmra.mrb[28].mxu1 %vm3152_vm1, %v3987_v4  ;;  %10837 = vmatprep.subr.bf16.mxu0 %v14692_v8  ;;  %v10878_v0 = vpack.c.bf16 %v3628_v5, %v3626_v12  ;;  %v3630_v44 = vld [vmem:[#allocation16 + $0x5c0] sm:$0xff]  ;;  %v3636_v1 = vld [vmem:[#allocation16 + $0x5f0] sm:$0xff]  ;;  %v3647_v61 = vld [vmem:[#allocation16 + $0x648] sm:$0xff] }
 0xad3   :  { %11087 = vmatpush1.bf16.msra.mxu1 %v10814_v13  ;;  %4126 = vmatprep.mubr.f32.mxu1 %v16056_v45  ;;  %v3609_v13 = vld [vmem:[#allocation16 + $0x518] sm:$0xff]  ;;  %v10882_v54 = vpack.c.bf16 %v3632_v37, %v3630_v44  ;;  %v3634_v56 = vld [vmem:[#allocation16 + $0x5e0] sm:$0xff]  ;;  %v3640_v16 = vld [vmem:[#allocation16 + $0x610] sm:$0xff] }
 0xad4   :  { %11217 = vmatprep.subr.bf16.mxu1 %v14645_v52  ;;  %v3638_v48 = vld [vmem:[#allocation16 + $0x600] sm:$0xff]  ;;  %v3644_v17 = vld [vmem:[#allocation16 + $0x630] sm:$0xff]  ;;  %v3649_v57 = vld [vmem:[#allocation16 + $0x658] sm:$0xff] }
 0xad5   :  { %10839 = vmatpush1.bf16.msra.mxu0 %v14697_v29  ;;  %v3642_v7 = vld [vmem:[#allocation16 + $0x620] sm:$0xff]  ;;  %v3648_v40 = vld [vmem:[#allocation16 + $0x650] sm:$0xff] }
 0xad6   :  { %9703 = vmatmul.mubr.msk.f32.vlgmr.msra.gmra.mrb[30].mxu1 %vm3152_vm1, %v3987_v4  ;;  %10841 = vmatprep.subr.bf16.mxu0 %v14701_v50  ;;  %v3629_v4 = vld [vmem:[#allocation16 + $0x5b8] sm:$0xff]  ;;  %v3646_v39 = vld [vmem:[#allocation16 + $0x640] sm:$0xff] }
 0xad7   :  { %11219 = vmatpush1.bf16.msra.mxu1 %v14665_v15  ;;  %4484 = vmatprep.mubr.f32.mxu1 %v16056_v45 }
 0xad8   :  { %11221 = vmatprep.subr.bf16.mxu1 %v14673_v31 }
 0xad9   :  { %10843 = vmatpush1.bf16.msra.mxu0 %v14706_v47 }
 0xada   :  { %9704 = vmatmul.mubr.msk.f32.vlgmr.msra.gmra.mrb[32].mxu1 %vm3152_vm1, %v14634_v19  ;;  %10845 = vmatprep.subr.bf16.mxu0 %v14710_v53 }
 0xadb   :  { %11223 = vmatpush1.bf16.msra.mxu1 %v14684_v11  ;;  %4555 = vmatprep.mubr.f32.mxu1 %v16056_v45 }
 0xadc   :  { %11225 = vmatprep.subr.bf16.mxu1 %v14645_v52 }
 0xadd   :  { %10847 = vmatpush1.bf16.msra.mxu0 %v14716_v27 }
 0xade   :  { %9705 = vmatmul.mubr.msk.f32.vlgmr.msra.gmra.mrb[34].mxu1 %vm3152_vm1, %v14634_v19  ;;  %10849 = vmatprep.subr.bf16.mxu0 %v14721_v51  ;;  %v14743_v19 = vpack.c.bf16 %v3609_v13, %v3607_v62  ;;  %v14788_v13 = vpack.c.bf16 %v3640_v16, %v3638_v48  ;;  %v3666_v48 = vld [vmem:[#allocation16 + $0x6e0] sm:$0xff]  ;;  %v3668_v16 = vld [vmem:[#allocation16 + $0x6f0] sm:$0xff] }
 0xadf   :  { %11227 = vmatpush1.bf16.msra.mxu1 %v14665_v15  ;;  %4626 = vmatprep.mubr.f32.mxu1 %v16056_v45 }
 0xae0   :  { %11229 = vmatprep.subr.bf16.mxu1 %v14673_v31 }
 0xae1   :  { %10851 = vmatpush1.bf16.msra.mxu0 %v14727_v35 }
 0xae2   :  { %9706 = vmatmul.mubr.msk.f32.vlgmr.msra.gmra.mrb[36].mxu1 %vm3152_vm1, %v14636_v41  ;;  %10853 = vmatprep.subr.bf16.mxu0 %v14732_v28 }
 0xae3   :  { %11231 = vmatpush1.bf16.msra.mxu1 %v14684_v11  ;;  %4697 = vmatprep.mubr.f32.mxu1 %v16056_v45 }
 0xae4   :  { %11233 = vmatprep.subr.bf16.mxu1 %v14584_v26  ;;  %v14759_v26 = vpack.c.bf16 %v3612_v25, %v3610_v21  ;;  %v14797_v21 = vpack.c.bf16 %v3644_v17, %v3642_v7  ;;  %v14800_v25 = vpack.c.bf16 %v3649_v57, %v3647_v61  ;;  %v14851_v7 = vpack.c.bf16 %v3668_v16, %v3666_v48  ;;  %v3670_v61 = vld [vmem:[#allocation16 + $0x700] sm:$0xff]  ;;  %v3672_v57 = vld [vmem:[#allocation16 + $0x710] sm:$0xff]  ;;  %v3693_v48 = vld [vmem:[#allocation16 + $0x7b8] sm:$0xff] }
 0xae5   :  { %10855 = vmatpush1.bf16.msra.mxu0 %v14738_v23  ;;  %v3690_v16 = vld [vmem:[#allocation16 + $0x7a0] sm:$0xff] }
 0xae6   :  { %9707 = vmatmul.mubr.msk.f32.vlgmr.msra.gmra.mrb[38].mxu1 %vm3152_vm1, %v14636_v41  ;;  %10857 = vmatprep.subr.bf16.mxu0 %v14743_v19  ;;  %v3614_v41 = vld [vmem:[#allocation16 + $0x540] sm:$0xff] }
 0xae7   :  { %11235 = vmatpush1.bf16.msra.mxu1 %v14587_v38  ;;  %v10866_v38 = vpack.c.bf16 %v3616_v60, %v3614_v41 }
 0xae8   :  { %11237 = vmatprep.subr.bf16.mxu1 %v14589_v43  ;;  %v10868_v43 = vpack.c.bf16 %v3621_v36, %v3619_v55  ;;  %v14805_v55 = vpack.c.bf16 %v3648_v40, %v3646_v39  ;;  %v3675_v39 = vld [vmem:[#allocation16 + $0x728] sm:$0xff]  ;;  %v3677_v40 = vld [vmem:[#allocation16 + $0x738] sm:$0xff] }
 0xae9   :  { %10859 = vmatpush1.bf16.msra.mxu0 %v14749_v24 }
 0xaea   :  { %10861 = vmatprep.subr.bf16.mxu0 %v14754_v20 }
 0xaeb   :  { %11239 = vmatpush1.bf16.msra.mxu1 %v14591_v46  ;;  %v10870_v46 = vpack.c.bf16 %v3620_v42, %v3618_v33  ;;  %v3655_v33 = vld [vmem:[#allocation16 + $0x688] sm:$0xff]  ;;  %v3657_v42 = vld [vmem:[#allocation16 + $0x698] sm:$0xff] }
 0xaec   :  { %11241 = vmatprep.subr.bf16.mxu1 %v14677_v32  ;;  %v3624_v32 = vld [vmem:[#allocation16 + $0x590] sm:$0xff] }
 0xaed   :  { %10863 = vmatpush1.bf16.msra.mxu0 %v14759_v26  ;;  %v10874_v18 = vpack.c.bf16 %v3624_v32, %v3622_v14  ;;  %v3654_v14 = vld [vmem:[#allocation16 + $0x680] sm:$0xff]  ;;  %v3656_v32 = vld [vmem:[#allocation16 + $0x690] sm:$0xff] }
 0xaee   :  { %10865 = vmatprep.subr.bf16.mxu0 %v14762_v9  ;;  %v14825_v12 = vpack.c.bf16 %v3656_v32, %v3654_v14  ;;  %v3681_v14 = vld [vmem:[#allocation16 + $0x758] sm:$0xff]  ;;  %v3678_v32 = vld [vmem:[#allocation16 + $0x740] sm:$0xff] }
 0xaef   :  { %11243 = vmatpush1.bf16.msra.mxu1 %v14687_v10  ;;  %v10876_v10 = vpack.c.bf16 %v3629_v4, %v3627_v3  ;;  %v3659_v3 = vld [vmem:[#allocation16 + $0x6a8] sm:$0xff]  ;;  %v3661_v4 = vld [vmem:[#allocation16 + $0x6b8] sm:$0xff] }
 0xaf0   :  { %11245 = vmatprep.subr.bf16.mxu1 %v14692_v8  ;;  %v3631_v8 = vld [vmem:[#allocation16 + $0x5c8] sm:$0xff]  ;;  %v14828_v5 = vpack.c.bf16 %v3661_v4, %v3659_v3  ;;  %v3680_v3 = vld [vmem:[#allocation16 + $0x750] sm:$0xff] }
 0xaf1   :  { %10867 = vmatpush1.bf16.msra.mxu0 %v10866_v38  ;;  %v3683_v4 = vld [vmem:[#allocation16 + $0x768] sm:$0xff] }
 0xaf2   :  { %10869 = vmatprep.subr.bf16.mxu0 %v10868_v43 }
 0xaf3   :  { %11247 = vmatpush1.bf16.msra.mxu1 %v14697_v29  ;;  %v10880_v29 = vpack.c.bf16 %v3633_v30, %v3631_v8  ;;  %v3658_v8 = vld [vmem:[#allocation16 + $0x6a0] sm:$0xff]  ;;  %v3660_v30 = vld [vmem:[#allocation16 + $0x6b0] sm:$0xff] }
 0xaf4   :  { %11249 = vmatprep.subr.bf16.mxu1 %v14701_v50  ;;  %v3635_v50 = vld [vmem:[#allocation16 + $0x5e8] sm:$0xff] }
 0xaf5   :  { %10871 = vmatpush1.bf16.msra.mxu0 %v10870_v46 }
 0xaf6   :  { %10873 = vmatprep.subr.bf16.mxu0 %v10872_v22 }
 0xaf7   :  { %11251 = vmatpush1.bf16.msra.mxu1 %v14706_v47  ;;  %v10884_v47 = vpack.c.bf16 %v3637_v34, %v3635_v50  ;;  %v14835_v50 = vpack.c.bf16 %v3660_v30, %v3658_v8  ;;  %v3685_v8 = vld [vmem:[#allocation16 + $0x778] sm:$0xff]  ;;  %v3682_v30 = vld [vmem:[#allocation16 + $0x760] sm:$0xff] }
 0xaf8   :  { %11253 = vmatprep.subr.bf16.mxu1 %v14710_v53  ;;  %v10886_v53 = vpack.c.bf16 %v3636_v1, %v3634_v56  ;;  %v3667_v56 = vld [vmem:[#allocation16 + $0x6e8] sm:$0xff]  ;;  %v3669_v1 = vld [vmem:[#allocation16 + $0x6f8] sm:$0xff] }
 0xaf9   :  { %10875 = vmatpush1.bf16.msra.mxu0 %v10874_v18 }
 0xafa   :  { %10877 = vmatprep.subr.bf16.mxu0 %v10876_v10 }
 0xafb   :  { %11255 = vmatpush1.bf16.msra.mxu1 %v14716_v27  ;;  %v3639_v27 = vld [vmem:[#allocation16 + $0x608] sm:$0xff] }
 0xafc   :  { %11257 = vmatprep.subr.bf16.mxu1 %v14721_v51  ;;  %v3641_v51 = vld [vmem:[#allocation16 + $0x618] sm:$0xff] }
 0xafd   :  { %10879 = vmatpush1.bf16.msra.mxu0 %v10878_v0  ;;  %v10888_v6 = vpack.c.bf16 %v3641_v51, %v3639_v27 }
 0xafe   :  { %10881 = vmatprep.subr.bf16.mxu0 %v10880_v29 }
 0xaff   :  { %11259 = vmatpush1.bf16.msra.mxu1 %v14727_v35  ;;  %v3643_v35 = vld [vmem:[#allocation16 + $0x628] sm:$0xff] }
 0xb00   :  { %11261 = vmatprep.subr.bf16.mxu1 %v14732_v28  ;;  %v3645_v28 = vld [vmem:[#allocation16 + $0x638] sm:$0xff] }
 0xb01   :  { %10883 = vmatpush1.bf16.msra.mxu0 %v10882_v54 }
 0xb02   :  { %10885 = vmatprep.subr.bf16.mxu0 %v10884_v47 }
 0xb03   :  { %11263 = vmatpush1.bf16.msra.mxu1 %v14738_v23 }
 0xb04   :  { %11265 = vmatprep.subr.bf16.mxu1 %v14743_v19  ;;  %v14790_v19 = vpack.c.bf16 %v3645_v28, %v3643_v35  ;;  %v3671_v35 = vld [vmem:[#allocation16 + $0x708] sm:$0xff]  ;;  %v3673_v28 = vld [vmem:[#allocation16 + $0x718] sm:$0xff] }
 0xb05   :  { %10887 = vmatpush1.bf16.msra.mxu0 %v10886_v53  ;;  %v14854_v17 = vpack.c.bf16 %v3673_v28, %v3671_v35  ;;  %v3692_v35 = vld [vmem:[#allocation16 + $0x7b0] sm:$0xff]  ;;  %v3695_v28 = vld [vmem:[#allocation16 + $0x7c8] sm:$0xff] }
 0xb06   :  { %10889 = vmatprep.subr.bf16.mxu0 %v10888_v6 }
 0xb07   :  { %11267 = vmatpush1.bf16.msra.mxu1 %v14749_v24 }
 0xb08   :  { %11269 = vmatprep.subr.bf16.mxu1 %v14754_v20 }
 0xb0b   :  { %11271 = vmatpush1.bf16.msra.mxu1 %v14759_v26  ;;  %v3651_v26 = vld [vmem:[#allocation16 + $0x668] sm:$0xff] }
 0xb0c   :  { %11273 = vmatprep.subr.bf16.mxu1 %v14762_v9  ;;  %v3653_v9 = vld [vmem:[#allocation16 + $0x678] sm:$0xff] }
 0xb0d   :  { %v14808_v36 = vpack.c.bf16 %v3653_v9, %v3651_v26  ;;  %v14861_v9 = vpack.c.bf16 %v3672_v57, %v3670_v61  ;;  %v3696_v61 = vld [vmem:[#allocation16 + $0x7d0] sm:$0xff]  ;;  %v3699_v57 = vld [vmem:[#allocation16 + $0x7e8] sm:$0xff] }
 0xb0f   :  { %11275 = vmatpush1.bf16.msra.mxu1 %v10866_v38  ;;  %v3650_v38 = vld [vmem:[#allocation16 + $0x660] sm:$0xff] }
 0xb10   :  { %11277 = vmatprep.subr.bf16.mxu1 %v10868_v43  ;;  %v3652_v43 = vld [vmem:[#allocation16 + $0x670] sm:$0xff] }
 0xb13   :  { %11279 = vmatpush1.bf16.msra.mxu1 %v10870_v46  ;;  %v14815_v46 = vpack.c.bf16 %v3652_v43, %v3650_v38  ;;  %v14864_v38 = vpack.c.bf16 %v3677_v40, %v3675_v39  ;;  %v3674_v43 = vld [vmem:[#allocation16 + $0x720] sm:$0xff]  ;;  %v3701_v39 = vld [vmem:[#allocation16 + $0x7f8] sm:$0xff] }
 0xb14   :  { %11281 = vmatprep.subr.bf16.mxu1 %v10872_v22  ;;  %v14818_v22 = vpack.c.bf16 %v3657_v42, %v3655_v33  ;;  %v3676_v33 = vld [vmem:[#allocation16 + $0x730] sm:$0xff]  ;;  %v3679_v42 = vld [vmem:[#allocation16 + $0x748] sm:$0xff]  ;;  %v3698_v40 = vld [vmem:[#allocation16 + $0x7e0] sm:$0xff] }
 0xb17   :  { %11283 = vmatpush1.bf16.msra.mxu1 %v10874_v18 }
 0xb18   :  { %11285 = vmatprep.subr.bf16.mxu1 %v10876_v10 }
 0xb1b   :  { %11287 = vmatpush1.bf16.msra.mxu1 %v10878_v0  ;;  %v3663_v0 = vld [vmem:[#allocation16 + $0x6c8] sm:$0xff] }
 0xb1c   :  { %11289 = vmatprep.subr.bf16.mxu1 %v10880_v29  ;;  %v3665_v29 = vld [vmem:[#allocation16 + $0x6d8] sm:$0xff] }
 0xb1d   :  { %v14838_v34 = vpack.c.bf16 %v3665_v29, %v3663_v0  ;;  %v3684_v0 = vld [vmem:[#allocation16 + $0x770] sm:$0xff]  ;;  %v3687_v29 = vld [vmem:[#allocation16 + $0x788] sm:$0xff] }
 0xb1f   :  { %11291 = vmatpush1.bf16.msra.mxu1 %v10882_v54  ;;  %v3662_v54 = vld [vmem:[#allocation16 + $0x6c0] sm:$0xff] }
 0xb20   :  { %11293 = vmatprep.subr.bf16.mxu1 %v10884_v47  ;;  %v3664_v47 = vld [vmem:[#allocation16 + $0x6d0] sm:$0xff] }
 0xb21   :  { %v14845_v51 = vpack.c.bf16 %v3664_v47, %v3662_v54  ;;  %v3689_v54 = vld [vmem:[#allocation16 + $0x798] sm:$0xff]  ;;  %v3686_v47 = vld [vmem:[#allocation16 + $0x780] sm:$0xff] }
 0xb23   :  { %11295 = vmatpush1.bf16.msra.mxu1 %v10886_v53 }
 0xb24   :  { %11297 = vmatprep.subr.bf16.mxu1 %v10888_v6  ;;  %v14848_v6 = vpack.c.bf16 %v3669_v1, %v3667_v56  ;;  %v3688_v56 = vld [vmem:[#allocation16 + $0x790] sm:$0xff]  ;;  %v3691_v1 = vld [vmem:[#allocation16 + $0x7a8] sm:$0xff] }
 0xb99   :  { %v14784_v2 = vpop.f32.mrb[22].mxu1 }
 0xb9a   :  { %v3497_v59 = vpop.f32.mrb[26].mxu0  ;;  %v14786_v62 = vpop.f32.mrb[23].mxu1 }
 0xb9b   :  { %v3499_v23 = vpop.f32.mrb[27].mxu0 }
 0xb9c   :  { %3766 = vmatprep.mubr.f32.mxu0 %v3499_v23 }
 0xb9d   :  { %3767 = vmatmul.mubr.f32.vlgmr.msra.gmra.mrb[28].mxu0 %v3497_v59  ;;  %v14792_v24 = vpop.f32.mrb[24].mxu1 }
 0xb9e   :  { %10891 = vmatpush1.bf16.msra.mxu0 %v14788_v13  ;;  %v14795_v20 = vpop.f32.mrb[25].mxu1 }
 0xb9f   :  { %10893 = vmatprep.subr.bf16.mxu0 %v14790_v19 }
 0xba1   :  { %v14802_v41 = vpop.f32.mrb[26].mxu1 }
 0xba2   :  { %10895 = vmatpush1.bf16.msra.mxu0 %v14797_v21  ;;  %v3570_v60 = vpop.f32.mrb[27].mxu1 }
 0xba3   :  { %10897 = vmatprep.subr.bf16.mxu0 %v14800_v25  ;;  %3837 = vmatprep.mubr.f32.mxu0 %v3570_v60 }
 0xba5   :  { %v14810_v63 = vpop.f32.mrb[28].mxu1 }
 0xba6   :  { %10899 = vmatpush1.bf16.msra.mxu0 %v14805_v55  ;;  %v14813_v58 = vpop.f32.mrb[29].mxu1 }
 0xba7   :  { %10901 = vmatprep.subr.bf16.mxu0 %v14808_v36 }
 0xba9   :  { %v14820_v18 = vpop.f32.mrb[30].mxu1 }
 0xbaa   :  { %10903 = vmatpush1.bf16.msra.mxu0 %v14815_v46  ;;  %v14823_v10 = vpop.f32.mrb[31].mxu1 }
 0xbab   :  { %10905 = vmatprep.subr.bf16.mxu0 %v14818_v22 }
 0xbad   :  { %v14830_v44 = vpop.f32.mrb[32].mxu1 }
 0xbae   :  { %10907 = vmatpush1.bf16.msra.mxu0 %v14825_v12  ;;  %v14833_v37 = vpop.f32.mrb[33].mxu1 }
 0xbaf   :  { %10909 = vmatprep.subr.bf16.mxu0 %v14828_v5 }
 0xbb1   :  { %v14840_v53 = vpop.f32.mrb[34].mxu1 }
 0xbb2   :  { %10911 = vmatpush1.bf16.msra.mxu0 %v14835_v50  ;;  %v14843_v27 = vpop.f32.mrb[35].mxu1 }
 0xbb3   :  { %10913 = vmatprep.subr.bf16.mxu0 %v14838_v34 }
 0xbb5   :  { %v4628_v59 = vpop.f32.mrb[36].mxu1 }
 0xbb6   :  { %10915 = vmatpush1.bf16.msra.mxu0 %v14845_v51  ;;  %v4630_v23 = vpop.f32.mrb[37].mxu1 }
 0xbb7   :  { %10917 = vmatprep.subr.bf16.mxu0 %v14848_v6  ;;  %4768 = vmatprep.mubr.f32.mxu1 %v4630_v23  ;;  %v3694_v23 = vld [vmem:[#allocation16 + $0x7c0] sm:$0xff] }
 0xbb8   :  { %4769 = vmatmul.mubr.f32.vlgmr.msra.gmra.mrb[40].mxu1 %v4628_v59  ;;  %v3697_v59 = vld [vmem:[#allocation16 + $0x7d8] sm:$0xff] }
 0xbb9   :  { %11299 = vmatpush1.bf16.msra.mxu1 %v14788_v13  ;;  %v14857_v26 = vpop.f32.mrb[38].mxu1  ;;  %v14869_v13 = vpack.c.bf16 %v3676_v33, %v3674_v43  ;;  %v3299_v43 = vld [vmem:[#allocation16 + $0x8] sm:$0xff]  ;;  %v3301_v33 = vld [vmem:[#allocation16 + $0x18] sm:$0xff] }
 0xbba   :  { %10919 = vmatpush1.bf16.msra.mxu0 %v14851_v7  ;;  %11301 = vmatprep.subr.bf16.mxu1 %v14790_v19  ;;  %v4701_v60 = vpop.f32.mrb[39].mxu1  ;;  %v14872_v19 = vpack.c.bf16 %v3681_v14, %v3679_v42  ;;  %v3298_v42 = vld [vmem:[#allocation16] sm:$0xff]  ;;  %v3300_v14 = vld [vmem:[#allocation16 + $0x10] sm:$0xff] }
 0xbbb   :  { %10921 = vmatprep.subr.bf16.mxu0 %v14854_v17  ;;  %4839 = vmatprep.mubr.f32.mxu1 %v4701_v60  ;;  %v3700_v60 = vld [vmem:[#allocation16 + $0x7f0] sm:$0xff] }
 0xbbd   :  { %11303 = vmatpush1.bf16.msra.mxu1 %v14797_v21  ;;  %v14877_v21 = vpack.c.bf16 %v3680_v3, %v3678_v32  ;;  %v3303_v32 = vld [vmem:[#allocation16 + $0x28] sm:$0xff]  ;;  %v3305_v3 = vld [vmem:[#allocation16 + $0x38] sm:$0xff] }
 0xbbe   :  { %10923 = vmatpush1.bf16.msra.mxu0 %v14861_v9  ;;  %11305 = vmatprep.subr.bf16.mxu1 %v14800_v25  ;;  %v14880_v25 = vpack.c.bf16 %v3685_v8, %v3683_v4  ;;  %v3302_v4 = vld [vmem:[#allocation16 + $0x20] sm:$0xff]  ;;  %v3304_v8 = vld [vmem:[#allocation16 + $0x30] sm:$0xff] }
 0xbbf   :  { %10925 = vmatprep.subr.bf16.mxu0 %v14864_v38 }
 0xbc1   :  { %11307 = vmatpush1.bf16.msra.mxu1 %v14805_v55  ;;  %v14885_v55 = vpack.c.bf16 %v3684_v0, %v3682_v30  ;;  %v3307_v30 = vld [vmem:[#allocation16 + $0x48] sm:$0xff]  ;;  %v3309_v0 = vld [vmem:[#allocation16 + $0x58] sm:$0xff] }
 0xbc2   :  { %10927 = vmatpush1.bf16.msra.mxu0 %v14869_v13  ;;  %11309 = vmatprep.subr.bf16.mxu1 %v14808_v36  ;;  %v14888_v36 = vpack.c.bf16 %v3689_v54, %v3687_v29  ;;  %v3306_v29 = vld [vmem:[#allocation16 + $0x40] sm:$0xff]  ;;  %v3308_v54 = vld [vmem:[#allocation16 + $0x50] sm:$0xff] }
 0xbc3   :  { %10929 = vmatprep.subr.bf16.mxu0 %v14872_v19 }
 0xbc5   :  { %11311 = vmatpush1.bf16.msra.mxu1 %v14815_v46  ;;  %v14893_v46 = vpack.c.bf16 %v3688_v56, %v3686_v47  ;;  %v3311_v47 = vld [vmem:[#allocation16 + $0x68] sm:$0xff]  ;;  %v3313_v56 = vld [vmem:[#allocation16 + $0x78] sm:$0xff] }
 0xbc6   :  { %10931 = vmatpush1.bf16.msra.mxu0 %v14877_v21  ;;  %11313 = vmatprep.subr.bf16.mxu1 %v14818_v22  ;;  %v14896_v22 = vpack.c.bf16 %v3693_v48, %v3691_v1  ;;  %v3315_v1 = vld [vmem:[#allocation16 + $0x88] sm:$0xff]  ;;  %v3317_v48 = vld [vmem:[#allocation16 + $0x98] sm:$0xff] }
 0xbc7   :  { %10933 = vmatprep.subr.bf16.mxu0 %v14880_v25 }
 0xbc9   :  { %11315 = vmatpush1.bf16.msra.mxu1 %v14825_v12  ;;  %v14901_v12 = vpack.c.bf16 %v3692_v35, %v3690_v16  ;;  %v3314_v16 = vld [vmem:[#allocation16 + $0x80] sm:$0xff]  ;;  %v3316_v35 = vld [vmem:[#allocation16 + $0x90] sm:$0xff] }
 0xbca   :  { %10935 = vmatpush1.bf16.msra.mxu0 %v14885_v55  ;;  %11317 = vmatprep.subr.bf16.mxu1 %v14828_v5  ;;  %v14904_v5 = vpack.c.bf16 %v3697_v59, %v3695_v28  ;;  %v3319_v28 = vld [vmem:[#allocation16 + $0xa8] sm:$0xff]  ;;  %v3321_v59 = vld [vmem:[#allocation16 + $0xb8] sm:$0xff] }
 0xbcb   :  { %10937 = vmatprep.subr.bf16.mxu0 %v14888_v36 }
 0xbcd   :  { %11319 = vmatpush1.bf16.msra.mxu1 %v14835_v50  ;;  %v14909_v50 = vpack.c.bf16 %v3696_v61, %v3694_v23  ;;  %v3318_v23 = vld [vmem:[#allocation16 + $0xa0] sm:$0xff]  ;;  %v3320_v61 = vld [vmem:[#allocation16 + $0xb0] sm:$0xff] }
 0xbce   :  { %10939 = vmatpush1.bf16.msra.mxu0 %v14893_v46  ;;  %11321 = vmatprep.subr.bf16.mxu1 %v14838_v34  ;;  %v14912_v34 = vpack.c.bf16 %v3701_v39, %v3699_v57  ;;  %v3323_v57 = vld [vmem:[#allocation16 + $0xc8] sm:$0xff]  ;;  %v3325_v39 = vld [vmem:[#allocation16 + $0xd8] sm:$0xff] }
 0xbcf   :  { %10941 = vmatprep.subr.bf16.mxu0 %v14896_v22 }
 0xbd1   :  { %11323 = vmatpush1.bf16.msra.mxu1 %v14845_v51  ;;  %v14917_v51 = vpack.c.bf16 %v3700_v60, %v3698_v40  ;;  %v3322_v40 = vld [vmem:[#allocation16 + $0xc0] sm:$0xff]  ;;  %v3324_v60 = vld [vmem:[#allocation16 + $0xd0] sm:$0xff] }
 0xbd2   :  { %10943 = vmatpush1.bf16.msra.mxu0 %v14901_v12  ;;  %11325 = vmatprep.subr.bf16.mxu1 %v14848_v6  ;;  %v14920_v6 = vpack.c.bf16 %v3301_v33, %v3299_v43  ;;  %v3327_v43 = vld [vmem:[#allocation16 + $0xe8] sm:$0xff]  ;;  %v3329_v33 = vld [vmem:[#allocation16 + $0xf8] sm:$0xff] }
 0xbd3   :  { %10945 = vmatprep.subr.bf16.mxu0 %v14904_v5 }
 0xbd5   :  { %11327 = vmatpush1.bf16.msra.mxu1 %v14851_v7  ;;  %v14925_v7 = vpack.c.bf16 %v3300_v14, %v3298_v42  ;;  %v3326_v42 = vld [vmem:[#allocation16 + $0xe0] sm:$0xff]  ;;  %v3328_v14 = vld [vmem:[#allocation16 + $0xf0] sm:$0xff] }
 0xbd6   :  { %10947 = vmatpush1.bf16.msra.mxu0 %v14909_v50  ;;  %11329 = vmatprep.subr.bf16.mxu1 %v14854_v17  ;;  %v14928_v17 = vpack.c.bf16 %v3305_v3, %v3303_v32  ;;  %v3331_v32 = vld [vmem:[#allocation16 + $0x108] sm:$0xff]  ;;  %v3333_v3 = vld [vmem:[#allocation16 + $0x118] sm:$0xff] }
 0xbd7   :  { %10949 = vmatprep.subr.bf16.mxu0 %v14912_v34 }
 0xbd9   :  { %11331 = vmatpush1.bf16.msra.mxu1 %v14861_v9  ;;  %v14934_v9 = vpack.c.bf16 %v3304_v8, %v3302_v4  ;;  %v3330_v4 = vld [vmem:[#allocation16 + $0x100] sm:$0xff]  ;;  %v3332_v8 = vld [vmem:[#allocation16 + $0x110] sm:$0xff] }
 0xbda   :  { %10951 = vmatpush1.bf16.msra.mxu0 %v14917_v51  ;;  %11333 = vmatprep.subr.bf16.mxu1 %v14864_v38  ;;  %v14938_v38 = vpack.c.bf16 %v3309_v0, %v3307_v30  ;;  %v3335_v30 = vld [vmem:[#allocation16 + $0x128] sm:$0xff]  ;;  %v3337_v0 = vld [vmem:[#allocation16 + $0x138] sm:$0xff] }
 0xbdb   :  { %10953 = vmatprep.subr.bf16.mxu0 %v14920_v6 }
 0xbdd   :  { %3838 = vmatmul.mubr.f32.vlgmr.msra.gmra.mrb[28].mxu0 %v14802_v41  ;;  %11335 = vmatpush1.bf16.msra.mxu1 %v14869_v13  ;;  %v14943_v41 = vpack.c.bf16 %v3308_v54, %v3306_v29  ;;  %v3310_v13 = vld [vmem:[#allocation16 + $0x60] sm:$0xff]  ;;  %v3336_v54 = vld [vmem:[#allocation16 + $0x130] sm:$0xff] }
 0xbde   :  { %10955 = vmatpush1.bf16.msra.mxu0 %v14925_v7  ;;  %3908 = vmatprep.mubr.f32.mxu0 %v14786_v62  ;;  %v14946_v62 = vpack.c.bf16 %v3313_v56, %v3311_v47  ;;  %v3334_v29 = vld [vmem:[#allocation16 + $0x120] sm:$0xff]  ;;  %v3339_v47 = vld [vmem:[#allocation16 + $0x148] sm:$0xff]  ;;  %v3340_v56 = vld [vmem:[#allocation16 + $0x150] sm:$0xff] }
 0xbdf   :  { %10957 = vmatprep.subr.bf16.mxu0 %v14928_v17  ;;  %11337 = vmatprep.subr.bf16.mxu1 %v14872_v19  ;;  %v3312_v19 = vld [vmem:[#allocation16 + $0x70] sm:$0xff] }
 0xbe1   :  { %11339 = vmatpush1.bf16.msra.mxu1 %v14877_v21  ;;  %v14951_v21 = vpack.c.bf16 %v3312_v19, %v3310_v13  ;;  %v3343_v13 = vld [vmem:[#allocation16 + $0x168] sm:$0xff]  ;;  %v3345_v19 = vld [vmem:[#allocation16 + $0x178] sm:$0xff] }
 0xbe2   :  { %10959 = vmatpush1.bf16.msra.mxu0 %v14934_v9  ;;  %11341 = vmatprep.subr.bf16.mxu1 %v14880_v25  ;;  %v14954_v25 = vpack.c.bf16 %v3317_v48, %v3315_v1  ;;  %v3342_v1 = vld [vmem:[#allocation16 + $0x160] sm:$0xff]  ;;  %v3344_v48 = vld [vmem:[#allocation16 + $0x170] sm:$0xff] }
 0xbe3   :  { %10961 = vmatprep.subr.bf16.mxu0 %v14938_v38 }
 0xbe5   :  { %11343 = vmatpush1.bf16.msra.mxu1 %v14885_v55  ;;  %v14959_v55 = vpack.c.bf16 %v3316_v35, %v3314_v16  ;;  %v3347_v16 = vld [vmem:[#allocation16 + $0x188] sm:$0xff]  ;;  %v3349_v35 = vld [vmem:[#allocation16 + $0x198] sm:$0xff] }
 0xbe6   :  { %10963 = vmatpush1.bf16.msra.mxu0 %v14943_v41  ;;  %11345 = vmatprep.subr.bf16.mxu1 %v14888_v36  ;;  %v14962_v36 = vpack.c.bf16 %v3321_v59, %v3319_v28  ;;  %v3346_v28 = vld [vmem:[#allocation16 + $0x180] sm:$0xff]  ;;  %v3348_v59 = vld [vmem:[#allocation16 + $0x190] sm:$0xff] }
 0xbe7   :  { %10965 = vmatprep.subr.bf16.mxu0 %v14946_v62 }
 0xbe9   :  { %11347 = vmatpush1.bf16.msra.mxu1 %v14893_v46  ;;  %v14967_v46 = vpack.c.bf16 %v3320_v61, %v3318_v23  ;;  %v3351_v23 = vld [vmem:[#allocation16 + $0x1a8] sm:$0xff]  ;;  %v3353_v61 = vld [vmem:[#allocation16 + $0x1b8] sm:$0xff] }
 0xbea   :  { %10967 = vmatpush1.bf16.msra.mxu0 %v14951_v21  ;;  %11349 = vmatprep.subr.bf16.mxu1 %v14896_v22  ;;  %v14970_v22 = vpack.c.bf16 %v3325_v39, %v3323_v57  ;;  %v3350_v57 = vld [vmem:[#allocation16 + $0x1a0] sm:$0xff]  ;;  %v3352_v39 = vld [vmem:[#allocation16 + $0x1b0] sm:$0xff] }
 0xbeb   :  { %10969 = vmatprep.subr.bf16.mxu0 %v14954_v25 }
 0xbed   :  { %11351 = vmatpush1.bf16.msra.mxu1 %v14901_v12  ;;  %v14975_v12 = vpack.c.bf16 %v3324_v60, %v3322_v40  ;;  %v3355_v40 = vld [vmem:[#allocation16 + $0x1c8] sm:$0xff]  ;;  %v3357_v60 = vld [vmem:[#allocation16 + $0x1d8] sm:$0xff] }
 0xbee   :  { %10971 = vmatpush1.bf16.msra.mxu0 %v14959_v55  ;;  %11353 = vmatprep.subr.bf16.mxu1 %v14904_v5  ;;  %v14978_v5 = vpack.c.bf16 %v3329_v33, %v3327_v43  ;;  %v3354_v43 = vld [vmem:[#allocation16 + $0x1c0] sm:$0xff]  ;;  %v3356_v33 = vld [vmem:[#allocation16 + $0x1d0] sm:$0xff] }
 0xbef   :  { %10973 = vmatprep.subr.bf16.mxu0 %v14962_v36 }
 0xbf1   :  { %11355 = vmatpush1.bf16.msra.mxu1 %v14909_v50  ;;  %v14983_v50 = vpack.c.bf16 %v3328_v14, %v3326_v42  ;;  %v3359_v42 = vld [vmem:[#allocation16 + $0x1e8] sm:$0xff]  ;;  %v3361_v14 = vld [vmem:[#allocation16 + $0x1f8] sm:$0xff] }
 0xbf2   :  { %10975 = vmatpush1.bf16.msra.mxu0 %v14967_v46  ;;  %11357 = vmatprep.subr.bf16.mxu1 %v14912_v34  ;;  %v14986_v34 = vpack.c.bf16 %v3333_v3, %v3331_v32  ;;  %v3358_v32 = vld [vmem:[#allocation16 + $0x1e0] sm:$0xff]  ;;  %v3360_v3 = vld [vmem:[#allocation16 + $0x1f0] sm:$0xff] }
 0xbf3   :  { %10977 = vmatprep.subr.bf16.mxu0 %v14970_v22 }
 0xbf5   :  { %11359 = vmatpush1.bf16.msra.mxu1 %v14917_v51  ;;  %v14993_v51 = vpack.c.bf16 %v3332_v8, %v3330_v4  ;;  %v3363_v4 = vld [vmem:[#allocation16 + $0x208] sm:$0xff]  ;;  %v3365_v8 = vld [vmem:[#allocation16 + $0x218] sm:$0xff] }
 0xbf6   :  { %10979 = vmatpush1.bf16.msra.mxu0 %v14975_v12  ;;  %11361 = vmatprep.subr.bf16.mxu1 %v14920_v6  ;;  %v14996_v6 = vpack.c.bf16 %v3337_v0, %v3335_v30  ;;  %v3362_v30 = vld [vmem:[#allocation16 + $0x200] sm:$0xff]  ;;  %v3364_v0 = vld [vmem:[#allocation16 + $0x210] sm:$0xff] }
 0xbf7   :  { %10981 = vmatprep.subr.bf16.mxu0 %v14978_v5 }
 0xbf8   :  { %4840 = vmatmul.mubr.f32.vlgmr.msra.gmra.mrb[40].mxu1 %v14857_v26  ;;  %v3341_v26 = vld [vmem:[#allocation16 + $0x158] sm:$0xff] }
 0xbf9   :  { %11363 = vmatpush1.bf16.msra.mxu1 %v14925_v7  ;;  %4910 = vmatprep.mubr.f32.mxu1 %v14833_v37  ;;  %v15001_v37 = vpack.c.bf16 %v3336_v54, %v3334_v29  ;;  %v15004_v7 = vpack.c.bf16 %v3341_v26, %v3339_v47  ;;  %v3367_v29 = vld [vmem:[#allocation16 + $0x228] sm:$0xff]  ;;  %v3369_v54 = vld [vmem:[#allocation16 + $0x238] sm:$0xff]  ;;  %v3366_v47 = vld [vmem:[#allocation16 + $0x220] sm:$0xff] }
 0xbfa   :  { %10983 = vmatpush1.bf16.msra.mxu0 %v14983_v50  ;;  %11365 = vmatprep.subr.bf16.mxu1 %v14928_v17  ;;  %v3338_v17 = vld [vmem:[#allocation16 + $0x140] sm:$0xff]  ;;  %v3368_v26 = vld [vmem:[#allocation16 + $0x230] sm:$0xff] }
 0xbfb   :  { %10985 = vmatprep.subr.bf16.mxu0 %v14986_v34 }
 0xbfd   :  { %11367 = vmatpush1.bf16.msra.mxu1 %v14934_v9  ;;  %v15009_v9 = vpack.c.bf16 %v3340_v56, %v3338_v17  ;;  %v3371_v17 = vld [vmem:[#allocation16 + $0x248] sm:$0xff]  ;;  %v3373_v56 = vld [vmem:[#allocation16 + $0x258] sm:$0xff] }
 0xbfe   :  { %10987 = vmatpush1.bf16.msra.mxu0 %v14993_v51  ;;  %11369 = vmatprep.subr.bf16.mxu1 %v14938_v38  ;;  %v15012_v38 = vpack.c.bf16 %v3345_v19, %v3343_v13  ;;  %v3370_v13 = vld [vmem:[#allocation16 + $0x240] sm:$0xff]  ;;  %v3372_v19 = vld [vmem:[#allocation16 + $0x250] sm:$0xff] }
 0xbff   :  { %10989 = vmatprep.subr.bf16.mxu0 %v14996_v6 }
 0xc01   :  { %11371 = vmatpush1.bf16.msra.mxu1 %v14943_v41  ;;  %v15017_v41 = vpack.c.bf16 %v3344_v48, %v3342_v1  ;;  %v3375_v1 = vld [vmem:[#allocation16 + $0x268] sm:$0xff]  ;;  %v3377_v48 = vld [vmem:[#allocation16 + $0x278] sm:$0xff] }
 0xc02   :  { %10991 = vmatpush1.bf16.msra.mxu0 %v15001_v37  ;;  %11373 = vmatprep.subr.bf16.mxu1 %v14946_v62  ;;  %v15020_v62 = vpack.c.bf16 %v3349_v35, %v3347_v16  ;;  %v3379_v16 = vld [vmem:[#allocation16 + $0x288] sm:$0xff]  ;;  %v3381_v35 = vld [vmem:[#allocation16 + $0x298] sm:$0xff] }
 0xc03   :  { %10993 = vmatprep.subr.bf16.mxu0 %v15004_v7 }
 0xc05   :  { %11375 = vmatpush1.bf16.msra.mxu1 %v14951_v21  ;;  %v15025_v21 = vpack.c.bf16 %v3348_v59, %v3346_v28  ;;  %v3378_v28 = vld [vmem:[#allocation16 + $0x280] sm:$0xff]  ;;  %v3380_v59 = vld [vmem:[#allocation16 + $0x290] sm:$0xff] }
 0xc06   :  { %10995 = vmatpush1.bf16.msra.mxu0 %v15009_v9  ;;  %11377 = vmatprep.subr.bf16.mxu1 %v14954_v25  ;;  %v15028_v25 = vpack.c.bf16 %v3353_v61, %v3351_v23  ;;  %v3383_v23 = vld [vmem:[#allocation16 + $0x2a8] sm:$0xff]  ;;  %v3385_v61 = vld [vmem:[#allocation16 + $0x2b8] sm:$0xff] }
 0xc07   :  { %10997 = vmatprep.subr.bf16.mxu0 %v15012_v38 }
 0xc09   :  { %11379 = vmatpush1.bf16.msra.mxu1 %v14959_v55  ;;  %v15033_v55 = vpack.c.bf16 %v3352_v39, %v3350_v57  ;;  %v3382_v57 = vld [vmem:[#allocation16 + $0x2a0] sm:$0xff]  ;;  %v3384_v39 = vld [vmem:[#allocation16 + $0x2b0] sm:$0xff] }
 0xc0a   :  { %10999 = vmatpush1.bf16.msra.mxu0 %v15017_v41  ;;  %11381 = vmatprep.subr.bf16.mxu1 %v14962_v36  ;;  %v15036_v36 = vpack.c.bf16 %v3357_v60, %v3355_v40  ;;  %v3387_v40 = vld [vmem:[#allocation16 + $0x2c8] sm:$0xff]  ;;  %v3389_v60 = vld [vmem:[#allocation16 + $0x2d8] sm:$0xff] }
 0xc0b   :  { %11001 = vmatprep.subr.bf16.mxu0 %v15020_v62 }
 0xc0d   :  { %11383 = vmatpush1.bf16.msra.mxu1 %v14967_v46  ;;  %v15041_v46 = vpack.c.bf16 %v3356_v33, %v3354_v43  ;;  %v3386_v43 = vld [vmem:[#allocation16 + $0x2c0] sm:$0xff]  ;;  %v3388_v33 = vld [vmem:[#allocation16 + $0x2d0] sm:$0xff] }
 0xc0e   :  { %11003 = vmatpush1.bf16.msra.mxu0 %v15025_v21  ;;  %11385 = vmatprep.subr.bf16.mxu1 %v14970_v22  ;;  %v15044_v22 = vpack.c.bf16 %v3361_v14, %v3359_v42  ;;  %v3391_v42 = vld [vmem:[#allocation16 + $0x2e8] sm:$0xff]  ;;  %v3393_v14 = vld [vmem:[#allocation16 + $0x2f8] sm:$0xff] }
 0xc0f   :  { %11005 = vmatprep.subr.bf16.mxu0 %v15028_v25 }
 0xc11   :  { %11387 = vmatpush1.bf16.msra.mxu1 %v14975_v12  ;;  %v15049_v12 = vpack.c.bf16 %v3360_v3, %v3358_v32  ;;  %v3390_v32 = vld [vmem:[#allocation16 + $0x2e0] sm:$0xff]  ;;  %v3392_v3 = vld [vmem:[#allocation16 + $0x2f0] sm:$0xff] }
 0xc12   :  { %11007 = vmatpush1.bf16.msra.mxu0 %v15033_v55  ;;  %11389 = vmatprep.subr.bf16.mxu1 %v14978_v5  ;;  %v15052_v5 = vpack.c.bf16 %v3365_v8, %v3363_v4  ;;  %v3395_v4 = vld [vmem:[#allocation16 + $0x308] sm:$0xff]  ;;  %v3397_v8 = vld [vmem:[#allocation16 + $0x318] sm:$0xff] }
 0xc13   :  { %11009 = vmatprep.subr.bf16.mxu0 %v15036_v36 }
 0xc15   :  { %11391 = vmatpush1.bf16.msra.mxu1 %v14983_v50  ;;  %v15057_v50 = vpack.c.bf16 %v3364_v0, %v3362_v30  ;;  %v3394_v30 = vld [vmem:[#allocation16 + $0x300] sm:$0xff]  ;;  %v3396_v0 = vld [vmem:[#allocation16 + $0x310] sm:$0xff] }
 0xc16   :  { %11011 = vmatpush1.bf16.msra.mxu0 %v15041_v46  ;;  %11393 = vmatprep.subr.bf16.mxu1 %v14986_v34  ;;  %v15060_v34 = vpack.c.bf16 %v3369_v54, %v3367_v29  ;;  %v3399_v29 = vld [vmem:[#allocation16 + $0x328] sm:$0xff]  ;;  %v3401_v54 = vld [vmem:[#allocation16 + $0x338] sm:$0xff] }
 0xc17   :  { %11013 = vmatprep.subr.bf16.mxu0 %v15044_v22 }
 0xc19   :  { %11395 = vmatpush1.bf16.msra.mxu1 %v14993_v51  ;;  %v15066_v51 = vpack.c.bf16 %v3368_v26, %v3366_v47  ;;  %v3398_v47 = vld [vmem:[#allocation16 + $0x320] sm:$0xff]  ;;  %v3400_v26 = vld [vmem:[#allocation16 + $0x330] sm:$0xff] }
 0xc1a   :  { %11015 = vmatpush1.bf16.msra.mxu0 %v15049_v12  ;;  %11397 = vmatprep.subr.bf16.mxu1 %v14996_v6  ;;  %v15070_v6 = vpack.c.bf16 %v3373_v56, %v3371_v17  ;;  %v3403_v17 = vld [vmem:[#allocation16 + $0x348] sm:$0xff]  ;;  %v3404_v56 = vld [vmem:[#allocation16 + $0x350] sm:$0xff] }
 0xc1b   :  { %11017 = vmatprep.subr.bf16.mxu0 %v15052_v5 }
 0xc1d   :  { %3909 = vmatmul.mubr.f32.vlgmr.msra.gmra.mrb[28].mxu0 %v14784_v2  ;;  %11399 = vmatpush1.bf16.msra.mxu1 %v15001_v37  ;;  %v15075_v2 = vpack.c.bf16 %v3372_v19, %v3370_v13  ;;  %v3374_v37 = vld [vmem:[#allocation16 + $0x260] sm:$0xff]  ;;  %v3407_v13 = vld [vmem:[#allocation16 + $0x368] sm:$0xff]  ;;  %v3409_v19 = vld [vmem:[#allocation16 + $0x378] sm:$0xff] }
 0xc1e   :  { %11019 = vmatpush1.bf16.msra.mxu0 %v15057_v50  ;;  %3979 = vmatprep.mubr.f32.mxu0 %v14795_v20  ;;  %v15078_v20 = vpack.c.bf16 %v3377_v48, %v3375_v1  ;;  %v3406_v1 = vld [vmem:[#allocation16 + $0x360] sm:$0xff]  ;;  %v3408_v48 = vld [vmem:[#allocation16 + $0x370] sm:$0xff] }
 0xc1f   :  { %11021 = vmatprep.subr.bf16.mxu0 %v15060_v34  ;;  %11401 = vmatprep.subr.bf16.mxu1 %v15004_v7  ;;  %v3376_v7 = vld [vmem:[#allocation16 + $0x270] sm:$0xff] }
 0xc21   :  { %11403 = vmatpush1.bf16.msra.mxu1 %v15009_v9  ;;  %v15083_v9 = vpack.c.bf16 %v3376_v7, %v3374_v37  ;;  %v3411_v37 = vld [vmem:[#allocation16 + $0x388] sm:$0xff]  ;;  %v3413_v7 = vld [vmem:[#allocation16 + $0x398] sm:$0xff] }
 0xc22   :  { %11023 = vmatpush1.bf16.msra.mxu0 %v15066_v51  ;;  %11405 = vmatprep.subr.bf16.mxu1 %v15012_v38  ;;  %v15086_v38 = vpack.c.bf16 %v3381_v35, %v3379_v16  ;;  %v3410_v16 = vld [vmem:[#allocation16 + $0x380] sm:$0xff]  ;;  %v3412_v35 = vld [vmem:[#allocation16 + $0x390] sm:$0xff] }
 0xc23   :  { %11025 = vmatprep.subr.bf16.mxu0 %v15070_v6 }
 0xc25   :  { %11407 = vmatpush1.bf16.msra.mxu1 %v15017_v41  ;;  %v15091_v41 = vpack.c.bf16 %v3380_v59, %v3378_v28  ;;  %v3415_v28 = vld [vmem:[#allocation16 + $0x3a8] sm:$0xff]  ;;  %v3417_v59 = vld [vmem:[#allocation16 + $0x3b8] sm:$0xff] }
 0xc26   :  { %11027 = vmatpush1.bf16.msra.mxu0 %v15075_v2  ;;  %11409 = vmatprep.subr.bf16.mxu1 %v15020_v62  ;;  %v15094_v62 = vpack.c.bf16 %v3385_v61, %v3383_v23  ;;  %v3414_v23 = vld [vmem:[#allocation16 + $0x3a0] sm:$0xff]  ;;  %v3416_v61 = vld [vmem:[#allocation16 + $0x3b0] sm:$0xff] }
 0xc27   :  { %11029 = vmatprep.subr.bf16.mxu0 %v15078_v20 }
 0xc29   :  { %11411 = vmatpush1.bf16.msra.mxu1 %v15025_v21  ;;  %v15099_v21 = vpack.c.bf16 %v3384_v39, %v3382_v57  ;;  %v3419_v57 = vld [vmem:[#allocation16 + $0x3c8] sm:$0xff]  ;;  %v3421_v39 = vld [vmem:[#allocation16 + $0x3d8] sm:$0xff] }
 0xc2a   :  { %11031 = vmatpush1.bf16.msra.mxu0 %v15083_v9  ;;  %11413 = vmatprep.subr.bf16.mxu1 %v15028_v25  ;;  %v15102_v25 = vpack.c.bf16 %v3389_v60, %v3387_v40  ;;  %v3418_v40 = vld [vmem:[#allocation16 + $0x3c0] sm:$0xff]  ;;  %v3420_v60 = vld [vmem:[#allocation16 + $0x3d0] sm:$0xff] }
 0xc2b   :  { %11033 = vmatprep.subr.bf16.mxu0 %v15086_v38 }
 0xc2d   :  { %11415 = vmatpush1.bf16.msra.mxu1 %v15033_v55  ;;  %v15107_v55 = vpack.c.bf16 %v3388_v33, %v3386_v43  ;;  %v3423_v43 = vld [vmem:[#allocation16 + $0x3e8] sm:$0xff]  ;;  %v3425_v33 = vld [vmem:[#allocation16 + $0x3f8] sm:$0xff] }
 0xc2e   :  { %11035 = vmatpush1.bf16.msra.mxu0 %v15091_v41  ;;  %11417 = vmatprep.subr.bf16.mxu1 %v15036_v36  ;;  %v15110_v36 = vpack.c.bf16 %v3393_v14, %v3391_v42  ;;  %v3422_v42 = vld [vmem:[#allocation16 + $0x3e0] sm:$0xff]  ;;  %v3424_v14 = vld [vmem:[#allocation16 + $0x3f0] sm:$0xff] }
 0xc2f   :  { %11037 = vmatprep.subr.bf16.mxu0 %v15094_v62 }
 0xc31   :  { %11419 = vmatpush1.bf16.msra.mxu1 %v15041_v46  ;;  %v15115_v46 = vpack.c.bf16 %v3392_v3, %v3390_v32  ;;  %v4135_v32 = vld [vmem:[#allocation16 + $0x808] sm:$0xff]  ;;  %v4137_v3 = vld [vmem:[#allocation16 + $0x818] sm:$0xff] }
 0xc32   :  { %11039 = vmatpush1.bf16.msra.mxu0 %v15099_v21  ;;  %11421 = vmatprep.subr.bf16.mxu1 %v15044_v22  ;;  %v15118_v22 = vpack.c.bf16 %v3397_v8, %v3395_v4  ;;  %v4134_v4 = vld [vmem:[#allocation16 + $0x800] sm:$0xff]  ;;  %v4136_v8 = vld [vmem:[#allocation16 + $0x810] sm:$0xff] }
 0xc33   :  { %11041 = vmatprep.subr.bf16.mxu0 %v15102_v25 }
 0xc35   :  { %11423 = vmatpush1.bf16.msra.mxu1 %v15049_v12  ;;  %v15125_v12 = vpack.c.bf16 %v3396_v0, %v3394_v30  ;;  %v4139_v30 = vld [vmem:[#allocation16 + $0x828] sm:$0xff]  ;;  %v4141_v0 = vld [vmem:[#allocation16 + $0x838] sm:$0xff] }
 0xc36   :  { %11043 = vmatpush1.bf16.msra.mxu0 %v15107_v55  ;;  %11425 = vmatprep.subr.bf16.mxu1 %v15052_v5  ;;  %v15128_v5 = vpack.c.bf16 %v3401_v54, %v3399_v29  ;;  %v4138_v29 = vld [vmem:[#allocation16 + $0x820] sm:$0xff]  ;;  %v4140_v54 = vld [vmem:[#allocation16 + $0x830] sm:$0xff] }
 0xc37   :  { %11045 = vmatprep.subr.bf16.mxu0 %v15110_v36 }
 0xc38   :  { %4911 = vmatmul.mubr.f32.vlgmr.msra.gmra.mrb[40].mxu1 %v14830_v44  ;;  %v3405_v44 = vld [vmem:[#allocation16 + $0x358] sm:$0xff] }
 0xc39   :  { %11427 = vmatpush1.bf16.msra.mxu1 %v15057_v50  ;;  %4981 = vmatprep.mubr.f32.mxu1 %v14843_v27  ;;  %v15133_v27 = vpack.c.bf16 %v3400_v26, %v3398_v47  ;;  %v15136_v50 = vpack.c.bf16 %v3405_v44, %v3403_v17  ;;  %v4143_v47 = vld [vmem:[#allocation16 + $0x848] sm:$0xff]  ;;  %v4145_v26 = vld [vmem:[#allocation16 + $0x858] sm:$0xff]  ;;  %v4142_v17 = vld [vmem:[#allocation16 + $0x840] sm:$0xff] }
 0xc3a   :  { %11047 = vmatpush1.bf16.msra.mxu0 %v15115_v46  ;;  %11429 = vmatprep.subr.bf16.mxu1 %v15060_v34  ;;  %v3402_v34 = vld [vmem:[#allocation16 + $0x340] sm:$0xff]  ;;  %v4144_v44 = vld [vmem:[#allocation16 + $0x850] sm:$0xff] }
 0xc3b   :  { %11049 = vmatprep.subr.bf16.mxu0 %v15118_v22 }
 0xc3d   :  { %11431 = vmatpush1.bf16.msra.mxu1 %v15066_v51  ;;  %v15141_v51 = vpack.c.bf16 %v3404_v56, %v3402_v34  ;;  %v4147_v34 = vld [vmem:[#allocation16 + $0x868] sm:$0xff]  ;;  %v4149_v56 = vld [vmem:[#allocation16 + $0x878] sm:$0xff] }
 0xc3e   :  { %11051 = vmatpush1.bf16.msra.mxu0 %v15125_v12  ;;  %11433 = vmatprep.subr.bf16.mxu1 %v15070_v6  ;;  %v15144_v6 = vpack.c.bf16 %v3409_v19, %v3407_v13  ;;  %v4151_v13 = vld [vmem:[#allocation16 + $0x888] sm:$0xff]  ;;  %v4153_v19 = vld [vmem:[#allocation16 + $0x898] sm:$0xff] }
 0xc3f   :  { %11053 = vmatprep.subr.bf16.mxu0 %v15128_v5 }
 0xc41   :  { %11435 = vmatpush1.bf16.msra.mxu1 %v15075_v2  ;;  %v15149_v2 = vpack.c.bf16 %v3408_v48, %v3406_v1  ;;  %v4150_v1 = vld [vmem:[#allocation16 + $0x880] sm:$0xff]  ;;  %v4152_v48 = vld [vmem:[#allocation16 + $0x890] sm:$0xff] }
 0xc42   :  { %11055 = vmatpush1.bf16.msra.mxu0 %v15133_v27  ;;  %11437 = vmatprep.subr.bf16.mxu1 %v15078_v20  ;;  %v15152_v20 = vpack.c.bf16 %v3413_v7, %v3411_v37  ;;  %v4155_v37 = vld [vmem:[#allocation16 + $0x8a8] sm:$0xff]  ;;  %v4157_v7 = vld [vmem:[#allocation16 + $0x8b8] sm:$0xff] }
 0xc43   :  { %11057 = vmatprep.subr.bf16.mxu0 %v15136_v50 }
 0xc45   :  { %11439 = vmatpush1.bf16.msra.mxu1 %v15083_v9  ;;  %v15157_v9 = vpack.c.bf16 %v3412_v35, %v3410_v16  ;;  %v4154_v16 = vld [vmem:[#allocation16 + $0x8a0] sm:$0xff]  ;;  %v4156_v35 = vld [vmem:[#allocation16 + $0x8b0] sm:$0xff] }
 0xc46   :  { %11059 = vmatpush1.bf16.msra.mxu0 %v15141_v51  ;;  %11441 = vmatprep.subr.bf16.mxu1 %v15086_v38  ;;  %v15160_v38 = vpack.c.bf16 %v3417_v59, %v3415_v28  ;;  %v4159_v28 = vld [vmem:[#allocation16 + $0x8c8] sm:$0xff]  ;;  %v4161_v59 = vld [vmem:[#allocation16 + $0x8d8] sm:$0xff] }
 0xc47   :  { %11061 = vmatprep.subr.bf16.mxu0 %v15144_v6 }
 0xc49   :  { %11443 = vmatpush1.bf16.msra.mxu1 %v15091_v41  ;;  %v15165_v41 = vpack.c.bf16 %v3416_v61, %v3414_v23  ;;  %v4158_v23 = vld [vmem:[#allocation16 + $0x8c0] sm:$0xff]  ;;  %v4160_v61 = vld [vmem:[#allocation16 + $0x8d0] sm:$0xff] }
 0xc4a   :  { %11063 = vmatpush1.bf16.msra.mxu0 %v15149_v2  ;;  %11445 = vmatprep.subr.bf16.mxu1 %v15094_v62  ;;  %v15168_v62 = vpack.c.bf16 %v3421_v39, %v3419_v57  ;;  %v4163_v57 = vld [vmem:[#allocation16 + $0x8e8] sm:$0xff]  ;;  %v4165_v39 = vld [vmem:[#allocation16 + $0x8f8] sm:$0xff] }
 0xc4b   :  { %11065 = vmatprep.subr.bf16.mxu0 %v15152_v20 }
 0xc4d   :  { %11447 = vmatpush1.bf16.msra.mxu1 %v15099_v21  ;;  %v15173_v21 = vpack.c.bf16 %v3420_v60, %v3418_v40  ;;  %v4162_v40 = vld [vmem:[#allocation16 + $0x8e0] sm:$0xff]  ;;  %v4164_v60 = vld [vmem:[#allocation16 + $0x8f0] sm:$0xff] }
 0xc4e   :  { %11067 = vmatpush1.bf16.msra.mxu0 %v15157_v9  ;;  %11449 = vmatprep.subr.bf16.mxu1 %v15102_v25  ;;  %v15176_v25 = vpack.c.bf16 %v3425_v33, %v3423_v43  ;;  %v4167_v43 = vld [vmem:[#allocation16 + $0x908] sm:$0xff]  ;;  %v4169_v33 = vld [vmem:[#allocation16 + $0x918] sm:$0xff] }
 0xc4f   :  { %11069 = vmatprep.subr.bf16.mxu0 %v15160_v38 }
 0xc51   :  { %11451 = vmatpush1.bf16.msra.mxu1 %v15107_v55  ;;  %v15181_v55 = vpack.c.bf16 %v3424_v14, %v3422_v42  ;;  %v4166_v42 = vld [vmem:[#allocation16 + $0x900] sm:$0xff]  ;;  %v4168_v14 = vld [vmem:[#allocation16 + $0x910] sm:$0xff] }
 0xc52   :  { %11071 = vmatpush1.bf16.msra.mxu0 %v15165_v41  ;;  %11453 = vmatprep.subr.bf16.mxu1 %v15110_v36  ;;  %v15184_v36 = vpack.c.bf16 %v4137_v3, %v4135_v32  ;;  %v4171_v32 = vld [vmem:[#allocation16 + $0x928] sm:$0xff]  ;;  %v4173_v3 = vld [vmem:[#allocation16 + $0x938] sm:$0xff] }
 0xc53   :  { %11073 = vmatprep.subr.bf16.mxu0 %v15168_v62 }
 0xc55   :  { %11455 = vmatpush1.bf16.msra.mxu1 %v15115_v46  ;;  %v15189_v46 = vpack.c.bf16 %v4136_v8, %v4134_v4  ;;  %v4170_v4 = vld [vmem:[#allocation16 + $0x920] sm:$0xff]  ;;  %v4172_v8 = vld [vmem:[#allocation16 + $0x930] sm:$0xff] }
 0xc56   :  { %11075 = vmatpush1.bf16.msra.mxu0 %v15173_v21  ;;  %11457 = vmatprep.subr.bf16.mxu1 %v15118_v22  ;;  %v15192_v22 = vpack.c.bf16 %v4141_v0, %v4139_v30  ;;  %v12838_v30 = vld [vmem:[#allocation14 + $0x10] sm:$0xff] }
 0xc57   :  { %11077 = vmatprep.subr.bf16.mxu0 %v15176_v25  ;;  %v4177_v0 = vld [vmem:[#allocation16 + $0x958] sm:$0xff] }
 0xc59   :  { %11459 = vmatpush1.bf16.msra.mxu1 %v15125_v12  ;;  %v15198_v12 = vpack.c.bf16 %v4140_v54, %v4138_v29  ;;  %v4174_v29 = vld [vmem:[#allocation16 + $0x940] sm:$0xff]  ;;  %v4176_v54 = vld [vmem:[#allocation16 + $0x950] sm:$0xff] }
 0xc5a   :  { %11079 = vmatpush1.bf16.msra.mxu0 %v15181_v55  ;;  %11461 = vmatprep.subr.bf16.mxu1 %v15128_v5  ;;  %v15202_v5 = vpack.c.bf16 %v4145_v26, %v4143_v47  ;;  %v4179_v47 = vld [vmem:[#allocation16 + $0x968] sm:$0xff]  ;;  %v4181_v26 = vld [vmem:[#allocation16 + $0x978] sm:$0xff] }
 0xc5b   :  { %11089 = vmatprep.subr.bf16.mxu0 %v15184_v36 }
 0xc5d   :  { %3980 = vmatmul.mubr.f32.vlgmr.msra.gmra.mrb[28].mxu0 %v14792_v24  ;;  %11463 = vmatpush1.bf16.msra.mxu1 %v15133_v27  ;;  %v15207_v24 = vpack.c.bf16 %v4144_v44, %v4142_v17  ;;  %v4146_v27 = vld [vmem:[#allocation16 + $0x860] sm:$0xff]  ;;  %v4180_v44 = vld [vmem:[#allocation16 + $0x970] sm:$0xff] }
 0xc5e   :  { %11091 = vmatpush1.bf16.msra.mxu0 %v15189_v46  ;;  %4326 = vmatprep.mubr.f32.mxu0 %v14813_v58  ;;  %v15210_v58 = vpack.c.bf16 %v4149_v56, %v4147_v34  ;;  %v4178_v17 = vld [vmem:[#allocation16 + $0x960] sm:$0xff]  ;;  %v4183_v34 = vld [vmem:[#allocation16 + $0x988] sm:$0xff]  ;;  %v4185_v56 = vld [vmem:[#allocation16 + $0x998] sm:$0xff] }
 0xc5f   :  { %11093 = vmatprep.subr.bf16.mxu0 %v15192_v22  ;;  %11465 = vmatprep.subr.bf16.mxu1 %v15136_v50  ;;  %v4148_v50 = vld [vmem:[#allocation16 + $0x870] sm:$0xff] }
 0xc61   :  { %11467 = vmatpush1.bf16.msra.mxu1 %v15141_v51  ;;  %v15215_v51 = vpack.c.bf16 %v4148_v50, %v4146_v27  ;;  %v15283_v27 = vpack.c.bf16 %v4180_v44, %v4178_v17  ;;  %v4184_v50 = vld [vmem:[#allocation16 + $0x990] sm:$0xff]  ;;  %v4221_v17 = vld [vmem:[#allocation16 + $0xab8] sm:$0xff] }
 0xc62   :  { %11095 = vmatpush1.bf16.msra.mxu0 %v15198_v12  ;;  %11469 = vmatprep.subr.bf16.mxu1 %v15144_v6  ;;  %v15218_v6 = vpack.c.bf16 %v4153_v19, %v4151_v13  ;;  %v4187_v13 = vld [vmem:[#allocation16 + $0x9a8] sm:$0xff]  ;;  %v4189_v19 = vld [vmem:[#allocation16 + $0x9b8] sm:$0xff] }
 0xc63   :  { %11097 = vmatprep.subr.bf16.mxu0 %v15202_v5 }
 0xc65   :  { %11471 = vmatpush1.bf16.msra.mxu1 %v15149_v2  ;;  %v15223_v2 = vpack.c.bf16 %v4152_v48, %v4150_v1  ;;  %v4188_v48 = vld [vmem:[#allocation16 + $0x9b0] sm:$0xff] }
 0xc66   :  { %11099 = vmatpush1.bf16.msra.mxu0 %v15207_v24  ;;  %11473 = vmatprep.subr.bf16.mxu1 %v15152_v20  ;;  %v15226_v20 = vpack.c.bf16 %v4157_v7, %v4155_v37  ;;  %v4191_v37 = vld [vmem:[#allocation16 + $0x9c8] sm:$0xff]  ;;  %v4193_v7 = vld [vmem:[#allocation16 + $0x9d8] sm:$0xff] }
 0xc67   :  { %11101 = vmatprep.subr.bf16.mxu0 %v15210_v58 }
 0xc69   :  { %11475 = vmatpush1.bf16.msra.mxu1 %v15157_v9  ;;  %v15231_v9 = vpack.c.bf16 %v4156_v35, %v4154_v16  ;;  %v4192_v35 = vld [vmem:[#allocation16 + $0x9d0] sm:$0xff] }
 0xc6a   :  { %11103 = vmatpush1.bf16.msra.mxu0 %v15215_v51  ;;  %11477 = vmatprep.subr.bf16.mxu1 %v15160_v38  ;;  %v15234_v38 = vpack.c.bf16 %v4161_v59, %v4159_v28  ;;  %v4195_v28 = vld [vmem:[#allocation16 + $0x9e8] sm:$0xff]  ;;  %v4197_v59 = vld [vmem:[#allocation16 + $0x9f8] sm:$0xff] }
 0xc6b   :  { %11105 = vmatprep.subr.bf16.mxu0 %v15218_v6 }
 0xc6d   :  { %11479 = vmatpush1.bf16.msra.mxu1 %v15165_v41  ;;  %v15239_v41 = vpack.c.bf16 %v4160_v61, %v4158_v23  ;;  %v4196_v61 = vld [vmem:[#allocation16 + $0x9f0] sm:$0xff] }
 0xc6e   :  { %11107 = vmatpush1.bf16.msra.mxu0 %v15223_v2  ;;  %11481 = vmatprep.subr.bf16.mxu1 %v15168_v62  ;;  %v15242_v62 = vpack.c.bf16 %v4165_v39, %v4163_v57  ;;  %v4199_v57 = vld [vmem:[#allocation16 + $0xa08] sm:$0xff]  ;;  %v4201_v39 = vld [vmem:[#allocation16 + $0xa18] sm:$0xff] }
 0xc6f   :  { %11109 = vmatprep.subr.bf16.mxu0 %v15226_v20 }
 0xc71   :  { %11483 = vmatpush1.bf16.msra.mxu1 %v15173_v21  ;;  %v15247_v21 = vpack.c.bf16 %v4164_v60, %v4162_v40  ;;  %v4200_v60 = vld [vmem:[#allocation16 + $0xa10] sm:$0xff] }
 0xc72   :  { %11111 = vmatpush1.bf16.msra.mxu0 %v15231_v9  ;;  %11485 = vmatprep.subr.bf16.mxu1 %v15176_v25  ;;  %v15250_v25 = vpack.c.bf16 %v4169_v33, %v4167_v43  ;;  %v4203_v43 = vld [vmem:[#allocation16 + $0xa28] sm:$0xff]  ;;  %v4205_v33 = vld [vmem:[#allocation16 + $0xa38] sm:$0xff] }
 0xc73   :  { %11113 = vmatprep.subr.bf16.mxu0 %v15234_v38 }
 0xc75   :  { %11487 = vmatpush1.bf16.msra.mxu1 %v15181_v55  ;;  %v15260_v55 = vpack.c.bf16 %v4173_v3, %v4171_v32  ;;  %v4207_v32 = vld [vmem:[#allocation16 + $0xa48] sm:$0xff]  ;;  %v4209_v3 = vld [vmem:[#allocation16 + $0xa58] sm:$0xff] }
 0xc76   :  { %11115 = vmatpush1.bf16.msra.mxu0 %v15239_v41  ;;  %11489 = vmatprep.subr.bf16.mxu1 %v14645_v52  ;;  %v15257_v52 = vpack.c.bf16 %v4168_v14, %v4166_v42  ;;  %v4204_v14 = vld [vmem:[#allocation16 + $0xa30] sm:$0xff] }
 0xc77   :  { %11117 = vmatprep.subr.bf16.mxu0 %v15242_v62 }
 0xc78   :  { %4982 = vmatmul.mubr.f32.vlgmr.msra.gmra.mrb[40].mxu1 %v14840_v53  ;;  %v4175_v53 = vld [vmem:[#allocation16 + $0x948] sm:$0xff] }
 0xc79   :  { %11491 = vmatpush1.bf16.msra.mxu1 %v14665_v15  ;;  %5052 = vmatprep.mubr.f32.mxu1 %v16056_v45  ;;  %v15266_v15 = vpack.c.bf16 %v4172_v8, %v4170_v4  ;;  %v4206_v4 = vld [vmem:[#allocation16 + $0xa40] sm:$0xff]  ;;  %v4208_v8 = vld [vmem:[#allocation16 + $0xa50] sm:$0xff] }
 0xc7a   :  { %11119 = vmatpush1.bf16.msra.mxu0 %v15247_v21  ;;  %11493 = vmatprep.subr.bf16.mxu1 %v14673_v31  ;;  %v15270_v31 = vpack.c.bf16 %v4177_v0, %v4175_v53  ;;  %v4213_v53 = vld [vmem:[#allocation16 + $0xa78] sm:$0xff]  ;;  %v4212_v0 = vld [vmem:[#allocation16 + $0xa70] sm:$0xff] }
 0xc7b   :  { %11121 = vmatprep.subr.bf16.mxu0 %v15250_v25 }
 0xc7c   :  { %9708 = vmatmul.mubr.msk.f32.vlgmr.msra.gmra.mrb[42].mxu1 %vm3152_vm1, %v12838_v30 }
 0xc7d   :  { %11495 = vmatpush1.bf16.msra.mxu1 %v14684_v11  ;;  %5123 = vmatprep.mubr.f32.mxu1 %v16056_v45  ;;  %v15275_v11 = vpack.c.bf16 %v4176_v54, %v4174_v29  ;;  %v4215_v29 = vld [vmem:[#allocation16 + $0xa88] sm:$0xff]  ;;  %v4217_v54 = vld [vmem:[#allocation16 + $0xa98] sm:$0xff] }
 0xc7e   :  { %11123 = vmatpush1.bf16.msra.mxu0 %v15257_v52  ;;  %11497 = vmatprep.subr.bf16.mxu1 %v15184_v36  ;;  %v15279_v36 = vpack.c.bf16 %v4181_v26, %v4179_v47  ;;  %v4216_v47 = vld [vmem:[#allocation16 + $0xa90] sm:$0xff]  ;;  %v4219_v26 = vld [vmem:[#allocation16 + $0xaa8] sm:$0xff] }
 0xc7f   :  { %11125 = vmatprep.subr.bf16.mxu0 %v15260_v55 }
 0xc80   :  { %9709 = vmatmul.mubr.msk.f32.vlgmr.msra.gmra.mrb[44].mxu1 %vm3152_vm1, %v12838_v30  ;;  %v4211_v30 = vld [vmem:[#allocation16 + $0xa68] sm:$0xff] }
 0xc81   :  { %11499 = vmatpush1.bf16.msra.mxu1 %v15189_v46  ;;  %v15287_v46 = vpack.c.bf16 %v4185_v56, %v4183_v34  ;;  %v4220_v34 = vld [vmem:[#allocation16 + $0xab0] sm:$0xff]  ;;  %v4223_v56 = vld [vmem:[#allocation16 + $0xac8] sm:$0xff] }
 0xc82   :  { %11127 = vmatpush1.bf16.msra.mxu0 %v15266_v15  ;;  %11501 = vmatprep.subr.bf16.mxu1 %v15192_v22  ;;  %v4182_v22 = vld [vmem:[#allocation16 + $0x980] sm:$0xff] }
 0xc83   :  { %11129 = vmatprep.subr.bf16.mxu0 %v15270_v31  ;;  %v15291_v1 = vpack.c.bf16 %v4184_v50, %v4182_v22  ;;  %v4225_v22 = vld [vmem:[#allocation16 + $0xad8] sm:$0xff] }
 0xc85   :  { %11503 = vmatpush1.bf16.msra.mxu1 %v15198_v12  ;;  %v15295_v12 = vpack.c.bf16 %v4189_v19, %v4187_v13  ;;  %v4224_v13 = vld [vmem:[#allocation16 + $0xad0] sm:$0xff]  ;;  %v4227_v19 = vld [vmem:[#allocation16 + $0xae8] sm:$0xff] }
 0xc86   :  { %11131 = vmatpush1.bf16.msra.mxu0 %v15275_v11  ;;  %11505 = vmatprep.subr.bf16.mxu1 %v15202_v5  ;;  %v4186_v5 = vld [vmem:[#allocation16 + $0x9a0] sm:$0xff] }
 0xc87   :  { %11133 = vmatprep.subr.bf16.mxu0 %v15279_v36  ;;  %v15299_v16 = vpack.c.bf16 %v4188_v48, %v4186_v5  ;;  %v4229_v5 = vld [vmem:[#allocation16 + $0xaf8] sm:$0xff] }
 0xc89   :  { %11507 = vmatpush1.bf16.msra.mxu1 %v15207_v24  ;;  %v15303_v24 = vpack.c.bf16 %v4193_v7, %v4191_v37  ;;  %v4228_v37 = vld [vmem:[#allocation16 + $0xaf0] sm:$0xff]  ;;  %v4231_v7 = vld [vmem:[#allocation16 + $0xb08] sm:$0xff] }
 0xc8a   :  { %11135 = vmatpush1.bf16.msra.mxu0 %v15283_v27  ;;  %11509 = vmatprep.subr.bf16.mxu1 %v15210_v58  ;;  %v4190_v58 = vld [vmem:[#allocation16 + $0x9c0] sm:$0xff] }
 0xc8b   :  { %11137 = vmatprep.subr.bf16.mxu0 %v15287_v46  ;;  %v15307_v23 = vpack.c.bf16 %v4192_v35, %v4190_v58  ;;  %v4233_v58 = vld [vmem:[#allocation16 + $0xb18] sm:$0xff] }
 0xc8d   :  { %11511 = vmatpush1.bf16.msra.mxu1 %v15215_v51  ;;  %v15311_v51 = vpack.c.bf16 %v4197_v59, %v4195_v28  ;;  %v4232_v28 = vld [vmem:[#allocation16 + $0xb10] sm:$0xff]  ;;  %v4235_v59 = vld [vmem:[#allocation16 + $0xb28] sm:$0xff] }
 0xc8e   :  { %11139 = vmatpush1.bf16.msra.mxu0 %v15291_v1  ;;  %11513 = vmatprep.subr.bf16.mxu1 %v15218_v6  ;;  %v4194_v6 = vld [vmem:[#allocation16 + $0x9e0] sm:$0xff] }
 0xc8f   :  { %11141 = vmatprep.subr.bf16.mxu0 %v15295_v12  ;;  %v15315_v40 = vpack.c.bf16 %v4196_v61, %v4194_v6  ;;  %v4237_v6 = vld [vmem:[#allocation16 + $0xb38] sm:$0xff] }
 0xc91   :  { %11515 = vmatpush1.bf16.msra.mxu1 %v15223_v2  ;;  %v15319_v2 = vpack.c.bf16 %v4201_v39, %v4199_v57  ;;  %v4236_v57 = vld [vmem:[#allocation16 + $0xb30] sm:$0xff]  ;;  %v4239_v39 = vld [vmem:[#allocation16 + $0xb48] sm:$0xff] }
 0xc92   :  { %11143 = vmatpush1.bf16.msra.mxu0 %v15299_v16  ;;  %11517 = vmatprep.subr.bf16.mxu1 %v15226_v20  ;;  %v4198_v20 = vld [vmem:[#allocation16 + $0xa00] sm:$0xff] }
 0xc93   :  { %11145 = vmatprep.subr.bf16.mxu0 %v15303_v24  ;;  %v15323_v42 = vpack.c.bf16 %v4200_v60, %v4198_v20  ;;  %v4241_v20 = vld [vmem:[#allocation16 + $0xb58] sm:$0xff] }
 0xc95   :  { %11519 = vmatpush1.bf16.msra.mxu1 %v15231_v9  ;;  %v15327_v9 = vpack.c.bf16 %v4205_v33, %v4203_v43  ;;  %v4240_v43 = vld [vmem:[#allocation16 + $0xb50] sm:$0xff]  ;;  %v4243_v33 = vld [vmem:[#allocation16 + $0xb68] sm:$0xff] }
 0xc96   :  { %11147 = vmatpush1.bf16.msra.mxu0 %v15307_v23  ;;  %11521 = vmatprep.subr.bf16.mxu1 %v15234_v38  ;;  %v4202_v38 = vld [vmem:[#allocation16 + $0xa20] sm:$0xff] }
 0xc97   :  { %11149 = vmatprep.subr.bf16.mxu0 %v15311_v51 }
 0xc99   :  { %11523 = vmatpush1.bf16.msra.mxu1 %v15239_v41  ;;  %v15333_v41 = vpack.c.bf16 %v4204_v14, %v4202_v38  ;;  %v4245_v38 = vld [vmem:[#allocation16 + $0xb78] sm:$0xff] }
 0xc9a   :  { %11151 = vmatpush1.bf16.msra.mxu0 %v15315_v40  ;;  %11525 = vmatprep.subr.bf16.mxu1 %v15242_v62  ;;  %v15336_v62 = vpack.c.bf16 %v4209_v3, %v4207_v32  ;;  %v4242_v32 = vld [vmem:[#allocation16 + $0xb60] sm:$0xff]  ;;  %v4244_v3 = vld [vmem:[#allocation16 + $0xb70] sm:$0xff] }
 0xc9b   :  { %11153 = vmatprep.subr.bf16.mxu0 %v15319_v2 }
 0xc9d   :  { %4327 = vmatmul.mubr.f32.vlgmr.msra.gmra.mrb[28].mxu0 %v14810_v63  ;;  %11527 = vmatpush1.bf16.msra.mxu1 %v15247_v21  ;;  %v15341_v63 = vpack.c.bf16 %v4208_v8, %v4206_v4  ;;  %v4210_v21 = vld [vmem:[#allocation16 + $0xa60] sm:$0xff]  ;;  %v4247_v4 = vld [vmem:[#allocation16 + $0xb88] sm:$0xff]  ;;  %v15410_v8 = vpack.c.bf16 %v4244_v3, %v4242_v32  ;;  %v5323_v32 = vld [vmem:[%s16063_s21 + $0xa8] sm:$0xff] }
 0xc9e   :  { %11155 = vmatpush1.bf16.msra.mxu0 %v15323_v42  ;;  %4397 = vmatprep.mubr.f32.mxu0 %v14823_v10  ;;  %v15345_v10 = vpack.c.bf16 %v4213_v53, %v4211_v30  ;;  %v4246_v53 = vld [vmem:[#allocation16 + $0xb80] sm:$0xff] }
 0xc9f   :  { %11157 = vmatprep.subr.bf16.mxu0 %v15327_v9  ;;  %11529 = vmatprep.subr.bf16.mxu1 %v15250_v25  ;;  %v15349_v25 = vpack.c.bf16 %v4212_v0, %v4210_v21  ;;  %v4248_v21 = vld [vmem:[#allocation16 + $0xb90] sm:$0xff]  ;;  %v4251_v0 = vld [vmem:[#allocation16 + $0xba8] sm:$0xff] }
 0xca1   :  { %11531 = vmatpush1.bf16.msra.mxu1 %v15257_v52  ;;  %v15353_v52 = vpack.c.bf16 %v4217_v54, %v4215_v29  ;;  %v4253_v29 = vld [vmem:[#allocation16 + $0xbb8] sm:$0xff]  ;;  %v15416_v54 = vpack.c.bf16 %v4248_v21, %v4246_v53  ;;  %v5324_v53 = vld [vmem:[%s16063_s21 + $0xb0] sm:$0xff]  ;;  %v5325_v21 = vld [vmem:[%s16063_s21 + $0xb8] sm:$0xff] }
 0xca2   :  { %11159 = vmatpush1.bf16.msra.mxu0 %v15333_v41  ;;  %11533 = vmatprep.subr.bf16.mxu1 %v15260_v55  ;;  %v4214_v55 = vld [vmem:[#allocation16 + $0xa80] sm:$0xff] }
 0xca3   :  { %11161 = vmatprep.subr.bf16.mxu0 %v15336_v62  ;;  %v15357_v44 = vpack.c.bf16 %v4216_v47, %v4214_v55  ;;  %v15419_v55 = vpack.c.bf16 %v4253_v29, %v4251_v0  ;;  %v4250_v47 = vld [vmem:[#allocation16 + $0xba0] sm:$0xff]  ;;  %v11636_v29 = vpack.c.bf16 %v5325_v21, %v5324_v53 }
 0xca5   :  { %11535 = vmatpush1.bf16.msra.mxu1 %v15266_v15  ;;  %v15361_v15 = vpack.c.bf16 %v4221_v17, %v4219_v26  ;;  %v4252_v26 = vld [vmem:[#allocation16 + $0xbb0] sm:$0xff]  ;;  %v4255_v17 = vld [vmem:[#allocation16 + $0xbc8] sm:$0xff] }
 0xca6   :  { %11163 = vmatpush1.bf16.msra.mxu0 %v15341_v63  ;;  %11537 = vmatprep.subr.bf16.mxu1 %v15270_v31  ;;  %v4218_v31 = vld [vmem:[#allocation16 + $0xaa0] sm:$0xff] }
 0xca7   :  { %11165 = vmatprep.subr.bf16.mxu0 %v15345_v10  ;;  %v15365_v50 = vpack.c.bf16 %v4220_v34, %v4218_v31  ;;  %v4257_v31 = vld [vmem:[#allocation16 + $0xbd8] sm:$0xff]  ;;  %v15422_v34 = vpack.c.bf16 %v4252_v26, %v4250_v47 }
 0xca9   :  { %11539 = vmatpush1.bf16.msra.mxu1 %v15275_v11  ;;  %v15369_v11 = vpack.c.bf16 %v4225_v22, %v4223_v56  ;;  %v15425_v56 = vpack.c.bf16 %v4257_v31, %v4255_v17  ;;  %v4254_v22 = vld [vmem:[#allocation16 + $0xbc0] sm:$0xff] }
 0xcaa   :  { %11167 = vmatpush1.bf16.msra.mxu0 %v15349_v25  ;;  %11541 = vmatprep.subr.bf16.mxu1 %v15279_v36  ;;  %v4222_v36 = vld [vmem:[#allocation16 + $0xac0] sm:$0xff] }
 0xcab   :  { %11169 = vmatprep.subr.bf16.mxu0 %v15353_v52  ;;  %v15373_v48 = vpack.c.bf16 %v4224_v13, %v4222_v36  ;;  %v4256_v36 = vld [vmem:[#allocation16 + $0xbd0] sm:$0xff]  ;;  %v4259_v13 = vld [vmem:[#allocation16 + $0xbe8] sm:$0xff] }
 0xcad   :  { %11543 = vmatpush1.bf16.msra.mxu1 %v15283_v27  ;;  %v15377_v27 = vpack.c.bf16 %v4229_v5, %v4227_v19  ;;  %v4261_v19 = vld [vmem:[#allocation16 + $0xbf8] sm:$0xff]  ;;  %v15428_v5 = vpack.c.bf16 %v4256_v36, %v4254_v22  ;;  %v5406_v22 = vld [vmem:[#allocation19 + $0x8] sm:$0xff] }
 0xcae   :  { %11171 = vmatpush1.bf16.msra.mxu0 %v15357_v44  ;;  %11545 = vmatprep.subr.bf16.mxu1 %v15287_v46  ;;  %v4226_v46 = vld [vmem:[#allocation16 + $0xae0] sm:$0xff] }
 0xcaf   :  { %11173 = vmatprep.subr.bf16.mxu0 %v15361_v15  ;;  %v15381_v35 = vpack.c.bf16 %v4228_v37, %v4226_v46  ;;  %v15431_v46 = vpack.c.bf16 %v4261_v19, %v4259_v13  ;;  %v4258_v37 = vld [vmem:[#allocation16 + $0xbe0] sm:$0xff] }
 0xcb0   :  { %v5408_v36 = vld [vmem:[#allocation19 + $0x18] sm:$0xff] }
 0xcb1   :  { %11547 = vmatpush1.bf16.msra.mxu1 %v15291_v1  ;;  %v15385_v1 = vpack.c.bf16 %v4233_v58, %v4231_v7  ;;  %v4260_v7 = vld [vmem:[#allocation16 + $0xbf0] sm:$0xff]  ;;  %v15502_v19 = vpack.c.bf16 %v5408_v36, %v5406_v22 }
 0xcb2   :  { %11175 = vmatpush1.bf16.msra.mxu0 %v15365_v50  ;;  %11549 = vmatprep.subr.bf16.mxu1 %v15295_v12  ;;  %v4230_v12 = vld [vmem:[#allocation16 + $0xb00] sm:$0xff]  ;;  %v15434_v58 = vpack.c.bf16 %v4260_v7, %v4258_v37 }
 0xcb3   :  { %11177 = vmatprep.subr.bf16.mxu0 %v15369_v11  ;;  %v15389_v61 = vpack.c.bf16 %v4232_v28, %v4230_v12  ;;  %v5318_v12 = vld [vmem:[%s16063_s21 + $0x80] sm:$0xff]  ;;  %v5319_v28 = vld [vmem:[%s16063_s21 + $0x88] sm:$0xff] }
 0xcb5   :  { %11551 = vmatpush1.bf16.msra.mxu1 %v15299_v16  ;;  %v15393_v16 = vpack.c.bf16 %v4237_v6, %v4235_v59  ;;  %v5302_v59 = vld [vmem:[%s16063_s21] sm:$0xff]  ;;  %v11624_v6 = vpack.c.bf16 %v5319_v28, %v5318_v12 }
 0xcb6   :  { %11179 = vmatpush1.bf16.msra.mxu0 %v15373_v48  ;;  %11553 = vmatprep.subr.bf16.mxu1 %v15303_v24  ;;  %v4234_v24 = vld [vmem:[#allocation16 + $0xb20] sm:$0xff] }
 0xcb7   :  { %11181 = vmatprep.subr.bf16.mxu0 %v15377_v27  ;;  %v15397_v60 = vpack.c.bf16 %v4236_v57, %v4234_v24  ;;  %v5303_v24 = vld [vmem:[%s16063_s21 + $0x8] sm:$0xff]  ;;  %v5320_v57 = vld [vmem:[%s16063_s21 + $0x90] sm:$0xff] }
 0xcb9   :  { %11555 = vmatpush1.bf16.msra.mxu1 %v15307_v23  ;;  %v15401_v23 = vpack.c.bf16 %v4241_v20, %v4239_v39  ;;  %v5321_v39 = vld [vmem:[%s16063_s21 + $0x98] sm:$0xff]  ;;  %v11626_v20 = vpack.c.bf16 %v5303_v24, %v5302_v59 }
 0xcba   :  { %11183 = vmatpush1.bf16.msra.mxu0 %v15381_v35  ;;  %11557 = vmatprep.subr.bf16.mxu1 %v15311_v51  ;;  %v4238_v51 = vld [vmem:[#allocation16 + $0xb40] sm:$0xff] }
 0xcbb   :  { %11185 = vmatprep.subr.bf16.mxu0 %v15385_v1  ;;  %v15404_v14 = vpack.c.bf16 %v4240_v43, %v4238_v51  ;;  %v11628_v51 = vpack.c.bf16 %v5321_v39, %v5320_v57  ;;  %v5304_v43 = vld [vmem:[%s16063_s21 + $0x10] sm:$0xff] }
 0xcbd   :  { %11559 = vmatpush1.bf16.msra.mxu1 %v15315_v40  ;;  %v15407_v40 = vpack.c.bf16 %v4245_v38, %v4243_v33  ;;  %v5305_v33 = vld [vmem:[%s16063_s21 + $0x18] sm:$0xff]  ;;  %v5322_v38 = vld [vmem:[%s16063_s21 + $0xa0] sm:$0xff] }
 0xcbe   :  { %11187 = vmatpush1.bf16.msra.mxu0 %v15389_v61  ;;  %11561 = vmatprep.subr.bf16.mxu1 %v15319_v2  ;;  %v4249_v2 = vld [vmem:[#allocation16 + $0xb98] sm:$0xff]  ;;  %v11632_v3 = vpack.c.bf16 %v5323_v32, %v5322_v38 }
 0xcbf   :  { %11189 = vmatprep.subr.bf16.mxu0 %v15393_v16  ;;  %v15413_v30 = vpack.c.bf16 %v4249_v2, %v4247_v4  ;;  %v5306_v4 = vld [vmem:[%s16063_s21 + $0x20] sm:$0xff]  ;;  %v5307_v2 = vld [vmem:[%s16063_s21 + $0x28] sm:$0xff] }
 0xcc0   :  { %v11634_v0 = vpack.c.bf16 %v5307_v2, %v5306_v4 }
 0xcc2   :  { %11191 = vmatpush1.bf16.msra.mxu0 %v15397_v60 }
 0xcc3   :  { %11193 = vmatprep.subr.bf16.mxu0 %v15401_v23 }
 0xcc6   :  { %11195 = vmatpush1.bf16.msra.mxu0 %v15404_v14 }
 0xcc7   :  { %11197 = vmatprep.subr.bf16.mxu0 %v15407_v40 }
 0xcca   :  { %11199 = vmatpush1.bf16.msra.mxu0 %v15410_v8 }
 0xccb   :  { %11201 = vmatprep.subr.bf16.mxu0 %v15413_v30 }
 0xcce   :  { %11203 = vmatpush1.bf16.msra.mxu0 %v15416_v54 }
 0xccf   :  { %11205 = vmatprep.subr.bf16.mxu0 %v15419_v55 }
 0xcd2   :  { %11207 = vmatpush1.bf16.msra.mxu0 %v15422_v34 }
 0xcd3   :  { %11209 = vmatprep.subr.bf16.mxu0 %v15425_v56 }
 0xcd6   :  { %11211 = vmatpush1.bf16.msra.mxu0 %v15428_v5 }
 0xcd7   :  { %11213 = vmatprep.subr.bf16.mxu0 %v15431_v46 }
 0xcda   :  { %11215 = vmatpush1.bf16.msra.mxu0 %v15434_v58 }
 0xcdb   :  { %11625 = vmatprep.subr.bf16.mxu0 %v11624_v6 }
 0xcdd   :  { %4398 = vmatmul.mubr.f32.vlgmr.msra.gmra.mrb[28].mxu0 %v14820_v18  ;;  %v11630_v18 = vpack.c.bf16 %v5305_v33, %v5304_v43 }
 0xcde   :  { %11627 = vmatpush3.bf16.msra.mxu0 %v11626_v20 }
 0xcdf   :  { %11629 = vmatprep.subr.bf16.mxu0 %v11628_v51 }
 0xce2   :  { %11631 = vmatpush3.bf16.msra.mxu0 %v11630_v18 }
 0xce3   :  { %11633 = vmatprep.subr.bf16.mxu0 %v11632_v3 }
 0xce6   :  { %11635 = vmatpush3.bf16.msra.mxu0 %v11634_v0 }
 0xce7   :  { %11637 = vmatprep.subr.bf16.mxu0 %v11636_v29 }
 0xd4f   :  { %v5054_v47 = vpop.f32.mrb[42].mxu1 }
 0xd50   :  { %v5056_v26 = vpop.f32.mrb[43].mxu1 }
 0xd51   :  { %5194 = vmatprep.mubr.f32.mxu1 %v5056_v26 }
 0xd52   :  { %5195 = vmatmul.mubr.f32.vlgmr.msra.gmra.mrb[40].mxu1 %v5054_v47 }
 0xd53   :  { %11563 = vmatpush1.bf16.msra.mxu1 %v15323_v42  ;;  %v5125_v17 = vpop.f32.mrb[44].mxu1 }
 0xd54   :  { %11565 = vmatprep.subr.bf16.mxu1 %v15327_v9  ;;  %v5127_v31 = vpop.f32.mrb[45].mxu1 }
 0xd55   :  { %5265 = vmatprep.mubr.f32.mxu1 %v5127_v31 }
 0xd57   :  { %11567 = vmatpush1.bf16.msra.mxu1 %v15333_v41  ;;  %v5308_v41 = vld [vmem:[%s16063_s21 + $0x30] sm:$0xff] }
 0xd58   :  { %11569 = vmatprep.subr.bf16.mxu1 %v15336_v62  ;;  %v5309_v62 = vld [vmem:[%s16063_s21 + $0x38] sm:$0xff] }
 0xd5b   :  { %11571 = vmatpush1.bf16.msra.mxu1 %v15341_v63  ;;  %v11638_v63 = vpack.c.bf16 %v5309_v62, %v5308_v41  ;;  %v5407_v41 = vld [vmem:[#allocation19 + $0x10] sm:$0xff] }
 0xd5c   :  { %11573 = vmatprep.subr.bf16.mxu1 %v15345_v10  ;;  %v5326_v10 = vld [vmem:[%s16063_s21 + $0xc0] sm:$0xff] }
 0xd5d   :  { %11639 = vmatpush3.bf16.msra.mxu0 %v11638_v63 }
 0xd5f   :  { %11575 = vmatpush1.bf16.msra.mxu1 %v15349_v25  ;;  %v5327_v25 = vld [vmem:[%s16063_s21 + $0xc8] sm:$0xff] }
 0xd60   :  { %11577 = vmatprep.subr.bf16.mxu1 %v15353_v52  ;;  %v5310_v52 = vld [vmem:[%s16063_s21 + $0x40] sm:$0xff] }
 0xd63   :  { %11579 = vmatpush1.bf16.msra.mxu1 %v15357_v44  ;;  %v11640_v44 = vpack.c.bf16 %v5327_v25, %v5326_v10 }
 0xd64   :  { %11581 = vmatprep.subr.bf16.mxu1 %v15361_v15  ;;  %v5311_v15 = vld [vmem:[%s16063_s21 + $0x48] sm:$0xff] }
 0xd65   :  { %11641 = vmatprep.subr.bf16.mxu0 %v11640_v44 }
 0xd67   :  { %11583 = vmatpush1.bf16.msra.mxu1 %v15365_v50  ;;  %v5328_v50 = vld [vmem:[%s16063_s21 + $0xd0] sm:$0xff] }
 0xd68   :  { %11585 = vmatprep.subr.bf16.mxu1 %v15369_v11  ;;  %v5329_v11 = vld [vmem:[%s16063_s21 + $0xd8] sm:$0xff] }
 0xd6b   :  { %11587 = vmatpush1.bf16.msra.mxu1 %v15373_v48  ;;  %v11642_v48 = vpack.c.bf16 %v5311_v15, %v5310_v52  ;;  %v5410_v15 = vld [vmem:[#allocation19 + $0x28] sm:$0xff] }
 0xd6c   :  { %11589 = vmatprep.subr.bf16.mxu1 %v15377_v27  ;;  %v11644_v27 = vpack.c.bf16 %v5329_v11, %v5328_v50  ;;  %v5412_v50 = vld [vmem:[#allocation19 + $0x38] sm:$0xff]  ;;  %v5409_v11 = vld [vmem:[#allocation19 + $0x20] sm:$0xff] }
 0xd6d   :  { %11643 = vmatpush3.bf16.msra.mxu0 %v11642_v48 }
 0xd6e   :  { %11645 = vmatprep.subr.bf16.mxu0 %v11644_v27 }
 0xd6f   :  { %11591 = vmatpush1.bf16.msra.mxu1 %v15381_v35  ;;  %v5312_v35 = vld [vmem:[%s16063_s21 + $0x50] sm:$0xff] }
 0xd70   :  { %11593 = vmatprep.subr.bf16.mxu1 %v15385_v1  ;;  %v5313_v1 = vld [vmem:[%s16063_s21 + $0x58] sm:$0xff] }
 0xd73   :  { %11595 = vmatpush1.bf16.msra.mxu1 %v15389_v61  ;;  %v5330_v61 = vld [vmem:[%s16063_s21 + $0xe0] sm:$0xff] }
 0xd74   :  { %11597 = vmatprep.subr.bf16.mxu1 %v15393_v16  ;;  %v5331_v16 = vld [vmem:[%s16063_s21 + $0xe8] sm:$0xff] }
 0xd77   :  { %11599 = vmatpush1.bf16.msra.mxu1 %v15397_v60  ;;  %v11646_v60 = vpack.c.bf16 %v5313_v1, %v5312_v35 }
 0xd78   :  { %11601 = vmatprep.subr.bf16.mxu1 %v15401_v23  ;;  %v11648_v23 = vpack.c.bf16 %v5331_v16, %v5330_v61 }
 0xd79   :  { %11647 = vmatpush3.bf16.msra.mxu0 %v11646_v60 }
 0xd7a   :  { %11649 = vmatprep.subr.bf16.mxu0 %v11648_v23 }
 0xd7b   :  { %11603 = vmatpush1.bf16.msra.mxu1 %v15404_v14  ;;  %v5314_v14 = vld [vmem:[%s16063_s21 + $0x60] sm:$0xff] }
 0xd7c   :  { %11605 = vmatprep.subr.bf16.mxu1 %v15407_v40  ;;  %v5315_v40 = vld [vmem:[%s16063_s21 + $0x68] sm:$0xff] }
 0xd7f   :  { %11607 = vmatpush1.bf16.msra.mxu1 %v15410_v8  ;;  %v5332_v8 = vld [vmem:[%s16063_s21 + $0xf0] sm:$0xff] }
 0xd80   :  { %11609 = vmatprep.subr.bf16.mxu1 %v15413_v30  ;;  %v5333_v30 = vld [vmem:[%s16063_s21 + $0xf8] sm:$0xff] }
 0xd83   :  { %11611 = vmatpush1.bf16.msra.mxu1 %v15416_v54  ;;  %v11650_v54 = vpack.c.bf16 %v5315_v40, %v5314_v14 }
 0xd84   :  { %11613 = vmatprep.subr.bf16.mxu1 %v15419_v55  ;;  %v11652_v55 = vpack.c.bf16 %v5333_v30, %v5332_v8 }
 0xd85   :  { %11651 = vmatpush3.bf16.msra.mxu0 %v11650_v54 }
 0xd86   :  { %11653 = vmatprep.subr.bf16.mxu0 %v11652_v55 }
 0xd87   :  { %11615 = vmatpush1.bf16.msra.mxu1 %v15422_v34  ;;  %v5316_v34 = vld [vmem:[%s16063_s21 + $0x70] sm:$0xff] }
 0xd88   :  { %11617 = vmatprep.subr.bf16.mxu1 %v15425_v56  ;;  %v5317_v56 = vld [vmem:[%s16063_s21 + $0x78] sm:$0xff] }
 0xd89   :  { %v11654_v13 = vpack.c.bf16 %v5317_v56, %v5316_v34 }
 0xd8b   :  { %11619 = vmatpush1.bf16.msra.mxu1 %v15428_v5  ;;  %11655 = vmatpush3.bf16.msra.mxu0 %v11654_v13  ;;  %v4406_v5 = vld [vmem:[#allocation17] sm:$0x3] }
 0xd8c   :  { %11621 = vmatprep.subr.bf16.mxu1 %v15431_v46  ;;  %11657 = vmatprep.subr.bf16.mxu0 %v15502_v19  ;;  %v16064_v46 = vld [vmem:[#allocation88_spill] sm:$0xff]  ;;  %v4411_v7 = vrot.slane %v4406_v5, %v14327_v49 }
 0xd8d   :  { %v4415_v37 = vrot.slane %v4406_v5, %v16064_v46 }
 0xd8f   :  { %11623 = vmatpush1.bf16.msra.mxu1 %v15434_v58 }
 0xd90   :  { %11665 = vmatprep.subr.bf16.mxu1 %v11624_v6 }
 0xd92   :  { %5266 = vmatmul.mubr.f32.vlgmr.msra.gmra.mrb[40].mxu1 %v5125_v17 }
 0xd93   :  { %11667 = vmatpush3.bf16.msra.mxu1 %v11626_v20 }
 0xd94   :  { %11669 = vmatprep.subr.bf16.mxu1 %v11628_v51 }
 0xd97   :  { %11671 = vmatpush3.bf16.msra.mxu1 %v11630_v18 }
 0xd98   :  { %11673 = vmatprep.subr.bf16.mxu1 %v11632_v3 }
 0xd9b   :  { %11675 = vmatpush3.bf16.msra.mxu1 %v11634_v0 }
 0xd9c   :  { %11677 = vmatprep.subr.bf16.mxu1 %v11636_v29 }
 0xd9f   :  { %11679 = vmatpush3.bf16.msra.mxu1 %v11638_v63 }
 0xda0   :  { %11681 = vmatprep.subr.bf16.mxu1 %v11640_v44 }
 0xda3   :  { %11683 = vmatpush3.bf16.msra.mxu1 %v11642_v48  ;;  %v15527_v48 = vpack.c.bf16 %v5412_v50, %v5410_v15  ;;  %v5604_v50 = vld [vmem:[#allocation22] sm:$0x1] }
 0xda4   :  { %11685 = vmatprep.subr.bf16.mxu1 %v11644_v27  ;;  %v5411_v27 = vld [vmem:[#allocation19 + $0x30] sm:$0xff] }
 0xda5   :  { %v15529_v35 = vpack.c.bf16 %v5411_v27, %v5409_v11  ;;  %v5883_v27 = vld [vmem:[#allocation25 + $0x80] sm:$0xff] }
 0xda7   :  { %11687 = vmatpush3.bf16.msra.mxu1 %v11646_v60 }
 0xda8   :  { %11689 = vmatprep.subr.bf16.mxu1 %v11648_v23 }
 0xdab   :  { %11691 = vmatpush3.bf16.msra.mxu1 %v11650_v54 }
 0xdac   :  { %11693 = vmatprep.subr.bf16.mxu1 %v11652_v55 }
 0xdaf   :  { %11695 = vmatpush3.bf16.msra.mxu1 %v11654_v13 }
 0xdb0   :  { %v4399_v42 = vpop.f32.mrb[28].mxu0 }
 0xdb1   :  { %v4401_v9 = vpop.f32.mrb[29].mxu0  ;;  %v15509_v12 = vadd.f32 %v4411_v7, %v4399_v42 }
 0xdb2   :  { %v15507_v58 = vadd.f32 %v4415_v37, %v4401_v9  ;;  %v5405_v9 = vld [vmem:[#allocation19] sm:$0xff] }
 0xdb3   :  { %v5276_v59 = vrot.slane %v15509_v12, 4  ;;  %v15523_v52 = vpack.c.bf16 %v5407_v41, %v5405_v9 }
 0xdb4   :  { %v5282_v28 = vrot.slane %v15507_v58, 4 }
 0xdb5   :  { %v5277_v24 = vadd.f32 %v5276_v59, %v15509_v12 }
 0xdb6   :  { %v5283_v6 = vadd.f32 %v5282_v28, %v15507_v58 }
 0xdb7   :  { %v5278_v33 = vrot.slane %v5277_v24, 2 }
 0xdb8   :  { %v5284_v43 = vrot.slane %v5283_v6, 2 }
 0xdb9   :  { %v5279_v2 = vadd.f32 %v5278_v33, %v5277_v24 }
 0xdba   :  { %v5285_v4 = vadd.f32 %v5284_v43, %v5283_v6 }
 0xdbb   :  { %v5280_v26 = vrot.slane %v5279_v2, 1 }
 0xdbc   :  { %v5286_v29 = vrot.slane %v5285_v4, 1 }
 0xdbd   :  { %v5281_v10 = vadd.f32 %v5280_v26, %v5279_v2 }
 0xdbe   :  { %v5287_v62 = vadd.f32 %v5286_v29, %v5285_v4 }
 0xe65   :  { %v5267_v57 = vpop.f32.mrb[40].mxu1 }
 0xe66   :  { %v15515_v39 = vadd.f32 %v5267_v57, %v4411_v7  ;;  %v5269_v20 = vpop.f32.mrb[41].mxu1 }
 0xe67   :  { %v15517_v51 = vadd.f32 %v5269_v20, %v4415_v37 }
 0xe68   :  { %v5288_v38 = vrot.slane %v15515_v39, 4 }
 0xe69   :  { %v5294_v32 = vrot.slane %v15517_v51, 4 }
 0xe6a   :  { %v5289_v18 = vadd.f32 %v5288_v38, %v15515_v39 }
 0xe6b   :  { %v5295_v3 = vadd.f32 %v5294_v32, %v15517_v51 }
 0xe6c   :  { %v5290_v53 = vrot.slane %v5289_v18, 2 }
 0xe6d   :  { %v5296_v21 = vrot.slane %v5295_v3, 2 }
 0xe6e   :  { %v5291_v0 = vadd.f32 %v5290_v53, %v5289_v18 }
 0xe6f   :  { %v5297_v47 = vadd.f32 %v5296_v21, %v5295_v3 }
 0xe70   :  { %v5292_v17 = vrot.slane %v5291_v0, 1 }
 0xe71   :  { %v5298_v31 = vrot.slane %v5297_v47, 1 }
 0xe72   :  { %v5293_v42 = vadd.f32 %v5292_v17, %v5291_v0 }
 0xe73   :  { %v5299_v63 = vadd.f32 %v5298_v31, %v5297_v47 }
 0xe74   :  { %v5300_v44 = vadd.f32 %v5293_v42, %v5281_v10  ;;  %v5600_v10 = vld [vmem:[#allocation20] sm:$0x1] }
 0xe75   :  { %v5301_v25 = vadd.f32 %v5299_v63, %v5287_v62 }
 0xe77   :  { %5398 = vmatprep.mubr.f32.mxu0 %v5301_v25 }
 0xe78   :  { %5399 = vmatmul.mubr.f32.vlgmr.msra.gmra.mrb[30].mxu0 %v5300_v44 }
 0xe79   :  { %11659 = vmatpush1.bf16.msra.mxu0 %v15523_v52  ;;  %5480 = vmatprep.mubr.f32.mxu0 %v16056_v45 }
 0xe7a   :  { %11661 = vmatprep.subr.bf16.mxu0 %v15527_v48 }
 0xe7d   :  { %11663 = vmatpush1.bf16.msra.mxu0 %v15529_v35 }
 0xe7e   :  { %11697 = vmatprep.subr.bf16.mxu0 %v15502_v19 }
 0xf4b   :  { %v9935_v1 = vpop.f32.mrb[30].mxu0 }
 0xf4c   :  { %v9936_v61 = vpop.f32.mrb[31].mxu0 }
 0xf4d   :  { %v9937_v16 = vadd.f32 %v9936_v61, %v9935_v1  ;;  %v5884_v1 = vld [vmem:[#allocation25 + $0x88] sm:$0xff]  ;;  %v5867_v61 = vld [vmem:[#allocation25] sm:$0xff] }
 0xf4f   :  { %v5404_v60 = vmul.f32 0.0078125, %v9937_v16  ;;  %v15553_v16 = vpack.c.bf16 %v5884_v1, %v5883_v27 }
 0xf51   :  { %9710 = vmatmul.mubr.msk.f32.vlgmr.msra.gmra.mrb[32].mxu0 %vm528_vm0, %v5404_v60  ;;  %11745 = vmatprep.subr.bf16.mxu1 %v15553_v16 }
 0xf52   :  { %11699 = vmatpush1.bf16.msra.mxu0 %v15523_v52  ;;  %5674 = vmatprep.mubr.f32.mxu0 %v16056_v45 }
 0xf53   :  { %11701 = vmatprep.subr.bf16.mxu0 %v15527_v48 }
 0xf56   :  { %11703 = vmatpush1.bf16.msra.mxu0 %v15529_v35 }
 0xf57   :  { %11705 = vmatprep.subr.bf16.mxu0 %v15502_v19 }
0x1024   :  { %v5482_v23 = vpop.f32.mrb[32].mxu0 }
0x1025   :  { %v5490_v14 = vrot.slane %v5482_v23, %v14327_v49  ;;  %v5484_v40 = vpop.f32.mrb[33].mxu0  ;;  %v5868_v23 = vld [vmem:[#allocation25 + $0x8] sm:$0xff] }
0x1026   :  { %v5494_v8 = vrot.slane %v5484_v40, %v14327_v49  ;;  %v15555_v40 = vpack.c.bf16 %v5868_v23, %v5867_v61 }
0x1027   :  { %v5495_v30 = vsub.f32 %v15509_v12, %v5490_v14  ;;  %v5511_v54 = vsub.f32 %v15515_v39, %v5490_v14  ;;  %v5886_v14 = vld [vmem:[#allocation25 + $0x98] sm:$0xff] }
0x1028   :  { %v5496_v55 = vsub.f32 %v15507_v58, %v5494_v8  ;;  %v5512_v34 = vsub.f32 %v15517_v51, %v5494_v8  ;;  %v5870_v8 = vld [vmem:[#allocation25 + $0x18] sm:$0xff] }
0x1029   :  { %v5497_v56 = vmul.f32 %v5495_v30, %v5495_v30  ;;  %v5513_v22 = vmul.f32 %v5511_v54, %v5511_v54  ;;  %v5888_v30 = vld [vmem:[#allocation25 + $0xa8] sm:$0xff] }
0x102a   :  { %v5498_v36 = vmul.f32 %v5496_v55, %v5496_v55  ;;  %v5514_v13 = vmul.f32 %v5512_v34, %v5512_v34  ;;  %v5871_v34 = vld [vmem:[#allocation25 + $0x20] sm:$0xff] }
0x102b   :  { %v5499_v5 = vrot.slane %v5497_v56, 4  ;;  %v5515_v19 = vrot.slane %v5513_v22, 4 }
0x102c   :  { %v5505_v37 = vrot.slane %v5498_v36, 4  ;;  %v5521_v7 = vrot.slane %v5514_v13, 4 }
0x102d   :  { %v5500_v28 = vadd.f32 %v5499_v5, %v5497_v56  ;;  %v5516_v59 = vadd.f32 %v5515_v19, %v5513_v22  ;;  %v5872_v56 = vld [vmem:[#allocation25 + $0x28] sm:$0xff]  ;;  %v5889_v22 = vld [vmem:[#allocation25 + $0xb0] sm:$0xff] }
0x102e   :  { %v5506_v6 = vadd.f32 %v5505_v37, %v5498_v36  ;;  %v5522_v24 = vadd.f32 %v5521_v7, %v5514_v13  ;;  %v5890_v36 = vld [vmem:[#allocation25 + $0xb8] sm:$0xff]  ;;  %v15567_v13 = vpack.c.bf16 %v5872_v56, %v5871_v34  ;;  %v5873_v19 = vld [vmem:[#allocation25 + $0x30] sm:$0xff]  ;;  %v5891_v7 = vld [vmem:[#allocation25 + $0xc0] sm:$0xff] }
0x102f   :  { %v5501_v57 = vrot.slane %v5500_v28, 2  ;;  %v5517_v20 = vrot.slane %v5516_v59, 2  ;;  %v15570_v5 = vpack.c.bf16 %v5890_v36, %v5889_v22  ;;  %v5874_v37 = vld [vmem:[#allocation25 + $0x38] sm:$0xff]  ;;  %v5994_v34 = vld [vmem:[#allocation25 + $0x190] sm:$0xff] }
0x1030   :  { %v5507_v43 = vrot.slane %v5506_v6, 2  ;;  %v5523_v33 = vrot.slane %v5522_v24, 2  ;;  %v5995_v56 = vld [vmem:[#allocation25 + $0x198] sm:$0xff] }
0x1031   :  { %v5502_v38 = vadd.f32 %v5501_v57, %v5500_v28  ;;  %v5518_v32 = vadd.f32 %v5517_v20, %v5516_v59  ;;  %v5892_v28 = vld [vmem:[#allocation25 + $0xc8] sm:$0xff]  ;;  %v15573_v59 = vpack.c.bf16 %v5874_v37, %v5873_v19  ;;  %v5893_v20 = vld [vmem:[#allocation25 + $0xd0] sm:$0xff]  ;;  %v15625_v22 = vld [vmem:[#allocation23 + $0x4] sm:$0xf]  ;;  %v15630_v19 = vpack.c.bf16 %v5995_v56, %v5994_v34 }
0x1032   :  { %v5508_v18 = vadd.f32 %v5507_v43, %v5506_v6  ;;  %v5524_v3 = vadd.f32 %v5523_v33, %v5522_v24  ;;  %v15576_v6 = vpack.c.bf16 %v5892_v28, %v5891_v7  ;;  %v5875_v24 = vld [vmem:[#allocation25 + $0x40] sm:$0xff]  ;;  %v5876_v57 = vld [vmem:[#allocation25 + $0x48] sm:$0xff]  ;;  %v5894_v43 = vld [vmem:[#allocation25 + $0xd8] sm:$0xff] }
0x1033   :  { %v5503_v4 = vrot.slane %v5502_v38, 1  ;;  %v5519_v2 = vrot.slane %v5518_v32, 1  ;;  %v15579_v33 = vpack.c.bf16 %v5876_v57, %v5875_v24  ;;  %v5978_v37 = vld [vmem:[#allocation25 + $0x110] sm:$0xff]  ;;  %v5979_v7 = vld [vmem:[#allocation25 + $0x118] sm:$0xff]  ;;  %v5996_v28 = vld [vmem:[#allocation25 + $0x1a0] sm:$0xff] }
0x1034   :  { %v5509_v53 = vrot.slane %v5508_v18, 1  ;;  %v5525_v21 = vrot.slane %v5524_v3, 1  ;;  %v5997_v24 = vld [vmem:[#allocation25 + $0x1a8] sm:$0xff]  ;;  %v15635_v57 = vpack.c.bf16 %v5979_v7, %v5978_v37  ;;  %v5990_v56 = vld [vmem:[#allocation25 + $0x170] sm:$0xff]  ;;  %v5991_v37 = vld [vmem:[#allocation25 + $0x178] sm:$0xff] }
0x1035   :  { %v5504_v0 = vadd.f32 %v5503_v4, %v5502_v38  ;;  %v5520_v29 = vadd.f32 %v5519_v2, %v5518_v32  ;;  %v15582_v38 = vpack.c.bf16 %v5894_v43, %v5893_v20  ;;  %v5877_v32 = vld [vmem:[#allocation25 + $0x50] sm:$0xff]  ;;  %v5896_v4 = vld [vmem:[#allocation25 + $0xe8] sm:$0xff]  ;;  %v15638_v20 = vpack.c.bf16 %v5997_v24, %v5996_v28  ;;  %v5980_v43 = vld [vmem:[#allocation25 + $0x120] sm:$0xff] }
0x1036   :  { %v5510_v47 = vadd.f32 %v5509_v53, %v5508_v18  ;;  %v5526_v26 = vadd.f32 %v5525_v21, %v5524_v3  ;;  %v5878_v18 = vld [vmem:[#allocation25 + $0x58] sm:$0xff]  ;;  %v5895_v3 = vld [vmem:[#allocation25 + $0xe0] sm:$0xff]  ;;  %v15671_v7 = vpack.c.bf16 %v5991_v37, %v5990_v56  ;;  %v5881_v28 = vld [vmem:[#allocation25 + $0x70] sm:$0xff] }
0x1037   :  { %v5527_v31 = vadd.f32 %v5520_v29, %v5504_v0  ;;  %v15585_v2 = vpack.c.bf16 %v5878_v18, %v5877_v32  ;;  %v15588_v53 = vpack.c.bf16 %v5896_v4, %v5895_v3  ;;  %v5879_v21 = vld [vmem:[#allocation25 + $0x60] sm:$0xff]  ;;  %v5880_v0 = vld [vmem:[#allocation25 + $0x68] sm:$0xff]  ;;  %v5897_v29 = vld [vmem:[#allocation25 + $0xf0] sm:$0xff] }
0x1038   :  { %v5528_v17 = vadd.f32 %v5526_v26, %v5510_v47  ;;  %v5898_v47 = vld [vmem:[#allocation25 + $0xf8] sm:$0xff]  ;;  %v15591_v26 = vpack.c.bf16 %v5880_v0, %v5879_v21  ;;  %v5981_v32 = vld [vmem:[#allocation25 + $0x128] sm:$0xff]  ;;  %v5998_v18 = vld [vmem:[#allocation25 + $0x1b0] sm:$0xff] }
0x1039   :  { %v5999_v3 = vld [vmem:[#allocation25 + $0x1b8] sm:$0xff]  ;;  %v15641_v4 = vpack.c.bf16 %v5981_v32, %v5980_v43  ;;  %v5982_v0 = vld [vmem:[#allocation25 + $0x130] sm:$0xff]  ;;  %v6241_v32 = vld [vmem:[#allocation25 + $0x280] sm:$0xff] }
0x103a   :  { %5593 = vmatprep.mubr.f32.mxu1 %v5528_v17  ;;  %v15594_v17 = vpack.c.bf16 %v5898_v47, %v5897_v29  ;;  %v15644_v21 = vpack.c.bf16 %v5999_v3, %v5998_v18  ;;  %v5983_v29 = vld [vmem:[#allocation25 + $0x138] sm:$0xff]  ;;  %v6000_v47 = vld [vmem:[#allocation25 + $0x1c0] sm:$0xff]  ;;  %v6242_v18 = vld [vmem:[#allocation25 + $0x288] sm:$0xff] }
0x103b   :  { %5594 = vmatmul.mubr.f32.vlgmr.msra.gmra.mrb[46].mxu1 %v5527_v31  ;;  %v5882_v24 = vld [vmem:[#allocation25 + $0x78] sm:$0xff]  ;;  %v15679_v3 = vpack.c.bf16 %v6242_v18, %v6241_v32  ;;  %v6229_v56 = vld [vmem:[#allocation25 + $0x220] sm:$0xff]  ;;  %v6230_v37 = vld [vmem:[#allocation25 + $0x228] sm:$0xff] }
0x103c   :  { %11747 = vmatpush3.bf16.msra.mxu1 %v15555_v40  ;;  %v15676_v43 = vpack.c.bf16 %v5882_v24, %v5881_v28  ;;  %v6247_v24 = vld [vmem:[#allocation25 + $0x2b0] sm:$0xff]  ;;  %v6248_v32 = vld [vmem:[#allocation25 + $0x2b8] sm:$0xff] }
0x110e   :  { %v9970_v42 = vpop.f32.mrb[46].mxu1 }
0x110f   :  { %v9971_v9 = vpop.f32.mrb[47].mxu1 }
0x1110   :  { %v9972_v41 = vadd.f32 %v9971_v9, %v9970_v42 }
0x1112   :  { %v5599_v62 = vmul.f32 0.0078125, %v9972_v41 }
0x1114   :  { %v5601_v63 = vadd.f32 1e-05, %v5599_v62 }
0x1116   :  { %12828 = vrsqrt.f32 %v5601_v63 }
0x1120   :  { %v12829_v25 = vpop.eup %12828 }
0x1121   :  { %v5603_v44 = vmul.f32 %v12829_v25, %v5600_v10 }
0x1123   :  { %9711 = vmatmul.mubr.msk.f32.vlgmr.msra.gmra.mrb[34].mxu0 %vm528_vm0, %v5603_v44  ;;  %v5605_v15 = vmul.f32 %v5603_v44, %v5404_v60  ;;  %v5869_v60 = vld [vmem:[#allocation25 + $0x10] sm:$0xff] }
0x1124   :  { %11707 = vmatpush1.bf16.msra.mxu0 %v15523_v52  ;;  %5748 = vmatprep.mubr.f32.mxu0 %v16056_v45  ;;  %v5885_v52 = vld [vmem:[#allocation25 + $0x90] sm:$0xff]  ;;  %v15561_v54 = vpack.c.bf16 %v5870_v8, %v5869_v60 }
0x1125   :  { %11709 = vmatprep.subr.bf16.mxu0 %v15527_v48  ;;  %v5606_v11 = vsub.f32 %v5604_v50, %v5605_v15  ;;  %v15557_v48 = vpack.c.bf16 %v5886_v14, %v5885_v52  ;;  %v5993_v14 = vld [vmem:[#allocation25 + $0x188] sm:$0xff]  ;;  %v15612_v8 = vld [vmem:[#allocation23] sm:$0xf] }
0x1127   :  { %11749 = vmatprep.subr.bf16.mxu1 %v15557_v48 }
0x1128   :  { %11711 = vmatpush1.bf16.msra.mxu0 %v15529_v35  ;;  %v5887_v35 = vld [vmem:[#allocation25 + $0xa0] sm:$0xff]  ;;  %11751 = vmatpush3.bf16.msra.mxu1 %v15561_v54 }
0x1129   :  { %v15564_v55 = vpack.c.bf16 %v5888_v30, %v5887_v35  ;;  %v5976_v35 = vld [vmem:[#allocation25 + $0x100] sm:$0xff]  ;;  %v5977_v30 = vld [vmem:[#allocation25 + $0x108] sm:$0xff] }
0x112a   :  { %v15627_v36 = vpack.c.bf16 %v5977_v30, %v5976_v35  ;;  %v6007_v35 = vld [vmem:[#allocation25 + $0x1f8] sm:$0xff] }
0x112b   :  { %9712 = vmatmul.mubr.msk.f32.vlgmr.msra.gmra.mrb[36].mxu0 %vm528_vm0, %v5606_v11  ;;  %11753 = vmatprep.subr.bf16.mxu1 %v15564_v55 }
0x112c   :  { %5860 = vmatprep.mubr.f32.mxu0 %v16056_v45  ;;  %11755 = vmatpush3.bf16.msra.mxu1 %v15567_v13 }
0x112d   :  { %11757 = vmatprep.subr.bf16.mxu1 %v15570_v5 }
0x1130   :  { %11759 = vmatpush3.bf16.msra.mxu1 %v15573_v59 }
0x1131   :  { %11761 = vmatprep.subr.bf16.mxu1 %v15576_v6 }
0x1134   :  { %11763 = vmatpush3.bf16.msra.mxu1 %v15579_v33 }
0x1135   :  { %11765 = vmatprep.subr.bf16.mxu1 %v15582_v38 }
0x1138   :  { %11767 = vmatpush3.bf16.msra.mxu1 %v15585_v2 }
0x1139   :  { %11769 = vmatprep.subr.bf16.mxu1 %v15588_v53 }
0x113c   :  { %11771 = vmatpush3.bf16.msra.mxu1 %v15591_v26 }
0x113d   :  { %11773 = vmatprep.subr.bf16.mxu1 %v15594_v17 }
0x1140   :  { %11775 = vmatpush3.bf16.msra.mxu1 %v15676_v43 }
0x1141   :  { %11777 = vmatprep.subr.bf16.mxu1 %v15679_v3 }
0x11f6   :  { %v5676_v31 = vpop.f32.mrb[34].mxu0 }
0x11f7   :  { %v5678_v42 = vpop.f32.mrb[35].mxu0  ;;  %v5758_v9 = vrot.slane %v5676_v31, %v14327_v49  ;;  %v6001_v31 = vld [vmem:[#allocation25 + $0x1c8] sm:$0xff] }
0x11f8   :  { %v5762_v41 = vrot.slane %v5678_v42, %v14327_v49  ;;  %v15647_v42 = vpack.c.bf16 %v5983_v29, %v5982_v0  ;;  %v6225_v0 = vld [vmem:[#allocation25 + $0x200] sm:$0xff]  ;;  %v6226_v29 = vld [vmem:[#allocation25 + $0x208] sm:$0xff] }
0x11f9   :  { %v5763_v63 = vmul.f32 %v5758_v9, %v15509_v12  ;;  %v5781_v10 = vmul.f32 %v5758_v9, %v15515_v39  ;;  %v5992_v39 = vld [vmem:[#allocation25 + $0x180] sm:$0xff]  ;;  %v15650_v9 = vpack.c.bf16 %v6001_v31, %v6000_v47  ;;  %v6243_v47 = vld [vmem:[#allocation25 + $0x290] sm:$0xff]  ;;  %v6244_v31 = vld [vmem:[#allocation25 + $0x298] sm:$0xff] }
0x11fa   :  { %v5764_v15 = vmul.f32 %v5762_v41, %v15507_v58  ;;  %v5782_v50 = vmul.f32 %v5762_v41, %v15517_v51  ;;  %v15617_v51 = vpack.c.bf16 %v5993_v14, %v5992_v39  ;;  %v5984_v41 = vld [vmem:[#allocation25 + $0x140] sm:$0xff]  ;;  %v5989_v39 = vld [vmem:[#allocation25 + $0x168] sm:$0xff]  ;;  %v6006_v14 = vld [vmem:[#allocation25 + $0x1f0] sm:$0xff] }
0x11fb   :  { %v15668_v34 = vpack.c.bf16 %v6007_v35, %v6006_v14 }
0x11fe   :  { %v5750_v62 = vpop.f32.mrb[36].mxu0 }
0x11ff   :  { %v5768_v25 = vrot.slane %v5750_v62, %v14327_v49  ;;  %v5752_v44 = vpop.f32.mrb[37].mxu0  ;;  %v5985_v62 = vld [vmem:[#allocation25 + $0x148] sm:$0xff] }
0x1200   :  { %v5772_v11 = vrot.slane %v5752_v44, %v14327_v49 }
0x1201   :  { %v5773_v27 = vadd.f32 %v5768_v25, %v5763_v63  ;;  %v15606_v1 = vadd.f32 %v5781_v10, %v5768_v25  ;;  %v6002_v63 = vld [vmem:[#allocation25 + $0x1d0] sm:$0xff]  ;;  %v6003_v10 = vld [vmem:[#allocation25 + $0x1d8] sm:$0xff]  ;;  %v15653_v25 = vpack.c.bf16 %v5985_v62, %v5984_v41  ;;  %v15682_v62 = vpack.c.bf16 %v6226_v29, %v6225_v0 }
0x1202   :  { %v5774_v61 = vadd.f32 %v5772_v11, %v5764_v15  ;;  %v15608_v23 = vadd.f32 %v5782_v50, %v5772_v11  ;;  %v15656_v44 = vpack.c.bf16 %v6003_v10, %v6002_v63  ;;  %v5986_v15 = vld [vmem:[#allocation25 + $0x150] sm:$0xff]  ;;  %v5987_v50 = vld [vmem:[#allocation25 + $0x158] sm:$0xff]  ;;  %v6004_v11 = vld [vmem:[#allocation25 + $0x1e0] sm:$0xff]  ;;  %v15684_v63 = vpack.c.bf16 %v6244_v31, %v6243_v47 }
0x1203   :  { %v5777_v52 = vmul.f32 0.01, %v5773_v27  ;;  %vm5775_vm4 = vcmp.ge.f32.partialorder %v5773_v27, 0.0  ;;  %v6227_v10 = vld [vmem:[#allocation25 + $0x210] sm:$0xff]  ;;  %v5787_v28 = vmul.f32 0.01, %v15606_v1  ;;  %v15702_v29 = vpack.c.bf16 %v6230_v37, %v6229_v56 }
0x1204   :  { %vm5776_vm1 = vcmp.ge.f32.partialorder %v5774_v61, 0.0  ;;  %v5778_v12 = vmul.f32 0.01, %v5774_v61  ;;  %vm5786_vm6 = vcmp.ge.f32.partialorder %v15608_v23, 0.0  ;;  %v15698_v0 = vld [vmem:[#allocation23 + $0x8] sm:$0xf]  ;;  %v15705_v47 = vpack.c.bf16 %v6248_v32, %v6247_v24 }
0x1205   :  { %v15615_v58 = vsel %vm5775_vm4, %v5773_v27, %v5777_v52  ;;  %v6005_v27 = vld [vmem:[#allocation25 + $0x1e8] sm:$0xff]  ;;  %vm5785_vm7 = vcmp.ge.f32.partialorder %v15606_v1, 0.0  ;;  %v6231_v31 = vld [vmem:[#allocation25 + $0x230] sm:$0xff]  ;;  %v6236_v37 = vld [vmem:[#allocation25 + $0x258] sm:$0xff] }
0x1206   :  { %v15610_v60 = vsel %vm5776_vm1, %v5774_v61, %v5778_v12  ;;  %v15659_v61 = vpack.c.bf16 %v5987_v50, %v5986_v15  ;;  %v15662_v52 = vpack.c.bf16 %v6005_v27, %v6004_v11  ;;  %v5988_v12 = vld [vmem:[#allocation25 + $0x160] sm:$0xff]  ;;  %v6228_v15 = vld [vmem:[#allocation25 + $0x218] sm:$0xff]  ;;  %v6246_v11 = vld [vmem:[#allocation25 + $0x2a8] sm:$0xff] }
0x1207   :  { %5796 = vmatprep.subr.mxu0 %v15610_v60  ;;  %v15665_v30 = vpack.c.bf16 %v5989_v39, %v5988_v12  ;;  %v6245_v50 = vld [vmem:[#allocation25 + $0x2a0] sm:$0xff]  ;;  %v5788_v12 = vmul.f32 0.01, %v15608_v23  ;;  %v15690_v14 = vpack.c.bf16 %v6228_v15, %v6227_v10  ;;  %v6235_v56 = vld [vmem:[#allocation25 + $0x250] sm:$0xff] }
0x1208   :  { %5797 = vmatpush1.msra.mxu0 %v15615_v58  ;;  %v15692_v35 = vpack.c.bf16 %v6246_v11, %v6245_v50  ;;  %v6233_v50 = vld [vmem:[#allocation25 + $0x240] sm:$0xff]  ;;  %v6234_v11 = vld [vmem:[#allocation25 + $0x248] sm:$0xff] }
0x1209   :  { %9713 = vmatmul.mubr.msk.f32.vlgmr.msra.gmra.mrb[38].mxu0 %vm5792_vm5, %v15612_v8  ;;  %5904 = vmatprep.subr.mxu0 %v15610_v60  ;;  %v5790_v18 = vsel %vm5786_vm6, %v15608_v23, %v5788_v12  ;;  %v15710_v23 = vsel %vm5785_vm7, %v15606_v1, %v5787_v28  ;;  %v6251_v1 = vld [vmem:[#allocation25 + $0x2d0] sm:$0xff]  ;;  %v15726_v12 = vpack.c.bf16 %v6234_v11, %v6233_v50  ;;  %v6786_v50 = vld [vmem:[%s16065_s26 + $0x48] sm:$0xff] }
0x120a   :  { %5905 = vmatpush1.msra.mxu0 %v15615_v58  ;;  %5968 = vmatprep.mubr.f32.mxu0 %v16056_v45 }
0x120b   :  { %11713 = vmatprep.subr.bf16.mxu0 %v15617_v51 }
0x120d   :  { %9714 = vmatmul.mubr.msk.f32.vlgmr.msra.gmra.mrb[40].mxu0 %vm5792_vm5, %v15625_v22 }
0x120e   :  { %11715 = vmatpush3.bf16.msra.mxu0 %v15627_v36 }
0x120f   :  { %11717 = vmatprep.subr.bf16.mxu0 %v15630_v19 }
0x1212   :  { %11719 = vmatpush3.bf16.msra.mxu0 %v15635_v57 }
0x1213   :  { %11721 = vmatprep.subr.bf16.mxu0 %v15638_v20 }
0x1216   :  { %11723 = vmatpush3.bf16.msra.mxu0 %v15641_v4 }
0x1217   :  { %11725 = vmatprep.subr.bf16.mxu0 %v15644_v21 }
0x121a   :  { %11727 = vmatpush3.bf16.msra.mxu0 %v15647_v42 }
0x121b   :  { %11729 = vmatprep.subr.bf16.mxu0 %v15650_v9 }
0x121e   :  { %11731 = vmatpush3.bf16.msra.mxu0 %v15653_v25 }
0x121f   :  { %11733 = vmatprep.subr.bf16.mxu0 %v15656_v44 }
0x1222   :  { %11735 = vmatpush3.bf16.msra.mxu0 %v15659_v61 }
0x1223   :  { %11737 = vmatprep.subr.bf16.mxu0 %v15662_v52 }
0x1226   :  { %11739 = vmatpush3.bf16.msra.mxu0 %v15665_v30 }
0x1227   :  { %11741 = vmatprep.subr.bf16.mxu0 %v15668_v34 }
0x122a   :  { %11743 = vmatpush3.bf16.msra.mxu0 %v15671_v7 }
0x122b   :  { %6153 = vmatprep.subr.mxu0 %v15610_v60 }
0x12dc   :  { %v5862_v41 = vpop.f32.mrb[38].mxu0 }
0x12dd   :  { %v5864_v60 = vpop.f32.mrb[39].mxu0 }
0x12de   :  { %6142 = vmatprep.mubr.f32.mxu1 %v5864_v60  ;;  %v6250_v60 = vld [vmem:[#allocation25 + $0x2c8] sm:$0xff] }
0x12df   :  { %6143 = vmatmul.mubr.f32.vlgmr.msra.gmra.mrb[48].mxu1 %v5862_v41  ;;  %v6232_v41 = vld [vmem:[#allocation25 + $0x238] sm:$0xff] }
0x12e0   :  { %v5970_v27 = vpop.f32.mrb[40].mxu0  ;;  %11779 = vmatpush3.bf16.msra.mxu1 %v15682_v62  ;;  %v15715_v10 = vpack.c.bf16 %v6232_v41, %v6231_v31 }
0x12e1   :  { %v5972_v39 = vpop.f32.mrb[41].mxu0  ;;  %11781 = vmatprep.subr.bf16.mxu1 %v15684_v63 }
0x12e2   :  { %6072 = vmatprep.mubr.f32.mxu0 %v5972_v39 }
0x12e3   :  { %6073 = vmatmul.mubr.f32.vlgmr.msra.gmra.mrb[42].mxu0 %v5970_v27  ;;  %v6252_v27 = vld [vmem:[#allocation25 + $0x2d8] sm:$0xff] }
0x12e4   :  { %6154 = vmatpush1.msra.mxu0 %v15615_v58  ;;  %6217 = vmatprep.mubr.f32.mxu0 %v16056_v45  ;;  %v6249_v58 = vld [vmem:[#allocation25 + $0x2c0] sm:$0xff]  ;;  %v15729_v39 = vpack.c.bf16 %v6252_v27, %v6251_v1  ;;  %v6787_v1 = vld [vmem:[%s16065_s26 + $0x50] sm:$0xff]  ;;  %v6788_v27 = vld [vmem:[%s16065_s26 + $0x58] sm:$0xff] }
0x12e5   :  { %6336 = vmatprep.subr.mxu0 %v5790_v18  ;;  %11783 = vmatpush3.bf16.msra.mxu1 %v15690_v14  ;;  %v15718_v15 = vpack.c.bf16 %v6250_v60, %v6249_v58  ;;  %v6784_v60 = vld [vmem:[%s16065_s26 + $0x38] sm:$0xff] }
0x12e6   :  { %11785 = vmatprep.subr.bf16.mxu1 %v15692_v35 }
0x12e7   :  { %9715 = vmatmul.mubr.msk.f32.vlgmr.msra.gmra.mrb[44].mxu0 %vm5792_vm5, %v15698_v0 }
0x12e8   :  { %6337 = vmatpush1.msra.mxu0 %v15710_v23  ;;  %6400 = vmatprep.mubr.f32.mxu0 %v16056_v45 }
0x12e9   :  { %6407 = vmatprep.subr.mxu0 %v5790_v18  ;;  %11787 = vmatpush3.bf16.msra.mxu1 %v15702_v29 }
0x12ea   :  { %11789 = vmatprep.subr.bf16.mxu1 %v15705_v47 }
0x12eb   :  { %9717 = vmatmul.mubr.msk.f32.vlgmr.msra.gmra.mrb[46].mxu0 %vm5792_vm5, %v15612_v8  ;;  %v15736_v8 = vpack.c.bf16 %v6236_v37, %v6235_v56  ;;  %v6790_v56 = vld [vmem:[%s16065_s26 + $0x68] sm:$0xff] }
0x12ec   :  { %6408 = vmatpush1.msra.mxu0 %v15710_v23  ;;  %6471 = vmatprep.mubr.f32.mxu0 %v16056_v45 }
0x12ed   :  { %11809 = vmatprep.subr.bf16.mxu0 %v15617_v51  ;;  %11791 = vmatpush3.bf16.msra.mxu1 %v15715_v10  ;;  %v6253_v51 = vld [vmem:[#allocation25 + $0x2e0] sm:$0xff] }
0x12ee   :  { %11793 = vmatprep.subr.bf16.mxu1 %v15718_v15 }
0x12ef   :  { %9718 = vmatmul.mubr.msk.f32.vlgmr.msra.gmra.mrb[48].mxu0 %vm5792_vm5, %v15625_v22  ;;  %v6254_v22 = vld [vmem:[#allocation25 + $0x2e8] sm:$0xff] }
0x12f0   :  { %11811 = vmatpush3.bf16.msra.mxu0 %v15627_v36  ;;  %v6237_v36 = vld [vmem:[#allocation25 + $0x260] sm:$0xff] }
0x12f1   :  { %11813 = vmatprep.subr.bf16.mxu0 %v15630_v19  ;;  %11795 = vmatpush3.bf16.msra.mxu1 %v15726_v12  ;;  %v11800_v19 = vpack.c.bf16 %v6254_v22, %v6253_v51  ;;  %v6792_v51 = vld [vmem:[%s16065_s26 + $0x78] sm:$0xff]  ;;  %v6864_v22 = vld [vmem:[#allocation28] sm:$0xff] }
0x12f2   :  { %11797 = vmatprep.subr.bf16.mxu1 %v15729_v39 }
0x12f4   :  { %11815 = vmatpush3.bf16.msra.mxu0 %v15635_v57  ;;  %v6238_v57 = vld [vmem:[#allocation25 + $0x268] sm:$0xff] }
0x12f5   :  { %11817 = vmatprep.subr.bf16.mxu0 %v15638_v20  ;;  %11799 = vmatpush3.bf16.msra.mxu1 %v15736_v8  ;;  %v11802_v20 = vpack.c.bf16 %v6238_v57, %v6237_v36  ;;  %v6865_v36 = vld [vmem:[#allocation28 + $0x8] sm:$0xff] }
0x12f6   :  { %11801 = vmatprep.subr.bf16.mxu1 %v11800_v19 }
0x12f8   :  { %11819 = vmatpush3.bf16.msra.mxu0 %v15641_v4  ;;  %v6255_v4 = vld [vmem:[#allocation25 + $0x2f0] sm:$0xff] }
0x12f9   :  { %11821 = vmatprep.subr.bf16.mxu0 %v15644_v21  ;;  %11803 = vmatpush3.bf16.msra.mxu1 %v11802_v20  ;;  %v6256_v21 = vld [vmem:[#allocation25 + $0x2f8] sm:$0xff] }
0x12fc   :  { %11823 = vmatpush3.bf16.msra.mxu0 %v15647_v42  ;;  %v6239_v42 = vld [vmem:[#allocation25 + $0x270] sm:$0xff] }
0x12fd   :  { %11825 = vmatprep.subr.bf16.mxu0 %v15650_v9  ;;  %v11804_v9 = vpack.c.bf16 %v6256_v21, %v6255_v4 }
0x12ff   :  { %11805 = vmatprep.subr.bf16.mxu1 %v11804_v9 }
0x1300   :  { %11827 = vmatpush3.bf16.msra.mxu0 %v15653_v25  ;;  %v6240_v25 = vld [vmem:[#allocation25 + $0x278] sm:$0xff] }
0x1301   :  { %11829 = vmatprep.subr.bf16.mxu0 %v15656_v44  ;;  %v11806_v44 = vpack.c.bf16 %v6240_v25, %v6239_v42 }
0x1303   :  { %11807 = vmatpush3.bf16.msra.mxu1 %v11806_v44 }
0x1304   :  { %11831 = vmatpush3.bf16.msra.mxu0 %v15659_v61  ;;  %11841 = vmatprep.subr.bf16.mxu1 %v15553_v16 }
0x1305   :  { %11833 = vmatprep.subr.bf16.mxu0 %v15662_v52 }
0x1308   :  { %11835 = vmatpush3.bf16.msra.mxu0 %v15665_v30 }
0x1309   :  { %11837 = vmatprep.subr.bf16.mxu0 %v15668_v34 }
0x130c   :  { %11839 = vmatpush3.bf16.msra.mxu0 %v15671_v7 }
0x130d   :  { %6618 = vmatprep.subr.mxu0 %v5790_v18 }
0x13b2   :  { %v10040_v61 = vpop.f32.mrb[48].mxu1 }
0x13b3   :  { %v10041_v52 = vpop.f32.mrb[49].mxu1 }
0x13b4   :  { %v10042_v30 = vadd.f32 %v10041_v52, %v10040_v61 }
0x13b6   :  { %v10005_v34 = vpop.f32.mrb[42].mxu0 }
0x13b7   :  { %v10006_v7 = vpop.f32.mrb[43].mxu0 }
0x13b8   :  { %v10007_v28 = vadd.f32 %v10006_v7, %v10005_v34 }
0x13ba   :  { %v15754_v24 = vadd.f32 %v10042_v30, %v10007_v28  ;;  %v6219_v32 = vpop.f32.mrb[44].mxu0 }
0x13bb   :  { %v6221_v18 = vpop.f32.mrb[45].mxu0 }
0x13bc   :  { %6321 = vmatprep.mubr.f32.mxu1 %v6221_v18 }
0x13bd   :  { %6322 = vmatmul.mubr.f32.vlgmr.msra.gmra.mrb[50].mxu1 %v6219_v32 }
0x13be   :  { %11843 = vmatpush3.bf16.msra.mxu1 %v15555_v40  ;;  %v6402_v31 = vpop.f32.mrb[46].mxu0  ;;  %v6777_v40 = vld [vmem:[%s16065_s26] sm:$0xff] }
0x13bf   :  { %11845 = vmatprep.subr.bf16.mxu1 %v15557_v48  ;;  %v6404_v41 = vpop.f32.mrb[47].mxu0  ;;  %v6778_v48 = vld [vmem:[%s16065_s26 + $0x8] sm:$0xff] }
0x13c0   :  { %6612 = vmatprep.mubr.f32.mxu1 %v6404_v41 }
0x13c2   :  { %11847 = vmatpush3.bf16.msra.mxu1 %v15561_v54  ;;  %v6473_v16 = vpop.f32.mrb[48].mxu0  ;;  %v6779_v54 = vld [vmem:[%s16065_s26 + $0x10] sm:$0xff] }
0x13c3   :  { %v6475_v58 = vpop.f32.mrb[49].mxu0  ;;  %11849 = vmatprep.subr.bf16.mxu1 %v15564_v55  ;;  %v13652_v55 = vmov 0.0|0.0  }
0x13c4   :  { %6542 = vmatprep.mubr.f32.mxu0 %v6475_v58 }
0x13c5   :  { %6543 = vmatmul.mubr.f32.vlgmr.msra.gmra.mrb[50].mxu0 %v6473_v16 }
0x13c6   :  { %11851 = vmatpush3.bf16.msra.mxu1 %v15567_v13  ;;  %6619 = vmatpush1.msra.mxu0 %v15710_v23  ;;  %v15791_v13 = vpack.c.bf16 %v6778_v48, %v6777_v40  ;;  %v6783_v23 = vld [vmem:[%s16065_s26 + $0x30] sm:$0xff] }
0x13c7   :  { %11853 = vmatprep.subr.bf16.mxu1 %v15570_v5  ;;  %6682 = vmatprep.mubr.f32.mxu0 %v16056_v45  ;;  %v6780_v5 = vld [vmem:[%s16065_s26 + $0x18] sm:$0xff] }
0x13c8   :  { %11873 = vmatprep.subr.bf16.mxu0 %v15679_v3 }
0x13c9   :  { %9719 = vmatmul.mubr.msk.f32.vlgmr.msra.gmra.mrb[52].mxu0 %vm5792_vm5, %v15698_v0  ;;  %v6781_v0 = vld [vmem:[%s16065_s26 + $0x20] sm:$0xff] }
0x13ca   :  { %11855 = vmatpush3.bf16.msra.mxu1 %v15573_v59  ;;  %11875 = vmatpush3.bf16.msra.mxu0 %v15682_v62  ;;  %v15796_v59 = vpack.c.bf16 %v6780_v5, %v6779_v54  ;;  %v6866_v54 = vld [vmem:[#allocation28 + $0x10] sm:$0xff]  ;;  %v6867_v5 = vld [vmem:[#allocation28 + $0x18] sm:$0xff] }
0x13cb   :  { %11857 = vmatprep.subr.bf16.mxu1 %v15576_v6  ;;  %11877 = vmatprep.subr.bf16.mxu0 %v15684_v63 }
0x13ce   :  { %11859 = vmatpush3.bf16.msra.mxu1 %v15579_v33  ;;  %11879 = vmatpush3.bf16.msra.mxu0 %v15690_v14 }
0x13cf   :  { %11861 = vmatprep.subr.bf16.mxu1 %v15582_v38  ;;  %11881 = vmatprep.subr.bf16.mxu0 %v15692_v35 }
0x13d2   :  { %11863 = vmatpush3.bf16.msra.mxu1 %v15585_v2  ;;  %11883 = vmatpush3.bf16.msra.mxu0 %v15702_v29  ;;  %v6782_v29 = vld [vmem:[%s16065_s26 + $0x28] sm:$0xff] }
0x13d3   :  { %11865 = vmatprep.subr.bf16.mxu1 %v15588_v53  ;;  %11885 = vmatprep.subr.bf16.mxu0 %v15705_v47  ;;  %v15804_v47 = vpack.c.bf16 %v6782_v29, %v6781_v0 }
0x13d6   :  { %11867 = vmatpush3.bf16.msra.mxu1 %v15591_v26  ;;  %11887 = vmatpush3.bf16.msra.mxu0 %v15715_v10  ;;  %v15810_v10 = vpack.c.bf16 %v6784_v60, %v6783_v23 }
0x13d7   :  { %11869 = vmatprep.subr.bf16.mxu1 %v15594_v17  ;;  %11889 = vmatprep.subr.bf16.mxu0 %v15718_v15  ;;  %v6785_v15 = vld [vmem:[%s16065_s26 + $0x40] sm:$0xff] }
0x13d8   :  { %v15815_v11 = vpack.c.bf16 %v6786_v50, %v6785_v15 }
0x13da   :  { %11871 = vmatpush3.bf16.msra.mxu1 %v15676_v43  ;;  %11891 = vmatpush3.bf16.msra.mxu0 %v15726_v12  ;;  %v15825_v12 = vpack.c.bf16 %v6788_v27, %v6787_v1 }
0x13db   :  { %11893 = vmatprep.subr.bf16.mxu0 %v15729_v39  ;;  %11904 = vmatprep.subr.bf16.mxu1 %v13652_v55  ;;  %v6789_v39 = vld [vmem:[%s16065_s26 + $0x60] sm:$0xff] }
0x13dc   :  { %v15831_v37 = vpack.c.bf16 %v6790_v56, %v6789_v39  ;;  %v7278_v39 = vld [vmem:[#allocation32 + $0x238] sm:$0xff] }
0x13dd   :  { %6613 = vmatmul.mubr.f32.vlgmr.msra.gmra.mrb[52].mxu1 %v6402_v31 }
0x13de   :  { %11895 = vmatpush3.bf16.msra.mxu0 %v15736_v8  ;;  %11906 = vmatpush3.bf16.msra.mxu1 %v15791_v13  ;;  %v6791_v8 = vld [vmem:[%s16065_s26 + $0x70] sm:$0xff] }
0x13df   :  { %11897 = vmatprep.subr.bf16.mxu0 %v11800_v19  ;;  %11907 = vmatprep.subr.bf16.mxu1 %v13652_v55  ;;  %v15836_v19 = vpack.c.bf16 %v6865_v36, %v6864_v22  ;;  %v11926_v57 = vpack.c.bf16 %v6792_v51, %v6791_v8  ;;  %v7277_v8 = vld [vmem:[#allocation32 + $0x230] sm:$0xff]  ;;  %v7282_v22 = vld [vmem:[#allocation32 + $0x258] sm:$0xff] }
0x13e0   :  { %10382 = vmatprep.mubr.msk.f32.mxu1 %vm13653_vm8, %v16056_v45  ;;  %v7286_v36 = vld [vmem:[#allocation32 + $0x278] sm:$0xff] }
0x13e2   :  { %11899 = vmatpush3.bf16.msra.mxu0 %v11802_v20  ;;  %11909 = vmatpush3.bf16.msra.mxu1 %v15796_v59  ;;  %v9716_v20 = vld [vmem:[#allocation26] ss:$0 sm:$0xff] }
0x13e3   :  { %11901 = vmatprep.subr.bf16.mxu0 %v11804_v9  ;;  %11910 = vmatprep.subr.bf16.mxu1 %v13652_v55 }
0x13e6   :  { %11903 = vmatpush3.bf16.msra.mxu0 %v11806_v44  ;;  %11912 = vmatpush3.bf16.msra.mxu1 %v15804_v47 }
0x13e7   :  { %11928 = vmatprep.subr.bf16.mxu0 %v13652_v55  ;;  %11913 = vmatprep.subr.bf16.mxu1 %v13652_v55 }
0x13ea   :  { %11915 = vmatpush3.bf16.msra.mxu1 %v15810_v10 }
0x13eb   :  { %11916 = vmatprep.subr.bf16.mxu1 %v13652_v55 }
0x13ee   :  { %11918 = vmatpush3.bf16.msra.mxu1 %v15815_v11 }
0x13ef   :  { %11919 = vmatprep.subr.bf16.mxu1 %v13652_v55 }
0x13f2   :  { %11921 = vmatpush3.bf16.msra.mxu1 %v15825_v12 }
0x13f3   :  { %11922 = vmatprep.subr.bf16.mxu1 %v13652_v55 }
0x13f6   :  { %11924 = vmatpush3.bf16.msra.mxu1 %v15831_v37 }
0x13f7   :  { %11925 = vmatprep.subr.bf16.mxu1 %v13652_v55 }
0x13fa   :  { %11927 = vmatpush3.bf16.msra.mxu1 %v11926_v57 }
0x13fb   :  { %11958 = vmatprep.subr.bf16.mxu1 %v13652_v55 }
0x1490   :  { %v10075_v6 = vpop.f32.mrb[50].mxu1 }
0x1491   :  { %v10076_v33 = vpop.f32.mrb[51].mxu1 }
0x1492   :  { %v10077_v38 = vadd.f32 %v10076_v33, %v10075_v6  ;;  %v15855_v6 = vpack.c.bf16 %v6867_v5, %v6866_v54 }
0x1494   :  { %v6327_v2 = vadd.f32 %v10077_v38, %v15754_v24 }
0x1496   :  { %v15843_v4 = vadd.f32 %v9716_v20, %v6327_v2 }
0x1498   :  { %v10110_v53 = vpop.f32.mrb[50].mxu0  ;;  %v6762_v21 = vsel %vm6761_vm9, %v15843_v4, 0.0 }
0x1499   :  { %v10111_v26 = vpop.f32.mrb[51].mxu0  ;;  %v6763_v42 = vrot.slane %v6762_v21, 4 }
0x149a   :  { %v10112_v17 = vadd.f32 %v10111_v26, %v10110_v53 }
0x149b   :  { %v6764_v61 = vadd.f32 %v6763_v42, %v6762_v21  ;;  %v7285_v21 = vld [vmem:[#allocation32 + $0x270] sm:$0xff] }
0x149c   :  { %v6684_v43 = vpop.f32.mrb[52].mxu0 }
0x149d   :  { %v6686_v3 = vpop.f32.mrb[53].mxu0  ;;  %v6765_v34 = vrot.slane %v6764_v61, 2 }
0x149e   :  { %6753 = vmatprep.mubr.f32.mxu0 %v6686_v3 }
0x149f   :  { %6754 = vmatmul.mubr.f32.vlgmr.msra.gmra.mrb[54].mxu0 %v6684_v43  ;;  %v6766_v32 = vadd.f32 %v6765_v34, %v6764_v61  ;;  %v7289_v61 = vld [vmem:[#allocation32 + $0x290] sm:$0xff] }
0x14a0   :  { %10393 = vmatprep.mubr.msk.f32.mxu0 %vm13653_vm8, %v16056_v45  ;;  %11930 = vmatpush3.bf16.msra.mxu0 %v15836_v19 }
0x14a1   :  { %11931 = vmatprep.subr.bf16.mxu0 %v13652_v55  ;;  %v6767_v31 = vrot.slane %v6766_v32, 1 }
0x14a3   :  { %v6768_v58 = vadd.f32 %v6767_v31, %v6766_v32  ;;  %v7297_v32 = vld [vmem:[#allocation32 + $0x2d0] sm:$0xff] }
0x14a4   :  { %11933 = vmatpush3.bf16.msra.mxu0 %v15855_v6 }
0x14a5   :  { %11934 = vmatprep.subr.bf16.mxu0 %v13652_v55 }
0x14b0   :  { %v10145_v62 = vpop.f32.mrb[52].mxu1 }
0x14b1   :  { %v10146_v63 = vpop.f32.mrb[53].mxu1 }
0x14b2   :  { %v10147_v14 = vadd.f32 %v10146_v63, %v10145_v62 }
0x14b4   :  { %v6615_v35 = vadd.f32 %v10147_v14, %v10112_v17 }
0x1572   :  { %v10180_v9 = vpop.f32.mrb[54].mxu0 }
0x1573   :  { %v10181_v25 = vpop.f32.mrb[55].mxu0 }
0x1574   :  { %v10182_v44 = vadd.f32 %v10181_v25, %v10180_v9  ;;  %v7290_v9 = vld [vmem:[#allocation32 + $0x298] sm:$0xff] }
0x1575   :  { %v7294_v25 = vld [vmem:[#allocation32 + $0x2b8] sm:$0xff] }
0x1576   :  { %v6759_v52 = vadd.f32 %v10182_v44, %v6615_v35  ;;  %v12010_v44 = vpack.c.bf16 %v7294_v25, %v7290_v9  ;;  %v7316_v25 = vld [vmem:[#allocation32 + $0x368] sm:$0xff] }
0x1578   :  { %v15847_v30 = vadd.f32 %v9716_v20, %v6759_v52  ;;  %v7281_v20 = vld [vmem:[#allocation32 + $0x250] sm:$0xff] }
0x1579   :  { %v12008_v42 = vpack.c.bf16 %v7285_v21, %v7281_v20  ;;  %v7293_v52 = vld [vmem:[#allocation32 + $0x2b0] sm:$0xff] }
0x157a   :  { %v6769_v7 = vsel %vm6761_vm9, %v15847_v30, 0.0  ;;  %v12012_v34 = vpack.c.bf16 %v7293_v52, %v7289_v61  ;;  %v7305_v20 = vld [vmem:[#allocation32 + $0x310] sm:$0xff]  ;;  %v7318_v61 = vld [vmem:[#allocation32 + $0x378] sm:$0xff] }
0x157b   :  { %v6770_v28 = vrot.slane %v6769_v7, 4  ;;  %v7309_v21 = vld [vmem:[#allocation32 + $0x330] sm:$0xff] }
0x157c   :  { %v12020_v9 = vpack.c.bf16 %v7309_v21, %v7305_v20  ;;  %v7212_v20 = vld [vmem:[#allocation32 + $0x30] sm:$0xff]  ;;  %v7215_v21 = vld [vmem:[#allocation32 + $0x48] sm:$0xff] }
0x157d   :  { %v6771_v24 = vadd.f32 %v6770_v28, %v6769_v7  ;;  %v7298_v7 = vld [vmem:[#allocation32 + $0x2d8] sm:$0xff] }
0x157e   :  { %v7302_v28 = vld [vmem:[#allocation32 + $0x2f8] sm:$0xff] }
0x157f   :  { %v6772_v18 = vrot.slane %v6771_v24, 2 }
0x1581   :  { %v6773_v41 = vadd.f32 %v6772_v18, %v6771_v24  ;;  %v12014_v24 = vpack.c.bf16 %v7302_v28, %v7298_v7  ;;  %v7301_v18 = vld [vmem:[#allocation32 + $0x2f0] sm:$0xff]  ;;  %v7311_v7 = vld [vmem:[#allocation32 + $0x340] sm:$0xff] }
0x1582   :  { %v12016_v31 = vpack.c.bf16 %v7301_v18, %v7297_v32  ;;  %v7315_v28 = vld [vmem:[#allocation32 + $0x360] sm:$0xff]  ;;  %v7317_v18 = vld [vmem:[#allocation32 + $0x370] sm:$0xff] }
0x1583   :  { %v6774_v16 = vrot.slane %v6773_v41, 1  ;;  %v11992_v32 = vpack.c.bf16 %v7315_v28, %v7311_v7 }
0x1585   :  { %v6775_v40 = vadd.f32 %v6774_v16, %v6773_v41 }
0x1587   :  { %v6776_v48 = vadd.f32 %v6775_v40, %v6768_v58 }
0x1589   :  { %10383 = vmatmul.mubr.f32.vlgmr.msra.gmra.mrb[54].mxu1 %v6776_v48  ;;  %v7035_v48 = vld [vmem:[#allocation29] sm:$0x1] }
0x158a   :  { %11960 = vmatpush3.bf16.msra.mxu1 %v15836_v19  ;;  %10439 = vmatprep.mubr.msk.f32.mxu1 %vm13653_vm8, %v16056_v45 }
0x158b   :  { %11961 = vmatprep.subr.bf16.mxu1 %v13652_v55 }
0x158e   :  { %11963 = vmatpush3.bf16.msra.mxu1 %v15855_v6 }
0x158f   :  { %11964 = vmatprep.subr.bf16.mxu1 %v13652_v55 }
0x165c   :  { %v6859_v33 = vpop.f32.mrb[54].mxu1 }
0x165d   :  { %v15861_v38 = vmul.f32 0.03125, %v6859_v33  ;;  %v10384_v2 = vpop.f32.mrb[55].mxu1  ;;  %v7272_v33 = vld [vmem:[#allocation32 + $0x208] sm:$0xff] }
0x165e   :  { %v7276_v2 = vld [vmem:[#allocation32 + $0x228] sm:$0xff] }
0x165f   :  { %10394 = vmatmul.mubr.msk.f32.vlgmr.msra.gmra.mrb[56].mxu0 %vm528_vm0, %v15861_v38 }
0x1660   :  { %11936 = vmatpush3.bf16.msra.mxu0 %v15791_v13  ;;  %10428 = vmatprep.mubr.msk.f32.mxu0 %vm13653_vm8, %v16056_v45 }
0x1661   :  { %11937 = vmatprep.subr.bf16.mxu0 %v13652_v55 }
0x1664   :  { %11939 = vmatpush3.bf16.msra.mxu0 %v15796_v59 }
0x1665   :  { %11940 = vmatprep.subr.bf16.mxu0 %v13652_v55 }
0x1668   :  { %11942 = vmatpush3.bf16.msra.mxu0 %v15804_v47 }
0x1669   :  { %11943 = vmatprep.subr.bf16.mxu0 %v13652_v55 }
0x166c   :  { %11945 = vmatpush3.bf16.msra.mxu0 %v15810_v10 }
0x166d   :  { %11946 = vmatprep.subr.bf16.mxu0 %v13652_v55 }
0x1670   :  { %11948 = vmatpush3.bf16.msra.mxu0 %v15815_v11 }
0x1671   :  { %11949 = vmatprep.subr.bf16.mxu0 %v13652_v55 }
0x1674   :  { %11951 = vmatpush3.bf16.msra.mxu0 %v15825_v12  ;;  %v7274_v12 = vld [vmem:[#allocation32 + $0x218] sm:$0xff] }
0x1675   :  { %11952 = vmatprep.subr.bf16.mxu0 %v13652_v55  ;;  %v12002_v56 = vpack.c.bf16 %v7278_v39, %v7274_v12  ;;  %v7304_v12 = vld [vmem:[#allocation32 + $0x308] sm:$0xff] }
0x1676   :  { %v7308_v39 = vld [vmem:[#allocation32 + $0x328] sm:$0xff] }
0x1678   :  { %11954 = vmatpush3.bf16.msra.mxu0 %v15831_v37  ;;  %v7273_v37 = vld [vmem:[#allocation32 + $0x210] sm:$0xff] }
0x1679   :  { %11955 = vmatprep.subr.bf16.mxu0 %v13652_v55  ;;  %v12004_v51 = vpack.c.bf16 %v7277_v8, %v7273_v37  ;;  %v11986_v37 = vpack.c.bf16 %v7308_v39, %v7304_v12  ;;  %v7310_v8 = vld [vmem:[#allocation32 + $0x338] sm:$0xff] }
0x167c   :  { %11957 = vmatpush3.bf16.msra.mxu0 %v11926_v57  ;;  %v12006_v57 = vpack.c.bf16 %v7286_v36, %v7282_v22  ;;  %v7307_v22 = vld [vmem:[#allocation32 + $0x320] sm:$0xff] }
0x167d   :  { %12003 = vmatprep.subr.bf16.mxu0 %v12002_v56  ;;  %v7306_v56 = vld [vmem:[#allocation32 + $0x318] sm:$0xff] }
0x167e   :  { %v12018_v36 = vpack.c.bf16 %v7310_v8, %v7306_v56 }
0x1732   :  { %v6937_v13 = vpop.f32.mrb[56].mxu0 }
0x1733   :  { %v6944_v59 = vrot.slane %v6937_v13, %v14327_v49  ;;  %v10395_v53 = vpop.f32.mrb[57].mxu0 }
0x1734   :  { %v7271_v53 = vld [vmem:[#allocation32 + $0x200] sm:$0xff] }
0x1735   :  { %v6945_v26 = vsub.f32 %v15843_v4, %v6944_v59  ;;  %v6954_v17 = vsub.f32 %v15847_v30, %v6944_v59  ;;  %v11970_v59 = vpack.c.bf16 %v7276_v2, %v7272_v33 }
0x1737   :  { %v6946_v43 = vmul.f32 %v6945_v26, %v6945_v26  ;;  %v6955_v3 = vmul.f32 %v6954_v17, %v6954_v17  ;;  %v7275_v26 = vld [vmem:[#allocation32 + $0x220] sm:$0xff]  ;;  %v7039_v17 = vld [vmem:[#allocation31] sm:$0x1] }
0x1739   :  { %v6947_v62 = vsel %vm6761_vm9, %v6946_v43, 0.0  ;;  %v6956_v63 = vsel %vm6761_vm9, %v6955_v3, 0.0  ;;  %v7280_v43 = vld [vmem:[#allocation32 + $0x248] sm:$0xff] }
0x173a   :  { %v6948_v14 = vrot.slane %v6947_v62, 4  ;;  %v6957_v35 = vrot.slane %v6956_v63, 4  ;;  %v7284_v3 = vld [vmem:[#allocation32 + $0x268] sm:$0xff] }
0x173c   :  { %v6949_v0 = vadd.f32 %v6948_v14, %v6947_v62  ;;  %v6958_v29 = vadd.f32 %v6957_v35, %v6956_v63  ;;  %v11972_v62 = vpack.c.bf16 %v7275_v26, %v7271_v53  ;;  %v11974_v14 = vpack.c.bf16 %v7284_v3, %v7280_v43  ;;  %v7283_v35 = vld [vmem:[#allocation32 + $0x260] sm:$0xff]  ;;  %v7328_v53 = vld [vmem:[#allocation32 + $0x3c8] sm:$0xff]  ;;  %v7330_v43 = vld [vmem:[#allocation32 + $0x3d8] sm:$0xff] }
0x173d   :  { %v7334_v3 = vld [vmem:[#allocation32 + $0x3f8] sm:$0xff] }
0x173e   :  { %v6950_v47 = vrot.slane %v6949_v0, 2  ;;  %v6959_v23 = vrot.slane %v6958_v29, 2 }
0x1740   :  { %v6951_v60 = vadd.f32 %v6950_v47, %v6949_v0  ;;  %v6960_v10 = vadd.f32 %v6959_v23, %v6958_v29  ;;  %v7288_v0 = vld [vmem:[#allocation32 + $0x288] sm:$0xff]  ;;  %v7287_v23 = vld [vmem:[#allocation32 + $0x280] sm:$0xff] }
0x1741   :  { %v7292_v29 = vld [vmem:[#allocation32 + $0x2a8] sm:$0xff] }
0x1742   :  { %v6952_v15 = vrot.slane %v6951_v60, 1  ;;  %v6961_v50 = vrot.slane %v6960_v10, 1  ;;  %v11978_v47 = vpack.c.bf16 %v7292_v29, %v7288_v0  ;;  %v7333_v29 = vld [vmem:[#allocation32 + $0x3f0] sm:$0xff] }
0x1744   :  { %v6953_v11 = vadd.f32 %v6952_v15, %v6951_v60  ;;  %v6962_v1 = vadd.f32 %v6961_v50, %v6960_v10  ;;  %v7291_v60 = vld [vmem:[#allocation32 + $0x2a0] sm:$0xff]  ;;  %v7296_v10 = vld [vmem:[#allocation32 + $0x2c8] sm:$0xff] }
0x1745   :  { %v11980_v15 = vpack.c.bf16 %v7291_v60, %v7287_v23 }
0x1746   :  { %v6963_v27 = vadd.f32 %v6962_v1, %v6953_v11  ;;  %v7295_v11 = vld [vmem:[#allocation32 + $0x2c0] sm:$0xff] }
0x1747   :  { %v7299_v1 = vld [vmem:[#allocation32 + $0x2e0] sm:$0xff] }
0x1748   :  { %10429 = vmatmul.mubr.f32.vlgmr.msra.gmra.mrb[58].mxu0 %v6963_v27  ;;  %v11984_v27 = vpack.c.bf16 %v7299_v1, %v7295_v11 }
0x1749   :  { %7473 = vmatprep.mubr.f32.mxu0 %v16056_v45  ;;  %12005 = vmatpush1.bf16.msra.mxu0 %v12004_v51  ;;  %v7303_v51 = vld [vmem:[#allocation32 + $0x300] sm:$0xff] }
0x174a   :  { %12007 = vmatprep.subr.bf16.mxu0 %v12006_v57  ;;  %v11988_v57 = vpack.c.bf16 %v7307_v22, %v7303_v51  ;;  %v7206_v22 = vld [vmem:[#allocation32] sm:$0xff] }
0x174d   :  { %12009 = vmatpush1.bf16.msra.mxu0 %v12008_v42  ;;  %v7312_v42 = vld [vmem:[#allocation32 + $0x348] sm:$0xff] }
0x174e   :  { %12011 = vmatprep.subr.bf16.mxu0 %v12010_v44  ;;  %v7314_v44 = vld [vmem:[#allocation32 + $0x358] sm:$0xff]  ;;  %v11990_v52 = vpack.c.bf16 %v7316_v25, %v7312_v42 }
0x174f   :  { %v7217_v25 = vld [vmem:[#allocation32 + $0x58] sm:$0xff] }
0x1751   :  { %12013 = vmatpush1.bf16.msra.mxu0 %v12012_v34  ;;  %v12022_v34 = vpack.c.bf16 %v7318_v61, %v7314_v44  ;;  %v7221_v44 = vld [vmem:[#allocation32 + $0x78] sm:$0xff] }
0x1752   :  { %12015 = vmatprep.subr.bf16.mxu0 %v12014_v24  ;;  %v7313_v24 = vld [vmem:[#allocation32 + $0x350] sm:$0xff] }
0x1755   :  { %12017 = vmatpush1.bf16.msra.mxu0 %v12016_v31  ;;  %v12024_v31 = vpack.c.bf16 %v7317_v18, %v7313_v24  ;;  %v12070_v24 = vpack.c.bf16 %v7221_v44, %v7217_v25  ;;  %v7220_v18 = vld [vmem:[#allocation32 + $0x70] sm:$0xff]  ;;  %v7255_v44 = vld [vmem:[#allocation32 + $0x188] sm:$0xff] }
0x1756   :  { %12019 = vmatprep.subr.bf16.mxu0 %v12018_v36  ;;  %v7210_v36 = vld [vmem:[#allocation32 + $0x20] sm:$0xff]  ;;  %v7252_v25 = vld [vmem:[#allocation32 + $0x170] sm:$0xff] }
0x1759   :  { %12021 = vmatpush1.bf16.msra.mxu0 %v12020_v9  ;;  %v7219_v9 = vld [vmem:[#allocation32 + $0x68] sm:$0xff] }
0x175a   :  { %12023 = vmatprep.subr.bf16.mxu0 %v12022_v34  ;;  %v7218_v34 = vld [vmem:[#allocation32 + $0x60] sm:$0xff]  ;;  %v12038_v28 = vpack.c.bf16 %v7219_v9, %v7215_v21  ;;  %v7248_v9 = vld [vmem:[#allocation32 + $0x150] sm:$0xff] }
0x175d   :  { %12025 = vmatpush1.bf16.msra.mxu0 %v12024_v31  ;;  %v7223_v31 = vld [vmem:[#allocation32 + $0x88] sm:$0xff] }
0x181b   :  { %v7030_v41 = vpop.f32.mrb[58].mxu0 }
0x181c   :  { %v7034_v16 = vmul.f32 0.03125, %v7030_v41  ;;  %v10430_v58 = vpop.f32.mrb[59].mxu0  ;;  %v7320_v41 = vld [vmem:[#allocation32 + $0x388] sm:$0xff] }
0x181d   :  { %v7322_v58 = vld [vmem:[#allocation32 + $0x398] sm:$0xff] }
0x181e   :  { %v7036_v40 = vadd.f32 1e-05, %v7034_v16  ;;  %v7324_v16 = vld [vmem:[#allocation32 + $0x3a8] sm:$0xff] }
0x1820   :  { %12830 = vrsqrt.f32 %v7036_v40  ;;  %v11994_v40 = vpack.c.bf16 %v7324_v16, %v7320_v41  ;;  %v7227_v41 = vld [vmem:[#allocation32 + $0xa8] sm:$0xff]  ;;  %v7225_v16 = vld [vmem:[#allocation32 + $0x98] sm:$0xff] }
0x182a   :  { %v12831_v54 = vpop.eup %12830 }
0x182b   :  { %v7038_v5 = vmul.f32 %v12831_v54, %v7035_v48  ;;  %v7326_v48 = vld [vmem:[#allocation32 + $0x3b8] sm:$0xff]  ;;  %v7319_v54 = vld [vmem:[#allocation32 + $0x380] sm:$0xff] }
0x182c   :  { %v12026_v33 = vpack.c.bf16 %v7326_v48, %v7322_v58  ;;  %v7229_v58 = vld [vmem:[#allocation32 + $0xb8] sm:$0xff] }
0x182d   :  { %10440 = vmatmul.mubr.msk.f32.vlgmr.msra.gmra.mrb[56].mxu1 %vm528_vm0, %v7038_v5  ;;  %v7040_v13 = vmul.f32 %v7038_v5, %v15861_v38  ;;  %v7323_v5 = vld [vmem:[#allocation32 + $0x3a0] sm:$0xff] }
0x182e   :  { %11966 = vmatpush3.bf16.msra.mxu1 %v15836_v19  ;;  %10450 = vmatprep.mubr.msk.f32.mxu1 %vm13653_vm8, %v16056_v45  ;;  %v7279_v19 = vld [vmem:[#allocation32 + $0x240] sm:$0xff]  ;;  %v11996_v2 = vpack.c.bf16 %v7323_v5, %v7319_v54 }
0x182f   :  { %11967 = vmatprep.subr.bf16.mxu1 %v13652_v55  ;;  %v7041_v63 = vsub.f32 %v7039_v17, %v7040_v13  ;;  %v11976_v38 = vpack.c.bf16 %v7283_v35, %v7279_v19  ;;  %v7321_v13 = vld [vmem:[#allocation32 + $0x390] sm:$0xff]  ;;  %v7332_v17 = vld [vmem:[#allocation32 + $0x3e8] sm:$0xff]  ;;  %12027 = vmatprep.subr.bf16.mxu0 %v12026_v33  ;;  %v7331_v19 = vld [vmem:[#allocation32 + $0x3e0] sm:$0xff]  ;;  %v12042_v33 = vpack.c.bf16 %v7227_v41, %v7223_v31 }
0x1830   :  { %v7329_v35 = vld [vmem:[#allocation32 + $0x3d0] sm:$0xff]  ;;  %v7222_v54 = vld [vmem:[#allocation32 + $0x80] sm:$0xff] }
0x1831   :  { %v12032_v23 = vpack.c.bf16 %v7333_v29, %v7329_v35  ;;  %v7226_v5 = vld [vmem:[#allocation32 + $0xa0] sm:$0xff]  ;;  %v7236_v29 = vld [vmem:[#allocation32 + $0xf0] sm:$0xff] }
0x1832   :  { %11969 = vmatpush3.bf16.msra.mxu1 %v15855_v6  ;;  %v7300_v6 = vld [vmem:[#allocation32 + $0x2e8] sm:$0xff]  ;;  %v7256_v31 = vld [vmem:[#allocation32 + $0x190] sm:$0xff] }
0x1833   :  { %11971 = vmatprep.subr.bf16.mxu1 %v11970_v59  ;;  %v11982_v50 = vpack.c.bf16 %v7300_v6, %v7296_v10  ;;  %v7325_v59 = vld [vmem:[#allocation32 + $0x3b0] sm:$0xff]  ;;  %v7209_v10 = vld [vmem:[#allocation32 + $0x18] sm:$0xff] }
0x1834   :  { %v12028_v26 = vpack.c.bf16 %v7325_v59, %v7321_v13  ;;  %v7213_v6 = vld [vmem:[#allocation32 + $0x38] sm:$0xff]  ;;  %v7224_v13 = vld [vmem:[#allocation32 + $0x90] sm:$0xff] }
0x1835   :  { %10451 = vmatmul.mubr.msk.f32.vlgmr.msra.gmra.mrb[58].mxu1 %vm528_vm0, %v7041_v63  ;;  %v12030_v63 = vpack.c.bf16 %v7334_v3, %v7330_v43  ;;  %v7228_v59 = vld [vmem:[#allocation32 + $0xb0] sm:$0xff]  ;;  %v7237_v43 = vld [vmem:[#allocation32 + $0xf8] sm:$0xff]  ;;  %v12044_v3 = vpack.c.bf16 %v7226_v5, %v7222_v54 }
0x1836   :  { %11973 = vmatpush1.bf16.msra.mxu1 %v11972_v62  ;;  %7402 = vmatprep.mubr.f32.mxu1 %v16056_v45  ;;  %v11998_v62 = vpack.c.bf16 %v7332_v17, %v7328_v53  ;;  %v7231_v53 = vld [vmem:[#allocation32 + $0xc8] sm:$0xff]  ;;  %v7233_v17 = vld [vmem:[#allocation32 + $0xd8] sm:$0xff]  ;;  %v7260_v41 = vld [vmem:[#allocation32 + $0x1b0] sm:$0xff] }
0x1837   :  { %11975 = vmatprep.subr.bf16.mxu1 %v11974_v14  ;;  %v7327_v14 = vld [vmem:[#allocation32 + $0x3c0] sm:$0xff]  ;;  %12029 = vmatpush1.bf16.msra.mxu0 %v12028_v26  ;;  %v7235_v26 = vld [vmem:[#allocation32 + $0xe8] sm:$0xff]  ;;  %v12078_v35 = vpack.c.bf16 %v7237_v43, %v7233_v17  ;;  %v12092_v5 = vpack.c.bf16 %v7260_v41, %v7256_v31 }
0x1838   :  { %v12000_v0 = vpack.c.bf16 %v7331_v19, %v7327_v14  ;;  %12031 = vmatprep.subr.bf16.mxu0 %v12030_v63  ;;  %v7230_v63 = vld [vmem:[#allocation32 + $0xc0] sm:$0xff]  ;;  %v12046_v19 = vpack.c.bf16 %v7235_v26, %v7231_v53  ;;  %v7264_v53 = vld [vmem:[#allocation32 + $0x1d0] sm:$0xff]  ;;  %v7624_v17 = vld [vmem:[#allocation32 + $0x408] sm:$0xff] }
0x1839   :  { %v7234_v14 = vld [vmem:[#allocation32 + $0xe0] sm:$0xff]  ;;  %v7268_v26 = vld [vmem:[#allocation32 + $0x1f0] sm:$0xff]  ;;  %v7628_v43 = vld [vmem:[#allocation32 + $0x428] sm:$0xff] }
0x183a   :  { %11977 = vmatpush1.bf16.msra.mxu1 %v11976_v38  ;;  %v7207_v38 = vld [vmem:[#allocation32 + $0x8] sm:$0xff] }
0x183b   :  { %11979 = vmatprep.subr.bf16.mxu1 %v11978_v47  ;;  %v7211_v47 = vld [vmem:[#allocation32 + $0x28] sm:$0xff]  ;;  %12033 = vmatpush1.bf16.msra.mxu0 %v12032_v23  ;;  %v7241_v23 = vld [vmem:[#allocation32 + $0x118] sm:$0xff] }
0x183c   :  { %v12034_v60 = vpack.c.bf16 %v7211_v47, %v7207_v38  ;;  %v7239_v38 = vld [vmem:[#allocation32 + $0x108] sm:$0xff] }
0x183d   :  { %v7243_v47 = vld [vmem:[#allocation32 + $0x128] sm:$0xff] }
0x183e   :  { %11981 = vmatpush1.bf16.msra.mxu1 %v11980_v15  ;;  %v12066_v15 = vpack.c.bf16 %v7213_v6, %v7209_v10  ;;  %v12048_v10 = vpack.c.bf16 %v7234_v14, %v7230_v63  ;;  %v12096_v14 = vpack.c.bf16 %v7268_v26, %v7264_v53 }
0x183f   :  { %11983 = vmatprep.subr.bf16.mxu1 %v11982_v50 }
0x1840   :  { %12067 = vmatprep.subr.bf16.mxu0 %v12066_v15  ;;  %v7238_v15 = vld [vmem:[#allocation32 + $0x100] sm:$0xff] }
0x1842   :  { %11985 = vmatpush1.bf16.msra.mxu1 %v11984_v27 }
0x1843   :  { %11987 = vmatprep.subr.bf16.mxu1 %v11986_v37 }
0x1846   :  { %11989 = vmatpush1.bf16.msra.mxu1 %v11988_v57  ;;  %v7208_v57 = vld [vmem:[#allocation32 + $0x10] sm:$0xff] }
0x1847   :  { %11991 = vmatprep.subr.bf16.mxu1 %v11990_v52  ;;  %v7214_v52 = vld [vmem:[#allocation32 + $0x40] sm:$0xff] }
0x184a   :  { %11993 = vmatpush1.bf16.msra.mxu1 %v11992_v32  ;;  %v7216_v32 = vld [vmem:[#allocation32 + $0x50] sm:$0xff] }
0x184b   :  { %11995 = vmatprep.subr.bf16.mxu1 %v11994_v40  ;;  %v12040_v40 = vpack.c.bf16 %v7218_v34, %v7214_v52  ;;  %v12072_v48 = vpack.c.bf16 %v7220_v18, %v7216_v32  ;;  %v7261_v52 = vld [vmem:[#allocation32 + $0x1b8] sm:$0xff] }
0x184e   :  { %11997 = vmatpush1.bf16.msra.mxu1 %v11996_v2  ;;  %v12074_v2 = vpack.c.bf16 %v7229_v58, %v7225_v16  ;;  %v7263_v16 = vld [vmem:[#allocation32 + $0x1c8] sm:$0xff] }
0x184f   :  { %11999 = vmatprep.subr.bf16.mxu1 %v11998_v62  ;;  %v12076_v62 = vpack.c.bf16 %v7228_v59, %v7224_v13  ;;  %v7267_v58 = vld [vmem:[#allocation32 + $0x1e8] sm:$0xff] }
0x1850   :  { %v12062_v13 = vpack.c.bf16 %v7267_v58, %v7263_v16  ;;  %v7649_v16 = vld [vmem:[#allocation32 + $0x4d0] sm:$0xff] }
0x1851   :  { %v7653_v58 = vld [vmem:[#allocation32 + $0x4f0] sm:$0xff] }
0x1852   :  { %12001 = vmatpush1.bf16.msra.mxu1 %v12000_v0  ;;  %v7232_v0 = vld [vmem:[#allocation32 + $0xd0] sm:$0xff] }
0x1853   :  { %12035 = vmatprep.subr.bf16.mxu1 %v12034_v60  ;;  %v7245_v60 = vld [vmem:[#allocation32 + $0x138] sm:$0xff]  ;;  %v12080_v6 = vpack.c.bf16 %v7236_v29, %v7232_v0  ;;  %v12098_v0 = vpack.c.bf16 %v7628_v43, %v7624_v17  ;;  %v7657_v17 = vld [vmem:[#allocation32 + $0x510] sm:$0xff] }
0x1854   :  { %v7661_v43 = vld [vmem:[#allocation32 + $0x530] sm:$0xff] }
0x1900   :  { %v7111_v50 = vpop.f32.mrb[56].mxu1 }
0x1901   :  { %v10441_v11 = vpop.f32.mrb[57].mxu1  ;;  %v7191_v1 = vrot.slane %v7111_v50, %v14327_v49  ;;  %v7242_v50 = vld [vmem:[#allocation32 + $0x120] sm:$0xff] }
0x1902   :  { %v12050_v11 = vpack.c.bf16 %v7243_v47, %v7239_v38  ;;  %v7625_v38 = vld [vmem:[#allocation32 + $0x410] sm:$0xff] }
0x1903   :  { %v7192_v12 = vmul.f32 %v7191_v1, %v15843_v4  ;;  %v7201_v39 = vmul.f32 %v7191_v1, %v15847_v30  ;;  %v12036_v4 = vpack.c.bf16 %v7210_v36, %v7206_v22  ;;  %v12068_v30 = vpack.c.bf16 %v7212_v20, %v7208_v57  ;;  %v7246_v57 = vld [vmem:[#allocation32 + $0x140] sm:$0xff]  ;;  %v7629_v47 = vld [vmem:[#allocation32 + $0x430] sm:$0xff] }
0x1904   :  { %v12082_v1 = vpack.c.bf16 %v7245_v60, %v7241_v23  ;;  %v12052_v22 = vpack.c.bf16 %v7242_v50, %v7238_v15  ;;  %v7250_v20 = vld [vmem:[#allocation32 + $0x160] sm:$0xff]  ;;  %v7632_v23 = vld [vmem:[#allocation32 + $0x448] sm:$0xff]  ;;  %v12132_v50 = vpack.c.bf16 %v7629_v47, %v7625_v38 }
0x1905   :  { %v12056_v34 = vpack.c.bf16 %v7250_v20, %v7246_v57  ;;  %v7636_v60 = vld [vmem:[#allocation32 + $0x468] sm:$0xff] }
0x1908   :  { %v7184_v27 = vpop.f32.mrb[58].mxu1 }
0x1909   :  { %v7196_v56 = vrot.slane %v7184_v27, %v14327_v49  ;;  %v10452_v37 = vpop.f32.mrb[59].mxu1  ;;  %v7240_v27 = vld [vmem:[#allocation32 + $0x110] sm:$0xff] }
0x190a   :  { %v7249_v37 = vld [vmem:[#allocation32 + $0x158] sm:$0xff] }
0x190b   :  { %v7197_v8 = vadd.f32 %v7196_v56, %v7192_v12  ;;  %v15900_v51 = vadd.f32 %v7201_v39, %v7196_v56  ;;  %v7244_v12 = vld [vmem:[#allocation32 + $0x130] sm:$0xff]  ;;  %v7247_v39 = vld [vmem:[#allocation32 + $0x148] sm:$0xff] }
0x190c   :  { %v7251_v56 = vld [vmem:[#allocation32 + $0x168] sm:$0xff]  ;;  %v12084_v36 = vpack.c.bf16 %v7244_v12, %v7240_v27  ;;  %v12102_v27 = vpack.c.bf16 %v7636_v60, %v7632_v23  ;;  %v7665_v23 = vld [vmem:[#allocation32 + $0x550] sm:$0xff] }
0x190d   :  { %vm7198_vm0 = vcmp.ge.f32.partialorder %v7197_v8, 0.0  ;;  %v7199_v42 = vmul.f32 0.01, %v7197_v8  ;;  %v12054_v21 = vpack.c.bf16 %v7251_v56, %v7247_v39  ;;  %v7633_v39 = vld [vmem:[#allocation32 + $0x450] sm:$0xff]  ;;  %vm7203_vm10 = vcmp.ge.f32.partialorder %v15900_v51, 0.0 }
0x190e   :  { %v7637_v56 = vld [vmem:[#allocation32 + $0x470] sm:$0xff] }
0x190f   :  { %v15902_v61 = vsel %vm7198_vm0, %v7197_v8, %v7199_v42  ;;  %v7253_v8 = vld [vmem:[#allocation32 + $0x178] sm:$0xff]  ;;  %v12136_v20 = vpack.c.bf16 %v7637_v56, %v7633_v39  ;;  %v7669_v60 = vld [vmem:[#allocation32 + $0x570] sm:$0xff] }
0x1910   :  { %v7336_v7 = vrot.slane %v15902_v61, 1  ;;  %v12086_v42 = vpack.c.bf16 %v7253_v8, %v7249_v37  ;;  %v7640_v37 = vld [vmem:[#allocation32 + $0x488] sm:$0xff] }
0x1911   :  { %v7644_v8 = vld [vmem:[#allocation32 + $0x4a8] sm:$0xff] }
0x1912   :  { %7403 = vmatmul.mubr.f32.vlgmr.msra.gmra.mrb[60].mxu1 %v7336_v7  ;;  %7474 = vmatmul.mubr.f32.vlgmr.msra.gmra.mrb[60].mxu0 %v7336_v7  ;;  %v12088_v7 = vpack.c.bf16 %v7252_v25, %v7248_v9  ;;  %v12106_v9 = vpack.c.bf16 %v7644_v8, %v7640_v37  ;;  %v7673_v37 = vld [vmem:[#allocation32 + $0x590] sm:$0xff] }
0x1913   :  { %12037 = vmatpush1.bf16.msra.mxu1 %v12036_v4  ;;  %12069 = vmatpush1.bf16.msra.mxu0 %v12068_v30  ;;  %v7259_v4 = vld [vmem:[#allocation32 + $0x1a8] sm:$0xff]  ;;  %v7257_v30 = vld [vmem:[#allocation32 + $0x198] sm:$0xff]  ;;  %v7677_v8 = vld [vmem:[#allocation32 + $0x5b0] sm:$0xff] }
0x1914   :  { %12039 = vmatprep.subr.bf16.mxu1 %v12038_v28  ;;  %12071 = vmatprep.subr.bf16.mxu0 %v12070_v24  ;;  %v7254_v28 = vld [vmem:[#allocation32 + $0x180] sm:$0xff]  ;;  %v12058_v32 = vpack.c.bf16 %v7259_v4, %v7255_v44  ;;  %v12090_v18 = vpack.c.bf16 %v7261_v52, %v7257_v30  ;;  %v7641_v44 = vld [vmem:[#allocation32 + $0x490] sm:$0xff]  ;;  %v7648_v30 = vld [vmem:[#allocation32 + $0x4c8] sm:$0xff] }
0x1915   :  { %7544 = vmatprep.mubr.f32.mxu1 %v16056_v45  ;;  %7615 = vmatprep.mubr.f32.mxu0 %v16056_v45  ;;  %v7258_v24 = vld [vmem:[#allocation32 + $0x1a0] sm:$0xff]  ;;  %v7645_v4 = vld [vmem:[#allocation32 + $0x4b0] sm:$0xff]  ;;  %v7652_v52 = vld [vmem:[#allocation32 + $0x4e8] sm:$0xff] }
0x1916   :  { %v12060_v54 = vpack.c.bf16 %v7258_v24, %v7254_v28  ;;  %v12140_v24 = vpack.c.bf16 %v7645_v4, %v7641_v44  ;;  %v12110_v31 = vpack.c.bf16 %v7652_v52, %v7648_v30  ;;  %v7681_v30 = vld [vmem:[#allocation32 + $0x5d0] sm:$0xff] }
0x1917   :  { %12041 = vmatpush1.bf16.msra.mxu1 %v12040_v40  ;;  %12073 = vmatpush1.bf16.msra.mxu0 %v12072_v48  ;;  %v7265_v40 = vld [vmem:[#allocation32 + $0x1d8] sm:$0xff]  ;;  %v7685_v52 = vld [vmem:[#allocation32 + $0x5f0] sm:$0xff] }
0x1918   :  { %12043 = vmatprep.subr.bf16.mxu1 %v12042_v33  ;;  %12075 = vmatprep.subr.bf16.mxu0 %v12074_v2  ;;  %v7269_v48 = vld [vmem:[#allocation32 + $0x1f8] sm:$0xff]  ;;  %v7262_v33 = vld [vmem:[#allocation32 + $0x1c0] sm:$0xff] }
0x1919   :  { %v7266_v2 = vld [vmem:[#allocation32 + $0x1e0] sm:$0xff]  ;;  %v12094_v59 = vpack.c.bf16 %v7269_v48, %v7265_v40  ;;  %v7656_v40 = vld [vmem:[#allocation32 + $0x508] sm:$0xff] }
0x191a   :  { %v12064_v63 = vpack.c.bf16 %v7266_v2, %v7262_v33  ;;  %v7660_v48 = vld [vmem:[#allocation32 + $0x528] sm:$0xff]  ;;  %v12144_v2 = vpack.c.bf16 %v7653_v58, %v7649_v16 }
0x191b   :  { %12045 = vmatpush1.bf16.msra.mxu1 %v12044_v3  ;;  %12077 = vmatpush1.bf16.msra.mxu0 %v12076_v62  ;;  %v7626_v3 = vld [vmem:[#allocation32 + $0x418] sm:$0xff]  ;;  %v12114_v53 = vpack.c.bf16 %v7660_v48, %v7656_v40  ;;  %v7838_v40 = vld [vmem:[#allocation32 + $0x610] sm:$0xff] }
0x191c   :  { %12047 = vmatprep.subr.bf16.mxu1 %v12046_v19  ;;  %12079 = vmatprep.subr.bf16.mxu0 %v12078_v35  ;;  %v7630_v62 = vld [vmem:[#allocation32 + $0x438] sm:$0xff]  ;;  %v7623_v19 = vld [vmem:[#allocation32 + $0x400] sm:$0xff]  ;;  %v7842_v48 = vld [vmem:[#allocation32 + $0x630] sm:$0xff] }
0x191d   :  { %v7627_v35 = vld [vmem:[#allocation32 + $0x420] sm:$0xff]  ;;  %v12130_v29 = vpack.c.bf16 %v7630_v62, %v7626_v3  ;;  %v7664_v3 = vld [vmem:[#allocation32 + $0x548] sm:$0xff] }
0x191e   :  { %v12100_v15 = vpack.c.bf16 %v7627_v35, %v7623_v19  ;;  %v7668_v62 = vld [vmem:[#allocation32 + $0x568] sm:$0xff]  ;;  %v12148_v35 = vpack.c.bf16 %v7661_v43, %v7657_v17  ;;  %v7687_v17 = vrot.slane %v15902_v61, 2 }
0x191f   :  { %12049 = vmatpush1.bf16.msra.mxu1 %v12048_v10  ;;  %12081 = vmatpush1.bf16.msra.mxu0 %v12080_v6  ;;  %v7634_v10 = vld [vmem:[#allocation32 + $0x458] sm:$0xff]  ;;  %v12118_v38 = vpack.c.bf16 %v7668_v62, %v7664_v3  ;;  %v7846_v62 = vld [vmem:[#allocation32 + $0x650] sm:$0xff] }
0x1920   :  { %12051 = vmatprep.subr.bf16.mxu1 %v12050_v11  ;;  %12083 = vmatprep.subr.bf16.mxu0 %v12082_v1  ;;  %v7638_v6 = vld [vmem:[#allocation32 + $0x478] sm:$0xff]  ;;  %v7631_v11 = vld [vmem:[#allocation32 + $0x440] sm:$0xff] }
0x1921   :  { %v7635_v1 = vld [vmem:[#allocation32 + $0x460] sm:$0xff]  ;;  %v12134_v12 = vpack.c.bf16 %v7638_v6, %v7634_v10  ;;  %v7672_v10 = vld [vmem:[#allocation32 + $0x588] sm:$0xff] }
0x1922   :  { %v12104_v57 = vpack.c.bf16 %v7635_v1, %v7631_v11  ;;  %v7676_v6 = vld [vmem:[#allocation32 + $0x5a8] sm:$0xff]  ;;  %v12152_v1 = vpack.c.bf16 %v7669_v60, %v7665_v23  ;;  %v7856_v23 = vld [vmem:[#allocation32 + $0x6a0] sm:$0xff] }
0x1923   :  { %12053 = vmatpush1.bf16.msra.mxu1 %v12052_v22  ;;  %12085 = vmatpush1.bf16.msra.mxu0 %v12084_v36  ;;  %v7642_v22 = vld [vmem:[#allocation32 + $0x498] sm:$0xff]  ;;  %v12122_v39 = vpack.c.bf16 %v7676_v6, %v7672_v10  ;;  %v7854_v6 = vld [vmem:[#allocation32 + $0x690] sm:$0xff] }
0x1924   :  { %12055 = vmatprep.subr.bf16.mxu1 %v12054_v21  ;;  %12087 = vmatprep.subr.bf16.mxu0 %v12086_v42  ;;  %v7646_v36 = vld [vmem:[#allocation32 + $0x4b8] sm:$0xff]  ;;  %v7639_v21 = vld [vmem:[#allocation32 + $0x480] sm:$0xff] }
0x1925   :  { %v7643_v42 = vld [vmem:[#allocation32 + $0x4a0] sm:$0xff]  ;;  %v12138_v25 = vpack.c.bf16 %v7646_v36, %v7642_v22  ;;  %v7680_v22 = vld [vmem:[#allocation32 + $0x5c8] sm:$0xff] }
0x1926   :  { %v12108_v28 = vpack.c.bf16 %v7643_v42, %v7639_v21  ;;  %v7684_v36 = vld [vmem:[#allocation32 + $0x5e8] sm:$0xff]  ;;  %v12156_v42 = vpack.c.bf16 %v7677_v8, %v7673_v37  ;;  %v7864_v37 = vld [vmem:[#allocation32 + $0x6e0] sm:$0xff] }
0x1927   :  { %12057 = vmatpush1.bf16.msra.mxu1 %v12056_v34  ;;  %12089 = vmatpush1.bf16.msra.mxu0 %v12088_v7  ;;  %v7650_v34 = vld [vmem:[#allocation32 + $0x4d8] sm:$0xff]  ;;  %v12126_v44 = vpack.c.bf16 %v7684_v36, %v7680_v22  ;;  %v7862_v36 = vld [vmem:[#allocation32 + $0x6d0] sm:$0xff] }
0x1928   :  { %12059 = vmatprep.subr.bf16.mxu1 %v12058_v32  ;;  %12091 = vmatprep.subr.bf16.mxu0 %v12090_v18  ;;  %v7654_v7 = vld [vmem:[#allocation32 + $0x4f8] sm:$0xff]  ;;  %v7647_v32 = vld [vmem:[#allocation32 + $0x4c0] sm:$0xff] }
0x1929   :  { %v7651_v18 = vld [vmem:[#allocation32 + $0x4e0] sm:$0xff]  ;;  %v12142_v41 = vpack.c.bf16 %v7654_v7, %v7650_v34  ;;  %v7837_v34 = vld [vmem:[#allocation32 + $0x608] sm:$0xff] }
0x192a   :  { %v12112_v33 = vpack.c.bf16 %v7651_v18, %v7647_v32  ;;  %v7841_v7 = vld [vmem:[#allocation32 + $0x628] sm:$0xff]  ;;  %v12160_v18 = vpack.c.bf16 %v7685_v52, %v7681_v30  ;;  %v7872_v30 = vld [vmem:[#allocation32 + $0x720] sm:$0xff] }
0x192b   :  { %12061 = vmatpush1.bf16.msra.mxu1 %v12060_v54  ;;  %12093 = vmatpush1.bf16.msra.mxu0 %v12092_v5  ;;  %v7658_v54 = vld [vmem:[#allocation32 + $0x518] sm:$0xff]  ;;  %v12162_v16 = vpack.c.bf16 %v7841_v7, %v7837_v34  ;;  %v7870_v7 = vld [vmem:[#allocation32 + $0x710] sm:$0xff] }
0x192c   :  { %12063 = vmatprep.subr.bf16.mxu1 %v12062_v13  ;;  %12095 = vmatprep.subr.bf16.mxu0 %v12094_v59  ;;  %v7662_v5 = vld [vmem:[#allocation32 + $0x538] sm:$0xff]  ;;  %v7655_v13 = vld [vmem:[#allocation32 + $0x500] sm:$0xff] }
0x192d   :  { %v7659_v59 = vld [vmem:[#allocation32 + $0x520] sm:$0xff]  ;;  %v12146_v26 = vpack.c.bf16 %v7662_v5, %v7658_v54  ;;  %v7845_v54 = vld [vmem:[#allocation32 + $0x648] sm:$0xff] }
0x192e   :  { %v12116_v19 = vpack.c.bf16 %v7659_v59, %v7655_v13  ;;  %v7849_v5 = vld [vmem:[#allocation32 + $0x668] sm:$0xff]  ;;  %v12196_v59 = vpack.c.bf16 %v7842_v48, %v7838_v40  ;;  %v7880_v40 = vld [vmem:[#allocation32 + $0x760] sm:$0xff] }
0x192f   :  { %12065 = vmatpush1.bf16.msra.mxu1 %v12064_v63  ;;  %12097 = vmatpush1.bf16.msra.mxu0 %v12096_v14  ;;  %v7666_v63 = vld [vmem:[#allocation32 + $0x558] sm:$0xff]  ;;  %v12166_v43 = vpack.c.bf16 %v7849_v5, %v7845_v54  ;;  %v7878_v5 = vld [vmem:[#allocation32 + $0x750] sm:$0xff] }
0x1930   :  { %12099 = vmatprep.subr.bf16.mxu1 %v12098_v0  ;;  %12131 = vmatprep.subr.bf16.mxu0 %v12130_v29  ;;  %v7670_v14 = vld [vmem:[#allocation32 + $0x578] sm:$0xff]  ;;  %v7663_v0 = vld [vmem:[#allocation32 + $0x540] sm:$0xff] }
0x1931   :  { %v7667_v29 = vld [vmem:[#allocation32 + $0x560] sm:$0xff]  ;;  %v12150_v47 = vpack.c.bf16 %v7670_v14, %v7666_v63  ;;  %v7850_v63 = vld [vmem:[#allocation32 + $0x670] sm:$0xff]  ;;  %v7853_v14 = vld [vmem:[#allocation32 + $0x688] sm:$0xff] }
0x1932   :  { %7545 = vmatmul.mubr.f32.vlgmr.msra.gmra.mrb[60].mxu1 %v15902_v61  ;;  %7616 = vmatmul.mubr.f32.vlgmr.msra.gmra.mrb[60].mxu0 %v15902_v61  ;;  %v12120_v11 = vpack.c.bf16 %v7667_v29, %v7663_v0  ;;  %v7859_v0 = vld [vmem:[#allocation32 + $0x6b8] sm:$0xff] }
0x1933   :  { %12101 = vmatpush1.bf16.msra.mxu1 %v12100_v15  ;;  %12133 = vmatpush1.bf16.msra.mxu0 %v12132_v50  ;;  %v7674_v15 = vld [vmem:[#allocation32 + $0x598] sm:$0xff] }
0x1934   :  { %12103 = vmatprep.subr.bf16.mxu1 %v12102_v27  ;;  %12135 = vmatprep.subr.bf16.mxu0 %v12134_v12  ;;  %v7678_v50 = vld [vmem:[#allocation32 + $0x5b8] sm:$0xff]  ;;  %v7671_v27 = vld [vmem:[#allocation32 + $0x580] sm:$0xff] }
0x1935   :  { %7753 = vmatprep.mubr.f32.mxu1 %v16056_v45  ;;  %7824 = vmatprep.mubr.f32.mxu0 %v16056_v45  ;;  %v7675_v12 = vld [vmem:[#allocation32 + $0x5a0] sm:$0xff]  ;;  %v12154_v56 = vpack.c.bf16 %v7678_v50, %v7674_v15  ;;  %v7858_v15 = vld [vmem:[#allocation32 + $0x6b0] sm:$0xff]  ;;  %v7861_v50 = vld [vmem:[#allocation32 + $0x6c8] sm:$0xff] }
0x1936   :  { %v12124_v21 = vpack.c.bf16 %v7675_v12, %v7671_v27  ;;  %v7867_v27 = vld [vmem:[#allocation32 + $0x6f8] sm:$0xff] }
0x1937   :  { %12105 = vmatpush1.bf16.msra.mxu1 %v12104_v57  ;;  %12137 = vmatpush1.bf16.msra.mxu0 %v12136_v20  ;;  %v7682_v57 = vld [vmem:[#allocation32 + $0x5d8] sm:$0xff] }
0x1938   :  { %12107 = vmatprep.subr.bf16.mxu1 %v12106_v9  ;;  %12139 = vmatprep.subr.bf16.mxu0 %v12138_v25  ;;  %v7686_v20 = vld [vmem:[#allocation32 + $0x5f8] sm:$0xff]  ;;  %v7679_v9 = vld [vmem:[#allocation32 + $0x5c0] sm:$0xff] }
0x1939   :  { %v7683_v25 = vld [vmem:[#allocation32 + $0x5e0] sm:$0xff]  ;;  %v12158_v4 = vpack.c.bf16 %v7686_v20, %v7682_v57  ;;  %v7866_v57 = vld [vmem:[#allocation32 + $0x6f0] sm:$0xff]  ;;  %v7869_v20 = vld [vmem:[#allocation32 + $0x708] sm:$0xff] }
0x193a   :  { %v12128_v32 = vpack.c.bf16 %v7683_v25, %v7679_v9  ;;  %v7875_v9 = vld [vmem:[#allocation32 + $0x738] sm:$0xff] }
0x193b   :  { %12109 = vmatpush1.bf16.msra.mxu1 %v12108_v28  ;;  %12141 = vmatpush1.bf16.msra.mxu0 %v12140_v24  ;;  %v7839_v28 = vld [vmem:[#allocation32 + $0x618] sm:$0xff] }
0x193c   :  { %12111 = vmatprep.subr.bf16.mxu1 %v12110_v31  ;;  %12143 = vmatprep.subr.bf16.mxu0 %v12142_v41  ;;  %v7843_v24 = vld [vmem:[#allocation32 + $0x638] sm:$0xff]  ;;  %v7836_v31 = vld [vmem:[#allocation32 + $0x600] sm:$0xff] }
0x193d   :  { %v7840_v41 = vld [vmem:[#allocation32 + $0x620] sm:$0xff]  ;;  %v12194_v58 = vpack.c.bf16 %v7843_v24, %v7839_v28  ;;  %v7874_v28 = vld [vmem:[#allocation32 + $0x730] sm:$0xff]  ;;  %v7877_v24 = vld [vmem:[#allocation32 + $0x748] sm:$0xff] }
0x193e   :  { %v12164_v13 = vpack.c.bf16 %v7840_v41, %v7836_v31  ;;  %v7883_v31 = vld [vmem:[#allocation32 + $0x778] sm:$0xff] }
0x193f   :  { %12113 = vmatpush1.bf16.msra.mxu1 %v12112_v33  ;;  %12145 = vmatpush1.bf16.msra.mxu0 %v12144_v2  ;;  %v7847_v33 = vld [vmem:[#allocation32 + $0x658] sm:$0xff] }
0x1940   :  { %12115 = vmatprep.subr.bf16.mxu1 %v12114_v53  ;;  %12147 = vmatprep.subr.bf16.mxu0 %v12146_v26  ;;  %v7851_v2 = vld [vmem:[#allocation32 + $0x678] sm:$0xff]  ;;  %v7844_v53 = vld [vmem:[#allocation32 + $0x640] sm:$0xff] }
0x1941   :  { %v7848_v26 = vld [vmem:[#allocation32 + $0x660] sm:$0xff]  ;;  %v12198_v3 = vpack.c.bf16 %v7851_v2, %v7847_v33  ;;  %v7882_v33 = vld [vmem:[#allocation32 + $0x770] sm:$0xff]  ;;  %v7885_v2 = vld [vmem:[#allocation32 + $0x788] sm:$0xff] }
0x1942   :  { %v12168_v29 = vpack.c.bf16 %v7848_v26, %v7844_v53  ;;  %v7891_v53 = vld [vmem:[#allocation32 + $0x7b8] sm:$0xff] }
0x1943   :  { %12117 = vmatpush1.bf16.msra.mxu1 %v12116_v19  ;;  %12149 = vmatpush1.bf16.msra.mxu0 %v12148_v35  ;;  %v7857_v19 = vld [vmem:[#allocation32 + $0x6a8] sm:$0xff]  ;;  %v7855_v35 = vld [vmem:[#allocation32 + $0x698] sm:$0xff] }
0x1944   :  { %12119 = vmatprep.subr.bf16.mxu1 %v12118_v38  ;;  %12151 = vmatprep.subr.bf16.mxu0 %v12150_v47  ;;  %v12200_v38 = vpack.c.bf16 %v7850_v63, %v7846_v62  ;;  %v7852_v47 = vld [vmem:[#allocation32 + $0x680] sm:$0xff]  ;;  %v12170_v60 = vpack.c.bf16 %v7857_v19, %v7853_v14  ;;  %v12202_v10 = vpack.c.bf16 %v7859_v0, %v7855_v35  ;;  %v7886_v14 = vld [vmem:[#allocation32 + $0x790] sm:$0xff]  ;;  %v7893_v35 = vld [vmem:[#allocation32 + $0x7c8] sm:$0xff] }
0x1945   :  { %v12172_v12 = vpack.c.bf16 %v7856_v23, %v7852_v47  ;;  %v7890_v19 = vld [vmem:[#allocation32 + $0x7b0] sm:$0xff]  ;;  %v7897_v0 = vld [vmem:[#allocation32 + $0x7e8] sm:$0xff] }
0x1946   :  { %v12220_v23 = vpack.c.bf16 %v7890_v19, %v7886_v14 }
0x1947   :  { %12121 = vmatpush1.bf16.msra.mxu1 %v12120_v11  ;;  %12153 = vmatpush1.bf16.msra.mxu0 %v12152_v1  ;;  %v7865_v11 = vld [vmem:[#allocation32 + $0x6e8] sm:$0xff]  ;;  %v7863_v1 = vld [vmem:[#allocation32 + $0x6d8] sm:$0xff] }
0x1948   :  { %12123 = vmatprep.subr.bf16.mxu1 %v12122_v39  ;;  %12155 = vmatprep.subr.bf16.mxu0 %v12154_v56  ;;  %v12204_v39 = vpack.c.bf16 %v7858_v15, %v7854_v6  ;;  %v7860_v56 = vld [vmem:[#allocation32 + $0x6c0] sm:$0xff]  ;;  %v12174_v8 = vpack.c.bf16 %v7865_v11, %v7861_v50  ;;  %v12206_v22 = vpack.c.bf16 %v7867_v27, %v7863_v1  ;;  %v7894_v50 = vld [vmem:[#allocation32 + $0x7d0] sm:$0xff]  ;;  %v8147_v1 = vld [vmem:[#allocation32 + $0x208] sm:$0xff] }
0x1949   :  { %v12176_v25 = vpack.c.bf16 %v7864_v37, %v7860_v56  ;;  %v12190_v6 = vpack.c.bf16 %v7897_v0, %v7893_v35  ;;  %v7898_v11 = vld [vmem:[#allocation32 + $0x7f0] sm:$0xff]  ;;  %v8151_v27 = vld [vmem:[#allocation32 + $0x228] sm:$0xff] }
0x194a   :  { %v12224_v37 = vpack.c.bf16 %v7898_v11, %v7894_v50  ;;  %v8172_v35 = vld [vmem:[#allocation32 + $0x2d0] sm:$0xff] }
0x194b   :  { %12125 = vmatpush1.bf16.msra.mxu1 %v12124_v21  ;;  %12157 = vmatpush1.bf16.msra.mxu0 %v12156_v42  ;;  %v7873_v21 = vld [vmem:[#allocation32 + $0x728] sm:$0xff]  ;;  %v7871_v42 = vld [vmem:[#allocation32 + $0x718] sm:$0xff]  ;;  %v8176_v0 = vld [vmem:[#allocation32 + $0x2f0] sm:$0xff] }
0x194c   :  { %12127 = vmatprep.subr.bf16.mxu1 %v12126_v44  ;;  %12159 = vmatprep.subr.bf16.mxu0 %v12158_v4  ;;  %v12208_v44 = vpack.c.bf16 %v7866_v57, %v7862_v36  ;;  %v7868_v4 = vld [vmem:[#allocation32 + $0x700] sm:$0xff]  ;;  %v12178_v52 = vpack.c.bf16 %v7873_v21, %v7869_v20  ;;  %v12210_v34 = vpack.c.bf16 %v7875_v9, %v7871_v42  ;;  %v8148_v20 = vld [vmem:[#allocation32 + $0x210] sm:$0xff]  ;;  %v8155_v42 = vld [vmem:[#allocation32 + $0x248] sm:$0xff] }
0x194d   :  { %v12180_v41 = vpack.c.bf16 %v7872_v30, %v7868_v4  ;;  %v12226_v36 = vpack.c.bf16 %v8151_v27, %v8147_v1  ;;  %v8152_v21 = vld [vmem:[#allocation32 + $0x230] sm:$0xff]  ;;  %v8159_v9 = vld [vmem:[#allocation32 + $0x268] sm:$0xff] }
0x194e   :  { %v12260_v30 = vpack.c.bf16 %v8152_v21, %v8148_v20  ;;  %v8180_v1 = vld [vmem:[#allocation32 + $0x310] sm:$0xff] }
0x194f   :  { %12129 = vmatpush1.bf16.msra.mxu1 %v12128_v32  ;;  %12161 = vmatpush1.bf16.msra.mxu0 %v12160_v18  ;;  %v7881_v32 = vld [vmem:[#allocation32 + $0x768] sm:$0xff]  ;;  %v7879_v18 = vld [vmem:[#allocation32 + $0x758] sm:$0xff]  ;;  %v8184_v27 = vld [vmem:[#allocation32 + $0x330] sm:$0xff] }
0x1950   :  { %12163 = vmatprep.subr.bf16.mxu1 %v12162_v16  ;;  %12195 = vmatprep.subr.bf16.mxu0 %v12194_v58  ;;  %v12212_v16 = vpack.c.bf16 %v7874_v28, %v7870_v7  ;;  %v7876_v58 = vld [vmem:[#allocation32 + $0x740] sm:$0xff]  ;;  %v12182_v48 = vpack.c.bf16 %v7881_v32, %v7877_v24  ;;  %v12214_v54 = vpack.c.bf16 %v7883_v31, %v7879_v18  ;;  %v7900_v7 = vrot.slane %v15902_v61, 3  ;;  %v8156_v32 = vld [vmem:[#allocation32 + $0x250] sm:$0xff]  ;;  %v8163_v31 = vld [vmem:[#allocation32 + $0x288] sm:$0xff] }
0x1951   :  { %v12184_v26 = vpack.c.bf16 %v7880_v40, %v7876_v58  ;;  %v12230_v28 = vpack.c.bf16 %v8159_v9, %v8155_v42  ;;  %v8160_v18 = vld [vmem:[#allocation32 + $0x270] sm:$0xff]  ;;  %v8169_v58 = vld [vmem:[#allocation32 + $0x2b8] sm:$0xff] }
0x1952   :  { %7754 = vmatmul.mubr.f32.vlgmr.msra.gmra.mrb[60].mxu1 %v7687_v17  ;;  %7825 = vmatmul.mubr.f32.vlgmr.msra.gmra.mrb[60].mxu0 %v7687_v17  ;;  %v12216_v17 = vpack.c.bf16 %v7882_v33, %v7878_v5  ;;  %v8166_v5 = vld [vmem:[#allocation32 + $0x2a0] sm:$0xff]  ;;  %v8188_v42 = vld [vmem:[#allocation32 + $0x350] sm:$0xff] }
0x1953   :  { %12165 = vmatpush1.bf16.msra.mxu1 %v12164_v13  ;;  %12197 = vmatpush1.bf16.msra.mxu0 %v12196_v59  ;;  %v7889_v13 = vld [vmem:[#allocation32 + $0x7a8] sm:$0xff]  ;;  %v7887_v59 = vld [vmem:[#allocation32 + $0x798] sm:$0xff]  ;;  %v8192_v9 = vld [vmem:[#allocation32 + $0x370] sm:$0xff] }
0x1954   :  { %12167 = vmatprep.subr.bf16.mxu1 %v12166_v43  ;;  %12199 = vmatprep.subr.bf16.mxu0 %v12198_v3  ;;  %v7884_v43 = vld [vmem:[#allocation32 + $0x780] sm:$0xff]  ;;  %v12186_v62 = vpack.c.bf16 %v7889_v13, %v7885_v2  ;;  %v12218_v63 = vpack.c.bf16 %v7891_v53, %v7887_v59  ;;  %v8164_v2 = vld [vmem:[#allocation32 + $0x290] sm:$0xff]  ;;  %v8171_v59 = vld [vmem:[#allocation32 + $0x2c8] sm:$0xff] }
0x1955   :  { %7966 = vmatprep.mubr.f32.mxu1 %v16056_v45  ;;  %8037 = vmatprep.mubr.f32.mxu0 %v16056_v45  ;;  %v7888_v3 = vld [vmem:[#allocation32 + $0x7a0] sm:$0xff]  ;;  %v8168_v13 = vld [vmem:[#allocation32 + $0x2b0] sm:$0xff]  ;;  %v8175_v53 = vld [vmem:[#allocation32 + $0x2e8] sm:$0xff] }
0x1956   :  { %v12188_v47 = vpack.c.bf16 %v7888_v3, %v7884_v43  ;;  %v12268_v3 = vpack.c.bf16 %v8168_v13, %v8164_v2  ;;  %v12238_v14 = vpack.c.bf16 %v8175_v53, %v8171_v59  ;;  %v8204_v13 = vld [vmem:[#allocation32 + $0x3d0] sm:$0xff]  ;;  %v8083_v53 = vld [vmem:[#allocation32 + $0x8] sm:$0xff] }
0x1957   :  { %12169 = vmatpush1.bf16.msra.mxu1 %v12168_v29  ;;  %12201 = vmatpush1.bf16.msra.mxu0 %v12200_v38  ;;  %v7895_v29 = vld [vmem:[#allocation32 + $0x7d8] sm:$0xff]  ;;  %v8208_v59 = vld [vmem:[#allocation32 + $0x3f0] sm:$0xff] }
0x1958   :  { %12171 = vmatprep.subr.bf16.mxu1 %v12170_v60  ;;  %12203 = vmatprep.subr.bf16.mxu0 %v12202_v10  ;;  %v7899_v38 = vld [vmem:[#allocation32 + $0x7f8] sm:$0xff]  ;;  %v7892_v60 = vld [vmem:[#allocation32 + $0x7c0] sm:$0xff] }
0x1959   :  { %v7896_v10 = vld [vmem:[#allocation32 + $0x7e0] sm:$0xff]  ;;  %v12222_v15 = vpack.c.bf16 %v7899_v38, %v7895_v29  ;;  %v8179_v29 = vld [vmem:[#allocation32 + $0x308] sm:$0xff] }
0x195a   :  { %v12192_v56 = vpack.c.bf16 %v7896_v10, %v7892_v60  ;;  %v8183_v38 = vld [vmem:[#allocation32 + $0x328] sm:$0xff]  ;;  %v12272_v10 = vpack.c.bf16 %v8176_v0, %v8172_v35 }
0x195b   :  { %12173 = vmatpush1.bf16.msra.mxu1 %v12172_v12  ;;  %12205 = vmatpush1.bf16.msra.mxu0 %v12204_v39  ;;  %v8149_v12 = vld [vmem:[#allocation32 + $0x218] sm:$0xff]  ;;  %v12242_v50 = vpack.c.bf16 %v8183_v38, %v8179_v29  ;;  %v8084_v29 = vld [vmem:[#allocation32 + $0x10] sm:$0xff] }
0x195c   :  { %12175 = vmatprep.subr.bf16.mxu1 %v12174_v8  ;;  %12207 = vmatprep.subr.bf16.mxu0 %v12206_v22  ;;  %v8153_v39 = vld [vmem:[#allocation32 + $0x238] sm:$0xff]  ;;  %v8146_v8 = vld [vmem:[#allocation32 + $0x200] sm:$0xff]  ;;  %v8088_v38 = vld [vmem:[#allocation32 + $0x30] sm:$0xff] }
0x195d   :  { %v8150_v22 = vld [vmem:[#allocation32 + $0x220] sm:$0xff]  ;;  %v12258_v57 = vpack.c.bf16 %v8153_v39, %v8149_v12  ;;  %v8187_v12 = vld [vmem:[#allocation32 + $0x348] sm:$0xff] }
0x195e   :  { %v12228_v4 = vpack.c.bf16 %v8150_v22, %v8146_v8  ;;  %v8191_v39 = vld [vmem:[#allocation32 + $0x368] sm:$0xff]  ;;  %v12276_v22 = vpack.c.bf16 %v8184_v27, %v8180_v1  ;;  %v8094_v1 = vld [vmem:[#allocation32 + $0x60] sm:$0xff] }
0x195f   :  { %12177 = vmatpush1.bf16.msra.mxu1 %v12176_v25  ;;  %12209 = vmatpush1.bf16.msra.mxu0 %v12208_v44  ;;  %v8157_v25 = vld [vmem:[#allocation32 + $0x258] sm:$0xff]  ;;  %v12246_v20 = vpack.c.bf16 %v8191_v39, %v8187_v12 }
0x1960   :  { %12179 = vmatprep.subr.bf16.mxu1 %v12178_v52  ;;  %12211 = vmatprep.subr.bf16.mxu0 %v12210_v34  ;;  %v8161_v44 = vld [vmem:[#allocation32 + $0x278] sm:$0xff]  ;;  %v8154_v52 = vld [vmem:[#allocation32 + $0x240] sm:$0xff] }
0x1961   :  { %v8158_v34 = vld [vmem:[#allocation32 + $0x260] sm:$0xff]  ;;  %v12262_v24 = vpack.c.bf16 %v8161_v44, %v8157_v25  ;;  %v8195_v25 = vld [vmem:[#allocation32 + $0x388] sm:$0xff] }
0x1962   :  { %v12232_v40 = vpack.c.bf16 %v8158_v34, %v8154_v52  ;;  %v8199_v44 = vld [vmem:[#allocation32 + $0x3a8] sm:$0xff]  ;;  %v12280_v34 = vpack.c.bf16 %v8192_v9, %v8188_v42  ;;  %v8102_v42 = vld [vmem:[#allocation32 + $0xa0] sm:$0xff] }
0x1963   :  { %12181 = vmatpush1.bf16.msra.mxu1 %v12180_v41  ;;  %12213 = vmatpush1.bf16.msra.mxu0 %v12212_v16  ;;  %v8167_v41 = vld [vmem:[#allocation32 + $0x2a8] sm:$0xff]  ;;  %v8165_v16 = vld [vmem:[#allocation32 + $0x298] sm:$0xff] }
0x1964   :  { %12183 = vmatprep.subr.bf16.mxu1 %v12182_v48  ;;  %12215 = vmatprep.subr.bf16.mxu0 %v12214_v54  ;;  %v12264_v48 = vpack.c.bf16 %v8160_v18, %v8156_v32  ;;  %v8162_v54 = vld [vmem:[#allocation32 + $0x280] sm:$0xff]  ;;  %v12234_v61 = vpack.c.bf16 %v8167_v41, %v8163_v31  ;;  %v12266_v33 = vpack.c.bf16 %v8169_v58, %v8165_v16  ;;  %v8196_v18 = vld [vmem:[#allocation32 + $0x390] sm:$0xff]  ;;  %v8203_v41 = vld [vmem:[#allocation32 + $0x3c8] sm:$0xff] }
0x1965   :  { %v12236_v43 = vpack.c.bf16 %v8166_v5, %v8162_v54  ;;  %v8200_v31 = vld [vmem:[#allocation32 + $0x3b0] sm:$0xff]  ;;  %v8207_v16 = vld [vmem:[#allocation32 + $0x3e8] sm:$0xff]  ;;  %v8205_v58 = vld [vmem:[#allocation32 + $0x3d8] sm:$0xff] }
0x1966   :  { %v12284_v54 = vpack.c.bf16 %v8200_v31, %v8196_v18  ;;  %v8202_v5 = vld [vmem:[#allocation32 + $0x3c0] sm:$0xff] }
0x1967   :  { %12185 = vmatpush1.bf16.msra.mxu1 %v12184_v26  ;;  %12217 = vmatpush1.bf16.msra.mxu0 %v12216_v17  ;;  %v8173_v26 = vld [vmem:[#allocation32 + $0x2d8] sm:$0xff]  ;;  %v8110_v18 = vld [vmem:[#allocation32 + $0xe0] sm:$0xff] }
0x1968   :  { %12187 = vmatprep.subr.bf16.mxu1 %v12186_v62  ;;  %12219 = vmatprep.subr.bf16.mxu0 %v12218_v63  ;;  %v8177_v17 = vld [vmem:[#allocation32 + $0x2f8] sm:$0xff]  ;;  %v8170_v62 = vld [vmem:[#allocation32 + $0x2c0] sm:$0xff] }
0x1969   :  { %v8174_v63 = vld [vmem:[#allocation32 + $0x2e0] sm:$0xff]  ;;  %v12270_v19 = vpack.c.bf16 %v8177_v17, %v8173_v26  ;;  %v7204_v26 = vmul.f32 0.01, %v15900_v51  ;;  %v8087_v17 = vld [vmem:[#allocation32 + $0x28] sm:$0xff] }
0x196a   :  { %v12240_v60 = vpack.c.bf16 %v8174_v63, %v8170_v62  ;;  %v12288_v63 = vpack.c.bf16 %v8208_v59, %v8204_v13  ;;  %v12290_v35 = vpack.c.bf16 %v8087_v17, %v8083_v53  ;;  %v8118_v13 = vld [vmem:[#allocation32 + $0x120] sm:$0xff]  ;;  %v8120_v17 = vld [vmem:[#allocation32 + $0x130] sm:$0xff] }
0x196b   :  { %12189 = vmatpush1.bf16.msra.mxu1 %v12188_v47  ;;  %12221 = vmatpush1.bf16.msra.mxu0 %v12220_v23  ;;  %v8181_v47 = vld [vmem:[#allocation32 + $0x318] sm:$0xff] }
0x196c   :  { %12191 = vmatprep.subr.bf16.mxu1 %v12190_v6  ;;  %12223 = vmatprep.subr.bf16.mxu0 %v12222_v15  ;;  %v8185_v23 = vld [vmem:[#allocation32 + $0x338] sm:$0xff]  ;;  %v8178_v6 = vld [vmem:[#allocation32 + $0x300] sm:$0xff] }
0x196d   :  { %v8182_v15 = vld [vmem:[#allocation32 + $0x320] sm:$0xff]  ;;  %v12274_v11 = vpack.c.bf16 %v8185_v23, %v8181_v47  ;;  %v8091_v47 = vld [vmem:[#allocation32 + $0x48] sm:$0xff]  ;;  %v15920_v23 = vsel %vm7203_vm10, %v15900_v51, %v7204_v26  ;;  %v8116_v26 = vld [vmem:[#allocation32 + $0x110] sm:$0xff] }
0x196e   :  { %v12244_v8 = vpack.c.bf16 %v8182_v15, %v8178_v6  ;;  %v8097_v6 = vld [vmem:[#allocation32 + $0x78] sm:$0xff]  ;;  %v8211_v27 = vrot.slane %v15920_v23, 1  ;;  %v8103_v51 = vld [vmem:[#allocation32 + $0xa8] sm:$0xff] }
0x196f   :  { %12193 = vmatpush1.bf16.msra.mxu1 %v12192_v56  ;;  %12225 = vmatpush1.bf16.msra.mxu0 %v12224_v37  ;;  %v8189_v56 = vld [vmem:[#allocation32 + $0x358] sm:$0xff] }
0x1970   :  { %12227 = vmatprep.subr.bf16.mxu1 %v12226_v36  ;;  %12259 = vmatprep.subr.bf16.mxu0 %v12258_v57  ;;  %v8193_v37 = vld [vmem:[#allocation32 + $0x378] sm:$0xff]  ;;  %v8186_v36 = vld [vmem:[#allocation32 + $0x340] sm:$0xff] }
0x1971   :  { %v8190_v57 = vld [vmem:[#allocation32 + $0x360] sm:$0xff]  ;;  %v12278_v21 = vpack.c.bf16 %v8193_v37, %v8189_v56  ;;  %v8092_v56 = vld [vmem:[#allocation32 + $0x50] sm:$0xff] }
0x1972   :  { %7967 = vmatmul.mubr.f32.vlgmr.msra.gmra.mrb[60].mxu1 %v7900_v7  ;;  %8038 = vmatmul.mubr.f32.vlgmr.msra.gmra.mrb[60].mxu0 %v7900_v7  ;;  %v12248_v52 = vpack.c.bf16 %v8190_v57, %v8186_v36  ;;  %v8194_v7 = vld [vmem:[#allocation32 + $0x380] sm:$0xff]  ;;  %v8096_v37 = vld [vmem:[#allocation32 + $0x70] sm:$0xff]  ;;  %v8105_v36 = vld [vmem:[#allocation32 + $0xb8] sm:$0xff] }
0x1973   :  { %12229 = vmatpush1.bf16.msra.mxu1 %v12228_v4  ;;  %12261 = vmatpush1.bf16.msra.mxu0 %v12260_v30  ;;  %v8197_v4 = vld [vmem:[#allocation32 + $0x398] sm:$0xff] }
0x1974   :  { %12231 = vmatprep.subr.bf16.mxu1 %v12230_v28  ;;  %12263 = vmatprep.subr.bf16.mxu0 %v12262_v24  ;;  %v8201_v30 = vld [vmem:[#allocation32 + $0x3b8] sm:$0xff]  ;;  %v8198_v28 = vld [vmem:[#allocation32 + $0x3a0] sm:$0xff]  ;;  %v12250_v24 = vpack.c.bf16 %v8199_v44, %v8195_v25  ;;  %v8100_v44 = vld [vmem:[#allocation32 + $0x90] sm:$0xff] }
0x1975   :  { %8277 = vmatprep.mubr.f32.mxu1 %v16056_v45  ;;  %8348 = vmatprep.mubr.f32.mxu0 %v16056_v45  ;;  %v12282_v32 = vpack.c.bf16 %v8201_v30, %v8197_v4  ;;  %v8104_v4 = vld [vmem:[#allocation32 + $0xb0] sm:$0xff]  ;;  %v8107_v30 = vld [vmem:[#allocation32 + $0xc8] sm:$0xff] }
0x1977   :  { %12233 = vmatpush1.bf16.msra.mxu1 %v12232_v40  ;;  %12265 = vmatpush1.bf16.msra.mxu0 %v12264_v48  ;;  %v8209_v40 = vld [vmem:[#allocation32 + $0x3f8] sm:$0xff]  ;;  %v12252_v48 = vpack.c.bf16 %v8198_v28, %v8194_v7 }
0x1978   :  { %12235 = vmatprep.subr.bf16.mxu1 %v12234_v61  ;;  %12267 = vmatprep.subr.bf16.mxu0 %v12266_v33  ;;  %v8206_v61 = vld [vmem:[#allocation32 + $0x3e0] sm:$0xff]  ;;  %v12254_v33 = vpack.c.bf16 %v8207_v16, %v8203_v41  ;;  %v12286_v2 = vpack.c.bf16 %v8209_v40, %v8205_v58  ;;  %v8113_v7 = vld [vmem:[#allocation32 + $0xf8] sm:$0xff]  ;;  %v8108_v16 = vld [vmem:[#allocation32 + $0xd0] sm:$0xff] }
0x1979   :  { %v12256_v62 = vpack.c.bf16 %v8206_v61, %v8202_v5  ;;  %v8112_v58 = vld [vmem:[#allocation32 + $0xf0] sm:$0xff]  ;;  %v8115_v40 = vld [vmem:[#allocation32 + $0x108] sm:$0xff]  ;;  %v8121_v5 = vld [vmem:[#allocation32 + $0x138] sm:$0xff] }
0x197b   :  { %12237 = vmatpush1.bf16.msra.mxu1 %v12236_v43  ;;  %12269 = vmatpush1.bf16.msra.mxu0 %v12268_v3  ;;  %v8085_v43 = vld [vmem:[#allocation32 + $0x18] sm:$0xff] }
0x197c   :  { %12239 = vmatprep.subr.bf16.mxu1 %v12238_v14  ;;  %12271 = vmatprep.subr.bf16.mxu0 %v12270_v19  ;;  %v8089_v3 = vld [vmem:[#allocation32 + $0x38] sm:$0xff]  ;;  %v8082_v14 = vld [vmem:[#allocation32] sm:$0xff] }
0x197d   :  { %v8086_v19 = vld [vmem:[#allocation32 + $0x20] sm:$0xff]  ;;  %v12322_v0 = vpack.c.bf16 %v8089_v3, %v8085_v43  ;;  %v8123_v43 = vld [vmem:[#allocation32 + $0x148] sm:$0xff] }
0x197e   :  { %v12292_v15 = vpack.c.bf16 %v8086_v19, %v8082_v14  ;;  %v8127_v3 = vld [vmem:[#allocation32 + $0x168] sm:$0xff]  ;;  %v12340_v19 = vpack.c.bf16 %v8120_v17, %v8116_v26  ;;  %v8507_v17 = vld [vmem:[#allocation32 + $0x450] sm:$0xff] }
0x197f   :  { %12241 = vmatpush1.bf16.msra.mxu1 %v12240_v60  ;;  %12273 = vmatpush1.bf16.msra.mxu0 %v12272_v10  ;;  %v8095_v60 = vld [vmem:[#allocation32 + $0x68] sm:$0xff]  ;;  %v8093_v10 = vld [vmem:[#allocation32 + $0x58] sm:$0xff] }
0x1980   :  { %12243 = vmatprep.subr.bf16.mxu1 %v12242_v50  ;;  %12275 = vmatprep.subr.bf16.mxu0 %v12274_v11  ;;  %v12324_v50 = vpack.c.bf16 %v8088_v38, %v8084_v29  ;;  %v8090_v11 = vld [vmem:[#allocation32 + $0x40] sm:$0xff]  ;;  %v12294_v12 = vpack.c.bf16 %v8095_v60, %v8091_v47  ;;  %v12326_v39 = vpack.c.bf16 %v8097_v6, %v8093_v10  ;;  %v8124_v47 = vld [vmem:[#allocation32 + $0x150] sm:$0xff]  ;;  %v8131_v10 = vld [vmem:[#allocation32 + $0x188] sm:$0xff] }
0x1981   :  { %v12296_v57 = vpack.c.bf16 %v8094_v1, %v8090_v11  ;;  %v12310_v29 = vpack.c.bf16 %v8127_v3, %v8123_v43  ;;  %v8128_v60 = vld [vmem:[#allocation32 + $0x170] sm:$0xff]  ;;  %v8135_v6 = vld [vmem:[#allocation32 + $0x1a8] sm:$0xff] }
0x1982   :  { %v12344_v1 = vpack.c.bf16 %v8128_v60, %v8124_v47  ;;  %v8511_v43 = vld [vmem:[#allocation32 + $0x470] sm:$0xff]  ;;  %v8514_v3 = vld [vmem:[#allocation32 + $0x488] sm:$0xff] }
0x1983   :  { %12245 = vmatpush1.bf16.msra.mxu1 %v12244_v8  ;;  %12277 = vmatpush1.bf16.msra.mxu0 %v12276_v22  ;;  %v8099_v8 = vld [vmem:[#allocation32 + $0x88] sm:$0xff]  ;;  %v8101_v22 = vld [vmem:[#allocation32 + $0x98] sm:$0xff]  ;;  %v8515_v60 = vld [vmem:[#allocation32 + $0x490] sm:$0xff] }
0x1984   :  { %12247 = vmatprep.subr.bf16.mxu1 %v12246_v20  ;;  %12279 = vmatprep.subr.bf16.mxu0 %v12278_v21  ;;  %v12328_v20 = vpack.c.bf16 %v8096_v37, %v8092_v56  ;;  %v8098_v21 = vld [vmem:[#allocation32 + $0x80] sm:$0xff]  ;;  %v12298_v9 = vpack.c.bf16 %v8103_v51, %v8099_v8  ;;  %v12330_v25 = vpack.c.bf16 %v8105_v36, %v8101_v22  ;;  %v8132_v37 = vld [vmem:[#allocation32 + $0x190] sm:$0xff]  ;;  %v8139_v51 = vld [vmem:[#allocation32 + $0x1c8] sm:$0xff] }
0x1985   :  { %v12300_v28 = vpack.c.bf16 %v8102_v42, %v8098_v21  ;;  %v8136_v8 = vld [vmem:[#allocation32 + $0x1b0] sm:$0xff]  ;;  %v8143_v22 = vld [vmem:[#allocation32 + $0x1e8] sm:$0xff]  ;;  %v8141_v36 = vld [vmem:[#allocation32 + $0x1d8] sm:$0xff] }
0x1986   :  { %v12348_v21 = vpack.c.bf16 %v8136_v8, %v8132_v37  ;;  %v8138_v42 = vld [vmem:[#allocation32 + $0x1c0] sm:$0xff]  ;;  %v8523_v8 = vld [vmem:[#allocation32 + $0x4d0] sm:$0xff] }
0x1987   :  { %12249 = vmatpush1.bf16.msra.mxu1 %v12248_v52  ;;  %12281 = vmatpush1.bf16.msra.mxu0 %v12280_v34  ;;  %v8111_v52 = vld [vmem:[#allocation32 + $0xe8] sm:$0xff]  ;;  %v8109_v34 = vld [vmem:[#allocation32 + $0xd8] sm:$0xff] }
0x1988   :  { %12251 = vmatprep.subr.bf16.mxu1 %v12250_v24  ;;  %12283 = vmatprep.subr.bf16.mxu0 %v12282_v32  ;;  %v12332_v24 = vpack.c.bf16 %v8104_v4, %v8100_v44  ;;  %v8106_v32 = vld [vmem:[#allocation32 + $0xc0] sm:$0xff]  ;;  %v12302_v31 = vpack.c.bf16 %v8111_v52, %v8107_v30  ;;  %v12334_v41 = vpack.c.bf16 %v8113_v7, %v8109_v34  ;;  %v8140_v4 = vld [vmem:[#allocation32 + $0x1d0] sm:$0xff]  ;;  %v8498_v52 = vld [vmem:[#allocation32 + $0x408] sm:$0xff] }
0x1989   :  { %v12304_v61 = vpack.c.bf16 %v8110_v18, %v8106_v32  ;;  %v8144_v30 = vld [vmem:[#allocation32 + $0x1f0] sm:$0xff]  ;;  %v8502_v34 = vld [vmem:[#allocation32 + $0x428] sm:$0xff]  ;;  %v8500_v7 = vld [vmem:[#allocation32 + $0x418] sm:$0xff] }
0x198a   :  { %v12352_v32 = vpack.c.bf16 %v8144_v30, %v8140_v4  ;;  %v8497_v18 = vld [vmem:[#allocation32 + $0x400] sm:$0xff]  ;;  %v8531_v30 = vld [vmem:[#allocation32 + $0x510] sm:$0xff] }
0x198b   :  { %12253 = vmatpush1.bf16.msra.mxu1 %v12252_v48  ;;  %12285 = vmatpush1.bf16.msra.mxu0 %v12284_v54  ;;  %v8119_v48 = vld [vmem:[#allocation32 + $0x128] sm:$0xff]  ;;  %v8117_v54 = vld [vmem:[#allocation32 + $0x118] sm:$0xff] }
0x198c   :  { %12255 = vmatprep.subr.bf16.mxu1 %v12254_v33  ;;  %12287 = vmatprep.subr.bf16.mxu0 %v12286_v2  ;;  %v12336_v33 = vpack.c.bf16 %v8112_v58, %v8108_v16  ;;  %v8114_v2 = vld [vmem:[#allocation32 + $0x100] sm:$0xff]  ;;  %v12306_v59 = vpack.c.bf16 %v8119_v48, %v8115_v40  ;;  %v12338_v53 = vpack.c.bf16 %v8121_v5, %v8117_v54  ;;  %v8499_v58 = vld [vmem:[#allocation32 + $0x410] sm:$0xff]  ;;  %v8506_v48 = vld [vmem:[#allocation32 + $0x448] sm:$0xff] }
0x198d   :  { %v12308_v14 = vpack.c.bf16 %v8118_v13, %v8114_v2  ;;  %v8503_v40 = vld [vmem:[#allocation32 + $0x430] sm:$0xff]  ;;  %v8510_v54 = vld [vmem:[#allocation32 + $0x468] sm:$0xff]  ;;  %v8508_v5 = vld [vmem:[#allocation32 + $0x458] sm:$0xff] }
0x198e   :  { %v12388_v2 = vpack.c.bf16 %v8503_v40, %v8499_v58  ;;  %v8505_v13 = vld [vmem:[#allocation32 + $0x440] sm:$0xff]  ;;  %v8539_v40 = vld [vmem:[#allocation32 + $0x550] sm:$0xff] }
0x198f   :  { %12257 = vmatpush1.bf16.msra.mxu1 %v12256_v62  ;;  %12289 = vmatpush1.bf16.msra.mxu0 %v12288_v63  ;;  %v8125_v62 = vld [vmem:[#allocation32 + $0x158] sm:$0xff] }
0x1990   :  { %12291 = vmatprep.subr.bf16.mxu1 %v12290_v35  ;;  %12323 = vmatprep.subr.bf16.mxu0 %v12322_v0  ;;  %v8129_v63 = vld [vmem:[#allocation32 + $0x178] sm:$0xff]  ;;  %v8122_v35 = vld [vmem:[#allocation32 + $0x140] sm:$0xff] }
0x1991   :  { %v8126_v0 = vld [vmem:[#allocation32 + $0x160] sm:$0xff]  ;;  %v12342_v38 = vpack.c.bf16 %v8129_v63, %v8125_v62  ;;  %v8518_v62 = vld [vmem:[#allocation32 + $0x4a8] sm:$0xff]  ;;  %v8516_v63 = vld [vmem:[#allocation32 + $0x498] sm:$0xff] }
0x1992   :  { %8278 = vmatmul.mubr.f32.vlgmr.msra.gmra.mrb[62].mxu1 %v8211_v27  ;;  %8349 = vmatmul.mubr.f32.vlgmr.msra.gmra.mrb[62].mxu0 %v8211_v27  ;;  %v12312_v11 = vpack.c.bf16 %v8126_v0, %v8122_v35  ;;  %v8130_v27 = vld [vmem:[#allocation32 + $0x180] sm:$0xff]  ;;  %v12392_v35 = vpack.c.bf16 %v8511_v43, %v8507_v17  ;;  %v8547_v43 = vld [vmem:[#allocation32 + $0x590] sm:$0xff] }
0x1993   :  { %12293 = vmatpush1.bf16.msra.mxu1 %v12292_v15  ;;  %12325 = vmatpush1.bf16.msra.mxu0 %v12324_v50  ;;  %v8133_v15 = vld [vmem:[#allocation32 + $0x198] sm:$0xff]  ;;  %v8513_v0 = vld [vmem:[#allocation32 + $0x480] sm:$0xff] }
0x1994   :  { %12295 = vmatprep.subr.bf16.mxu1 %v12294_v12  ;;  %12327 = vmatprep.subr.bf16.mxu0 %v12326_v39  ;;  %v8137_v50 = vld [vmem:[#allocation32 + $0x1b8] sm:$0xff]  ;;  %v8134_v12 = vld [vmem:[#allocation32 + $0x1a0] sm:$0xff]  ;;  %v12314_v39 = vpack.c.bf16 %v8135_v6, %v8131_v10  ;;  %v8519_v10 = vld [vmem:[#allocation32 + $0x4b0] sm:$0xff] }
0x1995   :  { %8419 = vmatprep.mubr.f32.mxu1 %v16056_v45  ;;  %8490 = vmatprep.mubr.f32.mxu0 %v16056_v45  ;;  %v12346_v56 = vpack.c.bf16 %v8137_v50, %v8133_v15  ;;  %v8522_v6 = vld [vmem:[#allocation32 + $0x4c8] sm:$0xff]  ;;  %v8524_v50 = vld [vmem:[#allocation32 + $0x4d8] sm:$0xff] }
0x1996   :  { %v8526_v15 = vld [vmem:[#allocation32 + $0x4e8] sm:$0xff] }
0x1997   :  { %12297 = vmatpush1.bf16.msra.mxu1 %v12296_v57  ;;  %12329 = vmatpush1.bf16.msra.mxu0 %v12328_v20  ;;  %v8145_v57 = vld [vmem:[#allocation32 + $0x1f8] sm:$0xff]  ;;  %v12316_v20 = vpack.c.bf16 %v8134_v12, %v8130_v27  ;;  %v12396_v27 = vpack.c.bf16 %v8519_v10, %v8515_v60  ;;  %v8521_v12 = vld [vmem:[#allocation32 + $0x4c0] sm:$0xff]  ;;  %v8555_v10 = vld [vmem:[#allocation32 + $0x5d0] sm:$0xff] }
0x1998   :  { %12299 = vmatprep.subr.bf16.mxu1 %v12298_v9  ;;  %12331 = vmatprep.subr.bf16.mxu0 %v12330_v25  ;;  %v8142_v9 = vld [vmem:[#allocation32 + $0x1e0] sm:$0xff]  ;;  %v12318_v25 = vpack.c.bf16 %v8143_v22, %v8139_v51  ;;  %v12350_v44 = vpack.c.bf16 %v8145_v57, %v8141_v36  ;;  %v8527_v51 = vld [vmem:[#allocation32 + $0x4f0] sm:$0xff]  ;;  %v8530_v22 = vld [vmem:[#allocation32 + $0x508] sm:$0xff] }
0x1999   :  { %v8534_v36 = vld [vmem:[#allocation32 + $0x528] sm:$0xff]  ;;  %v8532_v57 = vld [vmem:[#allocation32 + $0x518] sm:$0xff] }
0x199b   :  { %12301 = vmatpush1.bf16.msra.mxu1 %v12300_v28  ;;  %12333 = vmatpush1.bf16.msra.mxu0 %v12332_v24  ;;  %v8504_v28 = vld [vmem:[#allocation32 + $0x438] sm:$0xff]  ;;  %v12320_v24 = vpack.c.bf16 %v8142_v9, %v8138_v42  ;;  %v12400_v42 = vpack.c.bf16 %v8527_v51, %v8523_v8  ;;  %v8529_v9 = vld [vmem:[#allocation32 + $0x500] sm:$0xff]  ;;  %v8711_v51 = vld [vmem:[#allocation32 + $0x610] sm:$0xff] }
0x199c   :  { %12303 = vmatprep.subr.bf16.mxu1 %v12302_v31  ;;  %12335 = vmatprep.subr.bf16.mxu0 %v12334_v41  ;;  %v8501_v31 = vld [vmem:[#allocation32 + $0x420] sm:$0xff]  ;;  %v12354_v41 = vpack.c.bf16 %v8502_v34, %v8498_v52  ;;  %v12386_v16 = vpack.c.bf16 %v8504_v28, %v8500_v7  ;;  %v8535_v52 = vld [vmem:[#allocation32 + $0x530] sm:$0xff]  ;;  %v8538_v34 = vld [vmem:[#allocation32 + $0x548] sm:$0xff] }
0x199d   :  { %v8542_v7 = vld [vmem:[#allocation32 + $0x568] sm:$0xff]  ;;  %v8540_v28 = vld [vmem:[#allocation32 + $0x558] sm:$0xff] }
0x199f   :  { %12305 = vmatpush1.bf16.msra.mxu1 %v12304_v61  ;;  %12337 = vmatpush1.bf16.msra.mxu0 %v12336_v33  ;;  %v8512_v61 = vld [vmem:[#allocation32 + $0x478] sm:$0xff]  ;;  %v12356_v33 = vpack.c.bf16 %v8501_v31, %v8497_v18  ;;  %v12404_v18 = vpack.c.bf16 %v8535_v52, %v8531_v30  ;;  %v8537_v31 = vld [vmem:[#allocation32 + $0x540] sm:$0xff] }
0x19a0   :  { %12307 = vmatprep.subr.bf16.mxu1 %v12306_v59  ;;  %12339 = vmatprep.subr.bf16.mxu0 %v12338_v53  ;;  %v8509_v59 = vld [vmem:[#allocation32 + $0x460] sm:$0xff]  ;;  %v12358_v53 = vpack.c.bf16 %v8510_v54, %v8506_v48  ;;  %v12390_v26 = vpack.c.bf16 %v8512_v61, %v8508_v5  ;;  %v8543_v48 = vld [vmem:[#allocation32 + $0x570] sm:$0xff]  ;;  %v8546_v54 = vld [vmem:[#allocation32 + $0x588] sm:$0xff] }
0x19a1   :  { %v8550_v5 = vld [vmem:[#allocation32 + $0x5a8] sm:$0xff]  ;;  %v8548_v61 = vld [vmem:[#allocation32 + $0x598] sm:$0xff] }
0x19a3   :  { %12309 = vmatpush1.bf16.msra.mxu1 %v12308_v14  ;;  %12341 = vmatpush1.bf16.msra.mxu0 %v12340_v19  ;;  %v8520_v14 = vld [vmem:[#allocation32 + $0x4b8] sm:$0xff]  ;;  %v12360_v19 = vpack.c.bf16 %v8509_v59, %v8505_v13  ;;  %v12408_v13 = vpack.c.bf16 %v8543_v48, %v8539_v40  ;;  %v8545_v59 = vld [vmem:[#allocation32 + $0x580] sm:$0xff] }
0x19a4   :  { %12311 = vmatprep.subr.bf16.mxu1 %v12310_v29  ;;  %12343 = vmatprep.subr.bf16.mxu0 %v12342_v38  ;;  %v8517_v29 = vld [vmem:[#allocation32 + $0x4a0] sm:$0xff]  ;;  %v12362_v38 = vpack.c.bf16 %v8518_v62, %v8514_v3  ;;  %v12394_v47 = vpack.c.bf16 %v8520_v14, %v8516_v63  ;;  %v8551_v3 = vld [vmem:[#allocation32 + $0x5b0] sm:$0xff]  ;;  %v8554_v62 = vld [vmem:[#allocation32 + $0x5c8] sm:$0xff] }
0x19a5   :  { %v8558_v63 = vld [vmem:[#allocation32 + $0x5e8] sm:$0xff]  ;;  %v8556_v14 = vld [vmem:[#allocation32 + $0x5d8] sm:$0xff] }
0x19a7   :  { %12313 = vmatpush1.bf16.msra.mxu1 %v12312_v11  ;;  %12345 = vmatpush1.bf16.msra.mxu0 %v12344_v1  ;;  %v8528_v11 = vld [vmem:[#allocation32 + $0x4f8] sm:$0xff]  ;;  %v12364_v1 = vpack.c.bf16 %v8517_v29, %v8513_v0  ;;  %v12412_v0 = vpack.c.bf16 %v8551_v3, %v8547_v43  ;;  %v8553_v29 = vld [vmem:[#allocation32 + $0x5c0] sm:$0xff] }
0x19a8   :  { %12315 = vmatprep.subr.bf16.mxu1 %v12314_v39  ;;  %12347 = vmatprep.subr.bf16.mxu0 %v12346_v56  ;;  %v8525_v39 = vld [vmem:[#allocation32 + $0x4e0] sm:$0xff]  ;;  %v12366_v56 = vpack.c.bf16 %v8526_v15, %v8522_v6  ;;  %v12398_v37 = vpack.c.bf16 %v8528_v11, %v8524_v50  ;;  %v8559_v6 = vld [vmem:[#allocation32 + $0x5f0] sm:$0xff]  ;;  %v8710_v15 = vld [vmem:[#allocation32 + $0x608] sm:$0xff] }
0x19a9   :  { %v8714_v50 = vld [vmem:[#allocation32 + $0x628] sm:$0xff]  ;;  %v8712_v11 = vld [vmem:[#allocation32 + $0x618] sm:$0xff] }
0x19ab   :  { %12317 = vmatpush1.bf16.msra.mxu1 %v12316_v20  ;;  %12349 = vmatpush1.bf16.msra.mxu0 %v12348_v21  ;;  %v8536_v20 = vld [vmem:[#allocation32 + $0x538] sm:$0xff]  ;;  %v12368_v21 = vpack.c.bf16 %v8525_v39, %v8521_v12  ;;  %v12416_v12 = vpack.c.bf16 %v8559_v6, %v8555_v10  ;;  %v8709_v39 = vld [vmem:[#allocation32 + $0x600] sm:$0xff] }
0x19ac   :  { %12319 = vmatprep.subr.bf16.mxu1 %v12318_v25  ;;  %12351 = vmatprep.subr.bf16.mxu0 %v12350_v44  ;;  %v8533_v25 = vld [vmem:[#allocation32 + $0x520] sm:$0xff]  ;;  %v12370_v44 = vpack.c.bf16 %v8534_v36, %v8530_v22  ;;  %v12402_v4 = vpack.c.bf16 %v8536_v20, %v8532_v57  ;;  %v8715_v22 = vld [vmem:[#allocation32 + $0x630] sm:$0xff]  ;;  %v8718_v36 = vld [vmem:[#allocation32 + $0x648] sm:$0xff] }
0x19ad   :  { %v8722_v57 = vld [vmem:[#allocation32 + $0x668] sm:$0xff]  ;;  %v8720_v20 = vld [vmem:[#allocation32 + $0x658] sm:$0xff] }
0x19ae   :  { %v12422_v30 = vpack.c.bf16 %v8722_v57, %v8718_v36  ;;  %v8751_v36 = vld [vmem:[#allocation32 + $0x750] sm:$0xff] }
0x19af   :  { %12321 = vmatpush1.bf16.msra.mxu1 %v12320_v24  ;;  %12353 = vmatpush1.bf16.msra.mxu0 %v12352_v32  ;;  %v8544_v24 = vld [vmem:[#allocation32 + $0x578] sm:$0xff]  ;;  %v12372_v32 = vpack.c.bf16 %v8533_v25, %v8529_v9  ;;  %v12452_v9 = vpack.c.bf16 %v8715_v22, %v8711_v51  ;;  %v8717_v25 = vld [vmem:[#allocation32 + $0x640] sm:$0xff]  ;;  %v8755_v57 = vld [vmem:[#allocation32 + $0x770] sm:$0xff] }
0x19b0   :  { %12355 = vmatprep.subr.bf16.mxu1 %v12354_v41  ;;  %12387 = vmatprep.subr.bf16.mxu0 %v12386_v16  ;;  %v8541_v41 = vld [vmem:[#allocation32 + $0x560] sm:$0xff]  ;;  %v12374_v16 = vpack.c.bf16 %v8542_v7, %v8538_v34  ;;  %v12406_v58 = vpack.c.bf16 %v8544_v24, %v8540_v28  ;;  %v8719_v34 = vld [vmem:[#allocation32 + $0x650] sm:$0xff]  ;;  %v8726_v28 = vld [vmem:[#allocation32 + $0x688] sm:$0xff] }
0x19b1   :  { %v8723_v7 = vld [vmem:[#allocation32 + $0x670] sm:$0xff]  ;;  %v8730_v24 = vld [vmem:[#allocation32 + $0x6a8] sm:$0xff] }
0x19b2   :  { %8420 = vmatmul.mubr.f32.vlgmr.msra.gmra.mrb[62].mxu1 %v15920_v23  ;;  %8491 = vmatmul.mubr.f32.vlgmr.msra.gmra.mrb[62].mxu0 %v15920_v23  ;;  %v12426_v40 = vpack.c.bf16 %v8730_v24, %v8726_v28  ;;  %v8763_v28 = vld [vmem:[#allocation32 + $0x7b0] sm:$0xff]  ;;  %v8766_v24 = vld [vmem:[#allocation32 + $0x7c8] sm:$0xff] }
0x19b3   :  { %12357 = vmatpush1.bf16.msra.mxu1 %v12356_v33  ;;  %12389 = vmatpush1.bf16.msra.mxu0 %v12388_v2  ;;  %v8552_v33 = vld [vmem:[#allocation32 + $0x5b8] sm:$0xff]  ;;  %v12376_v2 = vpack.c.bf16 %v8541_v41, %v8537_v31  ;;  %v12456_v41 = vpack.c.bf16 %v8723_v7, %v8719_v34  ;;  %v8759_v7 = vld [vmem:[#allocation32 + $0x790] sm:$0xff] }
0x19b4   :  { %12359 = vmatprep.subr.bf16.mxu1 %v12358_v53  ;;  %12391 = vmatprep.subr.bf16.mxu0 %v12390_v26  ;;  %v8549_v53 = vld [vmem:[#allocation32 + $0x5a0] sm:$0xff]  ;;  %v12378_v26 = vpack.c.bf16 %v8550_v5, %v8546_v54  ;;  %v12410_v17 = vpack.c.bf16 %v8552_v33, %v8548_v61  ;;  %v8727_v54 = vld [vmem:[#allocation32 + $0x690] sm:$0xff]  ;;  %v8734_v61 = vld [vmem:[#allocation32 + $0x6c8] sm:$0xff] }
0x19b5   :  { %8627 = vmatprep.mubr.f32.mxu1 %v16056_v45  ;;  %8698 = vmatprep.mubr.f32.mxu0 %v16056_v45  ;;  %v8731_v5 = vld [vmem:[#allocation32 + $0x6b0] sm:$0xff]  ;;  %v8738_v33 = vld [vmem:[#allocation32 + $0x6e8] sm:$0xff] }
0x19b6   :  { %v12430_v43 = vpack.c.bf16 %v8738_v33, %v8734_v61  ;;  %v8771_v61 = vld [vmem:[#allocation32 + $0x7f0] sm:$0xff]  ;;  %v8954_v33 = vld [vmem:[#allocation34 + $0x8] sm:$0xff] }
0x19b7   :  { %12361 = vmatpush1.bf16.msra.mxu1 %v12360_v19  ;;  %12393 = vmatpush1.bf16.msra.mxu0 %v12392_v35  ;;  %v8560_v19 = vld [vmem:[#allocation32 + $0x5f8] sm:$0xff]  ;;  %v12380_v35 = vpack.c.bf16 %v8549_v53, %v8545_v59  ;;  %v12460_v53 = vpack.c.bf16 %v8731_v5, %v8727_v54  ;;  %v8769_v54 = vld [vmem:[#allocation32 + $0x7e0] sm:$0xff]  ;;  %v8767_v5 = vld [vmem:[#allocation32 + $0x7d0] sm:$0xff] }
0x19b8   :  { %12363 = vmatprep.subr.bf16.mxu1 %v12362_v38  ;;  %12395 = vmatprep.subr.bf16.mxu0 %v12394_v47  ;;  %v8557_v38 = vld [vmem:[#allocation32 + $0x5e0] sm:$0xff]  ;;  %v12382_v47 = vpack.c.bf16 %v8558_v63, %v8554_v62  ;;  %v12414_v60 = vpack.c.bf16 %v8560_v19, %v8556_v14  ;;  %v8735_v62 = vld [vmem:[#allocation32 + $0x6d0] sm:$0xff]  ;;  %v8742_v14 = vld [vmem:[#allocation32 + $0x708] sm:$0xff] }
0x19b9   :  { %v8739_v63 = vld [vmem:[#allocation32 + $0x6f0] sm:$0xff]  ;;  %v8746_v19 = vld [vmem:[#allocation32 + $0x728] sm:$0xff] }
0x19ba   :  { %v12434_v10 = vpack.c.bf16 %v8746_v19, %v8742_v14  ;;  %v8957_v19 = vld [vmem:[#allocation34 + $0x20] sm:$0xff] }
0x19bb   :  { %12365 = vmatpush1.bf16.msra.mxu1 %v12364_v1  ;;  %12397 = vmatpush1.bf16.msra.mxu0 %v12396_v27  ;;  %v8716_v1 = vld [vmem:[#allocation32 + $0x638] sm:$0xff]  ;;  %v12384_v27 = vpack.c.bf16 %v8557_v38, %v8553_v29  ;;  %v12464_v38 = vpack.c.bf16 %v8739_v63, %v8735_v62  ;;  %v8773_v63 = vrot.slane %v15920_v23, 3 }
0x19bc   :  { %12367 = vmatprep.subr.bf16.mxu1 %v12366_v56  ;;  %12399 = vmatprep.subr.bf16.mxu0 %v12398_v37  ;;  %v8713_v56 = vld [vmem:[#allocation32 + $0x620] sm:$0xff]  ;;  %v12418_v37 = vpack.c.bf16 %v8714_v50, %v8710_v15  ;;  %v12450_v8 = vpack.c.bf16 %v8716_v1, %v8712_v11  ;;  %v8743_v15 = vld [vmem:[#allocation32 + $0x710] sm:$0xff]  ;;  %v8750_v11 = vld [vmem:[#allocation32 + $0x748] sm:$0xff] }
0x19bd   :  { %v8747_v50 = vld [vmem:[#allocation32 + $0x730] sm:$0xff]  ;;  %v8754_v1 = vld [vmem:[#allocation32 + $0x768] sm:$0xff] }
0x19be   :  { %v12438_v51 = vpack.c.bf16 %v8754_v1, %v8750_v11  ;;  %v8965_v11 = vld [vmem:[#allocation34 + $0x60] sm:$0xff]  ;;  %v8967_v1 = vld [vmem:[#allocation34 + $0x70] sm:$0xff] }
0x19bf   :  { %12369 = vmatpush1.bf16.msra.mxu1 %v12368_v21  ;;  %12401 = vmatpush1.bf16.msra.mxu0 %v12400_v42  ;;  %v8724_v21 = vld [vmem:[#allocation32 + $0x678] sm:$0xff]  ;;  %v12420_v42 = vpack.c.bf16 %v8713_v56, %v8709_v39  ;;  %v12468_v56 = vpack.c.bf16 %v8747_v50, %v8743_v15 }
0x19c0   :  { %12371 = vmatprep.subr.bf16.mxu1 %v12370_v44  ;;  %12403 = vmatprep.subr.bf16.mxu0 %v12402_v4  ;;  %v8721_v44 = vld [vmem:[#allocation32 + $0x660] sm:$0xff]  ;;  %v8561_v4 = vrot.slane %v15920_v23, 2  ;;  %v12454_v52 = vpack.c.bf16 %v8724_v21, %v8720_v20  ;;  %v8758_v20 = vld [vmem:[#allocation32 + $0x788] sm:$0xff]  ;;  %v8968_v15 = vld [vmem:[#allocation34 + $0x78] sm:$0xff] }
0x19c1   :  { %v12424_v31 = vpack.c.bf16 %v8721_v44, %v8717_v25  ;;  %v8762_v21 = vld [vmem:[#allocation32 + $0x7a8] sm:$0xff]  ;;  %v12472_v44 = vpack.c.bf16 %v8755_v57, %v8751_v36 }
0x19c3   :  { %12373 = vmatpush1.bf16.msra.mxu1 %v12372_v32  ;;  %12405 = vmatpush1.bf16.msra.mxu0 %v12404_v18  ;;  %v8728_v32 = vld [vmem:[#allocation32 + $0x698] sm:$0xff] }
0x19c4   :  { %12375 = vmatprep.subr.bf16.mxu1 %v12374_v16  ;;  %12407 = vmatprep.subr.bf16.mxu0 %v12406_v58  ;;  %v8732_v18 = vld [vmem:[#allocation32 + $0x6b8] sm:$0xff]  ;;  %v8725_v16 = vld [vmem:[#allocation32 + $0x680] sm:$0xff] }
0x19c5   :  { %v8729_v58 = vld [vmem:[#allocation32 + $0x6a0] sm:$0xff]  ;;  %v12458_v48 = vpack.c.bf16 %v8732_v18, %v8728_v32  ;;  %v8770_v32 = vld [vmem:[#allocation32 + $0x7e8] sm:$0xff]  ;;  %v8768_v18 = vld [vmem:[#allocation32 + $0x7d8] sm:$0xff] }
0x19c6   :  { %v12428_v59 = vpack.c.bf16 %v8729_v58, %v8725_v16  ;;  %v12476_v16 = vpack.c.bf16 %v8763_v28, %v8759_v7  ;;  %v8765_v58 = vld [vmem:[#allocation32 + $0x7c0] sm:$0xff] }
0x19c7   :  { %12377 = vmatpush1.bf16.msra.mxu1 %v12376_v2  ;;  %12409 = vmatpush1.bf16.msra.mxu0 %v12408_v13  ;;  %v8736_v2 = vld [vmem:[#allocation32 + $0x6d8] sm:$0xff] }
0x19c8   :  { %12379 = vmatprep.subr.bf16.mxu1 %v12378_v26  ;;  %12411 = vmatprep.subr.bf16.mxu0 %v12410_v17  ;;  %v8740_v13 = vld [vmem:[#allocation32 + $0x6f8] sm:$0xff]  ;;  %v8733_v26 = vld [vmem:[#allocation32 + $0x6c0] sm:$0xff] }
0x19c9   :  { %v8737_v17 = vld [vmem:[#allocation32 + $0x6e0] sm:$0xff]  ;;  %v12462_v3 = vpack.c.bf16 %v8740_v13, %v8736_v2  ;;  %v8956_v2 = vld [vmem:[#allocation34 + $0x18] sm:$0xff]  ;;  %v12448_v13 = vpack.c.bf16 %v8769_v54, %v8765_v58 }
0x19ca   :  { %v12432_v29 = vpack.c.bf16 %v8737_v17, %v8733_v26  ;;  %v8953_v26 = vld [vmem:[#allocation34] sm:$0xff]  ;;  %v8955_v17 = vld [vmem:[#allocation34 + $0x10] sm:$0xff]  ;;  %v8992_v54 = vld [vmem:[#allocation34 + $0x138] sm:$0xff] }
0x19cb   :  { %12381 = vmatpush1.bf16.msra.mxu1 %v12380_v35  ;;  %12413 = vmatpush1.bf16.msra.mxu0 %v12412_v0  ;;  %v8744_v35 = vld [vmem:[#allocation32 + $0x718] sm:$0xff]  ;;  %v12484_v62 = vpack.c.bf16 %v8955_v17, %v8953_v26  ;;  %v8985_v58 = vld [vmem:[#allocation34 + $0x100] sm:$0xff] }
0x19cc   :  { %12383 = vmatprep.subr.bf16.mxu1 %v12382_v47  ;;  %12415 = vmatprep.subr.bf16.mxu0 %v12414_v60  ;;  %v8748_v0 = vld [vmem:[#allocation32 + $0x738] sm:$0xff]  ;;  %v8741_v47 = vld [vmem:[#allocation32 + $0x700] sm:$0xff] }
0x19cd   :  { %v8745_v60 = vld [vmem:[#allocation32 + $0x720] sm:$0xff]  ;;  %v12466_v6 = vpack.c.bf16 %v8748_v0, %v8744_v35  ;;  %v8959_v35 = vld [vmem:[#allocation34 + $0x30] sm:$0xff]  ;;  %v8962_v0 = vld [vmem:[#allocation34 + $0x48] sm:$0xff] }
0x19ce   :  { %v12436_v39 = vpack.c.bf16 %v8745_v60, %v8741_v47  ;;  %v8961_v60 = vld [vmem:[#allocation34 + $0x40] sm:$0xff] }
0x19cf   :  { %12385 = vmatpush1.bf16.msra.mxu1 %v12384_v27  ;;  %12417 = vmatpush1.bf16.msra.mxu0 %v12416_v12  ;;  %v8752_v27 = vld [vmem:[#allocation32 + $0x758] sm:$0xff]  ;;  %v8993_v17 = vld [vmem:[#allocation34 + $0x140] sm:$0xff] }
0x19d0   :  { %12419 = vmatprep.subr.bf16.mxu1 %v12418_v37  ;;  %12451 = vmatprep.subr.bf16.mxu0 %v12450_v8  ;;  %v8756_v12 = vld [vmem:[#allocation32 + $0x778] sm:$0xff]  ;;  %v8749_v37 = vld [vmem:[#allocation32 + $0x740] sm:$0xff] }
0x19d1   :  { %v8753_v8 = vld [vmem:[#allocation32 + $0x760] sm:$0xff]  ;;  %v12470_v22 = vpack.c.bf16 %v8756_v12, %v8752_v27  ;;  %v8970_v27 = vld [vmem:[#allocation34 + $0x88] sm:$0xff]  ;;  %v8972_v12 = vld [vmem:[#allocation34 + $0x98] sm:$0xff] }
0x19d2   :  { %8628 = vmatmul.mubr.f32.vlgmr.msra.gmra.mrb[62].mxu1 %v8561_v4  ;;  %8699 = vmatmul.mubr.f32.vlgmr.msra.gmra.mrb[62].mxu0 %v8561_v4  ;;  %v12440_v25 = vpack.c.bf16 %v8753_v8, %v8749_v37  ;;  %v8757_v4 = vld [vmem:[#allocation32 + $0x780] sm:$0xff]  ;;  %v8971_v8 = vld [vmem:[#allocation34 + $0x90] sm:$0xff] }
0x19d3   :  { %12421 = vmatpush1.bf16.msra.mxu1 %v12420_v42  ;;  %12453 = vmatpush1.bf16.msra.mxu0 %v12452_v9  ;;  %v8760_v42 = vld [vmem:[#allocation32 + $0x798] sm:$0xff]  ;;  %v8969_v37 = vld [vmem:[#allocation34 + $0x80] sm:$0xff] }
0x19d4   :  { %12423 = vmatprep.subr.bf16.mxu1 %v12422_v30  ;;  %12455 = vmatprep.subr.bf16.mxu0 %v12454_v52  ;;  %v8764_v9 = vld [vmem:[#allocation32 + $0x7b8] sm:$0xff]  ;;  %v8761_v30 = vld [vmem:[#allocation32 + $0x7a0] sm:$0xff]  ;;  %v12442_v52 = vpack.c.bf16 %v8762_v21, %v8758_v20  ;;  %v12500_v36 = vpack.c.bf16 %v8971_v8, %v8969_v37  ;;  %v8975_v21 = vld [vmem:[#allocation34 + $0xb0] sm:$0xff] }
0x19d5   :  { %8839 = vmatprep.mubr.f32.mxu1 %v16056_v45  ;;  %8910 = vmatprep.mubr.f32.mxu0 %v16056_v45  ;;  %v12474_v34 = vpack.c.bf16 %v8764_v9, %v8760_v42  ;;  %v8973_v20 = vld [vmem:[#allocation34 + $0xa0] sm:$0xff]  ;;  %v8978_v42 = vld [vmem:[#allocation34 + $0xc8] sm:$0xff]  ;;  %v8980_v9 = vld [vmem:[#allocation34 + $0xd8] sm:$0xff] }
0x19d6   :  { %v8999_v37 = vld [vmem:[#allocation34 + $0x170] sm:$0xff] }
0x19d7   :  { %12425 = vmatpush1.bf16.msra.mxu1 %v12424_v31  ;;  %12457 = vmatpush1.bf16.msra.mxu0 %v12456_v41  ;;  %v8772_v31 = vld [vmem:[#allocation32 + $0x7f8] sm:$0xff]  ;;  %v12444_v41 = vpack.c.bf16 %v8761_v30, %v8757_v4  ;;  %v8977_v4 = vld [vmem:[#allocation34 + $0xc0] sm:$0xff]  ;;  %v8979_v30 = vld [vmem:[#allocation34 + $0xd0] sm:$0xff] }
0x19d8   :  { %12427 = vmatprep.subr.bf16.mxu1 %v12426_v40  ;;  %12459 = vmatprep.subr.bf16.mxu0 %v12458_v48  ;;  %v12446_v40 = vpack.c.bf16 %v8770_v32, %v8766_v24  ;;  %v12478_v48 = vpack.c.bf16 %v8772_v31, %v8768_v18  ;;  %v12508_v7 = vpack.c.bf16 %v8979_v30, %v8977_v4  ;;  %v8981_v24 = vld [vmem:[#allocation34 + $0xe0] sm:$0xff]  ;;  %v8983_v32 = vld [vmem:[#allocation34 + $0xf0] sm:$0xff]  ;;  %v8986_v18 = vld [vmem:[#allocation34 + $0x108] sm:$0xff] }
0x19d9   :  { %v8988_v31 = vld [vmem:[#allocation34 + $0x118] sm:$0xff]  ;;  %v9007_v4 = vld [vmem:[#allocation34 + $0x1b0] sm:$0xff]  ;;  %v9010_v30 = vld [vmem:[#allocation34 + $0x1c8] sm:$0xff] }
0x19db   :  { %12429 = vmatpush1.bf16.msra.mxu1 %v12428_v59  ;;  %12461 = vmatpush1.bf16.msra.mxu0 %v12460_v53  ;;  %v12480_v59 = vpack.c.bf16 %v8771_v61, %v8767_v5  ;;  %v12482_v53 = vpack.c.bf16 %v8956_v2, %v8954_v33  ;;  %v8989_v33 = vld [vmem:[#allocation34 + $0x120] sm:$0xff]  ;;  %v8991_v2 = vld [vmem:[#allocation34 + $0x130] sm:$0xff] }
0x19dc   :  { %12431 = vmatprep.subr.bf16.mxu1 %v12430_v43  ;;  %12463 = vmatprep.subr.bf16.mxu0 %v12462_v3  ;;  %v8958_v43 = vld [vmem:[#allocation34 + $0x28] sm:$0xff]  ;;  %v8960_v3 = vld [vmem:[#allocation34 + $0x38] sm:$0xff] }
0x19dd   :  { %v12486_v14 = vpack.c.bf16 %v8960_v3, %v8958_v43  ;;  %v8995_v43 = vld [vmem:[#allocation34 + $0x150] sm:$0xff] }
0x19de   :  { %v12524_v3 = vpack.c.bf16 %v8995_v43, %v8993_v17 }
0x19df   :  { %12433 = vmatpush1.bf16.msra.mxu1 %v12432_v29  ;;  %12465 = vmatpush1.bf16.msra.mxu0 %v12464_v38  ;;  %v8964_v29 = vld [vmem:[#allocation34 + $0x58] sm:$0xff]  ;;  %v12488_v38 = vpack.c.bf16 %v8959_v35, %v8957_v19 }
0x19e0   :  { %12435 = vmatprep.subr.bf16.mxu1 %v12434_v10  ;;  %12467 = vmatprep.subr.bf16.mxu0 %v12466_v6  ;;  %v12490_v47 = vpack.c.bf16 %v8964_v29, %v8962_v0  ;;  %v8963_v10 = vld [vmem:[#allocation34 + $0x50] sm:$0xff]  ;;  %v8966_v6 = vld [vmem:[#allocation34 + $0x68] sm:$0xff]  ;;  %v16066_v0 = vld [vmem:[#allocation87_spill] sm:$0xff] }
0x19e1   :  { %v12492_v50 = vpack.c.bf16 %v8963_v10, %v8961_v60  ;;  %v12494_v23 = vpack.c.bf16 %v8968_v15, %v8966_v6 }
0x19e3   :  { %12437 = vmatpush1.bf16.msra.mxu1 %v12436_v39  ;;  %12469 = vmatpush1.bf16.msra.mxu0 %v12468_v56  ;;  %v12496_v39 = vpack.c.bf16 %v8967_v1, %v8965_v11  ;;  %v12498_v56 = vpack.c.bf16 %v8972_v12, %v8970_v27  ;;  %v8998_v1 = vld [vmem:[#allocation34 + $0x168] sm:$0xff]  ;;  %v9000_v27 = vld [vmem:[#allocation34 + $0x178] sm:$0xff] }
0x19e4   :  { %12439 = vmatprep.subr.bf16.mxu1 %v12438_v51  ;;  %12471 = vmatprep.subr.bf16.mxu0 %v12470_v22  ;;  %v8974_v51 = vld [vmem:[#allocation34 + $0xa8] sm:$0xff]  ;;  %v8976_v22 = vld [vmem:[#allocation34 + $0xb8] sm:$0xff] }
0x19e5   :  { %v12502_v57 = vpack.c.bf16 %v8976_v22, %v8974_v51  ;;  %v9002_v51 = vld [vmem:[#allocation34 + $0x188] sm:$0xff]  ;;  %v9004_v22 = vld [vmem:[#allocation34 + $0x198] sm:$0xff] }
0x19e7   :  { %12441 = vmatpush1.bf16.msra.mxu1 %v12440_v25  ;;  %12473 = vmatpush1.bf16.msra.mxu0 %v12472_v44  ;;  %v12504_v25 = vpack.c.bf16 %v8975_v21, %v8973_v20  ;;  %v12506_v44 = vpack.c.bf16 %v8980_v9, %v8978_v42  ;;  %v9003_v20 = vld [vmem:[#allocation34 + $0x190] sm:$0xff]  ;;  %v9006_v21 = vld [vmem:[#allocation34 + $0x1a8] sm:$0xff]  ;;  %v9008_v42 = vld [vmem:[#allocation34 + $0x1b8] sm:$0xff] }
0x19e8   :  { %12443 = vmatprep.subr.bf16.mxu1 %v12442_v52  ;;  %12475 = vmatprep.subr.bf16.mxu0 %v12474_v34  ;;  %v8982_v52 = vld [vmem:[#allocation34 + $0xe8] sm:$0xff]  ;;  %v8984_v34 = vld [vmem:[#allocation34 + $0xf8] sm:$0xff] }
0x19e9   :  { %v12510_v28 = vpack.c.bf16 %v8984_v34, %v8982_v52  ;;  %v9012_v52 = vld [vmem:[#allocation34 + $0x1d8] sm:$0xff] }
0x19eb   :  { %12445 = vmatpush1.bf16.msra.mxu1 %v12444_v41  ;;  %12477 = vmatpush1.bf16.msra.mxu0 %v12476_v16  ;;  %v12512_v41 = vpack.c.bf16 %v8983_v32, %v8981_v24  ;;  %v12514_v16 = vpack.c.bf16 %v8988_v31, %v8986_v18  ;;  %v9011_v24 = vld [vmem:[#allocation34 + $0x1d0] sm:$0xff]  ;;  %v9014_v32 = vld [vmem:[#allocation34 + $0x1e8] sm:$0xff]  ;;  %v9016_v18 = vld [vmem:[#allocation34 + $0x1f8] sm:$0xff] }
0x19ec   :  { %12447 = vmatprep.subr.bf16.mxu1 %v12446_v40  ;;  %12479 = vmatprep.subr.bf16.mxu0 %v12478_v48  ;;  %v8987_v40 = vld [vmem:[#allocation34 + $0x110] sm:$0xff]  ;;  %v8990_v48 = vld [vmem:[#allocation34 + $0x128] sm:$0xff] }
0x19ed   :  { %v12516_v5 = vpack.c.bf16 %v8987_v40, %v8985_v58  ;;  %v12518_v61 = vpack.c.bf16 %v8992_v54, %v8990_v48  ;;  %v9015_v58 = vld [vmem:[#allocation34 + $0x1f0] sm:$0xff]  ;;  %v9018_v40 = vld [vmem:[#allocation34 + $0x208] sm:$0xff]  ;;  %v9020_v48 = vld [vmem:[#allocation34 + $0x218] sm:$0xff] }
0x19ef   :  { %12449 = vmatpush1.bf16.msra.mxu1 %v12448_v13  ;;  %12481 = vmatpush1.bf16.msra.mxu0 %v12480_v59  ;;  %v8994_v13 = vld [vmem:[#allocation34 + $0x148] sm:$0xff]  ;;  %v8996_v59 = vld [vmem:[#allocation34 + $0x158] sm:$0xff] }
0x19f0   :  { %12483 = vmatprep.subr.bf16.mxu1 %v12482_v53  ;;  %v12520_v53 = vpack.c.bf16 %v8991_v2, %v8989_v33  ;;  %v12522_v26 = vpack.c.bf16 %v8996_v59, %v8994_v13 }
0x19f2   :  { %8840 = vmatmul.mubr.f32.vlgmr.msra.gmra.mrb[62].mxu1 %v8773_v63  ;;  %8911 = vmatmul.mubr.f32.vlgmr.msra.gmra.mrb[62].mxu0 %v8773_v63 }
0x19f3   :  { %12485 = vmatpush1.bf16.msra.mxu1 %v12484_v62  ;;  %v13654_v62 = vmov 1966171168  }
0x19f4   :  { %12487 = vmatprep.subr.bf16.mxu1 %v12486_v14  ;;  %v8055_v63 = vunpack.c.l.s4 %v13654_v62 }
0x19f6   :  { %v8056_v14 = vunpack.c.0.s8 %v8055_v63 }
0x19f7   :  { %12489 = vmatpush1.bf16.msra.mxu1 %v12488_v38 }
0x19f8   :  { %12491 = vmatprep.subr.bf16.mxu1 %v12490_v47  ;;  %v15934_v29 = vsub.s32 %v8056_v14, %v16066_v0 }
0x19fb   :  { %12493 = vmatpush1.bf16.msra.mxu1 %v12492_v50 }
0x19fc   :  { %12495 = vmatprep.subr.bf16.mxu1 %v12494_v23  ;;  %v16067_v23 = vlaneseq }
0x19fe   :  { %vm15939_vm11 = vcmp.lt.s32.totalorder %v16067_v23, 512 }
0x19ff   :  { %12497 = vmatpush1.bf16.msra.mxu1 %v12496_v39  ;;  %v12526_v39 = vpack.c.bf16 %v9000_v27, %v8998_v1 }
0x1a00   :  { %12499 = vmatprep.subr.bf16.mxu1 %v12498_v56  ;;  %v8997_v56 = vld [vmem:[#allocation34 + $0x160] sm:$0xff] }
0x1a01   :  { %v12528_v8 = vpack.c.bf16 %v8999_v37, %v8997_v56 }
0x1a03   :  { %12501 = vmatpush1.bf16.msra.mxu1 %v12500_v36  ;;  %v9001_v36 = vld [vmem:[#allocation34 + $0x180] sm:$0xff] }
0x1a04   :  { %12503 = vmatprep.subr.bf16.mxu1 %v12502_v57  ;;  %v12530_v57 = vpack.c.bf16 %v9004_v22, %v9002_v51  ;;  %v12532_v9 = vpack.c.bf16 %v9003_v20, %v9001_v36  ;;  %v9027_v51 = vld [vmem:[#allocation34 + $0x250] sm:$0xff]  ;;  %v9030_v22 = vld [vmem:[#allocation34 + $0x268] sm:$0xff]  ;;  %v9032_v36 = vld [vmem:[#allocation34 + $0x278] sm:$0xff] }
0x1a05   :  { %v12558_v20 = vpack.c.bf16 %v9032_v36, %v9030_v22  ;;  %v9067_v22 = vld [vmem:[#allocation34 + $0x390] sm:$0xff]  ;;  %v9070_v36 = vld [vmem:[#allocation34 + $0x3a8] sm:$0xff] }
0x1a07   :  { %12505 = vmatpush1.bf16.msra.mxu1 %v12504_v25  ;;  %v12534_v25 = vpack.c.bf16 %v9008_v42, %v9006_v21  ;;  %v9029_v21 = vld [vmem:[#allocation34 + $0x260] sm:$0xff]  ;;  %v9031_v42 = vld [vmem:[#allocation34 + $0x270] sm:$0xff] }
0x1a08   :  { %12507 = vmatprep.subr.bf16.mxu1 %v12506_v44  ;;  %v9005_v44 = vld [vmem:[#allocation34 + $0x1a0] sm:$0xff] }
0x1a09   :  { %v12536_v34 = vpack.c.bf16 %v9007_v4, %v9005_v44  ;;  %v12560_v44 = vpack.c.bf16 %v9031_v42, %v9029_v21  ;;  %v9069_v42 = vld [vmem:[#allocation34 + $0x3a0] sm:$0xff] }
0x1a0b   :  { %12509 = vmatpush1.bf16.msra.mxu1 %v12508_v7  ;;  %v12538_v7 = vpack.c.bf16 %v9012_v52, %v9010_v30  ;;  %v9033_v30 = vld [vmem:[#allocation34 + $0x280] sm:$0xff]  ;;  %v9035_v52 = vld [vmem:[#allocation34 + $0x290] sm:$0xff] }
0x1a0c   :  { %12511 = vmatprep.subr.bf16.mxu1 %v12510_v28  ;;  %v9009_v28 = vld [vmem:[#allocation34 + $0x1c0] sm:$0xff] }
0x1a0d   :  { %v12540_v31 = vpack.c.bf16 %v9011_v24, %v9009_v28  ;;  %v12564_v28 = vpack.c.bf16 %v9035_v52, %v9033_v30  ;;  %v9073_v52 = vld [vmem:[#allocation34 + $0x3c0] sm:$0xff] }
0x1a0f   :  { %12513 = vmatpush1.bf16.msra.mxu1 %v12512_v41  ;;  %v12542_v41 = vpack.c.bf16 %v9016_v18, %v9014_v32  ;;  %v9037_v32 = vld [vmem:[#allocation34 + $0x2a0] sm:$0xff]  ;;  %v9039_v18 = vld [vmem:[#allocation34 + $0x2b0] sm:$0xff] }
0x1a10   :  { %12515 = vmatprep.subr.bf16.mxu1 %v12514_v16  ;;  %v9013_v16 = vld [vmem:[#allocation34 + $0x1e0] sm:$0xff] }
0x1a11   :  { %v12544_v54 = vpack.c.bf16 %v9015_v58, %v9013_v16  ;;  %v12568_v16 = vpack.c.bf16 %v9039_v18, %v9037_v32  ;;  %v9077_v18 = vld [vmem:[#allocation34 + $0x3e0] sm:$0xff] }
0x1a13   :  { %12517 = vmatpush1.bf16.msra.mxu1 %v12516_v5  ;;  %v12546_v5 = vpack.c.bf16 %v9020_v48, %v9018_v40  ;;  %v9041_v40 = vld [vmem:[#allocation34 + $0x2c0] sm:$0xff]  ;;  %v9043_v48 = vld [vmem:[#allocation34 + $0x2d0] sm:$0xff] }
0x1a14   :  { %12519 = vmatprep.subr.bf16.mxu1 %v12518_v61 }
0x1a17   :  { %12521 = vmatpush1.bf16.msra.mxu1 %v12520_v53 }
0x1a18   :  { %12523 = vmatprep.subr.bf16.mxu1 %v12522_v26 }
0x1a1b   :  { %12525 = vmatpush1.bf16.msra.mxu1 %v12524_v3  ;;  %v13655_v3 = vmov 1983009808  }
0x1a1c   :  { %12527 = vmatprep.subr.bf16.mxu1 %v12526_v39  ;;  %v9096_v62 = vunpack.c.l.s4 %v13655_v3  ;;  %v9026_v39 = vld [vmem:[#allocation34 + $0x248] sm:$0xff]  ;;  %v9051_v3 = vld [vmem:[#allocation34 + $0x310] sm:$0xff] }
0x1a1e   :  { %v9097_v14 = vunpack.c.0.s8 %v9096_v62  ;;  %v9054_v62 = vld [vmem:[#allocation34 + $0x328] sm:$0xff] }
0x1a1f   :  { %12529 = vmatpush1.bf16.msra.mxu1 %v12528_v8  ;;  %v9025_v8 = vld [vmem:[#allocation34 + $0x240] sm:$0xff] }
0x1a20   :  { %12531 = vmatprep.subr.bf16.mxu1 %v12530_v57  ;;  %v12556_v57 = vpack.c.bf16 %v9027_v51, %v9025_v8  ;;  %v9065_v51 = vld [vmem:[#allocation34 + $0x380] sm:$0xff] }
0x1a23   :  { %12533 = vmatpush1.bf16.msra.mxu1 %v12532_v9  ;;  %v9034_v9 = vld [vmem:[#allocation34 + $0x288] sm:$0xff] }
0x1a24   :  { %12535 = vmatprep.subr.bf16.mxu1 %v12534_v25  ;;  %v9036_v25 = vld [vmem:[#allocation34 + $0x298] sm:$0xff] }
0x1a25   :  { %v12562_v4 = vpack.c.bf16 %v9036_v25, %v9034_v9  ;;  %v9071_v9 = vld [vmem:[#allocation34 + $0x3b0] sm:$0xff]  ;;  %v9074_v25 = vld [vmem:[#allocation34 + $0x3c8] sm:$0xff] }
0x1a27   :  { %12537 = vmatpush1.bf16.msra.mxu1 %v12536_v34  ;;  %v9038_v34 = vld [vmem:[#allocation34 + $0x2a8] sm:$0xff] }
0x1a28   :  { %12539 = vmatprep.subr.bf16.mxu1 %v12538_v7  ;;  %v9040_v7 = vld [vmem:[#allocation34 + $0x2b8] sm:$0xff] }
0x1a29   :  { %v12566_v24 = vpack.c.bf16 %v9040_v7, %v9038_v34  ;;  %v9075_v34 = vld [vmem:[#allocation34 + $0x3d0] sm:$0xff]  ;;  %v9078_v7 = vld [vmem:[#allocation34 + $0x3e8] sm:$0xff] }
0x1a2b   :  { %12541 = vmatpush1.bf16.msra.mxu1 %v12540_v31  ;;  %v9042_v31 = vld [vmem:[#allocation34 + $0x2c8] sm:$0xff] }
0x1a2c   :  { %12543 = vmatprep.subr.bf16.mxu1 %v12542_v41  ;;  %v9044_v41 = vld [vmem:[#allocation34 + $0x2d8] sm:$0xff] }
0x1a2d   :  { %v12570_v58 = vpack.c.bf16 %v9044_v41, %v9042_v31  ;;  %v9079_v31 = vld [vmem:[#allocation34 + $0x3f0] sm:$0xff] }
0x1a2e   :  { %v12608_v41 = vpack.c.bf16 %v9079_v31, %v9077_v18 }
0x1a2f   :  { %12545 = vmatpush1.bf16.msra.mxu1 %v12544_v54  ;;  %v9046_v54 = vld [vmem:[#allocation34 + $0x2e8] sm:$0xff] }
0x1a30   :  { %12547 = vmatprep.subr.bf16.mxu1 %v12546_v5  ;;  %v9048_v5 = vld [vmem:[#allocation34 + $0x2f8] sm:$0xff] }
0x1a45   :  { %v7968_v19 = vpop.f32.mrb[60].mxu1  ;;  %v8039_v35 = vpop.f32.mrb[60].mxu0 }
0x1a46   :  { %v7970_v38 = vpop.f32.mrb[61].mxu1  ;;  %v8041_v47 = vpop.f32.mrb[61].mxu0 }
0x1a47   :  { %v8052_v60 = vcombine.low %v7968_v19, %v7970_v38  ;;  %v8053_v10 = vcombine.low %v8039_v35, %v8041_v47  ;;  %v9100_v19 = vsub.s32 %v9097_v14, %v16066_v0  ;;  %v9017_v38 = vld [vmem:[#allocation34 + $0x200] sm:$0xff]  ;;  %v9019_v47 = vld [vmem:[#allocation34 + $0x210] sm:$0xff]  ;;  %v9028_v0 = vld [vmem:[#allocation34 + $0x258] sm:$0xff] }
0x1a48   :  { %v12548_v23 = vpack.c.bf16 %v9019_v47, %v9017_v38  ;;  %v12554_v37 = vpack.c.bf16 %v9028_v0, %v9026_v39  ;;  %v9055_v38 = vld [vmem:[#allocation34 + $0x330] sm:$0xff]  ;;  %v9058_v47 = vld [vmem:[#allocation34 + $0x348] sm:$0xff] }
0x1a49   :  { %v8060_v6 = vrot.slane %v8052_v60, %v15934_v29  ;;  %v8067_v15 = vrot.slane %v8053_v10, %v15934_v29  ;;  %v9063_v39 = vld [vmem:[#allocation34 + $0x370] sm:$0xff]  ;;  %v9066_v0 = vld [vmem:[#allocation34 + $0x388] sm:$0xff] }
0x1a4b   :  { %v8068_v50 = vcombine.low %v8060_v6, %v8067_v15  ;;  %v9022_v6 = vld [vmem:[#allocation34 + $0x228] sm:$0xff]  ;;  %v9024_v15 = vld [vmem:[#allocation34 + $0x238] sm:$0xff] }
0x1a4c   :  { %v12550_v27 = vpack.c.bf16 %v9024_v15, %v9022_v6  ;;  %v9057_v15 = vld [vmem:[#allocation34 + $0x340] sm:$0xff] }
0x1a4d   :  { %v8075_v12 = vrot.slane %v8068_v50, %v15934_v29 }
0x1a4f   :  { %8081 = vst.msk [vmem:[#allocation49] ss:$2 sm:$0xf] %vm15939_vm11, %v8075_v12  ;;  %v9021_v12 = vld [vmem:[#allocation34 + $0x220] sm:$0xff] }
0x1ac5   :  { %v8841_v61 = vpop.f32.mrb[62].mxu1  ;;  %v8912_v33 = vpop.f32.mrb[62].mxu0 }
0x1ac6   :  { %v8843_v2 = vpop.f32.mrb[63].mxu1  ;;  %v8914_v13 = vpop.f32.mrb[63].mxu0 }
0x1ac7   :  { %v8925_v59 = vcombine.low %v8841_v61, %v8843_v2  ;;  %v8926_v53 = vcombine.low %v8912_v33, %v8914_v13  ;;  %v12572_v61 = vpack.c.bf16 %v9043_v48, %v9041_v40  ;;  %v12574_v33 = vpack.c.bf16 %v9048_v5, %v9046_v54  ;;  %v9045_v2 = vld [vmem:[#allocation34 + $0x2e0] sm:$0xff]  ;;  %v9047_v13 = vld [vmem:[#allocation34 + $0x2f0] sm:$0xff] }
0x1ac8   :  { %v9335_v48 = vld [vmem:[#allocation40] sm:$0xff]  ;;  %v9336_v54 = vld [vmem:[#allocation40 + $0x8] sm:$0xff] }
0x1ac9   :  { %v8933_v26 = vrot.slane %v8925_v59, %v15934_v29  ;;  %v8940_v17 = vrot.slane %v8926_v53, %v15934_v29  ;;  %v9050_v59 = vld [vmem:[#allocation34 + $0x308] sm:$0xff]  ;;  %v9052_v53 = vld [vmem:[#allocation34 + $0x318] sm:$0xff]  ;;  %v12612_v5 = vpack.c.bf16 %v9336_v54, %v9335_v48 }
0x1acb   :  { %v8941_v43 = vcombine.low %v8933_v26, %v8940_v17  ;;  %v12576_v26 = vpack.c.bf16 %v9047_v13, %v9045_v2  ;;  %v12578_v17 = vpack.c.bf16 %v9052_v53, %v9050_v59  ;;  %v9337_v13 = vld [vmem:[#allocation40 + $0x10] sm:$0xff]  ;;  %v9338_v59 = vld [vmem:[#allocation40 + $0x18] sm:$0xff] }
0x1acc   :  { %v12616_v53 = vpack.c.bf16 %v9338_v59, %v9337_v13 }
0x1acd   :  { %v8948_v63 = vrot.slane %v8941_v43, %v15934_v29  ;;  %v9023_v29 = vld [vmem:[#allocation34 + $0x230] sm:$0xff]  ;;  %v9049_v43 = vld [vmem:[#allocation34 + $0x300] sm:$0xff] }
0x1ace   :  { %v12552_v56 = vpack.c.bf16 %v9023_v29, %v9021_v12  ;;  %v12580_v14 = vpack.c.bf16 %v9051_v3, %v9049_v43  ;;  %v9340_v3 = vld [vmem:[#allocation40 + $0x28] sm:$0xff] }
0x1acf   :  { %8951 = vst.msk [vmem:[#allocation49 + $0x1] ss:$2 sm:$0xf] %vm15939_vm11, %v8948_v63  ;;  %v9056_v63 = vld [vmem:[#allocation34 + $0x338] sm:$0xff] }
0x1ad6   :  { %v8952_v35 = vld [vmem:[#allocation49] sm:$0xff] }
0x1ad7   :  { %v9101_v60 = vrot.slane %v8952_v35, %v9100_v19  ;;  %v9094_v10 = vcombine.high %v8952_v35, %v8952_v35  ;;  %v9053_v35 = vld [vmem:[#allocation34 + $0x320] sm:$0xff] }
0x1ad9   :  { %v9109_v50 = vcombine.high %v9101_v60, %v9101_v60  ;;  %v15952_v1 = vrot.slane %v9094_v10, %v9100_v19  ;;  %v12582_v19 = vpack.c.bf16 %v9056_v63, %v9054_v62  ;;  %v12584_v10 = vpack.c.bf16 %v9055_v38, %v9053_v35  ;;  %v9357_v63 = vld [vmem:[#allocation40 + $0xb0] sm:$0xff]  ;;  %v9342_v38 = vld [vmem:[#allocation40 + $0x38] sm:$0xff] }
0x1ada   :  { %v9341_v35 = vld [vmem:[#allocation40 + $0x30] sm:$0xff] }
0x1adb   :  { %9179 = vmatprep.mubr.f32.mxu1 %v9109_v50  ;;  %v9110_v11 = vcombine.high %v15952_v1, %v15952_v1  ;;  %v9059_v50 = vld [vmem:[#allocation34 + $0x350] sm:$0xff] }
0x1adc   :  { %9180 = vmatmul.mubr.f32.vlgmr.msra.gmra.mrb[64].mxu1 %v9101_v60  ;;  %v9060_v60 = vld [vmem:[#allocation34 + $0x358] sm:$0xff]  ;;  %v12588_v12 = vpack.c.bf16 %v9059_v50, %v9057_v15  ;;  %v9343_v15 = vld [vmem:[#allocation40 + $0x40] sm:$0xff]  ;;  %v9344_v50 = vld [vmem:[#allocation40 + $0x48] sm:$0xff] }
0x1add   :  { %12549 = vmatpush1.bf16.msra.mxu1 %v12548_v23  ;;  %9250 = vmatprep.mubr.f32.mxu1 %v9110_v11  ;;  %v12586_v6 = vpack.c.bf16 %v9060_v60, %v9058_v47  ;;  %v9062_v23 = vld [vmem:[#allocation34 + $0x368] sm:$0xff]  ;;  %v9061_v11 = vld [vmem:[#allocation34 + $0x360] sm:$0xff]  ;;  %v12624_v47 = vpack.c.bf16 %v9342_v38, %v9341_v35 }
0x1ade   :  { %12551 = vmatprep.subr.bf16.mxu1 %v12550_v27  ;;  %v9064_v27 = vld [vmem:[#allocation34 + $0x378] sm:$0xff]  ;;  %v9359_v60 = vld [vmem:[#allocation40 + $0xc0] sm:$0xff] }
0x1adf   :  { %v12590_v29 = vpack.c.bf16 %v9064_v27, %v9062_v23  ;;  %v12628_v23 = vpack.c.bf16 %v9344_v50, %v9343_v15  ;;  %v9361_v27 = vld [vmem:[#allocation40 + $0xd0] sm:$0xff] }
0x1ae1   :  { %12553 = vmatpush1.bf16.msra.mxu1 %v12552_v56  ;;  %v9068_v56 = vld [vmem:[#allocation34 + $0x398] sm:$0xff] }
0x1ae2   :  { %12555 = vmatprep.subr.bf16.mxu1 %v12554_v37  ;;  %v12592_v37 = vpack.c.bf16 %v9063_v39, %v9061_v11  ;;  %v12594_v8 = vpack.c.bf16 %v9068_v56, %v9066_v0  ;;  %v9346_v39 = vld [vmem:[#allocation40 + $0x58] sm:$0xff]  ;;  %v9363_v0 = vld [vmem:[#allocation40 + $0xe0] sm:$0xff]  ;;  %v9364_v56 = vld [vmem:[#allocation40 + $0xe8] sm:$0xff] }
0x1ae5   :  { %12557 = vmatpush1.bf16.msra.mxu1 %v12556_v57  ;;  %v9072_v57 = vld [vmem:[#allocation34 + $0x3b8] sm:$0xff] }
0x1ae6   :  { %12559 = vmatprep.subr.bf16.mxu1 %v12558_v20  ;;  %v12596_v20 = vpack.c.bf16 %v9067_v22, %v9065_v51  ;;  %v12598_v21 = vpack.c.bf16 %v9072_v57, %v9070_v36  ;;  %v9347_v51 = vld [vmem:[#allocation40 + $0x60] sm:$0xff]  ;;  %v9348_v22 = vld [vmem:[#allocation40 + $0x68] sm:$0xff]  ;;  %v9365_v36 = vld [vmem:[#allocation40 + $0xf0] sm:$0xff] }
0x1ae7   :  { %v9366_v57 = vld [vmem:[#allocation40 + $0xf8] sm:$0xff] }
0x1ae9   :  { %12561 = vmatpush1.bf16.msra.mxu1 %v12560_v44  ;;  %v9076_v44 = vld [vmem:[#allocation34 + $0x3d8] sm:$0xff] }
0x1aea   :  { %12563 = vmatprep.subr.bf16.mxu1 %v12562_v4  ;;  %v12600_v4 = vpack.c.bf16 %v9071_v9, %v9069_v42  ;;  %v12602_v30 = vpack.c.bf16 %v9076_v44, %v9074_v25  ;;  %v9349_v42 = vld [vmem:[#allocation40 + $0x70] sm:$0xff]  ;;  %v9350_v9 = vld [vmem:[#allocation40 + $0x78] sm:$0xff] }
0x1aeb   :  { %v12640_v25 = vpack.c.bf16 %v9350_v9, %v9349_v42  ;;  %v9081_v44 = vld [vmem:[#allocation35] sm:$0x3] }
0x1aed   :  { %12565 = vmatpush1.bf16.msra.mxu1 %v12564_v28  ;;  %v9080_v28 = vld [vmem:[#allocation34 + $0x3f8] sm:$0xff] }
0x1aee   :  { %12567 = vmatprep.subr.bf16.mxu1 %v12566_v24  ;;  %v12604_v24 = vpack.c.bf16 %v9075_v34, %v9073_v52  ;;  %v12606_v32 = vpack.c.bf16 %v9080_v28, %v9078_v7 }
0x1af1   :  { %12569 = vmatpush1.bf16.msra.mxu1 %v12568_v16  ;;  %v9351_v16 = vld [vmem:[#allocation40 + $0x80] sm:$0xff] }
0x1af2   :  { %12571 = vmatprep.subr.bf16.mxu1 %v12570_v58  ;;  %v9352_v58 = vld [vmem:[#allocation40 + $0x88] sm:$0xff] }
0x1af3   :  { %v12610_v40 = vpack.c.bf16 %v9352_v58, %v9351_v16 }
0x1af5   :  { %12573 = vmatpush1.bf16.msra.mxu1 %v12572_v61  ;;  %12611 = vmatprep.subr.bf16.mxu0 %v12610_v40  ;;  %v9353_v61 = vld [vmem:[#allocation40 + $0x90] sm:$0xff] }
0x1af6   :  { %12575 = vmatprep.subr.bf16.mxu1 %v12574_v33  ;;  %12613 = vmatpush3.bf16.msra.mxu0 %v12612_v5  ;;  %v9354_v33 = vld [vmem:[#allocation40 + $0x98] sm:$0xff] }
0x1af7   :  { %v12614_v2 = vpack.c.bf16 %v9354_v33, %v9353_v61 }
0x1af9   :  { %12577 = vmatpush1.bf16.msra.mxu1 %v12576_v26  ;;  %12615 = vmatprep.subr.bf16.mxu0 %v12614_v2  ;;  %v9355_v26 = vld [vmem:[#allocation40 + $0xa0] sm:$0xff] }
0x1afa   :  { %12579 = vmatprep.subr.bf16.mxu1 %v12578_v17  ;;  %12617 = vmatpush3.bf16.msra.mxu0 %v12616_v53  ;;  %v9356_v17 = vld [vmem:[#allocation40 + $0xa8] sm:$0xff] }
0x1afb   :  { %v12618_v43 = vpack.c.bf16 %v9356_v17, %v9355_v26 }
0x1afd   :  { %12581 = vmatpush1.bf16.msra.mxu1 %v12580_v14  ;;  %12619 = vmatprep.subr.bf16.mxu0 %v12618_v43  ;;  %v9358_v14 = vld [vmem:[#allocation40 + $0xb8] sm:$0xff] }
0x1afe   :  { %12583 = vmatprep.subr.bf16.mxu1 %v12582_v19  ;;  %v12622_v19 = vpack.c.bf16 %v9358_v14, %v9357_v63 }
0x1b01   :  { %12585 = vmatpush1.bf16.msra.mxu1 %v12584_v10  ;;  %v9360_v10 = vld [vmem:[#allocation40 + $0xc8] sm:$0xff] }
0x1b02   :  { %12587 = vmatprep.subr.bf16.mxu1 %v12586_v6  ;;  %v12626_v6 = vpack.c.bf16 %v9360_v10, %v9359_v60 }
0x1b05   :  { %12589 = vmatpush1.bf16.msra.mxu1 %v12588_v12  ;;  %v9362_v12 = vld [vmem:[#allocation40 + $0xd8] sm:$0xff] }
0x1b06   :  { %12591 = vmatprep.subr.bf16.mxu1 %v12590_v29  ;;  %v9345_v29 = vld [vmem:[#allocation40 + $0x50] sm:$0xff]  ;;  %v12630_v11 = vpack.c.bf16 %v9362_v12, %v9361_v27 }
0x1b09   :  { %12593 = vmatpush1.bf16.msra.mxu1 %v12592_v37  ;;  %v12632_v37 = vpack.c.bf16 %v9346_v39, %v9345_v29  ;;  %v9315_v39 = vld [vmem:[#allocation38] sm:$0x3] }
0x1b0a   :  { %12595 = vmatprep.subr.bf16.mxu1 %v12594_v8  ;;  %v12634_v8 = vpack.c.bf16 %v9364_v56, %v9363_v0 }
0x1b0d   :  { %12597 = vmatpush1.bf16.msra.mxu1 %v12596_v20  ;;  %v12636_v20 = vpack.c.bf16 %v9348_v22, %v9347_v51  ;;  %v9320_v22 = vrot.slane %v9315_v39, %v14327_v49 }
0x1b0e   :  { %12599 = vmatprep.subr.bf16.mxu1 %v12598_v21  ;;  %v12638_v21 = vpack.c.bf16 %v9366_v57, %v9365_v36  ;;  %v9324_v57 = vrot.slane %v9315_v39, %v16064_v46 }
0x1b11   :  { %12601 = vmatpush1.bf16.msra.mxu1 %v12600_v4  ;;  %v9086_v4 = vrot.slane %v9081_v44, %v14327_v49 }
0x1b12   :  { %12603 = vmatprep.subr.bf16.mxu1 %v12602_v30  ;;  %v9090_v30 = vrot.slane %v9081_v44, %v16064_v46 }
0x1b15   :  { %12605 = vmatpush1.bf16.msra.mxu1 %v12604_v24 }
0x1b16   :  { %12607 = vmatprep.subr.bf16.mxu1 %v12606_v32 }
0x1b19   :  { %12609 = vmatpush1.bf16.msra.mxu1 %v12608_v41 }
0x1b1c   :  { %9251 = vmatmul.mubr.f32.vlgmr.msra.gmra.mrb[64].mxu1 %v15952_v1  ;;  %v9339_v1 = vld [vmem:[#allocation40 + $0x20] sm:$0xff] }
0x1b1d   :  { %v12620_v62 = vpack.c.bf16 %v9340_v3, %v9339_v1 }
0x1b1f   :  { %12621 = vmatpush3.bf16.msra.mxu0 %v12620_v62 }
0x1b20   :  { %12623 = vmatprep.subr.bf16.mxu0 %v12622_v19 }
0x1b23   :  { %12625 = vmatpush3.bf16.msra.mxu0 %v12624_v47 }
0x1b24   :  { %12627 = vmatprep.subr.bf16.mxu0 %v12626_v6 }
0x1b27   :  { %12629 = vmatpush3.bf16.msra.mxu0 %v12628_v23 }
0x1b28   :  { %12631 = vmatprep.subr.bf16.mxu0 %v12630_v11  ;;  %v9301_v11 = vld [vmem:[#allocation37] sm:$0x3] }
0x1b29   :  { %v9306_v0 = vrot.slane %v9301_v11, %v14327_v49  ;;  %v9485_v49 = vld [vmem:[#allocation46 + $0x8] sm:$0xff] }
0x1b2b   :  { %12633 = vmatpush3.bf16.msra.mxu0 %v12632_v37  ;;  %v9310_v37 = vrot.slane %v9301_v11, %v16064_v46  ;;  %v9486_v46 = vld [vmem:[#allocation46 + $0x10] sm:$0xff] }
0x1b2c   :  { %12635 = vmatprep.subr.bf16.mxu0 %v12634_v8 }
0x1b2f   :  { %12637 = vmatpush3.bf16.msra.mxu0 %v12636_v20 }
0x1b30   :  { %12639 = vmatprep.subr.bf16.mxu0 %v12638_v21 }
0x1b33   :  { %12641 = vmatpush3.bf16.msra.mxu0 %v12640_v25 }
0x1b34   :  { %12642 = vmatprep.subr.bf16.mxu0 %v13652_v55 }
0x1bef   :  { %v9252_v52 = vpop.f32.mrb[64].mxu1 }
0x1bf0   :  { %v12666_v34 = vadd.f32 %v9252_v52, %v9086_v4  ;;  %v9254_v7 = vpop.f32.mrb[65].mxu1  ;;  %v9484_v52 = vld [vmem:[#allocation46] sm:$0xff] }
0x1bf1   :  { %v12667_v28 = vadd.f32 %v9254_v7, %v9090_v30  ;;  %v9487_v7 = vld [vmem:[#allocation46 + $0x18] sm:$0xff] }
0x1bf2   :  { %v9258_v24 = vsel %vm9257_vm12, %v12666_v34, 0.0 }
0x1bf3   :  { %v9259_v32 = vrot.slane %v9258_v24, 4  ;;  %v9265_v18 = vsel %vm9257_vm12, %v12667_v28, 0.0 }
0x1bf4   :  { %v9266_v31 = vrot.slane %v9265_v18, 4 }
0x1bf5   :  { %v9260_v41 = vadd.f32 %v9259_v32, %v9258_v24  ;;  %v9488_v24 = vld [vmem:[#allocation46 + $0x20] sm:$0xff]  ;;  %v9489_v32 = vld [vmem:[#allocation46 + $0x28] sm:$0xff] }
0x1bf6   :  { %v9267_v16 = vadd.f32 %v9266_v31, %v9265_v18  ;;  %v12649_v18 = vpack.c.bf16 %v9489_v32, %v9488_v24  ;;  %v9490_v31 = vld [vmem:[#allocation46 + $0x30] sm:$0xff] }
0x1bf7   :  { %v9261_v58 = vrot.slane %v9260_v41, 2 }
0x1bf8   :  { %v9268_v40 = vrot.slane %v9267_v16, 2 }
0x1bf9   :  { %v9262_v48 = vadd.f32 %v9261_v58, %v9260_v41  ;;  %v9493_v58 = vld [vmem:[#allocation46 + $0x48] sm:$0xff] }
0x1bfa   :  { %v9269_v54 = vadd.f32 %v9268_v40, %v9267_v16  ;;  %v9492_v16 = vld [vmem:[#allocation46 + $0x40] sm:$0xff] }
0x1bfb   :  { %v9263_v5 = vrot.slane %v9262_v48, 1  ;;  %v12655_v40 = vpack.c.bf16 %v9493_v58, %v9492_v16 }
0x1bfc   :  { %v9270_v61 = vrot.slane %v9269_v54, 1 }
0x1bfd   :  { %v9264_v33 = vadd.f32 %v9263_v5, %v9262_v48  ;;  %v9494_v48 = vld [vmem:[#allocation46 + $0x50] sm:$0xff]  ;;  %v9496_v5 = vld [vmem:[#allocation46 + $0x60] sm:$0xff] }
0x1bfe   :  { %v9271_v2 = vadd.f32 %v9270_v61, %v9269_v54  ;;  %v9495_v54 = vld [vmem:[#allocation46 + $0x58] sm:$0xff] }
0x1bff   :  { %v9273_v13 = vmul.f32 0.5, %v9264_v33  ;;  %v12658_v61 = vpack.c.bf16 %v9495_v54, %v9494_v48  ;;  %v9497_v33 = vld [vmem:[#allocation46 + $0x68] sm:$0xff] }
0x1c00   :  { %v9274_v59 = vmul.f32 0.5, %v9271_v2  ;;  %v12661_v2 = vpack.c.bf16 %v9497_v33, %v9496_v5 }
0x1c01   :  { %v9275_v53 = vsub.f32 %v12666_v34, %v9273_v13  ;;  %v12643_v34 = vpack.c.bf16 %v9485_v49, %v9484_v52  ;;  %v9498_v13 = vld [vmem:[#allocation46 + $0x70] sm:$0xff] }
0x1c02   :  { %v9276_v26 = vsub.f32 %v12667_v28, %v9274_v59  ;;  %v12646_v28 = vpack.c.bf16 %v9487_v7, %v9486_v46  ;;  %v9499_v59 = vld [vmem:[#allocation46 + $0x78] sm:$0xff] }
0x1c03   :  { %v9277_v17 = vmul.f32 %v9275_v53, %v9275_v53 }
0x1c04   :  { %v9278_v43 = vmul.f32 %v9276_v26, %v9276_v26 }
0x1c05   :  { %v9279_v1 = vsel %vm9257_vm12, %v9277_v17, 0.0  ;;  %v9723_v17 = vld [vmem:[#allocation41] ss:$0 sm:$0xff] }
0x1c06   :  { %v9280_v3 = vrot.slane %v9279_v1, 4  ;;  %v9286_v62 = vsel %vm9257_vm12, %v9278_v43, 0.0 }
0x1c07   :  { %v9287_v63 = vrot.slane %v9286_v62, 4 }
0x1c08   :  { %v9281_v14 = vadd.f32 %v9280_v3, %v9279_v1 }
0x1c09   :  { %v9288_v19 = vadd.f32 %v9287_v63, %v9286_v62 }
0x1c0a   :  { %v9282_v35 = vrot.slane %v9281_v14, 2 }
0x1c0b   :  { %v9289_v38 = vrot.slane %v9288_v19, 2 }
0x1c0c   :  { %v9283_v47 = vadd.f32 %v9282_v35, %v9281_v14 }
0x1c0d   :  { %v9290_v60 = vadd.f32 %v9289_v38, %v9288_v19 }
0x1c0e   :  { %v9284_v10 = vrot.slane %v9283_v47, 1 }
0x1c0f   :  { %v9291_v6 = vrot.slane %v9290_v60, 1 }
0x1c10   :  { %v9285_v15 = vadd.f32 %v9284_v10, %v9283_v47 }
0x1c11   :  { %v9292_v50 = vadd.f32 %v9291_v6, %v9290_v60 }
0x1c12   :  { %v9293_v23 = vmul.f32 0.5, %v9285_v15 }
0x1c13   :  { %v9294_v27 = vmul.f32 0.5, %v9292_v50 }
0x1c14   :  { %v9295_v12 = vadd.f32 1e-05, %v9293_v23 }
0x1c15   :  { %v9296_v29 = vadd.f32 1e-05, %v9294_v27 }
0x1c16   :  { %12832 = vrsqrt.f32 %v9295_v12 }
0x1c17   :  { %12834 = vrsqrt.f32 %v9296_v29 }
0x1c20   :  { %v12833_v56 = vpop.eup %12832 }
0x1c21   :  { %v12835_v8 = vpop.eup %12834  ;;  %v9299_v51 = vmul.f32 %v12833_v56, %v9275_v53  ;;  %v12664_v53 = vpack.c.bf16 %v9499_v59, %v9498_v13  ;;  %v9724_v56 = vld [vmem:[#allocation43] ss:$0 sm:$0xff] }
0x1c22   :  { %v9300_v36 = vmul.f32 %v12835_v8, %v9276_v26  ;;  %v9725_v8 = vld [vmem:[#allocation44] ss:$0 sm:$0xff] }
0x1c23   :  { %v9313_v20 = vmul.f32 %v9306_v0, %v9299_v51 }
0x1c24   :  { %v9314_v21 = vmul.f32 %v9310_v37, %v9300_v36 }
0x1c25   :  { %v9327_v42 = vadd.f32 %v9320_v22, %v9313_v20 }
0x1c26   :  { %v9328_v9 = vadd.f32 %v9324_v57, %v9314_v21 }
0x1c27   :  { %v9331_v25 = vmul.f32 0.01, %v9327_v42  ;;  %vm9329_vm14 = vcmp.ge.f32.partialorder %v9327_v42, 0.0 }
0x1c28   :  { %vm9330_vm13 = vcmp.ge.f32.partialorder %v9328_v9, 0.0  ;;  %v9332_v44 = vmul.f32 0.01, %v9328_v9 }
0x1c29   :  { %v9333_v30 = vsel %vm9329_vm14, %v9327_v42, %v9331_v25 }
0x1c2a   :  { %v9334_v4 = vsel %vm9330_vm13, %v9328_v9, %v9332_v44 }
0x1c2b   :  { %9438 = vmatprep.mubr.f32.mxu0 %v9334_v4 }
0x1c2c   :  { %9439 = vmatmul.mubr.f32.vlgmr.msra.gmra.mrb[64].mxu0 %v9333_v30 }
0x1c2d   :  { %10485 = vmatprep.mubr.msk.f32.mxu0 %vm13653_vm8, %v16056_v45  ;;  %12644 = vmatpush3.bf16.msra.mxu0 %v12643_v34  ;;  %v9491_v45 = vld [vmem:[#allocation46 + $0x38] sm:$0xff] }
0x1c2e   :  { %12645 = vmatprep.subr.bf16.mxu0 %v13652_v55  ;;  %v12652_v41 = vpack.c.bf16 %v9491_v45, %v9490_v31 }
0x1c31   :  { %12647 = vmatpush3.bf16.msra.mxu0 %v12646_v28 }
0x1c32   :  { %12648 = vmatprep.subr.bf16.mxu0 %v13652_v55 }
0x1c35   :  { %12650 = vmatpush3.bf16.msra.mxu0 %v12649_v18 }
0x1c36   :  { %12651 = vmatprep.subr.bf16.mxu0 %v13652_v55 }
0x1c39   :  { %12653 = vmatpush3.bf16.msra.mxu0 %v12652_v41 }
0x1c3a   :  { %12654 = vmatprep.subr.bf16.mxu0 %v13652_v55 }
0x1c3d   :  { %12656 = vmatpush3.bf16.msra.mxu0 %v12655_v40 }
0x1c3e   :  { %12657 = vmatprep.subr.bf16.mxu0 %v13652_v55 }
0x1c41   :  { %12659 = vmatpush3.bf16.msra.mxu0 %v12658_v61 }
0x1c42   :  { %12660 = vmatprep.subr.bf16.mxu0 %v13652_v55 }
0x1c45   :  { %12662 = vmatpush3.bf16.msra.mxu0 %v12661_v2 }
0x1c46   :  { %12663 = vmatprep.subr.bf16.mxu0 %v13652_v55 }
0x1c49   :  { %12665 = vmatpush3.bf16.msra.mxu0 %v12664_v53 }
0x1cff   :  { %v10264_v26 = vpop.f32.mrb[64].mxu0 }
0x1d00   :  { %v10265_v43 = vpop.f32.mrb[65].mxu0 }
0x1d01   :  { %v10266_v1 = vadd.f32 %v10265_v43, %v10264_v26 }
0x1d03   :  { %v9441_v3 = vadd.f32 %v10266_v1, %v9723_v17 }
0x1d05   :  { %v9444_v62 = vsel %vm9257_vm12, %v9441_v3, 0.0 }
0x1d06   :  { %v9445_v63 = vrot.slane %v9444_v62, 4 }
0x1d08   :  { %v9446_v14 = vadd.f32 %v9445_v63, %v9444_v62 }
0x1d0a   :  { %v9447_v19 = vrot.slane %v9446_v14, 2 }
0x1d0c   :  { %v9448_v35 = vadd.f32 %v9447_v19, %v9446_v14 }
0x1d0e   :  { %v9449_v38 = vrot.slane %v9448_v35, 1 }
0x1d10   :  { %v9450_v47 = vadd.f32 %v9449_v38, %v9448_v35 }
0x1d12   :  { %v9451_v60 = vmul.f32 0.5, %v9450_v47 }
0x1d14   :  { %v9452_v10 = vsub.f32 %v9441_v3, %v9451_v60 }
0x1d16   :  { %v9453_v6 = vmul.f32 %v9452_v10, %v9452_v10 }
0x1d18   :  { %v9454_v15 = vsel %vm9257_vm12, %v9453_v6, 0.0 }
0x1d19   :  { %v9455_v55 = vrot.slane %v9454_v15, 4 }
0x1d1b   :  { %v9456_v50 = vadd.f32 %v9455_v55, %v9454_v15 }
0x1d1d   :  { %v9457_v23 = vrot.slane %v9456_v50, 2 }
0x1d1f   :  { %v9458_v27 = vadd.f32 %v9457_v23, %v9456_v50 }
0x1d21   :  { %v9459_v12 = vrot.slane %v9458_v27, 1 }
0x1d23   :  { %v9460_v29 = vadd.f32 %v9459_v12, %v9458_v27 }
0x1d25   :  { %v9461_v11 = vmul.f32 0.5, %v9460_v29 }
0x1d27   :  { %v9462_v39 = vadd.f32 1e-05, %v9461_v11 }
0x1d29   :  { %12836 = vrsqrt.f32 %v9462_v39 }
0x1d33   :  { %v12837_v0 = vpop.eup %12836 }
0x1d34   :  { %v9464_v37 = vmul.f32 %v12837_v0, %v9452_v10 }
0x1d36   :  { %v9472_v51 = vmul.f32 %v9724_v56, %v9464_v37 }
0x1d38   :  { %v9480_v22 = vadd.f32 %v9725_v8, %v9472_v51 }
0x1d3a   :  { %vm9481_vm15 = vcmp.ge.f32.partialorder %v9480_v22, 0.0  ;;  %v9482_v36 = vmul.f32 0.01, %v9480_v22 }
0x1d3c   :  { %v9483_v57 = vsel %vm9481_vm15, %v9480_v22, %v9482_v36 }
0x1d3d   :  { %10486 = vmatmul.mubr.f32.vlgmr.msra.gmra.mrb[66].mxu0 %v9483_v57 }
0x1d3e   :  { %13510 = shalt.err (!%p13507_p6)
}
0x1d3f   :  { %s13511_s23 = scalar_lea.hbm %s13831_s12, 128 }
0x1d40   :  { %p13512_p7 = scmp.ne.s32.totalorder %s13831_s12, %s13511_s23  ;;  %p13515_p8 = scmp.lt.u32.totalorder %s13511_s23, %s13831_s12 }
0x1d42   :  { %p13517_p9 = pnand %p13515_p8, %p13512_p7 }
0x1d44   :  { %13520 = shalt.err (!%p13517_p9)
}
0x1d45   :  { %9587 = dma.vmem_to_hbm [thread:$0]  %s9585_s29, 128, %s13831_s12, [#allocation4]   ;;  %v9726_v20 = vld [vmem:[#allocation47] ss:$0 sm:$0xff] }
0x1d46   :  { %s13657_s30 = smov [#allocation50]  }
0x1d47   :  { %s9594_s1 = sshll.u32 %s13657_s30, 4  ;;  %s9595_s1 = int_to_ptr.vmem [resolvable:$true] %s9594_s1 }
0x1d48   :  { %s13521_s2 = scalar_lea.vmem %s9595_s1, 32  ;;  %p13526_p11 = scmp.lt.s32.totalorder %s9595_s1, %s9595_s1 }
0x1d49   :  { %p13522_p10 = scmp.ne.s32.totalorder %s9595_s1, %s13521_s2  ;;  %p13527_p12 = scmp.lt.s32.totalorder %s13521_s2, %s13521_s2 }
0x1d4b   :  { %p13528_p13 = por %p13527_p12, %p13526_p11 }
0x1d4d   :  { %p13529_p0 = pnand %p13528_p13, %p13522_p10 }
0x1e10   :  { %v9573_v21 = vpop.f32.mrb[66].mxu0 }
0x1e11   :  { %v9574_v42 = vadd.f32 %v9726_v20, %v9573_v21  ;;  %v10487_v9 = vpop.f32.mrb[67].mxu0 }
0x1e13   :  { %9577 = vst [vmem:[#allocation50] sm:$0x3] %v9574_v42 }
0x1e14   :  { %13532 = shalt.err (!%p13529_p0)
}
0x1e15   :  { %s13533_s14 = scalar_lea.hbm %s13836_s5, 32 }
0x1e16   :  { %p13534_p1 = scmp.ne.s32.totalorder %s13836_s5, %s13533_s14  ;;  %p13537_p2 = scmp.lt.u32.totalorder %s13533_s14, %s13836_s5 }
0x1e18   :  { %p13539_p3 = pnand %p13537_p2, %p13534_p1 }
0x1e1a   :  { %13542 = shalt.err (!%p13539_p3)
}
0x1e1b   :  { %9597 = dma.vmem_to_hbm [thread:$0]  %s9595_s1, 32, %s13836_s5, [#allocation51]  }
0x1e1c   :  { %13575 = dma.done.wait [#allocation4], 128  }
0x1e1d   :  { %13576 = vsyncadd [#allocation4], 4294967168 }
0x1e1e   :  { %13577 = dma.done.wait [#allocation51], 32  }
0x1e1f   :  { %13578 = vsyncadd [#allocation51], 4294967264 }
0x1e20   :  { %9604 = vsyncpa [#allocation3], 1 }
0x1e21   :  { %9605 = vsyncpa [#allocation6], 1 }
0x1e22   :  { %9606 = vsyncpa [#allocation9], 1 }
0x1e23   :  { %9607 = vsyncpa [#allocation12], 1 }
0x1e24   :  { %9608 = vsyncpa [#allocation15], 1 }
0x1e25   :  { %9609 = vsyncpa [#allocation18], 1 }
0x1e26   :  { %9610 = vsyncpa [#allocation21], 1 }
0x1e27   :  { %9611 = vsyncpa [#allocation24], 1 }
0x1e28   :  { %9612 = vsyncpa [#allocation27], 1 }
0x1e29   :  { %9613 = vsyncpa [#allocation30], 1 }
0x1e2a   :  { %9614 = vsyncpa [#allocation33], 1 }
0x1e2b   :  { %9615 = vsyncpa [#allocation36], 1 }
0x1e2c   :  { %9616 = vsyncpa [#allocation39], 1 }
0x1e2d   :  { %9617 = vsyncpa [#allocation42], 1 }
0x1e2e   :  { %9618 = vsyncpa [#allocation45], 1 }
0x1e2f   :  { %9619 = vsyncpa [#allocation48], 1 }
0x1e30   :  { %9620 = vsyncpa [#allocation4], 1 }
0x1e31   :  { %9621 = vsyncpa [#allocation51], 1 }

</bundles_post_ra>
